<compile_context>
chip_gen: v7x
topology: tpu7x:2x2x1
jax: 0.10.0
libtpu: 0.0.40
codegen_flags: <defaults>
</compile_context>

<pallas_src>
import numpy as np
import jax
import jax.numpy as jnp
from jax import lax
from jax.experimental import pallas as pl
from jax.experimental.pallas import tpu as pltpu


def _bilinear_matrix(in_size: int, out_size: int) -> np.ndarray:
    """Interpolation matrix M (out_size, in_size): out = M @ in (align_corners=True)."""
    M = np.zeros((out_size, in_size), dtype=np.float32)
    if out_size == 1 or in_size == 1:
        M[:, 0] = 1.0
        return M
    scale = (in_size - 1) / (out_size - 1)
    for o in range(out_size):
        src = o * scale
        lo = min(int(np.floor(src)), in_size - 2)
        frac = src - lo
        M[o, lo] += 1.0 - frac
        M[o, lo + 1] += frac
    return M


def _upsample_conv_bn_relu_kernel(x_ref, mw_ref, mh_ref, w_ref, scale_ref, bias_ref,
                                  o_ref):
    cin, Nb, H, W = x_ref.shape
    Wo_pad = mw_ref.shape[1]
    P = mh_ref.shape[2]            # Nb * tHo (rows of this output strip, batch-major)
    cout = w_ref.shape[2]
    tHo = P // Nb

    # (cin, Nb, H, W) -> (cin, Nb*H, W): free merge of non-minor dims when H % 8 == 0.
    x2 = x_ref[...].reshape(cin, Nb * H, W)

    # Width-interpolation taps (3 column shifts of the 3x3 stencil).  Minor dim Wo_pad
    # is a multiple of 128 -> lane-dense intermediates.  bf16 operands, f32 accumulate.
    s_taps = [
        jnp.einsum('jw,chw->chj', mw_ref[dj], x2,
                   preferred_element_type=jnp.float32).astype(jnp.bfloat16)
        for dj in range(3)
    ]

    # Shifted-tap accumulation: for each (di, dj), the row-shifted block-diagonal mh
    # produces tap_{di,dj} (= the padded upsampled map shifted by (di, dj)) for this
    # output-row strip, and one K=cin MXU dot accumulates it.  No im2col slab.
    acc = jnp.zeros((cout, P, Wo_pad), jnp.float32)
    for di in range(3):
        mh_di = mh_ref[di, 0]                               # (Nb*tHo, Nb*H) block-diag
        for dj in range(3):
            tap = jnp.einsum('ih,chj->icj', mh_di, s_taps[dj],
                             preferred_element_type=jnp.float32).astype(jnp.bfloat16)
            acc = acc + jnp.einsum('oc,icj->oij', w_ref[di, dj], tap,
                                   preferred_element_type=jnp.float32)

    # BatchNorm (inference) + ReLU epilogue in f32 (scale NOT folded into bf16 weights).
    y = acc * scale_ref[...][:, :, None] + bias_ref[...][:, :, None]
    y = jnp.maximum(y, 0.0)

    # (cout, Nb*tHo, Wo_pad) -> (cout, Nb, tHo, Wo_pad): free split (tHo % 8 == 0).
    o_ref[...] = y.reshape(cout, Nb, tHo, Wo_pad).astype(o_ref.dtype)


def upsample_block(x, conv_w, gamma, beta, running_mean, running_var, eps=1e-5,
                   batch_block=None, row_block=None):
    """x: (N, cin, H, W) f32; conv_w: (cout, cin, 3, 3). Returns (N, cout, 2H, 2W)."""
    N, cin, H, W = x.shape
    cout = conv_w.shape[0]
    Ho, Wo = 2 * H, 2 * W
    Wo_pad = ((Wo + 127) // 128) * 128          # lane-dense minor dim for all stages

    # -- batch block (folds Nb images into the matmul column dimension) --------------
    if batch_block is None:
        batch_block = next(d for d in (8, 4, 2, 1) if N % d == 0)
    Nb = batch_block
    assert N % Nb == 0, (N, Nb)

    # -- output-row strip (bounds per-step VMEM; mandatory at large H on v7x) ---------
    if row_block is None:
        row_block = Ho
        if Ho > 256:
            for cand in range(256, 7, -8):
                if Ho % cand == 0:
                    row_block = cand
                    break
    tHo = row_block
    assert Ho % tHo == 0 and (tHo == Ho or tHo % 8 == 0), (Ho, tHo)
    n_strips = Ho // tHo

    # -- halo-padded bilinear matrices (zero halo row/col gives conv padding=1) -------
    mh_full = np.zeros((Ho + 2, H), np.float32)
    mh_full[1:-1] = _bilinear_matrix(H, Ho)
    mw_full = np.zeros((Wo + 2, W), np.float32)
    mw_full[1:-1] = _bilinear_matrix(W, Wo)

    # 3 column-shifted width matrices, zero-padded to a lane-dense Wo_pad.
    mw_taps = np.zeros((3, Wo_pad, W), np.float32)
    for dj in range(3):
        mw_taps[dj, :Wo, :] = mw_full[dj:dj + Wo, :]

    # 3 row-shifted height matrices, per output-row strip, block-diagonal over the Nb
    # images of a batch block (so the row interpolation is one contraction with batch
    # folded into its column dimension).
    mh_taps = np.zeros((3, n_strips, Nb * tHo, Nb * H), np.float32)
    for di in range(3):
        for s in range(n_strips):
            sub = mh_full[di + s * tHo: di + s * tHo + tHo, :]   # (tHo, H)
            for n in range(Nb):
                mh_taps[di, s, n * tHo:(n + 1) * tHo, n * H:(n + 1) * H] = sub

    mw_taps = jnp.asarray(mw_taps, dtype=jnp.bfloat16)
    mh_taps = jnp.asarray(mh_taps, dtype=jnp.bfloat16)

    # Conv weights grouped by tap: (cout, cin, 3, 3) -> (3, 3, cout, cin), bf16.
    w_taps = jnp.transpose(conv_w.astype(jnp.float32), (2, 3, 0, 1)).astype(jnp.bfloat16)

    # BatchNorm (inference) as an f32 epilogue scale/bias.
    inv_std = 1.0 / jnp.sqrt(running_var.astype(jnp.float32) + eps)
    bn_scale = (gamma.astype(jnp.float32) * inv_std).reshape(cout, 1)
    bn_bias = (beta.astype(jnp.float32)
               - running_mean.astype(jnp.float32) * gamma.astype(jnp.float32)
               * inv_std).reshape(cout, 1)

    # Channel-major bf16 input (layout plumbing outside the kernel; halves input DMA).
    x_cm = jnp.transpose(x, (1, 0, 2, 3)).astype(jnp.bfloat16)   # (cin, N, H, W)

    # Generation-aware scoped-VMEM limit: raise on v5e/v6e (128 MiB physical), keep
    # headroom on v7x (64 MiB physical).
    try:
        cap = pltpu.get_tpu_info().vmem_capacity_bytes
        vmem_limit = int(min(100 * 1024 * 1024, (cap * 3) // 4))
    except Exception:
        vmem_limit = 48 * 1024 * 1024

    # NOTE: mw/mh/w/scale/bias are grid-invariant; Pallas does not re-DMA them, only
    # reserves default double-buffers (negligible here; could use pl.Buffered(1) to
    # halve that reservation for production-sized weights on v7x).
    out = pl.pallas_call(
        _upsample_conv_bn_relu_kernel,
        out_shape=jax.ShapeDtypeStruct((cout, N, Ho, Wo_pad), x.dtype),
        grid_spec=pltpu.PrefetchScalarGridSpec(
            num_scalar_prefetch=0,
            grid=(N // Nb, n_strips),
            in_specs=[
                pl.BlockSpec((cin, Nb, H, W), lambda b, s: (0, b, 0, 0)),
                pl.BlockSpec((3, Wo_pad, W), lambda b, s: (0, 0, 0)),
                pl.BlockSpec((3, 1, Nb * tHo, Nb * H), lambda b, s: (0, s, 0, 0)),
                pl.BlockSpec((3, 3, cout, cin), lambda b, s: (0, 0, 0, 0)),
                pl.BlockSpec((cout, 1), lambda b, s: (0, 0)),
                pl.BlockSpec((cout, 1), lambda b, s: (0, 0)),
            ],
            out_specs=pl.BlockSpec((cout, Nb, tHo, Wo_pad), lambda b, s: (0, b, s, 0)),
        ),
        compiler_params=pltpu.CompilerParams(
            dimension_semantics=("parallel", "parallel"),
            vmem_limit_bytes=vmem_limit,
        ),
    )(x_cm, mw_taps, mh_taps, w_taps, bn_scale, bn_bias)

    # (cout, N, Ho, Wo_pad) -> NCHW, dropping the lane padding (plumbing only).
    return jnp.transpose(out, (1, 0, 2, 3))[:, :, :, :Wo]


def _reference(x, conv_w, gamma, beta, mean, var, eps=1e-5):
    """Pure-JAX f32 reference for the UpsampleBlock forward pass."""
    N, cin, H, W = x.shape
    Ho, Wo = 2 * H, 2 * W
    Mh = jnp.asarray(_bilinear_matrix(H, Ho))
    Mw = jnp.asarray(_bilinear_matrix(W, Wo))
    up = jnp.einsum('oh,nchw,pw->ncop', Mh, x, Mw)
    y = lax.conv_general_dilated(
        up, conv_w, window_strides=(1, 1), padding=((1, 1), (1, 1)),
        dimension_numbers=('NCHW', 'OIHW', 'NCHW'))
    scale = (gamma / jnp.sqrt(var + eps))[None, :, None, None]
    bias = (beta - mean * gamma / jnp.sqrt(var + eps))[None, :, None, None]
    return jnp.maximum(y * scale + bias, 0.0)


if __name__ == "__main__":
    N, cin, cout, H, W = 2, 4, 8, 16, 16

    key = jax.random.PRNGKey(0)
    k_x, k_w, k_g, k_b, k_m, k_v = jax.random.split(key, 6)

    x = jax.random.normal(k_x, (N, cin, H, W), dtype=jnp.float32)
    conv_w = 0.1 * jax.random.normal(k_w, (cout, cin, 3, 3), dtype=jnp.float32)
    gamma = 1.0 + 0.1 * jax.random.normal(k_g, (cout,), dtype=jnp.float32)
    beta = 0.1 * jax.random.normal(k_b, (cout,), dtype=jnp.float32)
    running_mean = 0.05 * jax.random.normal(k_m, (cout,), dtype=jnp.float32)
    running_var = 1.0 + 0.5 * jnp.abs(jax.random.normal(k_v, (cout,), dtype=jnp.float32))

    # batch_block=2 folds both images into one grid step; row_block=16 exercises the
    # output-row-strip tiling (2 strips) that bounds VMEM at realistic sizes (v7x).
    y = upsample_block(x, conv_w, gamma, beta, running_mean, running_var,
                       batch_block=2, row_block=16)
    y = jax.block_until_ready(y)

    assert y.shape == (N, cout, 2 * H, 2 * W), y.shape
    assert bool(jnp.all(jnp.isfinite(y))) and bool(jnp.all(y >= 0.0))

    ref = _reference(x, conv_w, gamma, beta, running_mean, running_var)
    max_err = float(jnp.max(jnp.abs(y - ref)))
    assert max_err < 5e-2, f"max abs err vs f32 reference: {max_err}"
    print("KERNEL_OK")
</pallas_src>

<mosaic_0001>
module attributes {stable_mosaic.version = 11 : i64} {
  func.func @_upsample_conv_bn_relu_kernel(%arg0: i32, %arg1: i32, %arg2: memref<4x2x16x16xbf16, #tpu.memory_space<vmem>>, %arg3: memref<3x128x16xbf16, #tpu.memory_space<vmem>>, %arg4: memref<3x1x32x32xbf16, #tpu.memory_space<vmem>>, %arg5: memref<3x3x8x4xbf16, #tpu.memory_space<vmem>>, %arg6: memref<8x1xf32, #tpu.memory_space<vmem>>, %arg7: memref<8x1xf32, #tpu.memory_space<vmem>>, %arg8: memref<8x2x16x128xf32, #tpu.memory_space<vmem>>) attributes {dimension_semantics = [#tpu.dimension_semantics<parallel>, #tpu.dimension_semantics<parallel>], iteration_bounds = array<i64: 1, 2>, scalar_prefetch = 0 : i64, scratch_operands = 0 : i64, tpu.core_type = #tpu.core_type<tc>, window_params = [{transform_indices = @transform_0, window_bounds = array<i64: 4, 2, 16, 16>}, {pipeline_mode = #tpu.pipeline_mode<synchronous>, transform_indices = @transform_1, window_bounds = array<i64: 3, 128, 16>}, {transform_indices = @transform_2, window_bounds = array<i64: 3, 1, 32, 32>}, {pipeline_mode = #tpu.pipeline_mode<synchronous>, transform_indices = @transform_3, window_bounds = array<i64: 3, 3, 8, 4>}, {pipeline_mode = #tpu.pipeline_mode<synchronous>, transform_indices = @transform_4, window_bounds = array<i64: 8, 1>}, {pipeline_mode = #tpu.pipeline_mode<synchronous>, transform_indices = @transform_5, window_bounds = array<i64: 8, 1>}, {transform_indices = @transform_6, window_bounds = array<i64: 8, 2, 16, 128>}]} {
    %c0 = arith.constant 0 : index
    %c0_0 = arith.constant 0 : index
    %c0_1 = arith.constant 0 : index
    %c0_2 = arith.constant 0 : index
    %0 = vector.load %arg2[%c0, %c0_0, %c0_1, %c0_2] : memref<4x2x16x16xbf16, #tpu.memory_space<vmem>>, vector<4x2x16x16xbf16>
    %1 = vector.shape_cast %0 : vector<4x2x16x16xbf16> to vector<4x32x16xbf16>
    %c0_3 = arith.constant 0 : index
    %c0_4 = arith.constant 0 : index
    %c0_5 = arith.constant 0 : index
    %2 = vector.load %arg3[%c0_3, %c0_4, %c0_5] : memref<3x128x16xbf16, #tpu.memory_space<vmem>>, vector<1x128x16xbf16>
    %3 = vector.shape_cast %2 : vector<1x128x16xbf16> to vector<128x16xbf16>
    "tpu.trace_start"() <{level = 10 : i32, message = "jw,chw->chj"}> : () -> ()
    %cst = arith.constant dense<0.000000e+00> : vector<4x32x128xf32>
    %4 = tpu.matmul %1, %3, %cst {dimension_numbers = #tpu.dot_dimension_numbers<[2], [1], [0, 1], [0], [0, 0, 0, 1, 1, 0], [], []>} : vector<4x32x16xbf16>, vector<128x16xbf16>, vector<4x32x128xf32> -> vector<4x32x128xf32>
    "tpu.trace_stop"() : () -> ()
    %5 = arith.truncf %4 : vector<4x32x128xf32> to vector<4x32x128xbf16>
    %c1 = arith.constant 1 : index
    %c0_6 = arith.constant 0 : index
    %c0_7 = arith.constant 0 : index
    %6 = vector.load %arg3[%c1, %c0_6, %c0_7] : memref<3x128x16xbf16, #tpu.memory_space<vmem>>, vector<1x128x16xbf16>
    %7 = vector.shape_cast %6 : vector<1x128x16xbf16> to vector<128x16xbf16>
    "tpu.trace_start"() <{level = 10 : i32, message = "jw,chw->chj"}> : () -> ()
    %cst_8 = arith.constant dense<0.000000e+00> : vector<4x32x128xf32>
    %8 = tpu.matmul %1, %7, %cst_8 {dimension_numbers = #tpu.dot_dimension_numbers<[2], [1], [0, 1], [0], [0, 0, 0, 1, 1, 0], [], []>} : vector<4x32x16xbf16>, vector<128x16xbf16>, vector<4x32x128xf32> -> vector<4x32x128xf32>
    "tpu.trace_stop"() : () -> ()
    %9 = arith.truncf %8 : vector<4x32x128xf32> to vector<4x32x128xbf16>
    %c2 = arith.constant 2 : index
    %c0_9 = arith.constant 0 : index
    %c0_10 = arith.constant 0 : index
    %10 = vector.load %arg3[%c2, %c0_9, %c0_10] : memref<3x128x16xbf16, #tpu.memory_space<vmem>>, vector<1x128x16xbf16>
    %11 = vector.shape_cast %10 : vector<1x128x16xbf16> to vector<128x16xbf16>
    "tpu.trace_start"() <{level = 10 : i32, message = "jw,chw->chj"}> : () -> ()
    %cst_11 = arith.constant dense<0.000000e+00> : vector<4x32x128xf32>
    %12 = tpu.matmul %1, %11, %cst_11 {dimension_numbers = #tpu.dot_dimension_numbers<[2], [1], [0, 1], [0], [0, 0, 0, 1, 1, 0], [], []>} : vector<4x32x16xbf16>, vector<128x16xbf16>, vector<4x32x128xf32> -> vector<4x32x128xf32>
    "tpu.trace_stop"() : () -> ()
    %13 = arith.truncf %12 : vector<4x32x128xf32> to vector<4x32x128xbf16>
    %cst_12 = arith.constant 0.000000e+00 : f32
    %14 = vector.broadcast %cst_12 : f32 to vector<8x32x128xf32>
    %c0_13 = arith.constant 0 : index
    %c0_14 = arith.constant 0 : index
    %c0_15 = arith.constant 0 : index
    %c0_16 = arith.constant 0 : index
    %15 = vector.load %arg4[%c0_13, %c0_14, %c0_15, %c0_16] : memref<3x1x32x32xbf16, #tpu.memory_space<vmem>>, vector<1x1x32x32xbf16>
    %16 = vector.shape_cast %15 : vector<1x1x32x32xbf16> to vector<32x32xbf16>
    "tpu.trace_start"() <{level = 10 : i32, message = "ih,chj->icj"}> : () -> ()
    %cst_17 = arith.constant dense<0.000000e+00> : vector<32x4x128xf32>
    %17 = tpu.matmul %16, %5, %cst_17 {dimension_numbers = #tpu.dot_dimension_numbers<[1], [1], [0], [0, 2], [0, 0, 1, 0, 1, 2], [], []>} : vector<32x32xbf16>, vector<4x32x128xbf16>, vector<32x4x128xf32> -> vector<32x4x128xf32>
    "tpu.trace_stop"() : () -> ()
    %18 = arith.truncf %17 : vector<32x4x128xf32> to vector<32x4x128xbf16>
    %c0_18 = arith.constant 0 : index
    %c0_19 = arith.constant 0 : index
    %c0_20 = arith.constant 0 : index
    %c0_21 = arith.constant 0 : index
    %19 = vector.load %arg5[%c0_18, %c0_19, %c0_20, %c0_21] : memref<3x3x8x4xbf16, #tpu.memory_space<vmem>>, vector<1x1x8x4xbf16>
    %20 = vector.shape_cast %19 : vector<1x1x8x4xbf16> to vector<8x4xbf16>
    "tpu.trace_start"() <{level = 10 : i32, message = "oc,icj->oij"}> : () -> ()
    %cst_22 = arith.constant dense<0.000000e+00> : vector<8x32x128xf32>
    %21 = tpu.matmul %20, %18, %cst_22 {dimension_numbers = #tpu.dot_dimension_numbers<[1], [1], [0], [0, 2], [0, 0, 1, 0, 1, 2], [], []>} : vector<8x4xbf16>, vector<32x4x128xbf16>, vector<8x32x128xf32> -> vector<8x32x128xf32>
    "tpu.trace_stop"() : () -> ()
    %22 = arith.addf %14, %21 : vector<8x32x128xf32>
    "tpu.trace_start"() <{level = 10 : i32, message = "ih,chj->icj"}> : () -> ()
    %cst_23 = arith.constant dense<0.000000e+00> : vector<32x4x128xf32>
    %23 = tpu.matmul %16, %9, %cst_23 {dimension_numbers = #tpu.dot_dimension_numbers<[1], [1], [0], [0, 2], [0, 0, 1, 0, 1, 2], [], []>} : vector<32x32xbf16>, vector<4x32x128xbf16>, vector<32x4x128xf32> -> vector<32x4x128xf32>
    "tpu.trace_stop"() : () -> ()
    %24 = arith.truncf %23 : vector<32x4x128xf32> to vector<32x4x128xbf16>
    %c0_24 = arith.constant 0 : index
    %c1_25 = arith.constant 1 : index
    %c0_26 = arith.constant 0 : index
    %c0_27 = arith.constant 0 : index
    %25 = vector.load %arg5[%c0_24, %c1_25, %c0_26, %c0_27] : memref<3x3x8x4xbf16, #tpu.memory_space<vmem>>, vector<1x1x8x4xbf16>
    %26 = vector.shape_cast %25 : vector<1x1x8x4xbf16> to vector<8x4xbf16>
    "tpu.trace_start"() <{level = 10 : i32, message = "oc,icj->oij"}> : () -> ()
    %cst_28 = arith.constant dense<0.000000e+00> : vector<8x32x128xf32>
    %27 = tpu.matmul %26, %24, %cst_28 {dimension_numbers = #tpu.dot_dimension_numbers<[1], [1], [0], [0, 2], [0, 0, 1, 0, 1, 2], [], []>} : vector<8x4xbf16>, vector<32x4x128xbf16>, vector<8x32x128xf32> -> vector<8x32x128xf32>
    "tpu.trace_stop"() : () -> ()
    %28 = arith.addf %22, %27 : vector<8x32x128xf32>
    "tpu.trace_start"() <{level = 10 : i32, message = "ih,chj->icj"}> : () -> ()
    %cst_29 = arith.constant dense<0.000000e+00> : vector<32x4x128xf32>
    %29 = tpu.matmul %16, %13, %cst_29 {dimension_numbers = #tpu.dot_dimension_numbers<[1], [1], [0], [0, 2], [0, 0, 1, 0, 1, 2], [], []>} : vector<32x32xbf16>, vector<4x32x128xbf16>, vector<32x4x128xf32> -> vector<32x4x128xf32>
    "tpu.trace_stop"() : () -> ()
    %30 = arith.truncf %29 : vector<32x4x128xf32> to vector<32x4x128xbf16>
    %c0_30 = arith.constant 0 : index
    %c2_31 = arith.constant 2 : index
    %c0_32 = arith.constant 0 : index
    %c0_33 = arith.constant 0 : index
    %31 = vector.load %arg5[%c0_30, %c2_31, %c0_32, %c0_33] : memref<3x3x8x4xbf16, #tpu.memory_space<vmem>>, vector<1x1x8x4xbf16>
    %32 = vector.shape_cast %31 : vector<1x1x8x4xbf16> to vector<8x4xbf16>
    "tpu.trace_start"() <{level = 10 : i32, message = "oc,icj->oij"}> : () -> ()
    %cst_34 = arith.constant dense<0.000000e+00> : vector<8x32x128xf32>
    %33 = tpu.matmul %32, %30, %cst_34 {dimension_numbers = #tpu.dot_dimension_numbers<[1], [1], [0], [0, 2], [0, 0, 1, 0, 1, 2], [], []>} : vector<8x4xbf16>, vector<32x4x128xbf16>, vector<8x32x128xf32> -> vector<8x32x128xf32>
    "tpu.trace_stop"() : () -> ()
    %34 = arith.addf %28, %33 : vector<8x32x128xf32>
    %c1_35 = arith.constant 1 : index
    %c0_36 = arith.constant 0 : index
    %c0_37 = arith.constant 0 : index
    %c0_38 = arith.constant 0 : index
    %35 = vector.load %arg4[%c1_35, %c0_36, %c0_37, %c0_38] : memref<3x1x32x32xbf16, #tpu.memory_space<vmem>>, vector<1x1x32x32xbf16>
    %36 = vector.shape_cast %35 : vector<1x1x32x32xbf16> to vector<32x32xbf16>
    "tpu.trace_start"() <{level = 10 : i32, message = "ih,chj->icj"}> : () -> ()
    %cst_39 = arith.constant dense<0.000000e+00> : vector<32x4x128xf32>
    %37 = tpu.matmul %36, %5, %cst_39 {dimension_numbers = #tpu.dot_dimension_numbers<[1], [1], [0], [0, 2], [0, 0, 1, 0, 1, 2], [], []>} : vector<32x32xbf16>, vector<4x32x128xbf16>, vector<32x4x128xf32> -> vector<32x4x128xf32>
    "tpu.trace_stop"() : () -> ()
    %38 = arith.truncf %37 : vector<32x4x128xf32> to vector<32x4x128xbf16>
    %c1_40 = arith.constant 1 : index
    %c0_41 = arith.constant 0 : index
    %c0_42 = arith.constant 0 : index
    %c0_43 = arith.constant 0 : index
    %39 = vector.load %arg5[%c1_40, %c0_41, %c0_42, %c0_43] : memref<3x3x8x4xbf16, #tpu.memory_space<vmem>>, vector<1x1x8x4xbf16>
    %40 = vector.shape_cast %39 : vector<1x1x8x4xbf16> to vector<8x4xbf16>
    "tpu.trace_start"() <{level = 10 : i32, message = "oc,icj->oij"}> : () -> ()
    %cst_44 = arith.constant dense<0.000000e+00> : vector<8x32x128xf32>
    %41 = tpu.matmul %40, %38, %cst_44 {dimension_numbers = #tpu.dot_dimension_numbers<[1], [1], [0], [0, 2], [0, 0, 1, 0, 1, 2], [], []>} : vector<8x4xbf16>, vector<32x4x128xbf16>, vector<8x32x128xf32> -> vector<8x32x128xf32>
    "tpu.trace_stop"() : () -> ()
    %42 = arith.addf %34, %41 : vector<8x32x128xf32>
    "tpu.trace_start"() <{level = 10 : i32, message = "ih,chj->icj"}> : () -> ()
    %cst_45 = arith.constant dense<0.000000e+00> : vector<32x4x128xf32>
    %43 = tpu.matmul %36, %9, %cst_45 {dimension_numbers = #tpu.dot_dimension_numbers<[1], [1], [0], [0, 2], [0, 0, 1, 0, 1, 2], [], []>} : vector<32x32xbf16>, vector<4x32x128xbf16>, vector<32x4x128xf32> -> vector<32x4x128xf32>
    "tpu.trace_stop"() : () -> ()
    %44 = arith.truncf %43 : vector<32x4x128xf32> to vector<32x4x128xbf16>
    %c1_46 = arith.constant 1 : index
    %c1_47 = arith.constant 1 : index
    %c0_48 = arith.constant 0 : index
    %c0_49 = arith.constant 0 : index
    %45 = vector.load %arg5[%c1_46, %c1_47, %c0_48, %c0_49] : memref<3x3x8x4xbf16, #tpu.memory_space<vmem>>, vector<1x1x8x4xbf16>
    %46 = vector.shape_cast %45 : vector<1x1x8x4xbf16> to vector<8x4xbf16>
    "tpu.trace_start"() <{level = 10 : i32, message = "oc,icj->oij"}> : () -> ()
    %cst_50 = arith.constant dense<0.000000e+00> : vector<8x32x128xf32>
    %47 = tpu.matmul %46, %44, %cst_50 {dimension_numbers = #tpu.dot_dimension_numbers<[1], [1], [0], [0, 2], [0, 0, 1, 0, 1, 2], [], []>} : vector<8x4xbf16>, vector<32x4x128xbf16>, vector<8x32x128xf32> -> vector<8x32x128xf32>
    "tpu.trace_stop"() : () -> ()
    %48 = arith.addf %42, %47 : vector<8x32x128xf32>
    "tpu.trace_start"() <{level = 10 : i32, message = "ih,chj->icj"}> : () -> ()
    %cst_51 = arith.constant dense<0.000000e+00> : vector<32x4x128xf32>
    %49 = tpu.matmul %36, %13, %cst_51 {dimension_numbers = #tpu.dot_dimension_numbers<[1], [1], [0], [0, 2], [0, 0, 1, 0, 1, 2], [], []>} : vector<32x32xbf16>, vector<4x32x128xbf16>, vector<32x4x128xf32> -> vector<32x4x128xf32>
    "tpu.trace_stop"() : () -> ()
    %50 = arith.truncf %49 : vector<32x4x128xf32> to vector<32x4x128xbf16>
    %c1_52 = arith.constant 1 : index
    %c2_53 = arith.constant 2 : index
    %c0_54 = arith.constant 0 : index
    %c0_55 = arith.constant 0 : index
    %51 = vector.load %arg5[%c1_52, %c2_53, %c0_54, %c0_55] : memref<3x3x8x4xbf16, #tpu.memory_space<vmem>>, vector<1x1x8x4xbf16>
    %52 = vector.shape_cast %51 : vector<1x1x8x4xbf16> to vector<8x4xbf16>
    "tpu.trace_start"() <{level = 10 : i32, message = "oc,icj->oij"}> : () -> ()
    %cst_56 = arith.constant dense<0.000000e+00> : vector<8x32x128xf32>
    %53 = tpu.matmul %52, %50, %cst_56 {dimension_numbers = #tpu.dot_dimension_numbers<[1], [1], [0], [0, 2], [0, 0, 1, 0, 1, 2], [], []>} : vector<8x4xbf16>, vector<32x4x128xbf16>, vector<8x32x128xf32> -> vector<8x32x128xf32>
    "tpu.trace_stop"() : () -> ()
    %54 = arith.addf %48, %53 : vector<8x32x128xf32>
    %c2_57 = arith.constant 2 : index
    %c0_58 = arith.constant 0 : index
    %c0_59 = arith.constant 0 : index
    %c0_60 = arith.constant 0 : index
    %55 = vector.load %arg4[%c2_57, %c0_58, %c0_59, %c0_60] : memref<3x1x32x32xbf16, #tpu.memory_space<vmem>>, vector<1x1x32x32xbf16>
    %56 = vector.shape_cast %55 : vector<1x1x32x32xbf16> to vector<32x32xbf16>
    "tpu.trace_start"() <{level = 10 : i32, message = "ih,chj->icj"}> : () -> ()
    %cst_61 = arith.constant dense<0.000000e+00> : vector<32x4x128xf32>
    %57 = tpu.matmul %56, %5, %cst_61 {dimension_numbers = #tpu.dot_dimension_numbers<[1], [1], [0], [0, 2], [0, 0, 1, 0, 1, 2], [], []>} : vector<32x32xbf16>, vector<4x32x128xbf16>, vector<32x4x128xf32> -> vector<32x4x128xf32>
    "tpu.trace_stop"() : () -> ()
    %58 = arith.truncf %57 : vector<32x4x128xf32> to vector<32x4x128xbf16>
    %c2_62 = arith.constant 2 : index
    %c0_63 = arith.constant 0 : index
    %c0_64 = arith.constant 0 : index
    %c0_65 = arith.constant 0 : index
    %59 = vector.load %arg5[%c2_62, %c0_63, %c0_64, %c0_65] : memref<3x3x8x4xbf16, #tpu.memory_space<vmem>>, vector<1x1x8x4xbf16>
    %60 = vector.shape_cast %59 : vector<1x1x8x4xbf16> to vector<8x4xbf16>
    "tpu.trace_start"() <{level = 10 : i32, message = "oc,icj->oij"}> : () -> ()
    %cst_66 = arith.constant dense<0.000000e+00> : vector<8x32x128xf32>
    %61 = tpu.matmul %60, %58, %cst_66 {dimension_numbers = #tpu.dot_dimension_numbers<[1], [1], [0], [0, 2], [0, 0, 1, 0, 1, 2], [], []>} : vector<8x4xbf16>, vector<32x4x128xbf16>, vector<8x32x128xf32> -> vector<8x32x128xf32>
    "tpu.trace_stop"() : () -> ()
    %62 = arith.addf %54, %61 : vector<8x32x128xf32>
    "tpu.trace_start"() <{level = 10 : i32, message = "ih,chj->icj"}> : () -> ()
    %cst_67 = arith.constant dense<0.000000e+00> : vector<32x4x128xf32>
    %63 = tpu.matmul %56, %9, %cst_67 {dimension_numbers = #tpu.dot_dimension_numbers<[1], [1], [0], [0, 2], [0, 0, 1, 0, 1, 2], [], []>} : vector<32x32xbf16>, vector<4x32x128xbf16>, vector<32x4x128xf32> -> vector<32x4x128xf32>
    "tpu.trace_stop"() : () -> ()
    %64 = arith.truncf %63 : vector<32x4x128xf32> to vector<32x4x128xbf16>
    %c2_68 = arith.constant 2 : index
    %c1_69 = arith.constant 1 : index
    %c0_70 = arith.constant 0 : index
    %c0_71 = arith.constant 0 : index
    %65 = vector.load %arg5[%c2_68, %c1_69, %c0_70, %c0_71] : memref<3x3x8x4xbf16, #tpu.memory_space<vmem>>, vector<1x1x8x4xbf16>
    %66 = vector.shape_cast %65 : vector<1x1x8x4xbf16> to vector<8x4xbf16>
    "tpu.trace_start"() <{level = 10 : i32, message = "oc,icj->oij"}> : () -> ()
    %cst_72 = arith.constant dense<0.000000e+00> : vector<8x32x128xf32>
    %67 = tpu.matmul %66, %64, %cst_72 {dimension_numbers = #tpu.dot_dimension_numbers<[1], [1], [0], [0, 2], [0, 0, 1, 0, 1, 2], [], []>} : vector<8x4xbf16>, vector<32x4x128xbf16>, vector<8x32x128xf32> -> vector<8x32x128xf32>
    "tpu.trace_stop"() : () -> ()
    %68 = arith.addf %62, %67 : vector<8x32x128xf32>
    "tpu.trace_start"() <{level = 10 : i32, message = "ih,chj->icj"}> : () -> ()
    %cst_73 = arith.constant dense<0.000000e+00> : vector<32x4x128xf32>
    %69 = tpu.matmul %56, %13, %cst_73 {dimension_numbers = #tpu.dot_dimension_numbers<[1], [1], [0], [0, 2], [0, 0, 1, 0, 1, 2], [], []>} : vector<32x32xbf16>, vector<4x32x128xbf16>, vector<32x4x128xf32> -> vector<32x4x128xf32>
    "tpu.trace_stop"() : () -> ()
    %70 = arith.truncf %69 : vector<32x4x128xf32> to vector<32x4x128xbf16>
    %c2_74 = arith.constant 2 : index
    %c2_75 = arith.constant 2 : index
    %c0_76 = arith.constant 0 : index
    %c0_77 = arith.constant 0 : index
    %71 = vector.load %arg5[%c2_74, %c2_75, %c0_76, %c0_77] : memref<3x3x8x4xbf16, #tpu.memory_space<vmem>>, vector<1x1x8x4xbf16>
    %72 = vector.shape_cast %71 : vector<1x1x8x4xbf16> to vector<8x4xbf16>
    "tpu.trace_start"() <{level = 10 : i32, message = "oc,icj->oij"}> : () -> ()
    %cst_78 = arith.constant dense<0.000000e+00> : vector<8x32x128xf32>
    %73 = tpu.matmul %72, %70, %cst_78 {dimension_numbers = #tpu.dot_dimension_numbers<[1], [1], [0], [0, 2], [0, 0, 1, 0, 1, 2], [], []>} : vector<8x4xbf16>, vector<32x4x128xbf16>, vector<8x32x128xf32> -> vector<8x32x128xf32>
    "tpu.trace_stop"() : () -> ()
    %74 = arith.addf %68, %73 : vector<8x32x128xf32>
    %c0_79 = arith.constant 0 : index
    %c0_80 = arith.constant 0 : index
    %75 = vector.load %arg6[%c0_79, %c0_80] : memref<8x1xf32, #tpu.memory_space<vmem>>, vector<8x1xf32>
    %76 = vector.shape_cast %75 : vector<8x1xf32> to vector<8x1x1xf32>
    %77 = vector.broadcast %76 : vector<8x1x1xf32> to vector<8x32x128xf32>
    %78 = arith.mulf %74, %77 : vector<8x32x128xf32>
    %c0_81 = arith.constant 0 : index
    %c0_82 = arith.constant 0 : index
    %79 = vector.load %arg7[%c0_81, %c0_82] : memref<8x1xf32, #tpu.memory_space<vmem>>, vector<8x1xf32>
    %80 = vector.shape_cast %79 : vector<8x1xf32> to vector<8x1x1xf32>
    %81 = vector.broadcast %80 : vector<8x1x1xf32> to vector<8x32x128xf32>
    %82 = arith.addf %78, %81 : vector<8x32x128xf32>
    %cst_83 = arith.constant 0.000000e+00 : f32
    %83 = vector.broadcast %cst_83 : f32 to vector<8x32x128xf32>
    %84 = arith.maximumf %82, %83 : vector<8x32x128xf32>
    %85 = vector.shape_cast %84 : vector<8x32x128xf32> to vector<8x2x16x128xf32>
    %c0_84 = arith.constant 0 : index
    %c0_85 = arith.constant 0 : index
    %c0_86 = arith.constant 0 : index
    %c0_87 = arith.constant 0 : index
    %86 = vector.load %arg8[%c0_84, %c0_85, %c0_86, %c0_87] : memref<8x2x16x128xf32, #tpu.memory_space<vmem>>, vector<8x2x16x128xf32>
    tpu.vector_store %arg8[%c0_84, %c0_85, %c0_86, %c0_87], %85 {strides = array<i32>} : memref<8x2x16x128xf32, #tpu.memory_space<vmem>>, vector<8x2x16x128xf32>,
    return
  }
  func.func @transform_0(%arg0: i32, %arg1: i32) -> (i32, i32, i32, i32) {
    %c0_i32 = arith.constant 0 : i32
    %c0_i32_0 = arith.constant 0 : i32
    %c0_i32_1 = arith.constant 0 : i32
    %c0_i32_2 = arith.constant 0 : i32
    return %c0_i32, %arg0, %c0_i32_0, %c0_i32_1 : i32, i32, i32, i32
  }
  func.func @transform_1(%arg0: i32, %arg1: i32) -> (i32, i32, i32) {
    %c0_i32 = arith.constant 0 : i32
    %c0_i32_0 = arith.constant 0 : i32
    %c0_i32_1 = arith.constant 0 : i32
    %c0_i32_2 = arith.constant 0 : i32
    return %c0_i32, %c0_i32_0, %c0_i32_1 : i32, i32, i32
  }
  func.func @transform_2(%arg0: i32, %arg1: i32) -> (i32, i32, i32, i32) {
    %c0_i32 = arith.constant 0 : i32
    %c0_i32_0 = arith.constant 0 : i32
    %c0_i32_1 = arith.constant 0 : i32
    %c0_i32_2 = arith.constant 0 : i32
    return %c0_i32, %arg1, %c0_i32_0, %c0_i32_1 : i32, i32, i32, i32
  }
  func.func @transform_3(%arg0: i32, %arg1: i32) -> (i32, i32, i32, i32) {
    %c0_i32 = arith.constant 0 : i32
    %c0_i32_0 = arith.constant 0 : i32
    %c0_i32_1 = arith.constant 0 : i32
    %c0_i32_2 = arith.constant 0 : i32
    %c0_i32_3 = arith.constant 0 : i32
    return %c0_i32, %c0_i32_0, %c0_i32_1, %c0_i32_2 : i32, i32, i32, i32
  }
  func.func @transform_4(%arg0: i32, %arg1: i32) -> (i32, i32) {
    %c0_i32 = arith.constant 0 : i32
    %c0_i32_0 = arith.constant 0 : i32
    %c0_i32_1 = arith.constant 0 : i32
    return %c0_i32, %c0_i32_0 : i32, i32
  }
  func.func @transform_5(%arg0: i32, %arg1: i32) -> (i32, i32) {
    %c0_i32 = arith.constant 0 : i32
    %c0_i32_0 = arith.constant 0 : i32
    %c0_i32_1 = arith.constant 0 : i32
    return %c0_i32, %c0_i32_0 : i32, i32
  }
  func.func @transform_6(%arg0: i32, %arg1: i32) -> (i32, i32, i32, i32) {
    %c0_i32 = arith.constant 0 : i32
    %c0_i32_0 = arith.constant 0 : i32
    %c0_i32_1 = arith.constant 0 : i32
    return %c0_i32, %arg0, %arg1, %c0_i32_0 : i32, i32, i32, i32
  }
}

</mosaic_0001>

<bundles_post_ra>
// kernel: tpu_custom_call.1
= control target key start
LH: loop header
LB: loop body
LE: loop exit
PB: predicated region body
PF: predicated region fallthrough
CT: control target
= control target key end

     0   :  { %11 = vsyncpa [#allocation4], 0  ;;  %s31215_s0 = inlined_call_operand.vmem [shape: bf16[4,2,16,16], index: 0, kind: input, shape index: {}]   ;;  %s31216_s1 = inlined_call_operand.vmem [shape: bf16[3,128,16], index: 1, kind: input, shape index: {}]   ;;  %s31217_s2 = inlined_call_operand.vmem [shape: bf16[3,2,32,32], index: 2, kind: input, shape index: {}]   ;;  %s31218_s3 = inlined_call_operand.vmem [shape: bf16[3,3,8,4], index: 3, kind: input, shape index: {}]   ;;  %s31219_s4 = inlined_call_operand.vmem [shape: f32[8,1], index: 4, kind: input, shape index: {}]   ;;  %s31220_s5 = inlined_call_operand.vmem [shape: f32[8,1], index: 5, kind: input, shape index: {}]   ;;  %s31221_s6 = inlined_call_operand.hbm [shape: f32[8,2,32,128], index: 6, kind: output, shape index: {}]  }
   0x1   :  { %13 = vsyncpa [#allocation4 + $0x1], 0  ;;  %s25115_s21 = smov 0   ;;  %s25117_s22 = smov 0  }
   0x2   :  { %s25119_s23 = smov 0   ;;  %s25121_s24 = smov 0  }
   0x3   :  { %s25123_s25 = smov 0   ;;  %s25125_s26 = smov 0  }
   0x4 LB: > { %s24071_s27 = sadd.s32 4294967295, %s25066_s26   ;;  %s24072_s28 = sadd.s32 4294967294, %s25066_s26   ;;  %s25066_s26 = sphi %s25125_s26, %s19_s26   ;;  %s25062_s25 = sphi %s25123_s25, %s31673_s25   ;;  %s25058_s24 = sphi %s25121_s24, %s31672_s24   ;;  %s25054_s23 = sphi %s25119_s23, %s31671_s23   ;;  %s25050_s22 = sphi %s25117_s22, %s31670_s22   ;;  %s25046_s21 = sphi %s25115_s21, %s31669_s21  }
   0x5   : > { %s28_s29 = sadd.s32 1, %s25062_s25  ;;  %s85_s30 = sadd.s32 1, %s25054_s23 }
   0x6   : > { %p29_p0 = scmp.ge.s32.totalorder %s28_s29, 2  ;;  %p92_p1 = scmp.ne.s32.totalorder %s25054_s23, %s25050_s22 }
   0x7   : > { %p93_p2 = scmp.eq.s32.totalorder %s25066_s26, 0  ;;  %p187_p3 = scmp.eq.s32.totalorder %s24071_s27, 1 }
   0x8   : > { %s31675_s29 = smov (%p29_p0, %s28_s29), 0  ;;  %p192_p6 = scmp.ne.s32.totalorder %s25050_s22, %s25046_s21 }
   0x9   : > { %p94_p4 = por %p93_p2, %p92_p1  ;;  %p25154_p5 = por %p187_p3, %p92_p1 }
   0xa   : > { %s82_s8 = ssub.s32 %s25062_s25, %s31675_s29  ;;  %p193_p8 = scmp.eq.s32.totalorder %s24072_s28, 1 }
   0xb   : > { %p83_p7 = scmp.eq.s32.totalorder %s82_s8, 0  ;;  %p24075_p10 = scmp.ge.s32.totalorder %s25066_s26, 2 }
   0xc   : > { %p25165_p9 = por %p193_p8, %p192_p6 }
   0xd   : > { %s25163_s9 = scalar_select %p83_p7, %s25054_s23, %s85_s30  }
   0xe   : > { %231 = sbr.rel (%p24075_p10) target bundleno = 28 (0x1c), region = 36 }
  0x15   : > { %234 = sbr.rel (!%p94_p4) target bundleno = 28 (0x1c), region = 40  ;;  %s236_s11 = sand.u32 (%p94_p4), 1, %s25054_s23  }
  0x16   : > { %s24719_s12 = sshll.u32 (%p94_p4), %s25062_s25, 4  ;;  %s24889_s13 = smul.u32 (%p94_p4), 48, %s236_s11 }
  0x17   : > { %s241_s16 = scalar_lea.vmem (%p94_p4), %s31217_s2, %s24719_s12 }
  0x18   : > { %v257_v0 = vld [vmem:[%s241_s16] sm:$0xff] (%p94_p4)   ;;  %v261_v1 = vld [vmem:[%s241_s16 + $0x8] sm:$0xff] (%p94_p4)   ;;  %s238_s17 = scalar_lea.vmem (%p94_p4), [#allocation2], %s24889_s13 }
  0x19   : > { %v265_v2 = vld [vmem:[%s241_s16 + $0x20] sm:$0xff] (%p94_p4)   ;;  %v269_v3 = vld [vmem:[%s241_s16 + $0x28] sm:$0xff] (%p94_p4)   ;;  %258 = vst [vmem:[%s238_s17] sm:$0xff] (%p94_p4), %v257_v0   ;;  %262 = vst [vmem:[%s238_s17 + $0x8] sm:$0xff] (%p94_p4), %v261_v1  }
  0x1a   : > { %v273_v4 = vld [vmem:[%s241_s16 + $0x40] sm:$0xff] (%p94_p4)   ;;  %v277_v5 = vld [vmem:[%s241_s16 + $0x48] sm:$0xff] (%p94_p4)   ;;  %266 = vst [vmem:[%s238_s17 + $0x10] sm:$0xff] (%p94_p4), %v265_v2   ;;  %270 = vst [vmem:[%s238_s17 + $0x18] sm:$0xff] (%p94_p4), %v269_v3  }
  0x1b   : > { %274 = vst [vmem:[%s238_s17 + $0x20] sm:$0xff] (%p94_p4), %v273_v4   ;;  %278 = vst [vmem:[%s238_s17 + $0x28] sm:$0xff] (%p94_p4), %v277_v5  }
  0x1c PF: > { %p24078_p11 = scmp.ge.s32.totalorder %s25066_s26, 1  ;;  %p326_p12 = scmp.lt.s32.totalorder %s25066_s26, 3 }
  0x1e   : > { %p327_p13 = pnand %p24078_p11, %p326_p12 }
  0x20   : > { %330 = sbr.rel (%p327_p13) target bundleno = 3481 (0xd99), region = 81 }
  0x27   : > { %v24966_v6 = vld [vmem:[%s31216_s1] sm:$0xff]   ;;  %vm490_vm0 = vcmask 130048   ;;  %v24968_v9 = vld [vmem:[%s31216_s1 + $0x8] sm:$0xff]   ;;  %v24970_v13 = vld [vmem:[%s31216_s1 + $0x10] sm:$0xff]   ;;  %v31222_v46 = vmov 0   ;;  %s25337_s8 = sand.u32 1, %s25050_s22   ;;  %v1062_v56 = vlaneseq }
  0x28   : > { %v24967_v7 = vld [vmem:[%s31216_s1 + $0x40] sm:$0xff]   ;;  %24865 = vmatprep.subr.msk.bf16.mxu0 %vm490_vm0, %v24966_v6  ;;  %v516_v8 = vsel %vm490_vm0, %v24966_v6, 0  ;;  %v24969_v11 = vld [vmem:[%s31216_s1 + $0x48] sm:$0xff]   ;;  %v519_v12 = vsel %vm490_vm0, %v24968_v9, 0  ;;  %v24971_v15 = vld [vmem:[%s31216_s1 + $0x50] sm:$0xff]   ;;  %v522_v17 = vsel %vm490_vm0, %v24970_v13, 0  ;;  %24965 = vset.pattern.permute.xlu1 %v31222_v46 }
  0x29   : > { %24770 = vmatpush3.bf16.xpose.msra.mxu0 %v516_v8  ;;  %24873 = vmatprep.subr.msk.bf16.mxu1 %vm490_vm0, %v24967_v7  ;;  %v702_v10 = vsel %vm490_vm0, %v24967_v7, 0  ;;  %v705_v14 = vsel %vm490_vm0, %v24969_v11, 0  ;;  %v24972_v16 = vld [vmem:[%s31216_s1 + $0x18] sm:$0xff]   ;;  %v25214_v18 = vld [vmem:[%s31215_s0] sm:$0xff]   ;;  %v708_v19 = vsel %vm490_vm0, %v24971_v15, 0  ;;  %v24976_v26 = vld [vmem:[%s31216_s1 + $0x28] sm:$0xff]   ;;  %v25348_v8 = vpack.i.b16 %v31222_v46, %v31222_v46 }
  0x2a   : > { %24802 = vmatpush3.bf16.xpose.msra.mxu1 %v702_v10  ;;  %24866 = vmatprep.subr.msk.bf16.mxu0 %vm490_vm0, %v24968_v9  ;;  %v24973_v20 = vld [vmem:[%s31216_s1 + $0x58] sm:$0xff]   ;;  %v525_v21 = vsel %vm490_vm0, %v24972_v16, 0  ;;  %v24974_v22 = vld [vmem:[%s31216_s1 + $0x20] sm:$0xff]   ;;  %v24977_v28 = vld [vmem:[%s31216_s1 + $0x68] sm:$0xff]   ;;  %v531_v29 = vsel %vm490_vm0, %v24976_v26, 0  ;;  %s24890_s11 = smul.u32 48, %s25337_s8 }
  0x2b   : > { %24874 = vmatprep.subr.msk.bf16.mxu1 %vm490_vm0, %v24969_v11  ;;  %24785 = vmatprep.mubr.msk.bf16.mxu0 %vm490_vm0, %v25214_v18  ;;  %v711_v23 = vsel %vm490_vm0, %v24973_v20, 0  ;;  %v24975_v24 = vld [vmem:[%s31216_s1 + $0x60] sm:$0xff]   ;;  %v528_v25 = vsel %vm490_vm0, %v24974_v22, 0  ;;  %v24978_v30 = vld [vmem:[%s31216_s1 + $0x30] sm:$0xff]   ;;  %v717_v31 = vsel %vm490_vm0, %v24977_v28, 0  ;;  %v24980_v34 = vld [vmem:[%s31216_s1 + $0x38] sm:$0xff]  }
  0x2c   : > { %24817 = vmatprep.mubr.msk.bf16.mxu1 %vm490_vm0, %v25214_v18  ;;  %v714_v27 = vsel %vm490_vm0, %v24975_v24, 0  ;;  %v24979_v32 = vld [vmem:[%s31216_s1 + $0x70] sm:$0xff]   ;;  %v534_v33 = vsel %vm490_vm0, %v24978_v30, 0  ;;  %v24981_v36 = vld [vmem:[%s31216_s1 + $0x78] sm:$0xff]   ;;  %v537_v37 = vsel %vm490_vm0, %v24980_v34, 0  ;;  %v25271_v39 = vld [vmem:[%s31215_s0 + $0x8] sm:$0xff]   ;;  %24964 = vset.pattern.permute.xlu0 %v31222_v46 }
  0x2d   : > { %v720_v35 = vsel %vm490_vm0, %v24979_v32, 0  ;;  %v723_v38 = vsel %vm490_vm0, %v24981_v36, 0  ;;  %v25276_v40 = vld [vmem:[%s31215_s0 + $0x10] sm:$0xff]   ;;  %v25289_v41 = vld [vmem:[%s31215_s0 + $0x18] sm:$0xff]   ;;  %v25294_v42 = vld [vmem:[%s31215_s0 + $0x20] sm:$0xff]   ;;  %s25340_s12 = scalar_lea.vmem [#allocation2], %s24890_s11 }
  0x2e   : > { %v25307_v43 = vld [vmem:[%s31215_s0 + $0x28] sm:$0xff]   ;;  %v25312_v44 = vld [vmem:[%s31215_s0 + $0x30] sm:$0xff]   ;;  %v25325_v45 = vld [vmem:[%s31215_s0 + $0x38] sm:$0xff]   ;;  %v25069_v54 = vmov 1983009808   ;;  %v25344_v63 = vshrl.u32 %v1062_v56, 7 }
  0x2f   : > { %v1060_v55 = vunpack.c.l.s4 %v25069_v54  ;;  %v25070_v0 = vmov 1934713408   ;;  %vm1592_vm1 = vcmask 261120   ;;  %vm3502_vm2 = vcmask 1041408   ;;  %s24079_s14 = sshll.u32 %s25337_s8, 8  ;;  %s23932_s16 = scalar_lea.sflag [#allocation4], %s25337_s8 }
  0x30   : > { %31312 = vst [vmem:[#allocation8_spill] sm:$0xff] %v25344_v63  ;;  %v1091_v1 = vunpack.c.l.s4 %v25070_v0  ;;  %vm3498_vm3 = vcmask 31744   ;;  %s30918_s15 = scalar_lea.vmem [#allocation3], %s24079_s14 }
  0x31   : > { %24772 = vmatpush3.bf16.xpose.msra.mxu0 %v519_v12  ;;  %v1061_v62 = vunpack.c.0.s8 %v1060_v55 }
  0x32   : > { %24804 = vmatpush3.bf16.xpose.msra.mxu1 %v705_v14  ;;  %24867 = vmatprep.subr.msk.bf16.mxu0 %vm490_vm0, %v24970_v13  ;;  %v1092_v12 = vunpack.c.0.s8 %v1091_v1 }
  0x33   : > { %24875 = vmatprep.subr.msk.bf16.mxu1 %vm490_vm0, %v24971_v15  ;;  %v25351_v9 = vsub.s32 %v1061_v62, %v25344_v63 }
  0x39   : > { %24774 = vmatpush3.bf16.xpose.msra.mxu0 %v522_v17 }
  0x3a   : > { %24806 = vmatpush3.bf16.xpose.msra.mxu1 %v708_v19  ;;  %24868 = vmatprep.subr.msk.bf16.mxu0 %vm490_vm0, %v24972_v16 }
  0x3b   : > { %24876 = vmatprep.subr.msk.bf16.mxu1 %vm490_vm0, %v24973_v20 }
  0x41   : > { %24776 = vmatpush3.bf16.xpose.msra.mxu0 %v525_v21 }
  0x42   : > { %24808 = vmatpush3.bf16.xpose.msra.mxu1 %v711_v23  ;;  %24869 = vmatprep.subr.msk.bf16.mxu0 %vm490_vm0, %v24974_v22  ;;  %v24992_v22 = vld [vmem:[%s31216_s1 + $0x80] sm:$0xff]  }
  0x43   : > { %24877 = vmatprep.subr.msk.bf16.mxu1 %vm490_vm0, %v24975_v24 }
  0x49   : > { %24778 = vmatpush3.bf16.xpose.msra.mxu0 %v528_v25 }
  0x4a   : > { %24810 = vmatpush3.bf16.xpose.msra.mxu1 %v714_v27  ;;  %24870 = vmatprep.subr.msk.bf16.mxu0 %vm490_vm0, %v24976_v26 }
  0x4b   : > { %24878 = vmatprep.subr.msk.bf16.mxu1 %vm490_vm0, %v24977_v28 }
  0x51   : > { %24780 = vmatpush3.bf16.xpose.msra.mxu0 %v531_v29 }
  0x52   : > { %24812 = vmatpush3.bf16.xpose.msra.mxu1 %v717_v31  ;;  %24871 = vmatprep.subr.msk.bf16.mxu0 %vm490_vm0, %v24978_v30 }
  0x53   : > { %24879 = vmatprep.subr.msk.bf16.mxu1 %vm490_vm0, %v24979_v32 }
  0x59   : > { %24782 = vmatpush3.bf16.xpose.msra.mxu0 %v534_v33 }
  0x5a   : > { %24814 = vmatpush3.bf16.xpose.msra.mxu1 %v720_v35  ;;  %24872 = vmatprep.subr.msk.bf16.mxu0 %vm490_vm0, %v24980_v34 }
  0x5b   : > { %24880 = vmatprep.subr.msk.bf16.mxu1 %vm490_vm0, %v24981_v36 }
  0x61   : > { %24784 = vmatpush3.bf16.xpose.msra.mxu0 %v537_v37 }
  0x62   : > { %24816 = vmatpush3.bf16.xpose.msra.mxu1 %v723_v38  ;;  %24881 = vmatprep.subr.msk.bf16.mxu0 %vm490_vm0, %v24992_v22 }
  0x68   : > { %24786 = vmatmul.mubr.msk.bf16.vlgmr.msra.gmra.mrb[0].mxu0 %vm490_vm0, %v25271_v39 }
  0x69   : > { %24818 = vmatmul.mubr.msk.bf16.vlgmr.msra.gmra.mrb[0].mxu1 %vm490_vm0, %v25271_v39  ;;  %24789 = vmatprep.mubr.msk.bf16.mxu0 %vm490_vm0, %v25276_v40 }
  0x6a   : > { %24821 = vmatprep.mubr.msk.bf16.mxu1 %vm490_vm0, %v25276_v40 }
  0x70   : > { %24790 = vmatmul.mubr.msk.bf16.gmra.mrb[4].mxu0 %vm490_vm0, %v25289_v41 }
  0x71   : > { %24822 = vmatmul.mubr.msk.bf16.gmra.mrb[4].mxu1 %vm490_vm0, %v25289_v41  ;;  %24793 = vmatprep.mubr.msk.bf16.mxu0 %vm490_vm0, %v25294_v42 }
  0x72   : > { %24825 = vmatprep.mubr.msk.bf16.mxu1 %vm490_vm0, %v25294_v42 }
  0x78   : > { %24794 = vmatmul.mubr.msk.bf16.gmra.mrb[8].mxu0 %vm490_vm0, %v25307_v43 }
  0x79   : > { %24826 = vmatmul.mubr.msk.bf16.gmra.mrb[8].mxu1 %vm490_vm0, %v25307_v43  ;;  %24797 = vmatprep.mubr.msk.bf16.mxu0 %vm490_vm0, %v25312_v44 }
  0x7a   : > { %24829 = vmatprep.mubr.msk.bf16.mxu1 %vm490_vm0, %v25312_v44 }
  0x80   : > { %24798 = vmatmul.mubr.msk.bf16.gmra.mrb[12].mxu0 %vm490_vm0, %v25325_v45 }
  0x81   : > { %24830 = vmatmul.mubr.msk.bf16.gmra.mrb[12].mxu1 %vm490_vm0, %v25325_v45  ;;  %24849 = vmatprep.mubr.msk.bf16.mxu0 %vm490_vm0, %v25214_v18 }
  0x82   : > { %1631 = vmatprep.mubr.bf16.mxu1 %v31222_v46 }
 0x13b   : > { %v24787_v47 = vpop.f32.mrb[0].mxu0 }
 0x13c   : > { %v573_v48 = vpop.f32.mrb[1].mxu0  ;;  %v24819_v49 = vpop.f32.mrb[0].mxu1 }
 0x13d   : > { %v24788_v50 = vpop.f32.mrb[2].mxu0  ;;  %v759_v51 = vpop.f32.mrb[1].mxu1 }
 0x13e   : > { %v637_v52 = vpack.c.bf16 %v24788_v50, %v24787_v47  ;;  %v576_v53 = vpop.f32.mrb[3].mxu0  ;;  %v24820_v57 = vpop.f32.mrb[2].mxu1 }
 0x13f   : > { %v636_v58 = vpack.c.bf16 %v576_v53, %v573_v48  ;;  %v823_v59 = vpack.c.bf16 %v24820_v57, %v24819_v49  ;;  %v762_v60 = vpop.f32.mrb[3].mxu1  ;;  %v25368_v49 = vsub.s32 %v1092_v12, %v25344_v63 }
 0x140   : > { %v25342_v61 = vpack.c.bf16 %v762_v60, %v759_v51  ;;  %v1046_v13 = vshrl.u32 %v637_v52, 16 }
 0x141   : > { %v2030_v15 = vshrl.u32 %v823_v59, 16  ;;  %v1024_v18 = vshrl.u32 %v636_v58, 16 }
 0x142   : > { %v2014_v38 = vshrl.u32 %v25342_v61, 16 }
 0x143   : > { %v24791_v2 = vpop.f32.mrb[4].mxu0 }
 0x144   : > { %v589_v3 = vpop.f32.mrb[5].mxu0  ;;  %v24823_v4 = vpop.f32.mrb[4].mxu1 }
 0x145   : > { %v24792_v5 = vpop.f32.mrb[6].mxu0  ;;  %v775_v6 = vpop.f32.mrb[5].mxu1 }
 0x146   : > { %v639_v7 = vpack.c.bf16 %v24792_v5, %v24791_v2  ;;  %v592_v10 = vpop.f32.mrb[7].mxu0  ;;  %v24824_v11 = vpop.f32.mrb[6].mxu1  ;;  %v24993_v2 = vld [vmem:[%s31216_s1 + $0x88] sm:$0xff]  }
 0x147   : > { %v638_v14 = vpack.c.bf16 %v592_v10, %v589_v3  ;;  %v825_v16 = vpack.c.bf16 %v24824_v11, %v24823_v4  ;;  %v778_v17 = vpop.f32.mrb[7].mxu1 }
 0x148   : > { %v1044_v19 = vpack.i.b16 %v639_v7, %v637_v52  ;;  %v1047_v20 = vshrl.u32 %v639_v7, 16  ;;  %v824_v21 = vpack.c.bf16 %v778_v17, %v775_v6  ;;  %v24994_v7 = vld [vmem:[%s31216_s1 + $0x90] sm:$0xff]  }
 0x149   : > { %v1022_v23 = vpack.i.b16 %v638_v14, %v636_v58  ;;  %v1025_v24 = vshrl.u32 %v638_v14, 16  ;;  %v2028_v25 = vpack.i.b16 %v825_v16, %v823_v59  ;;  %v2031_v26 = vshrl.u32 %v825_v16, 16  ;;  %v25415_v14 = vld [vmem:[%s31216_s1 + $0x98] sm:$0xff]   ;;  %v25425_v16 = vld [vmem:[%s31216_s1 + $0xa8] sm:$0xff]  }
 0x14a   : > { %v1048_v27 = vpack.i.b16 %v1047_v20, %v1046_v13  ;;  %v2012_v28 = vpack.i.b16 %v824_v21, %v25342_v61  ;;  %v1190_v29 = vcombine.high %v1044_v19, %v25348_v8  ;;  %v25361_v36 = vrot.slane %v1044_v19, %v25351_v9 }
 0x14b   : > { %v1026_v30 = vpack.i.b16 %v1025_v24, %v1024_v18  ;;  %v24795_v31 = vpop.f32.mrb[8].mxu0  ;;  %v2032_v32 = vpack.i.b16 %v2031_v26, %v2030_v15  ;;  %v1058_v33 = vcombine.high %v1022_v23, %v25348_v8  ;;  %v25364_v37 = vrot.slane %v1022_v23, %v25351_v9  ;;  %v25420_v15 = vld [vmem:[%s31216_s1 + $0xa0] sm:$0xff]  }
 0x14c   : > { %v605_v34 = vpop.f32.mrb[9].mxu0  ;;  %v24827_v35 = vpop.f32.mrb[8].mxu1  ;;  %v1256_v50 = vcombine.high %v1048_v27, %v25348_v8  ;;  %v2174_v54 = vcombine.high %v2028_v25, %v25348_v8  ;;  %v25376_v56 = vrot.slane %v1190_v29, %v25351_v9  ;;  %v2015_v59 = vshrl.u32 %v824_v21, 16 }
 0x14d   : > { %v24796_v47 = vpop.f32.mrb[10].mxu0  ;;  %v791_v48 = vpop.f32.mrb[9].mxu1  ;;  %v1124_v51 = vcombine.high %v1026_v30, %v25348_v8  ;;  %v2240_v58 = vcombine.high %v2032_v32, %v25348_v8  ;;  %v25382_v61 = vrot.slane %v1048_v27, %v25351_v9  ;;  %v25385_v62 = vrot.slane %v1058_v33, %v25351_v9 }
 0x14e   : > { %v25372_v52 = vpack.c.bf16 %v24796_v47, %v24795_v31  ;;  %v608_v53 = vpop.f32.mrb[11].mxu0  ;;  %v24828_v55 = vpop.f32.mrb[10].mxu1  ;;  %v25388_v0 = vrot.slane %v1026_v30, %v25351_v9  ;;  %v2042_v1 = vcombine.high %v2012_v28, %v25348_v8  ;;  %v25395_v3 = vrot.slane %v2028_v25, %v25351_v9  ;;  %v25452_v30 = vld [vmem:[%s31216_s1 + $0xb8] sm:$0xff]  }
 0x14f   : > { %v25378_v57 = vpack.c.bf16 %v608_v53, %v605_v34  ;;  %v794_v60 = vpop.f32.mrb[11].mxu1  ;;  %v2016_v4 = vpack.i.b16 %v2015_v59, %v2014_v38  ;;  %v827_v5 = vpack.c.bf16 %v24828_v55, %v24827_v35  ;;  %v25403_v10 = vrot.slane %v1256_v50, %v25351_v9 }
 0x150   : > { %v25397_v6 = vpack.c.bf16 %v794_v60, %v791_v48  ;;  %v25406_v11 = vrot.slane %v1124_v51, %v25351_v9  ;;  %v25409_v12 = vrot.slane %v2174_v54, %v25351_v9  ;;  %v888_v13 = vsel %vm490_vm0, %v24992_v22, 0  ;;  %v25438_v22 = vld [vmem:[%s31216_s1 + $0xb0] sm:$0xff]  }
 0x151   : > { %v1054_v17 = vshrl.u32 %v25372_v52, 16  ;;  %v25429_v18 = vrot.slane %v2032_v32, %v25351_v9  ;;  %v25432_v19 = vrot.slane %v2240_v58, %v25351_v9  ;;  %v2108_v20 = vcombine.high %v2016_v4, %v25348_v8  ;;  %24834 = vmatpush3.bf16.xpose.msra.mxu0 %v888_v13 }
 0x152   : > { %v1032_v23 = vshrl.u32 %v25378_v57, 16  ;;  %v25442_v24 = vrot.slane %v2012_v28, %v25351_v9  ;;  %v25445_v25 = vrot.slane %v2042_v1, %v25351_v9  ;;  %24882 = vmatprep.subr.msk.bf16.mxu0 %vm490_vm0, %v24993_v2  ;;  %v891_v29 = vsel %vm490_vm0, %v24993_v2, 0 }
 0x153   : > { %v24799_v21 = vpop.f32.mrb[12].mxu0  ;;  %v25455_v31 = vrot.slane %v2016_v4, %v25351_v9  ;;  %v2038_v32 = vshrl.u32 %v827_v5, 16  ;;  %v2022_v28 = vshrl.u32 %v25397_v6, 16  ;;  %v894_v35 = vsel %vm490_vm0, %v24994_v7, 0 }
 0x154   : > { %v621_v26 = vpop.f32.mrb[13].mxu0  ;;  %v24831_v27 = vpop.f32.mrb[12].mxu1  ;;  %v25461_v50 = vsel %vm490_vm0, %v25415_v14, 0  ;;  %v25465_v51 = vsel %vm490_vm0, %v25420_v15, 0  ;;  %v25469_v53 = vsel %vm490_vm0, %v25425_v16, 0  ;;  %v25472_v54 = vrot.slane %v2108_v20, %v25351_v9 }
 0x155   : > { %v24800_v33 = vpop.f32.mrb[14].mxu0  ;;  %v807_v34 = vpop.f32.mrb[13].mxu1  ;;  %v25476_v60 = vsel %vm490_vm0, %v25438_v22, 0  ;;  %v25483_v13 = vsel %vm490_vm0, %v25452_v30, 0 }
 0x156   : > { %v643_v38 = vpack.c.bf16 %v24800_v33, %v24799_v21  ;;  %v624_v47 = vpop.f32.mrb[15].mxu0  ;;  %v24832_v48 = vpop.f32.mrb[14].mxu1 }
 0x157   : > { %v642_v55 = vpack.c.bf16 %v624_v47, %v621_v26  ;;  %v829_v58 = vpack.c.bf16 %v24832_v48, %v24831_v27  ;;  %v810_v59 = vpop.f32.mrb[15].mxu1 }
 0x158   : > { %v1052_v1 = vpack.i.b16 %v643_v38, %v25372_v52  ;;  %v1055_v2 = vshrl.u32 %v643_v38, 16  ;;  %v25479_v4 = vpack.c.bf16 %v810_v59, %v807_v34 }
 0x159   : > { %v1030_v21 = vpack.i.b16 %v642_v55, %v25378_v57  ;;  %v1033_v20 = vshrl.u32 %v642_v55, 16  ;;  %v2036_v33 = vpack.i.b16 %v829_v58, %v827_v5  ;;  %v2039_v26 = vshrl.u32 %v829_v58, 16  ;;  %24836 = vmatpush3.bf16.xpose.msra.mxu0 %v891_v29 }
 0x15a   : > { %v1056_v27 = vpack.i.b16 %v1055_v2, %v1054_v17  ;;  %v1205_v47 = vcombine.high %v1052_v1, %v25348_v8  ;;  %v1212_v48 = vrot.slane %v1052_v1, %v25351_v9  ;;  %v25490_v52 = vpack.i.b16 %v25479_v4, %v25397_v6  ;;  %24883 = vmatprep.subr.msk.bf16.mxu0 %vm490_vm0, %v24994_v7 }
 0x15b   : > { %v1034_v34 = vpack.i.b16 %v1033_v20, %v1032_v23  ;;  %v1073_v38 = vcombine.high %v1030_v21, %v25348_v8  ;;  %v1080_v59 = vrot.slane %v1030_v21, %v25351_v9  ;;  %v25494_v46 = vpack.i.b16 %v2039_v26, %v2038_v32 }
 0x15c   : > { %v1219_v57 = vrot.slane %v1205_v47, %v25351_v9  ;;  %v1220_v5 = vcombine.low %v25361_v36, %v1212_v48  ;;  %v1221_v17 = vcombine.high %v25361_v36, %v1212_v48  ;;  %v1271_v55 = vcombine.high %v1056_v27, %v25348_v8 }
 0x15d   : > { %v1278_v58 = vrot.slane %v1056_v27, %v25351_v9  ;;  %v1087_v23 = vrot.slane %v1073_v38, %v25351_v9  ;;  %v1088_v1 = vcombine.low %v25364_v37, %v1080_v59  ;;  %v1089_v32 = vcombine.high %v25364_v37, %v1080_v59 }
 0x15e   : > { %v25506_v29 = vrot.slane %v1220_v5, %v25368_v49  ;;  %v25509_v2 = vrot.slane %v1221_v17, %v25368_v49  ;;  %v1236_v36 = vcombine.low %v25376_v56, %v1219_v57  ;;  %v1237_v21 = vcombine.high %v25376_v56, %v1219_v57 }
 0x15f   : > { %v1285_v7 = vrot.slane %v1271_v55, %v25351_v9  ;;  %v1286_v20 = vcombine.low %v25382_v61, %v1278_v58  ;;  %v1287_v26 = vcombine.high %v25382_v61, %v1278_v58  ;;  %v25517_v27 = vrot.slane %v1088_v1, %v25368_v49 }
 0x160   : > { %v25520_v37 = vrot.slane %v1236_v36, %v25368_v49  ;;  %v25523_v47 = vrot.slane %v1237_v21, %v25368_v49  ;;  %v1422_v48 = vcombine.low %v25506_v29, %v25509_v2  ;;  %v24172_v56 = vcombine.high %v25506_v29, %v25509_v2 }
 0x161   : > { %v25530_v38 = vrot.slane %v1286_v20, %v25368_v49  ;;  %v25533_v61 = vrot.slane %v1287_v26, %v25368_v49  ;;  %v1302_v59 = vcombine.low %v25403_v10, %v1285_v7  ;;  %v1303_v57 = vcombine.high %v25403_v10, %v1285_v7  ;;  %24838 = vmatpush3.bf16.xpose.msra.mxu0 %v894_v35 }
 0x162   : > { %v1438_v5 = vcombine.low %v25520_v37, %v25523_v47  ;;  %v25542_v55 = vrot.slane %v1089_v32, %v25368_v49  ;;  %v1104_v58 = vcombine.low %v25385_v62, %v1087_v23  ;;  %v1105_v7 = vcombine.high %v25385_v62, %v1087_v23  ;;  %24884 = vmatprep.subr.msk.bf16.mxu0 %vm490_vm0, %v25415_v14 }
 0x163   : > { %v25546_v1 = vrot.slane %v1302_v59, %v25368_v49  ;;  %v25549_v36 = vrot.slane %v1303_v57, %v25368_v49  ;;  %v1139_v20 = vcombine.high %v1034_v34, %v25348_v8  ;;  %v1146_v26 = vrot.slane %v1034_v34, %v25351_v9 }
 0x164   : > { %v25557_v32 = vrot.slane %v1104_v58, %v25368_v49  ;;  %v1322_v59 = vcombine.low %v25517_v27, %v25542_v55  ;;  %v24168_v57 = vcombine.high %v25517_v27, %v25542_v55  ;;  %v2189_v35 = vcombine.high %v2036_v33, %v25348_v8 }
 0x165   : > { %v2196_v62 = vrot.slane %v2036_v33, %v25351_v9  ;;  %v25570_v23 = vrot.slane %v1105_v7, %v25368_v49  ;;  %v1153_v58 = vrot.slane %v1139_v20, %v25351_v9  ;;  %v1154_v34 = vcombine.low %v25388_v0, %v1146_v26 }
 0x166   : > { %v1155_v21 = vcombine.high %v25388_v0, %v1146_v26  ;;  %v2203_v14 = vrot.slane %v2189_v35, %v25351_v9  ;;  %v2255_v27 = vcombine.high %v25494_v46, %v25348_v8 }
 0x167   : > { %v2204_v10 = vcombine.low %v25395_v3, %v2196_v62  ;;  %v2205_v17 = vcombine.high %v25395_v3, %v2196_v62  ;;  %v25581_v33 = vrot.slane %v1154_v34, %v25368_v49  ;;  %v1170_v7 = vcombine.low %v25406_v11, %v1153_v58 }
 0x168   : > { %v25584_v55 = vrot.slane %v1155_v21, %v25368_v49  ;;  %v1171_v20 = vcombine.high %v25406_v11, %v1153_v58  ;;  %v1338_v0 = vcombine.low %v25557_v32, %v25570_v23  ;;  %v24169_v26 = vcombine.high %v25557_v32, %v25570_v23 }
 0x169   : > { %v25593_v3 = vrot.slane %v2204_v10, %v25368_v49  ;;  %v25596_v35 = vrot.slane %v2205_v17, %v25368_v49  ;;  %v25599_v62 = vrot.slane %v1170_v7, %v25368_v49  ;;  %v2220_v32 = vcombine.low %v25409_v12, %v2203_v14  ;;  %24840 = vmatpush3.bf16.xpose.msra.mxu0 %v25461_v50 }
 0x16a   : > { %v25602_v21 = vrot.slane %v1171_v20, %v25368_v49  ;;  %v1372_v11 = vcombine.low %v25581_v33, %v25584_v55  ;;  %v24170_v58 = vcombine.high %v25581_v33, %v25584_v55  ;;  %v2221_v10 = vcombine.high %v25409_v12, %v2203_v14  ;;  %24885 = vmatprep.subr.msk.bf16.mxu0 %vm490_vm0, %v25420_v15 }
 0x16b   : > { %v2262_v17 = vrot.slane %v25494_v46, %v25351_v9  ;;  %v2269_v23 = vrot.slane %v2255_v27, %v25351_v9  ;;  %v2406_v34 = vcombine.low %v25593_v3, %v25596_v35  ;;  %v2023_v20 = vshrl.u32 %v25479_v4, 16 }
 0x16c   : > { %v2057_v33 = vcombine.high %v25490_v52, %v25348_v8  ;;  %v25624_v46 = vrot.slane %v2220_v32, %v25368_v49  ;;  %v25627_v12 = vrot.slane %v2221_v10, %v25368_v49  ;;  %v2064_v15 = vrot.slane %v25490_v52, %v25351_v9 }
 0x16d   : > { %v2270_v50 = vcombine.low %v25429_v18, %v2262_v17  ;;  %v2271_v14 = vcombine.high %v25429_v18, %v2262_v17  ;;  %v2286_v27 = vcombine.low %v25432_v19, %v2269_v23  ;;  %v2287_v4 = vcombine.high %v25432_v19, %v2269_v23 }
 0x16e   : > { %v2024_v55 = vpack.i.b16 %v2023_v20, %v2022_v28  ;;  %v2422_v7 = vcombine.low %v25624_v46, %v25627_v12  ;;  %v2071_v28 = vrot.slane %v2057_v33, %v25351_v9  ;;  %v2072_v52 = vcombine.low %v25442_v24, %v2064_v15 }
 0x16f   : > { %v25638_v32 = vrot.slane %v2270_v50, %v25368_v49  ;;  %v25641_v10 = vrot.slane %v2271_v14, %v25368_v49  ;;  %v25648_v19 = vrot.slane %v2286_v27, %v25368_v49  ;;  %v25651_v6 = vrot.slane %v2287_v4, %v25368_v49 }
 0x170   : > { %v2073_v20 = vcombine.high %v25442_v24, %v2064_v15  ;;  %v2123_v50 = vcombine.high %v2024_v55, %v25348_v8  ;;  %v25662_v14 = vrot.slane %v2072_v52, %v25368_v49  ;;  %v2088_v27 = vcombine.low %v25445_v25, %v2071_v28 }
 0x171   : > { %v2089_v4 = vcombine.high %v25445_v25, %v2071_v28  ;;  %v2130_v33 = vrot.slane %v2024_v55, %v25351_v9  ;;  %v1329_v23 = vrot.slane %v1322_v59, %v25351_v9  ;;  %v1337_v24 = vrot.slane %v24168_v57, %v25351_v9  ;;  %24842 = vmatpush3.bf16.xpose.msra.mxu0 %v25465_v51 }
 0x172   : > { %v25668_v18 = vrot.slane %v2073_v20, %v25368_v49  ;;  %v2137_v17 = vrot.slane %v2123_v50, %v25351_v9  ;;  %v25675_v15 = vrot.slane %v2088_v27, %v25368_v49  ;;  %24886 = vmatprep.subr.msk.bf16.mxu0 %vm490_vm0, %v25425_v16 }
 0x173   : > { %v25678_v52 = vrot.slane %v2089_v4, %v25368_v49  ;;  %v2138_v25 = vcombine.low %v25455_v31, %v2130_v33  ;;  %v2139_v55 = vcombine.high %v25455_v31, %v2130_v33  ;;  %v1354_v33 = vcombine.low %v1329_v23, %v1337_v24 }
 0x174   : > { %v2154_v28 = vcombine.low %v25472_v54, %v2137_v17  ;;  %v2155_v59 = vcombine.high %v25472_v54, %v2137_v17  ;;  %v2306_v51 = vcombine.low %v25662_v14, %v25668_v18  ;;  %v24182_v57 = vcombine.high %v25662_v14, %v25668_v18 }
 0x175   : > { %v25691_v20 = vrot.slane %v2138_v25, %v25368_v49  ;;  %v25694_v50 = vrot.slane %v2139_v55, %v25368_v49  ;;  %v2322_v31 = vcombine.low %v25675_v15, %v25678_v52  ;;  %v24183_v16 = vcombine.high %v25675_v15, %v25678_v52 }
 0x176   : > { %v25701_v54 = vrot.slane %v2154_v28, %v25368_v49  ;;  %v25704_v17 = vrot.slane %v2155_v59, %v25368_v49  ;;  %v1345_v18 = vrot.slane %v1338_v0, %v25351_v9  ;;  %v1353_v14 = vrot.slane %v24169_v26, %v25351_v9 }
 0x177   : > { %v2356_v27 = vcombine.low %v25691_v20, %v25694_v50  ;;  %v24184_v4 = vcombine.high %v25691_v20, %v25694_v50  ;;  %v1379_v25 = vrot.slane %v1372_v11, %v25351_v9  ;;  %v1387_v52 = vrot.slane %v24170_v58, %v25351_v9 }
 0x178   : > { %v1362_v15 = vcombine.low %v1345_v18, %v1353_v14  ;;  %v1388_v55 = vcombine.low %v25599_v62, %v25602_v21  ;;  %v24171_v0 = vcombine.high %v25599_v62, %v25602_v21  ;;  %v1361_v26 = vrot.slane %v1354_v33, %v25368_v49 }
 0x179   : > { %v1429_v28 = vrot.slane %v1422_v48, %v25351_v9  ;;  %v1437_v11 = vrot.slane %v24172_v56, %v25351_v9  ;;  %v1445_v58 = vrot.slane %v1438_v5, %v25351_v9  ;;  %v1404_v24 = vcombine.low %v1379_v25, %v1387_v52  ;;  %24844 = vmatpush3.bf16.xpose.msra.mxu0 %v25469_v53 }
 0x17a   : > { %v1369_v23 = vrot.slane %v1362_v15, %v25368_v49  ;;  %v1395_v62 = vrot.slane %v1388_v55, %v25351_v9  ;;  %v1403_v21 = vrot.slane %v24171_v0, %v25351_v9  ;;  %v31313_v48 = vcombine.high %v25520_v37, %v25523_v47  ;;  %24887 = vmatprep.subr.msk.bf16.mxu0 %vm490_vm0, %v25438_v22 }
 0x17b   : > { %v1454_v2 = vcombine.low %v1429_v28, %v1437_v11  ;;  %v31314_v56 = vcombine.low %v25530_v38, %v25533_v61  ;;  %v31315_v59 = vcombine.high %v25530_v38, %v25533_v61  ;;  %v1411_v14 = vrot.slane %v1404_v24, %v25368_v49 }
 0x17c   : > { %v1453_v29 = vrot.slane %v31313_v48, %v25351_v9  ;;  %v1370_v53 = vcombine.low %v1361_v26, %v1369_v23  ;;  %v1412_v33 = vcombine.low %v1395_v62, %v1403_v21  ;;  %v1488_v37 = vcombine.low %v25546_v1, %v25549_v36 }
 0x17d   : > { %v1479_v5 = vrot.slane %v31314_v56, %v25351_v9  ;;  %v1487_v18 = vrot.slane %v31315_v59, %v25351_v9  ;;  %v1461_v47 = vrot.slane %v1454_v2, %v25368_v49  ;;  %v24175_v15 = vcombine.high %v25546_v1, %v25549_v36 }
 0x17e   : > { %v1462_v25 = vcombine.low %v1445_v58, %v1453_v29  ;;  %v1419_v38 = vrot.slane %v1412_v33, %v25368_v49  ;;  %v1526_v61 = vshrl.u32 %v1370_v53, 16  ;;  %v1495_v55 = vrot.slane %v1488_v37, %v25351_v9 }
 0x17f   : > { %v1504_v52 = vcombine.low %v1479_v5, %v1487_v18  ;;  %v1371_v22 = vcombine.high %v1361_v26, %v1369_v23  ;;  %v1503_v28 = vrot.slane %v24175_v15, %v25351_v9  ;;  %v2313_v62 = vrot.slane %v2306_v51, %v25351_v9 }
 0x180   : > { %v1469_v0 = vrot.slane %v1462_v25, %v25368_v49  ;;  %v1420_v21 = vcombine.low %v1411_v14, %v1419_v38  ;;  %v1421_v58 = vcombine.high %v1411_v14, %v1419_v38  ;;  %v2321_v1 = vrot.slane %v24182_v57, %v25351_v9 }
 0x181   : > { %v1511_v11 = vrot.slane %v1504_v52, %v25368_v49  ;;  %v1534_v24 = vshrl.u32 %v1371_v22, 16  ;;  %v1512_v48 = vcombine.low %v1495_v55, %v1503_v28  ;;  %v2329_v2 = vrot.slane %v2322_v31, %v25351_v9  ;;  %24846 = vmatpush3.bf16.xpose.msra.mxu0 %v25476_v60 }
 0x182   : > { %v1470_v36 = vcombine.low %v1461_v47, %v1469_v0  ;;  %v1471_v29 = vcombine.high %v1461_v47, %v1469_v0  ;;  %v1527_v56 = vshrl.u32 %v1420_v21, 16  ;;  %v25763_v26 = vpack.i.b16 %v1420_v21, %v1370_v53  ;;  %24888 = vmatprep.subr.msk.bf16.mxu0 %vm490_vm0, %v25452_v30 }
 0x183   : > { %v1535_v23 = vshrl.u32 %v1421_v58, 16  ;;  %v25765_v5 = vpack.i.b16 %v1421_v58, %v1371_v22  ;;  %v1519_v51 = vrot.slane %v1512_v48, %v25368_v49  ;;  %v2337_v14 = vrot.slane %v24183_v16, %v25351_v9 }
 0x184   : > { %31316 = vst [vmem:[#allocation9_spill] sm:$0xff] %v25763_v26  ;;  %v1542_v59 = vshrl.u32 %v1470_v36, 16  ;;  %v1550_v18 = vshrl.u32 %v1471_v29, 16  ;;  %v25772_v57 = vpack.i.b16 %v1527_v56, %v1526_v61  ;;  %v2338_v53 = vcombine.low %v2313_v62, %v2321_v1 }
 0x185   : > { %31317 = vst [vmem:[#allocation10_spill] sm:$0xff] %v25765_v5  ;;  %v25774_v31 = vpack.i.b16 %v1535_v23, %v1534_v24  ;;  %v2363_v33 = vrot.slane %v2356_v27, %v25351_v9  ;;  %v1520_v37 = vcombine.low %v1511_v11, %v1519_v51  ;;  %v1521_v47 = vcombine.high %v1511_v11, %v1519_v51 }
 0x186   : > { %31318 = vst [vmem:[#allocation11_spill] sm:$0xff] %v25772_v57  ;;  %v2346_v60 = vcombine.low %v2329_v2, %v2337_v14  ;;  %v2371_v25 = vrot.slane %v24184_v4, %v25351_v9  ;;  %1599 = vmatprep.subr.bf16.mxu1 %v25772_v57  ;;  %v2345_v30 = vrot.slane %v2338_v53, %v25368_v49 }
 0x187   : > { %31319 = vst [vmem:[#allocation12_spill] sm:$0xff] %v25774_v31  ;;  %v2372_v16 = vcombine.low %v25701_v54, %v25704_v17  ;;  %v24185_v15 = vcombine.high %v25701_v54, %v25704_v17  ;;  %v2413_v27 = vrot.slane %v2406_v34, %v25351_v9  ;;  %1600 = vmatpush1.bf16.msra.mxu1 %v25763_v26  ;;  %v1543_v52 = vshrl.u32 %v1520_v37, 16 }
 0x188   : > { %v25792_v20 = vpack.i.b16 %v1520_v37, %v1470_v36  ;;  %v1551_v50 = vshrl.u32 %v1521_v47, 16  ;;  %v25794_v4 = vpack.i.b16 %v1521_v47, %v1471_v29  ;;  %v2353_v38 = vrot.slane %v2346_v60, %v25368_v49 }
 0x189   : > { %v2379_v61 = vrot.slane %v2372_v16, %v25351_v9  ;;  %v2387_v54 = vrot.slane %v24185_v15, %v25351_v9  ;;  %v2388_v17 = vcombine.low %v2363_v33, %v2371_v25  ;;  %v25799_v55 = vpack.i.b16 %v1543_v52, %v1542_v59  ;;  %24848 = vmatpush3.bf16.xpose.msra.mxu0 %v25483_v13  ;;  %v24991_v52 = vld [vmem:[%s25340_s12 + $0x8] sm:$0xff]  }
 0x18a   : > { %31320 = vst [vmem:[#allocation13_spill] sm:$0xff] %v25792_v20  ;;  %31321 = vst [vmem:[#allocation14_spill] sm:$0xff] %v25794_v4  ;;  %v25801_v22 = vpack.i.b16 %v1551_v50, %v1550_v18  ;;  %v31324_v34 = vcombine.high %v25593_v3, %v25596_v35  ;;  %v2429_v28 = vrot.slane %v2422_v7, %v25351_v9  ;;  %v25819_v3 = vld [vmem:[%s25340_s12] sm:$0xff]   ;;  %v31328_v33 = vmov 0  }
 0x18b   : > { %31322 = vst [vmem:[#allocation15_spill] sm:$0xff] %v25799_v55  ;;  %v2354_v11 = vcombine.low %v2345_v30, %v2353_v38  ;;  %v2395_v62 = vrot.slane %v2388_v17, %v25368_v49  ;;  %v2396_v21 = vcombine.low %v2379_v61, %v2387_v54  ;;  %v31325_v58 = vcombine.high %v25624_v46, %v25627_v12 }
 0x18c   : > { %31323 = vst [vmem:[#allocation16_spill] sm:$0xff] %v25801_v22  ;;  %v2421_v0 = vrot.slane %v31324_v34, %v25351_v9  ;;  %1601 = vmatprep.subr.bf16.mxu1 %v25799_v55  ;;  %v31326_v7 = vcombine.low %v25638_v32, %v25641_v10  ;;  %v31327_v36 = vcombine.high %v25638_v32, %v25641_v10 }
 0x18d   : > { %v2437_v24 = vrot.slane %v31325_v58, %v25351_v9  ;;  %v2472_v46 = vcombine.low %v25648_v19, %v25651_v6  ;;  %1602 = vmatpush1.bf16.msra.mxu1 %v25792_v20  ;;  %v2403_v13 = vrot.slane %v2396_v21, %v25368_v49  ;;  %v2510_v12 = vshrl.u32 %v2354_v11, 16 }
 0x18e   : > { %v2438_v35 = vcombine.low %v2413_v27, %v2421_v0  ;;  %v2463_v1 = vrot.slane %v31326_v7, %v25351_v9  ;;  %v2471_v48 = vrot.slane %v31327_v36, %v25351_v9  ;;  %v24189_v2 = vcombine.high %v25648_v19, %v25651_v6  ;;  %1652 = vmatprep.subr.bf16.mxu1 %v25774_v31 }
 0x18f   : > { %v2446_v29 = vcombine.low %v2429_v28, %v2437_v24  ;;  %v2479_v23 = vrot.slane %v2472_v46, %v25351_v9  ;;  %v2355_v10 = vcombine.high %v2345_v30, %v2353_v38  ;;  %v2404_v51 = vcombine.low %v2395_v62, %v2403_v13 }
 0x190   : > { %v2445_v56 = vrot.slane %v2438_v35, %v25368_v49  ;;  %v2488_v32 = vcombine.low %v2463_v1, %v2471_v48  ;;  %v2487_v18 = vrot.slane %v24189_v2, %v25351_v9  ;;  %v2405_v14 = vcombine.high %v2395_v62, %v2403_v13  ;;  %24178 = vmatmul.mubr.msk.bf16.vlgmr.msra.gmra.mrb[16].mxu1 %vm1592_vm1, %v25819_v3 }
 0x191   : > { %v2453_v59 = vrot.slane %v2446_v29, %v25368_v49  ;;  %v2518_v19 = vshrl.u32 %v2355_v10, 16  ;;  %1653 = vmatpush1.bf16.msra.mxu1 %v25765_v5  ;;  %v2511_v6 = vshrl.u32 %v2404_v51, 16  ;;  %1641 = vmatprep.mubr.bf16.mxu1 %v31328_v33  ;;  %v25845_v37 = vpack.i.b16 %v2404_v51, %v2354_v11 }
 0x192   : > { %v2495_v53 = vrot.slane %v2488_v32, %v25368_v49  ;;  %v2496_v60 = vcombine.low %v2479_v23, %v2487_v18  ;;  %1654 = vmatprep.subr.bf16.mxu1 %v25801_v22  ;;  %v2519_v25 = vshrl.u32 %v2405_v14, 16  ;;  %v25848_v30 = vpack.i.b16 %v2405_v14, %v2355_v10  ;;  %24850 = vmatmul.mubr.msk.bf16.vlgmr.msra.gmra.mrb[16].mxu0 %vm490_vm0, %v25271_v39 }
 0x193   : > { %31329 = vst [vmem:[#allocation17_spill] sm:$0xff] %v25845_v37  ;;  %v2454_v47 = vcombine.low %v2445_v56, %v2453_v59  ;;  %v2455_v16 = vcombine.high %v2445_v56, %v2453_v59  ;;  %v25852_v15 = vpack.i.b16 %v2511_v6, %v2510_v12  ;;  %24853 = vmatprep.mubr.msk.bf16.mxu0 %vm490_vm0, %v25276_v40 }
 0x194   : > { %31330 = vst [vmem:[#allocation18_spill] sm:$0xff] %v25848_v30  ;;  %v2503_v27 = vrot.slane %v2496_v60, %v25368_v49  ;;  %v25858_v50 = vpack.i.b16 %v2519_v25, %v2518_v19 }
 0x195   : > { %31331 = vst [vmem:[#allocation19_spill] sm:$0xff] %v25852_v15  ;;  %1655 = vmatpush1.bf16.msra.mxu1 %v25794_v4  ;;  %v2526_v61 = vshrl.u32 %v2454_v47, 16  ;;  %v2534_v17 = vshrl.u32 %v2455_v16, 16 }
 0x196   : > { %31332 = vst [vmem:[#allocation20_spill] sm:$0xff] %v25858_v50  ;;  %v2504_v38 = vcombine.low %v2495_v53, %v2503_v27  ;;  %v2505_v54 = vcombine.high %v2495_v53, %v2503_v27  ;;  %2538 = vmatprep.subr.bf16.mxu1 %v25852_v15 }
 0x198   : > { %v2527_v34 = vshrl.u32 %v2504_v38, 16  ;;  %v25862_v39 = vpack.i.b16 %v2504_v38, %v2454_v47  ;;  %v2535_v0 = vshrl.u32 %v2505_v54, 16  ;;  %v25864_v28 = vpack.i.b16 %v2505_v54, %v2455_v16  ;;  %24179 = vmatmul.mubr.msk.bf16.gmra.mrb[20].mxu1 %vm1592_vm1, %v24991_v52 }
 0x199   : > { %1684 = vmatprep.mubr.bf16.mxu1 %v31328_v33 }
 0x19a   : > { %31333 = vst [vmem:[#allocation21_spill] sm:$0xff] %v25862_v39  ;;  %31334 = vst [vmem:[#allocation22_spill] sm:$0xff] %v25864_v28  ;;  %v25868_v40 = vpack.i.b16 %v2527_v34, %v2526_v61  ;;  %v25870_v11 = vpack.i.b16 %v2535_v0, %v2534_v17  ;;  %24854 = vmatmul.mubr.msk.bf16.gmra.mrb[20].mxu0 %vm490_vm0, %v25289_v41  ;;  %v31238_v41 = vmov 0.0  }
 0x19b   : > { %24857 = vmatprep.mubr.msk.bf16.mxu0 %vm490_vm0, %v25294_v42  ;;  %v1554_v42 = vcombine.low %v31238_v41, %v31238_v41 }
 0x19c   : > { %31335 = vst [vmem:[#allocation23_spill] sm:$0xff] %v25868_v40  ;;  %31336 = vst [vmem:[#allocation24_spill] sm:$0xff] %v25870_v11 }
 0x1a0   : > { %24180 = vmatmul.mubr.msk.bf16.vlgmr.msra.gmra.mrb[24].mxu1 %vm1592_vm1, %v25819_v3 }
 0x1a1   : > { %2539 = vmatpush1.bf16.msra.mxu1 %v25845_v37  ;;  %1694 = vmatprep.mubr.bf16.mxu1 %v31328_v33 }
 0x1a2   : > { %2540 = vmatprep.subr.bf16.mxu1 %v25868_v40  ;;  %24858 = vmatmul.mubr.msk.bf16.gmra.mrb[24].mxu0 %vm490_vm0, %v25307_v43 }
 0x1a3   : > { %24861 = vmatprep.mubr.msk.bf16.mxu0 %vm490_vm0, %v25312_v44  ;;  %v1561_v44 = vrot.slane %v1554_v42, %v25351_v9 }
 0x1a5   : > { %2541 = vmatpush1.bf16.msra.mxu1 %v25862_v39  ;;  %v1562_v58 = vcombine.low %v1561_v44, %v1561_v44  ;;  %v1563_v24 = vcombine.high %v1561_v44, %v1561_v44 }
 0x1a6   : > { %2591 = vmatprep.subr.bf16.mxu1 %v25858_v50 }
 0x1a7   : > { %v1577_v1 = vrot.slane %v1563_v24, %v25368_v49 }
 0x1a8   : > { %24181 = vmatmul.mubr.msk.bf16.gmra.mrb[28].mxu1 %vm1592_vm1, %v24991_v52 }
 0x1a9   : > { %2570 = vmatprep.mubr.bf16.mxu1 %v31328_v33  ;;  %v25918_v13 = vcombine.low %v1577_v1, %v1577_v1  ;;  %v25922_v29 = vcombine.high %v1577_v1, %v1577_v1 }
 0x1aa   : > { %24862 = vmatmul.mubr.msk.bf16.gmra.mrb[28].mxu0 %vm490_vm0, %v25325_v45 }
 0x1ab   : > { %3631 = vmatprep.mubr.bf16.mxu0 %v31328_v33 }
 0x1b0   : > { %24190 = vmatmul.mubr.msk.bf16.vlgmr.msra.gmra.mrb[32].mxu1 %vm1592_vm1, %v25819_v3 }
 0x1b1   : > { %2592 = vmatpush1.bf16.msra.mxu1 %v25848_v30  ;;  %2580 = vmatprep.mubr.bf16.mxu1 %v31328_v33 }
 0x1b2   : > { %2593 = vmatprep.subr.bf16.mxu1 %v25870_v11 }
 0x1b5   : > { %2594 = vmatpush1.bf16.msra.mxu1 %v25864_v28 }
 0x1b8   : > { %24191 = vmatmul.mubr.msk.bf16.gmra.mrb[36].mxu1 %vm1592_vm1, %v24991_v52 }
 0x1b9   : > { %2623 = vmatprep.mubr.bf16.mxu1 %v31328_v33 }
 0x1c0   : > { %24192 = vmatmul.mubr.msk.bf16.vlgmr.msra.gmra.mrb[40].mxu1 %vm1592_vm1, %v25819_v3  ;;  %v1570_v3 = vrot.slane %v1562_v58, %v25368_v49 }
 0x1c1   : > { %2633 = vmatprep.mubr.bf16.mxu1 %v31328_v33 }
 0x1c2   : > { %v25916_v46 = vcombine.low %v1570_v3, %v1570_v3  ;;  %v25920_v12 = vcombine.high %v1570_v3, %v1570_v3 }
 0x1c4   : > { %31337 = vst [vmem:[#allocation25_spill] sm:$0xff] %v25916_v46 }
 0x1c8   : > { %24193 = vmatmul.mubr.msk.bf16.gmra.mrb[44].mxu1 %vm1592_vm1, %v24991_v52 }
 0x1c9   : > { %3672 = vmatprep.mubr.bf16.mxu1 %v31328_v33 }
 0x263   : > { %v1633_v43 = vpop.f32.mrb[16].mxu1 }
 0x264   : > { %v1635_v45 = vpop.f32.mrb[17].mxu1  ;;  %v1634_v56 = vadd.f32 %v1633_v43, %v25916_v46 }
 0x265   : > { %v1637_v62 = vpop.f32.mrb[18].mxu1  ;;  %v1636_v10 = vadd.f32 %v1635_v45, %v25920_v12 }
 0x266   : > { %v1639_v21 = vpop.f32.mrb[19].mxu1  ;;  %v1638_v18 = vadd.f32 %v1637_v62, %v25916_v46 }
 0x267   : > { %v1640_v47 = vadd.f32 %v1639_v21, %v25920_v12 }
 0x26b   : > { %v1643_v35 = vpop.f32.mrb[20].mxu1 }
 0x26c   : > { %v25909_v7 = vpop.f32.mrb[21].mxu1  ;;  %v1644_v24 = vadd.f32 %v1643_v35, %v25916_v46 }
 0x26d   : > { %v25912_v36 = vpop.f32.mrb[22].mxu1 }
 0x26e   : > { %v25914_v48 = vpop.f32.mrb[23].mxu1 }
 0x273   : > { %v1686_v2 = vpop.f32.mrb[24].mxu1 }
 0x274   : > { %v1687_v23 = vadd.f32 %v1686_v2, %v25918_v13  ;;  %v1688_v32 = vpop.f32.mrb[25].mxu1 }
 0x275   : > { %v1689_v51 = vadd.f32 %v1688_v32, %v25922_v29  ;;  %v1690_v59 = vpop.f32.mrb[26].mxu1 }
 0x276   : > { %v1705_v14 = vcombine.low %v1634_v56, %v1687_v23  ;;  %v1706_v53 = vcombine.high %v1634_v56, %v1687_v23  ;;  %v1691_v19 = vadd.f32 %v1690_v59, %v25918_v13  ;;  %v1692_v6 = vpop.f32.mrb[27].mxu1 }
 0x277   : > { %v1721_v60 = vcombine.low %v1636_v10, %v1689_v51  ;;  %v1722_v25 = vcombine.high %v1636_v10, %v1689_v51  ;;  %v1693_v16 = vadd.f32 %v1692_v6, %v25922_v29 }
 0x278   : > { %v1713_v27 = vrot.slane %v1705_v14, %v25351_v9  ;;  %v1720_v52 = vrot.slane %v1706_v53, %v25351_v9  ;;  %v1773_v38 = vcombine.low %v1638_v18, %v1691_v19  ;;  %v1774_v61 = vcombine.high %v1638_v18, %v1691_v19 }
 0x279   : > { %v1729_v54 = vrot.slane %v1721_v60, %v25351_v9  ;;  %v1736_v17 = vrot.slane %v1722_v25, %v25351_v9  ;;  %v1789_v34 = vcombine.low %v1640_v47, %v1693_v16  ;;  %v1790_v0 = vcombine.high %v1640_v47, %v1693_v16 }
 0x27a   : > { %v1781_v42 = vrot.slane %v1773_v38, %v25351_v9  ;;  %v1788_v43 = vrot.slane %v1774_v61, %v25351_v9 }
 0x27b   : > { %v1737_v44 = vcombine.low %v1713_v27, %v1729_v54  ;;  %v1738_v45 = vcombine.high %v1713_v27, %v1729_v54  ;;  %v1753_v62 = vcombine.low %v1720_v52, %v1736_v17  ;;  %v1754_v21 = vcombine.high %v1720_v52, %v1736_v17  ;;  %v1696_v58 = vpop.f32.mrb[28].mxu1 }
 0x27c   : > { %v1797_v3 = vrot.slane %v1789_v34, %v25351_v9  ;;  %v1804_v1 = vrot.slane %v1790_v0, %v25351_v9  ;;  %v1697_v2 = vadd.f32 %v1696_v58, %v25918_v13  ;;  %v1698_v56 = vpop.f32.mrb[29].mxu1 }
 0x27d   : > { %v1745_v23 = vrot.slane %v1737_v44, %v25368_v49  ;;  %v1752_v32 = vrot.slane %v1738_v45, %v25368_v49  ;;  %v1761_v10 = vrot.slane %v1753_v62, %v25368_v49  ;;  %v1768_v51 = vrot.slane %v1754_v21, %v25368_v49  ;;  %v1700_v59 = vpop.f32.mrb[30].mxu1 }
 0x27e   : > { %v1805_v18 = vcombine.low %v1781_v42, %v1797_v3  ;;  %v1806_v14 = vcombine.high %v1781_v42, %v1797_v3  ;;  %v1821_v53 = vcombine.low %v1788_v43, %v1804_v1  ;;  %v1822_v35 = vcombine.high %v1788_v43, %v1804_v1  ;;  %v1702_v19 = vpop.f32.mrb[31].mxu1 }
 0x27f   : > { %v1769_v6 = vcombine.high %v1745_v23, %v31238_v41  ;;  %v1770_v47 = vcombine.high %v1752_v32, %v31238_v41  ;;  %v1771_v60 = vcombine.high %v1761_v10, %v31238_v41  ;;  %v1772_v25 = vcombine.high %v1768_v51, %v31238_v41 }
 0x280   : > { %v24243_v16 = vpack.c.bf16 %v1761_v10, %v1745_v23  ;;  %v24244_v27 = vpack.c.bf16 %v1768_v51, %v1752_v32  ;;  %v1813_v52 = vrot.slane %v1805_v18, %v25368_v49  ;;  %v1820_v38 = vrot.slane %v1806_v14, %v25368_v49 }
 0x281   : > { %v24247_v61 = vpack.c.bf16 %v1771_v60, %v1769_v6  ;;  %v24248_v54 = vpack.c.bf16 %v1772_v25, %v1770_v47  ;;  %v1829_v17 = vrot.slane %v1821_v53, %v25368_v49  ;;  %v1836_v34 = vrot.slane %v1822_v35, %v25368_v49 }
 0x282   : > { %v4806_v0 = vrot.slane %v24243_v16, %v25351_v9  ;;  %v4814_v42 = vrot.slane %v24244_v27, %v25351_v9  ;;  %v1837_v43 = vcombine.high %v1813_v52, %v31238_v41  ;;  %v1838_v44 = vcombine.high %v1820_v38, %v31238_v41 }
 0x283   : > { %v25959_v45 = vrot.slane %v24247_v61, %v25351_v9  ;;  %v25962_v62 = vrot.slane %v24248_v54, %v25351_v9  ;;  %v1839_v21 = vcombine.high %v1829_v17, %v31238_v41  ;;  %v1840_v58 = vcombine.high %v1836_v34, %v31238_v41  ;;  %v2572_v3 = vpop.f32.mrb[32].mxu1 }
 0x284   : > { %v4831_v1 = vcombine.low %v4806_v0, %v4814_v42  ;;  %v24245_v23 = vpack.c.bf16 %v1829_v17, %v1813_v52  ;;  %v24246_v32 = vpack.c.bf16 %v1836_v34, %v1820_v38  ;;  %v1841_v10 = vcombine.low %v1644_v24, %v1697_v2  ;;  %v2574_v51 = vpop.f32.mrb[33].mxu1 }
 0x285   : > { %v24249_v14 = vpack.c.bf16 %v1839_v21, %v1837_v43  ;;  %v24250_v53 = vpack.c.bf16 %v1840_v58, %v1838_v44  ;;  %v1842_v35 = vcombine.high %v1644_v24, %v1697_v2  ;;  %v25968_v6 = vpop.f32.mrb[34].mxu1  ;;  %v1646_v47 = vadd.f32 %v25909_v7, %v25920_v12 }
 0x286   : > { %v1648_v60 = vadd.f32 %v25912_v36, %v25916_v46  ;;  %v4822_v25 = vrot.slane %v24245_v23, %v25351_v9  ;;  %v4830_v16 = vrot.slane %v24246_v32, %v25351_v9  ;;  %v25976_v27 = vpop.f32.mrb[35].mxu1  ;;  %v1650_v52 = vadd.f32 %v25914_v48, %v25920_v12 }
 0x287   : > { %v25981_v38 = vrot.slane %v24249_v14, %v25351_v9  ;;  %v25984_v24 = vrot.slane %v24250_v53, %v25351_v9  ;;  %v1699_v7 = vadd.f32 %v1698_v56, %v25922_v29  ;;  %v1849_v36 = vrot.slane %v1841_v10, %v25351_v9 }
 0x288   : > { %v4839_v2 = vcombine.low %v4822_v25, %v4830_v16  ;;  %v1701_v61 = vadd.f32 %v1700_v59, %v25918_v13  ;;  %v1703_v54 = vadd.f32 %v1702_v19, %v25922_v29  ;;  %v1856_v48 = vrot.slane %v1842_v35, %v25351_v9  ;;  %v26011_v35 = vpop.f32.mrb[16].mxu0 }
 0x289   : > { %v1857_v34 = vcombine.low %v1646_v47, %v1699_v7  ;;  %v1858_v0 = vcombine.high %v1646_v47, %v1699_v7  ;;  %v25994_v42 = vrot.slane %v4831_v1, %v25368_v49  ;;  %v25999_v19 = vadd.f32 %v2572_v3, %v25916_v46 }
 0x28a   : > { %v1909_v43 = vcombine.low %v1648_v60, %v1701_v61  ;;  %v1910_v44 = vcombine.high %v1648_v60, %v1701_v61  ;;  %v1925_v56 = vcombine.low %v1650_v52, %v1703_v54  ;;  %v1926_v59 = vcombine.high %v1650_v52, %v1703_v54  ;;  %v26015_v52 = vpop.f32.mrb[17].mxu0 }
 0x28b   : > { %v1865_v21 = vrot.slane %v1857_v34, %v25351_v9  ;;  %v1872_v58 = vrot.slane %v1858_v0, %v25351_v9  ;;  %v26001_v23 = vpop.f32.mrb[36].mxu1  ;;  %v26007_v14 = vadd.f32 %v2574_v51, %v25920_v12  ;;  %v26018_v7 = vrot.slane %v4839_v2, %v25368_v49  ;;  %v26023_v0 = vpop.f32.mrb[18].mxu0 }
 0x28c   : > { %v1917_v32 = vrot.slane %v1909_v43, %v25351_v9  ;;  %v1924_v10 = vrot.slane %v1910_v44, %v25351_v9  ;;  %v1933_v1 = vrot.slane %v1925_v56, %v25351_v9  ;;  %v26009_v53 = vpop.f32.mrb[37].mxu1  ;;  %v1940_v61 = vrot.slane %v1926_v59, %v25351_v9  ;;  %v26029_v56 = vpop.f32.mrb[19].mxu0 }
 0x28d   : > { %v1873_v47 = vcombine.low %v1849_v36, %v1865_v21  ;;  %v1874_v60 = vcombine.high %v1849_v36, %v1865_v21  ;;  %v1889_v25 = vcombine.low %v1856_v48, %v1872_v58  ;;  %v1890_v3 = vcombine.high %v1856_v48, %v1872_v58  ;;  %v26013_v16 = vpop.f32.mrb[38].mxu1  ;;  %v26037_v17 = vpop.f32.mrb[20].mxu0 }
 0x28e   : > { %v1941_v54 = vcombine.low %v1917_v32, %v1933_v1  ;;  %v1942_v51 = vcombine.high %v1917_v32, %v1933_v1  ;;  %v26021_v34 = vpop.f32.mrb[39].mxu1  ;;  %v1957_v58 = vcombine.low %v1924_v10, %v1940_v61  ;;  %v1958_v59 = vcombine.high %v1924_v10, %v1940_v61  ;;  %v26041_v63 = vpop.f32.mrb[21].mxu0 }
 0x28f   : > { %v1881_v43 = vrot.slane %v1873_v47, %v25368_v49  ;;  %v1888_v36 = vrot.slane %v1874_v60, %v25368_v49  ;;  %v1897_v48 = vrot.slane %v1889_v25, %v25368_v49  ;;  %v1904_v44 = vrot.slane %v1890_v3, %v25368_v49  ;;  %v26045_v11 = vpop.f32.mrb[22].mxu0 }
 0x290   : > { %v1949_v2 = vrot.slane %v1941_v54, %v25368_v49  ;;  %v1956_v21 = vrot.slane %v1942_v51, %v25368_v49  ;;  %v1965_v18 = vrot.slane %v1957_v58, %v25368_v49  ;;  %v1972_v54 = vrot.slane %v1958_v59, %v25368_v49  ;;  %v26055_v58 = vpop.f32.mrb[23].mxu0 }
 0x291   : > { %v1905_v32 = vcombine.high %v1881_v43, %v31238_v41  ;;  %v1906_v1 = vcombine.high %v1888_v36, %v31238_v41  ;;  %v1907_v47 = vcombine.high %v1897_v48, %v31238_v41  ;;  %v1908_v60 = vcombine.high %v1904_v44, %v31238_v41 }
 0x292   : > { %v24251_v25 = vpack.c.bf16 %v1897_v48, %v1881_v43  ;;  %v24252_v3 = vpack.c.bf16 %v1904_v44, %v1888_v36  ;;  %v1973_v61 = vcombine.high %v1949_v2, %v31238_v41  ;;  %v1974_v28 = vcombine.high %v1956_v21, %v31238_v41 }
 0x293   : > { %v24255_v51 = vpack.c.bf16 %v1907_v47, %v1905_v32  ;;  %v24256_v10 = vpack.c.bf16 %v1908_v60, %v1906_v1  ;;  %v2625_v39 = vpop.f32.mrb[40].mxu1  ;;  %v1975_v36 = vcombine.high %v1965_v18, %v31238_v41  ;;  %v1976_v48 = vcombine.high %v1972_v54, %v31238_v41 }
 0x294   : > { %v26048_v30 = vrot.slane %v24251_v25, %v25351_v9  ;;  %v26051_v43 = vrot.slane %v24252_v3, %v25351_v9  ;;  %v2627_v44 = vpop.f32.mrb[41].mxu1  ;;  %v24253_v1 = vpack.c.bf16 %v1965_v18, %v1949_v2  ;;  %v24254_v47 = vpack.c.bf16 %v1972_v54, %v1956_v21  ;;  %v26063_v25 = vpop.f32.mrb[24].mxu0 }
 0x295   : > { %v26058_v59 = vrot.slane %v24255_v51, %v25351_v9  ;;  %v26061_v32 = vrot.slane %v24256_v10, %v25351_v9  ;;  %v2629_v60 = vpop.f32.mrb[42].mxu1  ;;  %v24257_v40 = vpack.c.bf16 %v1975_v36, %v1973_v61  ;;  %v24258_v37 = vpack.c.bf16 %v1976_v48, %v1974_v28  ;;  %v26069_v15 = vpop.f32.mrb[25].mxu0 }
 0x296   : > { %v2577_v41 = vadd.f32 %v25968_v6, %v25916_v46  ;;  %v2631_v50 = vpop.f32.mrb[43].mxu1  ;;  %31340 = vst [vmem:[#allocation28_spill] sm:$0xff] %v26069_v15  ;;  %v26074_v18 = vrot.slane %v24253_v1, %v25351_v9  ;;  %v26077_v2 = vrot.slane %v24254_v47, %v25351_v9  ;;  %v2579_v21 = vadd.f32 %v25976_v27, %v25920_v12  ;;  %v26081_v54 = vpop.f32.mrb[26].mxu0 }
 0x297   : > { %31338 = vst [vmem:[#allocation26_spill] sm:$0xff] %v26058_v59  ;;  %31339 = vst [vmem:[#allocation27_spill] sm:$0xff] %v26061_v32  ;;  %v26084_v28 = vrot.slane %v24257_v40, %v25351_v9  ;;  %v26087_v6 = vrot.slane %v24258_v37, %v25351_v9  ;;  %v26091_v10 = vadd.f32 %v26001_v23, %v25916_v46  ;;  %v26097_v36 = vpop.f32.mrb[27].mxu0 }
 0x298   : > { %v26095_v61 = vadd.f32 %v26009_v53, %v25920_v12  ;;  %31343 = vst [vmem:[#allocation31_spill] sm:$0xff] %v26097_v36  ;;  %v2626_v48 = vadd.f32 %v2625_v39, %v25918_v13  ;;  %v2628_v40 = vadd.f32 %v2627_v44, %v25922_v29  ;;  %v2630_v37 = vadd.f32 %v2629_v60, %v25918_v13  ;;  %v26104_v1 = vpop.f32.mrb[28].mxu0 }
 0x299   : > { %31341 = vst [vmem:[#allocation29_spill] sm:$0xff] %v26084_v28  ;;  %31342 = vst [vmem:[#allocation30_spill] sm:$0xff] %v26087_v6  ;;  %v2632_v47 = vadd.f32 %v2631_v50, %v25922_v29  ;;  %v26111_v53 = vcombine.low %v25994_v42, %v26018_v7  ;;  %v26115_v51 = vcombine.high %v25994_v42, %v26018_v7  ;;  %v26117_v39 = vpop.f32.mrb[29].mxu0 }
 0x29a   : > { %31344 = vst [vmem:[#allocation32_spill] sm:$0xff] %v26104_v1  ;;  %31345 = vst [vmem:[#allocation33_spill] sm:$0xff] %v26117_v39  ;;  %v26121_v44 = vadd.f32 %v26013_v16, %v25916_v46  ;;  %v2644_v60 = vcombine.low %v25999_v19, %v2626_v48  ;;  %v2645_v23 = vcombine.high %v25999_v19, %v2626_v48  ;;  %v26126_v3 = vpop.f32.mrb[30].mxu0 }
 0x29b   : > { %v2660_v50 = vcombine.low %v26007_v14, %v2628_v40  ;;  %v2635_v27 = vpop.f32.mrb[44].mxu1  ;;  %31346 = vst [vmem:[#allocation34_spill] sm:$0xff] %v26126_v3  ;;  %v2661_v4 = vcombine.high %v26007_v14, %v2628_v40  ;;  %v2712_v20 = vcombine.low %v2577_v41, %v2630_v37  ;;  %v2713_v42 = vcombine.high %v2577_v41, %v2630_v37  ;;  %v26129_v5 = vpop.f32.mrb[31].mxu0 }
 0x29c   : > { %v2728_v7 = vcombine.low %v2579_v21, %v2632_v47  ;;  %v2637_v22 = vpop.f32.mrb[45].mxu1  ;;  %31347 = vst [vmem:[#allocation35_spill] sm:$0xff] %v26129_v5  ;;  %v2652_v16 = vrot.slane %v2644_v60, %v25351_v9  ;;  %v2659_v55 = vrot.slane %v2645_v23, %v25351_v9  ;;  %v2729_v19 = vcombine.high %v2579_v21, %v2632_v47 }
 0x29d   : > { %v2668_v26 = vrot.slane %v2660_v50, %v25351_v9  ;;  %v2639_v48 = vpop.f32.mrb[46].mxu1  ;;  %v2675_v31 = vrot.slane %v2661_v4, %v25351_v9  ;;  %v2720_v57 = vrot.slane %v2712_v20, %v25351_v9  ;;  %v2727_v14 = vrot.slane %v2713_v42, %v25351_v9 }
 0x29e   : > { %v2736_v41 = vrot.slane %v2728_v7, %v25351_v9  ;;  %v2641_v40 = vpop.f32.mrb[47].mxu1  ;;  %v2743_v6 = vrot.slane %v2729_v19, %v25351_v9  ;;  %v2636_v60 = vadd.f32 %v2635_v27, %v25918_v13  ;;  %v31348_v19 = vmov 0.0  }
 0x29f   : > { %v2676_v37 = vcombine.low %v2652_v16, %v2668_v26  ;;  %v2677_v46 = vcombine.high %v2652_v16, %v2668_v26  ;;  %v2692_v23 = vcombine.low %v2659_v55, %v2675_v31  ;;  %v2693_v28 = vcombine.high %v2659_v55, %v2675_v31 }
 0x2a0   : > { %v2744_v50 = vcombine.low %v2720_v57, %v2736_v41  ;;  %v2745_v21 = vcombine.high %v2720_v57, %v2736_v41  ;;  %v2760_v20 = vcombine.low %v2727_v14, %v2743_v6  ;;  %v2761_v32 = vcombine.high %v2727_v14, %v2743_v6 }
 0x2a1   : > { %v2684_v47 = vrot.slane %v2676_v37, %v25368_v49  ;;  %v2691_v4 = vrot.slane %v2677_v46, %v25368_v49  ;;  %v2700_v42 = vrot.slane %v2692_v23, %v25368_v49  ;;  %v2707_v7 = vrot.slane %v2693_v28, %v25368_v49 }
 0x2a2   : > { %v2752_v26 = vrot.slane %v2744_v50, %v25368_v49  ;;  %v2759_v16 = vrot.slane %v2745_v21, %v25368_v49  ;;  %v2768_v57 = vrot.slane %v2760_v20, %v25368_v49  ;;  %v2775_v55 = vrot.slane %v2761_v32, %v25368_v49 }
 0x2a3   : > { %v2708_v27 = vcombine.high %v2684_v47, %v31348_v19  ;;  %v2709_v31 = vcombine.high %v2691_v4, %v31348_v19  ;;  %v2710_v46 = vcombine.high %v2700_v42, %v31348_v19  ;;  %v2711_v6 = vcombine.high %v2707_v7, %v31348_v19 }
 0x2a4   : > { %v24195_v14 = vpack.c.bf16 %v2700_v42, %v2684_v47  ;;  %v24196_v41 = vpack.c.bf16 %v2707_v7, %v2691_v4  ;;  %v2776_v28 = vcombine.high %v2752_v26, %v31348_v19  ;;  %v2777_v37 = vcombine.high %v2759_v16, %v31348_v19 }
 0x2a5   : > { %v2778_v23 = vcombine.high %v2768_v57, %v31348_v19  ;;  %v2779_v50 = vcombine.high %v2775_v55, %v31348_v19  ;;  %v24199_v59 = vpack.c.bf16 %v2710_v46, %v2708_v27  ;;  %v24200_v32 = vpack.c.bf16 %v2711_v6, %v2709_v31 }
 0x2a6   : > { %v2957_v21 = vrot.slane %v24195_v14, %v25351_v9  ;;  %v2965_v20 = vrot.slane %v24196_v41, %v25351_v9  ;;  %v24197_v5 = vpack.c.bf16 %v2768_v57, %v2752_v26  ;;  %v24198_v39 = vpack.c.bf16 %v2775_v55, %v2759_v16 }
 0x2a7   : > { %v24201_v3 = vpack.c.bf16 %v2778_v23, %v2776_v28  ;;  %v24202_v1 = vpack.c.bf16 %v2779_v50, %v2777_v37  ;;  %v3007_v4 = vrot.slane %v24199_v59, %v25351_v9  ;;  %v3015_v42 = vrot.slane %v24200_v32, %v25351_v9 }
 0x2a8   : > { %v2982_v47 = vcombine.low %v2957_v21, %v2965_v20  ;;  %v2780_v7 = vcombine.low %v26091_v10, %v2636_v60  ;;  %v2973_v36 = vrot.slane %v24197_v5, %v25351_v9  ;;  %v2981_v15 = vrot.slane %v24198_v39, %v25351_v9 }
 0x2a9   : > { %v3023_v14 = vrot.slane %v24201_v3, %v25351_v9  ;;  %v3031_v27 = vrot.slane %v24202_v1, %v25351_v9  ;;  %v2589_v26 = vadd.f32 %v26021_v34, %v25920_v12  ;;  %v3032_v31 = vcombine.low %v3007_v4, %v3015_v42 }
 0x2aa   : > { %v2989_v16 = vrot.slane %v2982_v47, %v25368_v49  ;;  %v2781_v59 = vcombine.high %v26091_v10, %v2636_v60  ;;  %v2990_v57 = vcombine.low %v2973_v36, %v2981_v15  ;;  %v2638_v46 = vadd.f32 %v2637_v22, %v25922_v29 }
 0x2ab   : > { %v3040_v55 = vcombine.low %v3023_v14, %v3031_v27  ;;  %v2640_v5 = vadd.f32 %v2639_v48, %v25918_v13  ;;  %v2788_v39 = vrot.slane %v2780_v7, %v25351_v9  ;;  %v2642_v1 = vadd.f32 %v2641_v40, %v25922_v29 }
 0x2ac   : > { %v2795_v3 = vrot.slane %v2781_v59, %v25351_v9  ;;  %v3039_v6 = vrot.slane %v3032_v31, %v25368_v49  ;;  %v2997_v34 = vrot.slane %v2990_v57, %v25368_v49  ;;  %v2796_v41 = vcombine.low %v26095_v61, %v2638_v46 }
 0x2ad   : > { %v2797_v10 = vcombine.high %v26095_v61, %v2638_v46  ;;  %v2848_v15 = vcombine.low %v26121_v44, %v2640_v5  ;;  %v2849_v22 = vcombine.high %v26121_v44, %v2640_v5  ;;  %v2864_v36 = vcombine.low %v2589_v26, %v2642_v1 }
 0x2ae   : > { %v2865_v48 = vcombine.high %v2589_v26, %v2642_v1  ;;  %v3047_v60 = vrot.slane %v3040_v55, %v25368_v49  ;;  %v2804_v28 = vrot.slane %v2796_v41, %v25351_v9  ;;  %v2998_v23 = vcombine.low %v2989_v16, %v2997_v34 }
 0x2af   : > { %v2811_v40 = vrot.slane %v2797_v10, %v25351_v9  ;;  %v2856_v37 = vrot.slane %v2848_v15, %v25351_v9  ;;  %v2863_v50 = vrot.slane %v2849_v22, %v25351_v9  ;;  %v2872_v21 = vrot.slane %v2864_v36, %v25351_v9 }
 0x2b0   : > { %v2879_v61 = vrot.slane %v2865_v48, %v25351_v9  ;;  %v2999_v20 = vcombine.high %v2989_v16, %v2997_v34  ;;  %v2812_v32 = vcombine.low %v2788_v39, %v2804_v28  ;;  %v2813_v44 = vcombine.high %v2788_v39, %v2804_v28 }
 0x2b1   : > { %v2828_v47 = vcombine.low %v2795_v3, %v2811_v40  ;;  %v2829_v4 = vcombine.high %v2795_v3, %v2811_v40  ;;  %v2880_v42 = vcombine.low %v2856_v37, %v2872_v21  ;;  %v2881_v7 = vcombine.high %v2856_v37, %v2872_v21 }
 0x2b2   : > { %v2896_v14 = vcombine.low %v2863_v50, %v2879_v61  ;;  %v2897_v27 = vcombine.high %v2863_v50, %v2879_v61  ;;  %v2820_v26 = vrot.slane %v2812_v32, %v25368_v49  ;;  %v2827_v31 = vrot.slane %v2813_v44, %v25368_v49 }
 0x2b3   : > { %v2836_v59 = vrot.slane %v2828_v47, %v25368_v49  ;;  %v2843_v57 = vrot.slane %v2829_v4, %v25368_v49  ;;  %v2888_v55 = vrot.slane %v2880_v42, %v25368_v49  ;;  %v2895_v16 = vrot.slane %v2881_v7, %v25368_v49 }
 0x2b4   : > { %v2904_v46 = vrot.slane %v2896_v14, %v25368_v49  ;;  %v2911_v5 = vrot.slane %v2897_v27, %v25368_v49  ;;  %v2844_v39 = vcombine.high %v2820_v26, %v31348_v19  ;;  %v2845_v3 = vcombine.high %v2827_v31, %v31348_v19 }
 0x2b5   : > { %v2846_v1 = vcombine.high %v2836_v59, %v31348_v19  ;;  %v2847_v34 = vcombine.high %v2843_v57, %v31348_v19  ;;  %v24203_v41 = vpack.c.bf16 %v2836_v59, %v2820_v26  ;;  %v24204_v10 = vpack.c.bf16 %v2843_v57, %v2827_v31 }
 0x2b6   : > { %v2912_v15 = vcombine.high %v2888_v55, %v31348_v19  ;;  %v2913_v22 = vcombine.high %v2895_v16, %v31348_v19  ;;  %v2914_v28 = vcombine.high %v2904_v46, %v31348_v19  ;;  %v2915_v40 = vcombine.high %v2911_v5, %v31348_v19 }
 0x2b7   : > { %v24207_v36 = vpack.c.bf16 %v2846_v1, %v2844_v39  ;;  %v24208_v48 = vpack.c.bf16 %v2847_v34, %v2845_v3  ;;  %v3057_v37 = vrot.slane %v24203_v41, %v25351_v9  ;;  %v3065_v50 = vrot.slane %v24204_v10, %v25351_v9 }
 0x2b8   : > { %v24205_v21 = vpack.c.bf16 %v2904_v46, %v2888_v55  ;;  %v24206_v61 = vpack.c.bf16 %v2911_v5, %v2895_v16  ;;  %v24209_v47 = vpack.c.bf16 %v2914_v28, %v2912_v15  ;;  %v24210_v4 = vpack.c.bf16 %v2915_v40, %v2913_v22 }
 0x2b9   : > { %v3107_v32 = vrot.slane %v24207_v36, %v25351_v9  ;;  %v3115_v44 = vrot.slane %v24208_v48, %v25351_v9  ;;  %v3082_v42 = vcombine.low %v3057_v37, %v3065_v50  ;;  %v3048_v27 = vcombine.low %v3039_v6, %v3047_v60 }
 0x2ba   : > { %v3073_v7 = vrot.slane %v24205_v21, %v25351_v9  ;;  %v3081_v14 = vrot.slane %v24206_v61, %v25351_v9  ;;  %v3123_v31 = vrot.slane %v24209_v47, %v25351_v9  ;;  %v3131_v59 = vrot.slane %v24210_v4, %v25351_v9 }
 0x2bb   : > { %v3132_v26 = vcombine.low %v3107_v32, %v3115_v44  ;;  %v3049_v57 = vcombine.high %v3039_v6, %v3047_v60  ;;  %v3152_v16 = vpack.i.b16 %v3048_v27, %v2998_v23  ;;  %v3153_v5 = vshrl.u32 %v2998_v23, 16 }
 0x2bc   : > { %v3090_v55 = vcombine.low %v3073_v7, %v3081_v14  ;;  %v3140_v46 = vcombine.low %v3123_v31, %v3131_v59  ;;  %v3154_v39 = vshrl.u32 %v3048_v27, 16  ;;  %v3089_v1 = vrot.slane %v3082_v42, %v25368_v49 }
 0x2bd   : > { %v3158_v3 = vpack.i.b16 %v3049_v57, %v2999_v20  ;;  %v3159_v41 = vshrl.u32 %v2999_v20, 16  ;;  %v3160_v10 = vshrl.u32 %v3049_v57, 16  ;;  %v3178_v22 = vshrl.u32 %v3152_v16, 16 }
 0x2be   : > { %v3097_v34 = vrot.slane %v3090_v55, %v25368_v49  ;;  %v3155_v15 = vpack.i.b16 %v3154_v39, %v3153_v5  ;;  %v3139_v36 = vrot.slane %v3132_v26, %v25368_v49  ;;  %v3147_v48 = vrot.slane %v3140_v46, %v25368_v49 }
 0x2bf   : > { %v3161_v28 = vpack.i.b16 %v3160_v10, %v3159_v41  ;;  %v3186_v6 = vshrl.u32 %v3158_v3, 16 }
 0x2c0   : > { %v3098_v60 = vcombine.low %v3089_v1, %v3097_v34  ;;  %v3099_v40 = vcombine.high %v3089_v1, %v3097_v34  ;;  %v3179_v37 = vshrl.u32 %v3155_v15, 16  ;;  %v3176_v23 = vpack.i.b16 %v3155_v15, %v3152_v16 }
 0x2c1   : > { %v3148_v50 = vcombine.low %v3139_v36, %v3147_v48  ;;  %v3149_v21 = vcombine.high %v3139_v36, %v3147_v48  ;;  %v3187_v61 = vshrl.u32 %v3161_v28, 16  ;;  %v3184_v32 = vpack.i.b16 %v3161_v28, %v3158_v3 }
 0x2c2   : > { %v3165_v44 = vshrl.u32 %v3098_v60, 16  ;;  %v3171_v47 = vshrl.u32 %v3099_v40, 16  ;;  %v3180_v20 = vpack.i.b16 %v3179_v37, %v3178_v22  ;;  %v3213_v4 = vrot.slane %v3176_v23, %v25351_v9 }
 0x2c3   : > { %v3206_v42 = vcombine.high %v3176_v23, %v25348_v8  ;;  %v3164_v7 = vpack.i.b16 %v3148_v50, %v3098_v60  ;;  %v3188_v14 = vpack.i.b16 %v3187_v61, %v3186_v6  ;;  %v3228_v27 = vrot.slane %v3184_v32, %v25351_v9 }
 0x2c4   : > { %v3221_v26 = vcombine.high %v3184_v32, %v25348_v8  ;;  %v3166_v31 = vshrl.u32 %v3148_v50, 16  ;;  %v3279_v59 = vrot.slane %v3180_v20, %v25351_v9  ;;  %v3272_v57 = vcombine.high %v3180_v20, %v25348_v8 }
 0x2c5   : > { %v3220_v55 = vrot.slane %v3206_v42, %v25351_v9  ;;  %v3170_v16 = vpack.i.b16 %v3149_v21, %v3099_v40  ;;  %v3294_v46 = vrot.slane %v3188_v14, %v25351_v9  ;;  %v3236_v5 = vcombine.low %v3213_v4, %v3228_v27 }
 0x2c6   : > { %v3237_v39 = vcombine.high %v3213_v4, %v3228_v27  ;;  %v3287_v3 = vcombine.high %v3188_v14, %v25348_v8  ;;  %v3286_v1 = vrot.slane %v3272_v57, %v25351_v9  ;;  %v3235_v34 = vrot.slane %v3221_v26, %v25351_v9 }
 0x2c7   : > { %v3167_v41 = vpack.i.b16 %v3166_v31, %v3165_v44  ;;  %v3172_v10 = vshrl.u32 %v3149_v21, 16  ;;  %v3302_v15 = vcombine.low %v3279_v59, %v3294_v46  ;;  %v3244_v22 = vrot.slane %v3236_v5, %v25368_v49 }
 0x2c8   : > { %v3303_v36 = vcombine.high %v3279_v59, %v3294_v46  ;;  %v3251_v48 = vrot.slane %v3237_v39, %v25368_v49  ;;  %v3301_v28 = vrot.slane %v3287_v3, %v25351_v9  ;;  %v3252_v6 = vcombine.low %v3220_v55, %v3235_v34 }
 0x2c9   : > { %v3253_v60 = vcombine.high %v3220_v55, %v3235_v34  ;;  %v3173_v40 = vpack.i.b16 %v3172_v10, %v3171_v47  ;;  %v3310_v37 = vrot.slane %v3302_v15, %v25368_v49  ;;  %v3268_v50 = vcombine.high %v3244_v22, %v31328_v33  ;;  %v26239_v47 = vld [vmem:[%s31218_s3 + $0x4] sm:$0xf] }
 0x2ca   : > { %v3317_v23 = vrot.slane %v3303_v36, %v25368_v49  ;;  %v3318_v61 = vcombine.low %v3286_v1, %v3301_v28  ;;  %v3260_v21 = vrot.slane %v3252_v6, %v25368_v49  ;;  %v3504_v32 = vsel %vm3502_vm2, %v3244_v22, 0 }
 0x2cb   : > { %24211 = vmatprep.subr.msk.bf16.mxu0 %vm3502_vm2, %v3310_v37  ;;  %v3334_v44 = vcombine.high %v3310_v37, %v31328_v33  ;;  %v3319_v20 = vcombine.high %v3286_v1, %v3301_v28  ;;  %v3269_v42 = vcombine.high %v3251_v48, %v31328_v33  ;;  %v31349_v14 = vcombine.low %v25959_v45, %v25962_v62 }
 0x2cc   : > { %3600 = vmatpush1.bf16.msra.mxu0 %v3504_v32  ;;  %v3326_v4 = vrot.slane %v3318_v61, %v25368_v49  ;;  %v31350_v26 = vcombine.low %v25981_v38, %v25984_v24  ;;  %v3510_v59 = vsel %vm3502_vm2, %v3268_v50, 0  ;;  %v3335_v57 = vcombine.high %v3317_v23, %v31328_v33 }
 0x2cd   : > { %v4888_v27 = vrot.slane %v31349_v14, %v25368_v49  ;;  %24213 = vmatprep.subr.msk.bf16.mxu1 %vm3502_vm2, %v3334_v44  ;;  %24215 = vmatprep.subr.msk.bf16.mxu0 %vm3502_vm2, %v3317_v23  ;;  %v3194_v55 = vshrl.u32 %v3164_v7, 16  ;;  %v3195_v46 = vshrl.u32 %v3167_v41, 16  ;;  %v3333_v5 = vrot.slane %v3319_v20, %v25368_v49 }
 0x2ce   : > { %v4896_v31 = vrot.slane %v31350_v26, %v25368_v49  ;;  %3641 = vmatpush1.bf16.msra.mxu1 %v3510_v59  ;;  %v3270_v45 = vcombine.high %v3260_v21, %v31328_v33  ;;  %v3202_v62 = vshrl.u32 %v3170_v16, 16  ;;  %v3203_v39 = vshrl.u32 %v3173_v40, 16 }
 0x2cf   : > { %24212 = vmatmul.mubr.msk.bf16.vlgmr.msra.gmra.mrb[32].mxu0 %vm3498_vm3, %v26239_v47  ;;  %24217 = vmatprep.subr.msk.bf16.mxu1 %vm3502_vm2, %v3335_v57  ;;  %v3516_v38 = vsel %vm3502_vm2, %v3251_v48, 0  ;;  %v3336_v24 = vcombine.high %v3326_v4, %v31328_v33  ;;  %v3267_v3 = vrot.slane %v3253_v60, %v25368_v49  ;;  %v3196_v1 = vpack.i.b16 %v3195_v46, %v3194_v55 }
 0x2d0   : > { %3682 = vmatpush1.bf16.msra.mxu0 %v3516_v38  ;;  %3713 = vmatprep.mubr.bf16.mxu0 %v31328_v33  ;;  %v3204_v34 = vpack.i.b16 %v3203_v39, %v3202_v62  ;;  %v3192_v10 = vpack.i.b16 %v3167_v41, %v3164_v7  ;;  %v3200_v15 = vpack.i.b16 %v3173_v40, %v3170_v16  ;;  %v3522_v22 = vsel %vm3502_vm2, %v3269_v42, 0 }
 0x2d1   : > { %24214 = vmatmul.mubr.msk.bf16.vlgmr.msra.gmra.mrb[48].mxu1 %vm3498_vm3, %v26239_v47  ;;  %24219 = vmatprep.subr.msk.bf16.mxu0 %vm3502_vm2, %v3326_v4  ;;  %v3411_v36 = vrot.slane %v3196_v1, %v25351_v9  ;;  %v3404_v48 = vcombine.high %v3196_v1, %v25348_v8  ;;  %v4897_v28 = vcombine.low %v4888_v27, %v4896_v31  ;;  %v3528_v14 = vsel %vm3502_vm2, %v3260_v21, 0 }
 0x2d2   : > { %3723 = vmatpush1.bf16.msra.mxu1 %v3522_v22  ;;  %3754 = vmatprep.mubr.bf16.mxu1 %v31328_v33  ;;  %v3426_v6 = vrot.slane %v3204_v34, %v25351_v9  ;;  %v3345_v7 = vrot.slane %v3192_v10, %v25351_v9  ;;  %v3360_v16 = vrot.slane %v3200_v15, %v25351_v9 }
 0x2d3   : > { %24221 = vmatprep.subr.msk.bf16.mxu1 %vm3502_vm2, %v3336_v24  ;;  %v26276_v41 = vrot.slane %v3404_v48, %v25351_v9  ;;  %v3419_v60 = vcombine.high %v3204_v34, %v25348_v8  ;;  %v3338_v40 = vcombine.high %v3192_v10, %v25348_v8  ;;  %v3353_v37 = vcombine.high %v3200_v15, %v25348_v8 }
 0x2d4   : > { %v3434_v23 = vcombine.low %v3411_v36, %v3426_v6  ;;  %v3368_v50 = vcombine.low %v3345_v7, %v3360_v16  ;;  %v3435_v61 = vcombine.high %v3411_v36, %v3426_v6  ;;  %v3369_v32 = vcombine.high %v3345_v7, %v3360_v16 }
 0x2d5   : > { %v26282_v44 = vrot.slane %v3419_v60, %v25351_v9  ;;  %v26285_v20 = vrot.slane %v3338_v40, %v25351_v9  ;;  %v26288_v4 = vrot.slane %v3353_v37, %v25351_v9  ;;  %v4898_v42 = vcombine.high %v4888_v27, %v4896_v31 }
 0x2d6   : > { %v3271_v21 = vcombine.high %v3267_v3, %v31328_v33  ;;  %v3534_v27 = vsel %vm3502_vm2, %v3270_v45, 0  ;;  %v3337_v31 = vcombine.high %v3333_v5, %v31328_v33  ;;  %v3442_v46 = vrot.slane %v3434_v23, %v25368_v49 }
 0x2d7   : > { %24216 = vmatmul.mubr.msk.bf16.vlgmr.msra.gmra.mrb[36].mxu0 %vm3498_vm3, %v26239_v47  ;;  %v3450_v26 = vcombine.low %v26276_v41, %v26282_v44  ;;  %v3384_v59 = vcombine.low %v26285_v20, %v26288_v4  ;;  %v3451_v57 = vcombine.high %v26276_v41, %v26282_v44  ;;  %v3385_v55 = vcombine.high %v26285_v20, %v26288_v4 }
 0x2d8   : > { %3764 = vmatpush1.bf16.msra.mxu0 %v3528_v14  ;;  %3795 = vmatprep.mubr.bf16.mxu0 %v31328_v33  ;;  %v5001_v62 = vpack.i.b16 %v4897_v28, %v26111_v53  ;;  %v31351_v39 = vcombine.low %v26048_v30, %v26051_v43  ;;  %v3540_v24 = vsel %vm3502_vm2, %v3267_v3, 0  ;;  %v5002_v45 = vshrl.u32 %v26111_v53, 16 }
 0x2d9   : > { %24223 = vmatprep.subr.msk.bf16.mxu0 %vm3502_vm2, %v3333_v5  ;;  %24218 = vmatmul.mubr.msk.bf16.vlgmr.msra.gmra.mrb[52].mxu1 %vm3498_vm3, %v26239_v47  ;;  %v5008_v5 = vshrl.u32 %v26115_v51, 16  ;;  %v3546_v1 = vsel %vm3502_vm2, %v3271_v21, 0  ;;  %v3376_v34 = vrot.slane %v3368_v50, %v25368_v49  ;;  %v5003_v10 = vshrl.u32 %v4897_v28, 16 }
 0x2da   : > { %3805 = vmatpush1.bf16.msra.mxu1 %v3534_v27  ;;  %3836 = vmatprep.mubr.bf16.mxu1 %v31328_v33  ;;  %v26315_v38 = vrot.slane %v31351_v39, %v25368_v49  ;;  %v5007_v15 = vpack.i.b16 %v4898_v42, %v26115_v51  ;;  %v3466_v22 = vcombine.high %v3442_v46, %v31328_v33  ;;  %v5009_v36 = vshrl.u32 %v4898_v42, 16 }
 0x2db   : > { %24225 = vmatprep.subr.msk.bf16.mxu1 %vm3502_vm2, %v3337_v31  ;;  %v3449_v30 = vrot.slane %v3435_v61, %v25368_v49  ;;  %v3383_v43 = vrot.slane %v3369_v32, %v25368_v49  ;;  %v5004_v48 = vpack.i.b16 %v5003_v10, %v5002_v45  ;;  %v5027_v3 = vshrl.u32 %v5001_v62, 16 }
 0x2dc   : > { %v1009_v53 = vpack.c.bf16 %v26023_v0, %v26011_v35  ;;  %v1008_v6 = vpack.c.bf16 %v26029_v56, %v26015_v52  ;;  %v5010_v28 = vpack.i.b16 %v5009_v36, %v5008_v5  ;;  %v5035_v51 = vshrl.u32 %v5007_v15, 16 }
 0x2dd   : > { %v1011_v7 = vpack.c.bf16 %v26045_v11, %v26037_v17  ;;  %v1010_v16 = vpack.c.bf16 %v26055_v58, %v26041_v63  ;;  %v5028_v60 = vshrl.u32 %v5004_v48, 16  ;;  %v26338_v40 = vpack.i.b16 %v5004_v48, %v5001_v62 }
 0x2de   : > { %v7182_v35 = vshrl.u32 %v1009_v53, 16  ;;  %v7166_v0 = vshrl.u32 %v1008_v6, 16  ;;  %v5036_v52 = vshrl.u32 %v5010_v28, 16  ;;  %v26343_v56 = vpack.i.b16 %v5010_v28, %v5007_v15 }
 0x2df   : > { %24220 = vmatmul.mubr.msk.bf16.vlgmr.msra.gmra.mrb[40].mxu0 %vm3498_vm3, %v26239_v47  ;;  %v7180_v11 = vpack.i.b16 %v1011_v7, %v1009_v53  ;;  %v7183_v17 = vshrl.u32 %v1011_v7, 16  ;;  %v5029_v63 = vpack.i.b16 %v5028_v60, %v5027_v3  ;;  %v5062_v58 = vrot.slane %v26338_v40, %v25351_v9 }
 0x2e0   : > { %3846 = vmatpush1.bf16.msra.mxu0 %v3540_v24  ;;  %3877 = vmatprep.mubr.bf16.mxu0 %v31328_v33  ;;  %v26348_v37 = vpack.i.b16 %v1010_v16, %v1008_v6  ;;  %v7167_v23 = vshrl.u32 %v1010_v16, 16  ;;  %v3400_v50 = vcombine.high %v3376_v34, %v31328_v33  ;;  %v5037_v61 = vpack.i.b16 %v5036_v52, %v5035_v51 }
 0x2e1   : > { %24227 = vmatprep.subr.msk.bf16.mxu0 %vm3502_vm2, %v3442_v46  ;;  %24222 = vmatmul.mubr.msk.bf16.vlgmr.msra.gmra.mrb[56].mxu1 %vm3498_vm3, %v26239_v47  ;;  %v5077_v32 = vrot.slane %v26343_v56, %v25351_v9  ;;  %v7184_v42 = vpack.i.b16 %v7183_v17, %v7182_v35  ;;  %v3401_v14 = vcombine.high %v3383_v43, %v31328_v33  ;;  %v3552_v45 = vsel %vm3502_vm2, %v3376_v34, 0  ;;  %v31353_v35 = vld [vmem:[#allocation28_spill] sm:$0xff] }
 0x2e2   : > { %3887 = vmatpush1.bf16.msra.mxu1 %v3546_v1  ;;  %3918 = vmatprep.mubr.bf16.mxu1 %v31328_v33  ;;  %v26356_v21 = vrot.slane %v5029_v63, %v25351_v9  ;;  %v5121_v27 = vcombine.high %v5029_v63, %v25348_v8  ;;  %v26359_v31 = vpack.i.b16 %v7167_v23, %v7166_v0  ;;  %v3558_v20 = vsel %vm3502_vm2, %v3400_v50, 0  ;;  %v31354_v0 = vld [vmem:[#allocation31_spill] sm:$0xff]  ;;  %v31355_v50 = vld [vmem:[#allocation32_spill] sm:$0xff] }
 0x2e3   : > { %24229 = vmatprep.subr.msk.bf16.mxu1 %vm3502_vm2, %v3466_v22  ;;  %v26362_v46 = vrot.slane %v5037_v61, %v25351_v9  ;;  %v5085_v62 = vcombine.low %v5062_v58, %v5077_v32  ;;  %v5086_v39 = vcombine.high %v5062_v58, %v5077_v32  ;;  %v5136_v24 = vcombine.high %v5037_v61, %v25348_v8 }
 0x2e4   : > { %v3458_v5 = vrot.slane %v3450_v26, %v25368_v49  ;;  %v3392_v1 = vrot.slane %v3384_v59, %v25368_v49  ;;  %v26375_v10 = vrot.slane %v5121_v27, %v25351_v9  ;;  %v26383_v34 = vrot.slane %v3451_v57, %v25368_v49  ;;  %v31357_v27 = vld [vmem:[#allocation33_spill] sm:$0xff] }
 0x2e5   : > { %v3399_v26 = vrot.slane %v3385_v55, %v25368_v49  ;;  %v5151_v59 = vcombine.low %v26356_v21, %v26362_v46  ;;  %v5152_v15 = vcombine.high %v26356_v21, %v26362_v46  ;;  %v31352_v22 = vcombine.low %v26074_v18, %v26077_v2  ;;  %v31358_v46 = vld [vmem:[#allocation35_spill] sm:$0xff] }
 0x2e6   : > { %v26401_v41 = vrot.slane %v5136_v24, %v25351_v9  ;;  %v7326_v44 = vcombine.high %v7180_v11, %v25348_v8  ;;  %v3467_v4 = vcombine.high %v3449_v30, %v31328_v33  ;;  %v3564_v18 = vsel %vm3502_vm2, %v3383_v43, 0 }
 0x2e7   : > { %24224 = vmatmul.mubr.msk.bf16.vlgmr.msra.gmra.mrb[44].mxu0 %vm3498_vm3, %v26239_v47  ;;  %v26397_v36 = vrot.slane %v31352_v22, %v25368_v49  ;;  %v3570_v2 = vsel %vm3502_vm2, %v3401_v14, 0  ;;  %v3468_v57 = vcombine.high %v3458_v5, %v31328_v33  ;;  %v26414_v55 = vsel %vm3502_vm2, %v3392_v1, 0 }
 0x2e8   : > { %3928 = vmatpush1.bf16.msra.mxu0 %v3552_v45  ;;  %3959 = vmatprep.mubr.bf16.mxu0 %v31328_v33  ;;  %v5167_v48 = vcombine.low %v26375_v10, %v26401_v41  ;;  %v7392_v3 = vcombine.high %v7184_v42, %v25348_v8  ;;  %v26423_v43 = vcombine.high %v26383_v34, %v31328_v33  ;;  %v26426_v53 = vsel %vm3502_vm2, %v3399_v26, 0 }
 0x2e9   : > { %24231 = vmatprep.subr.msk.bf16.mxu0 %vm3502_vm2, %v3449_v30  ;;  %24226 = vmatmul.mubr.msk.bf16.vlgmr.msra.gmra.mrb[60].mxu1 %vm3498_vm3, %v26239_v47  ;;  %v3402_v30 = vcombine.high %v3392_v1, %v31328_v33  ;;  %v26429_v6 = vcombine.high %v3399_v26, %v31328_v33  ;;  %v26432_v28 = vrot.slane %v5085_v62, %v25368_v49 }
 0x2ea   : > { %3969 = vmatpush1.bf16.msra.mxu1 %v3558_v20  ;;  %4000 = vmatprep.mubr.bf16.mxu1 %v31328_v33  ;;  %v7333_v51 = vrot.slane %v7180_v11, %v25351_v9  ;;  %v7340_v7 = vrot.slane %v7326_v44, %v25351_v9  ;;  %v26437_v16 = vrot.slane %v7184_v42, %v25351_v9 }
 0x2eb   : > { %24233 = vmatprep.subr.msk.bf16.mxu1 %vm3502_vm2, %v3467_v4  ;;  %v1013_v60 = vpack.c.bf16 %v26081_v54, %v26063_v25  ;;  %v1012_v52 = vpack.c.bf16 %v31354_v0, %v31353_v35  ;;  %v5055_v17 = vcombine.high %v26338_v40, %v25348_v8  ;;  %v5070_v63 = vcombine.high %v26343_v56, %v25348_v8  ;;  %v31356_v25 = vld [vmem:[#allocation34_spill] sm:$0xff] }
 0x2ec   : > { %v26448_v58 = vrot.slane %v5086_v39, %v25368_v49  ;;  %v26451_v11 = vrot.slane %v7392_v3, %v25351_v9  ;;  %v5168_v23 = vcombine.high %v26375_v10, %v26401_v41  ;;  %v1015_v54 = vpack.c.bf16 %v31356_v25, %v31355_v50 }
 0x2ed   : > { %v7194_v40 = vcombine.high %v26348_v37, %v25348_v8  ;;  %v7190_v61 = vshrl.u32 %v1013_v60, 16  ;;  %v26462_v56 = vrot.slane %v5055_v17, %v25351_v9  ;;  %v26465_v32 = vrot.slane %v5070_v63, %v25351_v9 }
 0x2ee   : > { %v26469_v42 = vrot.slane %v5151_v59, %v25368_v49  ;;  %v7188_v14 = vpack.i.b16 %v1015_v54, %v1013_v60  ;;  %v7191_v21 = vshrl.u32 %v1015_v54, 16  ;;  %v1014_v62 = vpack.c.bf16 %v31358_v46, %v31357_v27 }
 0x2ef   : > { %24228 = vmatmul.mubr.msk.bf16.vlgmr.msra.gmra.mrb[48].mxu0 %vm3498_vm3, %v26239_v47  ;;  %v7174_v39 = vshrl.u32 %v1012_v52, 16  ;;  %v5101_v24 = vcombine.low %v26462_v56, %v26465_v32  ;;  %v5102_v45 = vcombine.high %v26462_v56, %v26465_v32  ;;  %v26482_v1 = vcombine.low %v26315_v38, %v26397_v36 }
 0x2f0   : > { %4010 = vmatpush1.bf16.msra.mxu0 %v3564_v18  ;;  %4041 = vmatprep.mubr.bf16.mxu0 %v31328_v33  ;;  %v7192_v26 = vpack.i.b16 %v7191_v21, %v7190_v61  ;;  %v7348_v59 = vrot.slane %v7188_v14, %v25351_v9  ;;  %v7175_v22 = vshrl.u32 %v1014_v62, 16  ;;  %v26489_v44 = vrot.slane %v5152_v15, %v25368_v49 }
 0x2f1   : > { %24235 = vmatprep.subr.msk.bf16.mxu0 %vm3502_vm2, %v3458_v5  ;;  %24230 = vmatmul.mubr.msk.bf16.vlgmr.msra.gmra.mrb[64].mxu1 %vm3498_vm3, %v26239_v47  ;;  %v7341_v5 = vcombine.high %v7188_v14, %v25348_v8  ;;  %v26493_v20 = vcombine.high %v26432_v28, %v31328_v33  ;;  %v26497_v4 = vrot.slane %v26348_v37, %v25351_v9  ;;  %v3582_v61 = vsel %vm3502_vm2, %v3402_v30, 0 }
 0x2f2   : > { %4051 = vmatpush1.bf16.msra.mxu1 %v3570_v2  ;;  %4082 = vmatprep.mubr.bf16.mxu1 %v31328_v33  ;;  %v7172_v18 = vpack.i.b16 %v1014_v62, %v1012_v52  ;;  %v7356_v3 = vcombine.low %v7333_v51, %v7348_v59  ;;  %v7357_v60 = vcombine.high %v7333_v51, %v7348_v59 }
 0x2f3   : > { %24237 = vmatprep.subr.msk.bf16.mxu1 %vm3502_vm2, %v3468_v57  ;;  %v7355_v2 = vrot.slane %v7341_v5, %v25351_v9  ;;  %v7407_v35 = vcombine.high %v7192_v26, %v25348_v8  ;;  %v26503_v57 = vcombine.high %v26469_v42, %v31328_v33  ;;  %v26506_v15 = vrot.slane %v7194_v40, %v25351_v9 }
 0x2f4   : > { %v7414_v0 = vrot.slane %v7192_v26, %v25351_v9  ;;  %v7176_v17 = vpack.i.b16 %v7175_v22, %v7174_v39  ;;  %v26510_v37 = vrot.slane %v7356_v3, %v25368_v49  ;;  %v26513_v52 = vrot.slane %v7357_v60, %v25368_v49  ;;  %v31359_v60 = vld [vmem:[#allocation26_spill] sm:$0xff] }
 0x2f5   : > { %v7372_v63 = vcombine.low %v7340_v7, %v7355_v2  ;;  %v7373_v51 = vcombine.high %v7340_v7, %v7355_v2  ;;  %v7260_v50 = vcombine.high %v26359_v31, %v25348_v8  ;;  %v26520_v25 = vrot.slane %v7407_v35, %v25351_v9  ;;  %v31360_v35 = vld [vmem:[#allocation27_spill] sm:$0xff] }
 0x2f6   : > { %v7422_v54 = vcombine.low %v26437_v16, %v7414_v0  ;;  %v7423_v40 = vcombine.high %v26437_v16, %v7414_v0  ;;  %v7558_v21 = vcombine.low %v26510_v37, %v26513_v52  ;;  %v7267_v39 = vrot.slane %v26359_v31, %v25351_v9 }
 0x2f7   : > { %24232 = vmatmul.mubr.msk.bf16.vlgmr.msra.gmra.mrb[52].mxu0 %vm3498_vm3, %v26239_v47  ;;  %v26528_v7 = vrot.slane %v7372_v63, %v25368_v49  ;;  %v26531_v14 = vrot.slane %v7373_v51, %v25368_v49  ;;  %v7438_v27 = vcombine.low %v26451_v11, %v26520_v25  ;;  %v7439_v46 = vcombine.high %v26451_v11, %v26520_v25  ;;  %v31362_v51 = vld [vmem:[#allocation29_spill] sm:$0xff] }
 0x2f8   : > { %4092 = vmatpush1.bf16.msra.mxu0 %v26414_v55  ;;  %4123 = vmatprep.mubr.bf16.mxu0 %v31328_v33  ;;  %v3594_v55 = vsel %vm3502_vm2, %v26429_v6, 0  ;;  %v26542_v30 = vrot.slane %v7422_v54, %v25368_v49  ;;  %v26545_v16 = vrot.slane %v7423_v40, %v25368_v49  ;;  %v24327_v6 = vcombine.high %v26510_v37, %v26513_v52 }
 0x2f9   : > { %24239 = vmatprep.subr.msk.bf16.mxu0 %vm3502_vm2, %v26383_v34  ;;  %24234 = vmatmul.mubr.msk.bf16.vlgmr.msra.gmra.mrb[68].mxu1 %vm3498_vm3, %v26239_v47  ;;  %v26552_v34 = vsel %vm3502_vm2, %v26432_v28, 0  ;;  %v26571_v59 = vrot.slane %v7260_v50, %v25351_v9  ;;  %v7209_v22 = vcombine.high %v7172_v18, %v25348_v8  ;;  %v7216_v2 = vrot.slane %v7172_v18, %v25351_v9  ;;  %v31363_v50 = vld [vmem:[#allocation30_spill] sm:$0xff] }
 0x2fa   : > { %4133 = vmatpush1.bf16.msra.mxu1 %v3582_v61  ;;  %4164 = vmatprep.mubr.bf16.mxu1 %v31328_v33  ;;  %v7282_v31 = vrot.slane %v7176_v17, %v25351_v9  ;;  %v4948_v3 = vcombine.high %v26315_v38, %v26397_v36  ;;  %v31361_v0 = vcombine.low %v31359_v60, %v31360_v35 }
 0x2fb   : > { %24241 = vmatprep.subr.msk.bf16.mxu1 %vm3502_vm2, %v26423_v43  ;;  %v7275_v43 = vcombine.high %v7176_v17, %v25348_v8  ;;  %v31364_v54 = vcombine.low %v31362_v51, %v31363_v50  ;;  %v7223_v61 = vrot.slane %v7209_v22, %v25351_v9  ;;  %v7224_v18 = vcombine.low %v26497_v4, %v7216_v2 }
 0x2fc   : > { %v4988_v63 = vrot.slane %v31361_v0, %v25368_v49  ;;  %v7225_v5 = vcombine.high %v26497_v4, %v7216_v2  ;;  %v7290_v38 = vcombine.low %v7267_v39, %v7282_v31  ;;  %v7291_v36 = vcombine.high %v7267_v39, %v7282_v31 }
 0x2fd   : > { %v4996_v40 = vrot.slane %v31364_v54, %v25368_v49  ;;  %v26591_v17 = vrot.slane %v7275_v43, %v25351_v9  ;;  %v7232_v22 = vrot.slane %v7224_v18, %v25368_v49  ;;  %v7240_v4 = vcombine.low %v26506_v15, %v7223_v61 }
 0x2fe   : > { %v7239_v0 = vrot.slane %v7225_v5, %v25368_v49  ;;  %v5014_v2 = vshrl.u32 %v26482_v1, 16  ;;  %v7241_v39 = vcombine.high %v26506_v15, %v7223_v61  ;;  %v26610_v43 = vrot.slane %v7291_v36, %v25368_v49 }
 0x2ff   : > { %24236 = vmatmul.mubr.msk.bf16.vlgmr.msra.gmra.mrb[56].mxu0 %vm3498_vm3, %v26239_v47  ;;  %v4997_v60 = vcombine.low %v4988_v63, %v4996_v40  ;;  %v4998_v35 = vcombine.high %v4988_v63, %v4996_v40  ;;  %v7248_v5 = vrot.slane %v7240_v4, %v25368_v49  ;;  %v7307_v63 = vcombine.high %v26571_v59, %v26591_v17 }
 0x300   : > { %4174 = vmatpush1.bf16.msra.mxu0 %v26426_v53  ;;  %4205 = vmatprep.mubr.bf16.mxu0 %v31328_v33  ;;  %v26607_v53 = vrot.slane %v7290_v38, %v25368_v49  ;;  %v7255_v15 = vrot.slane %v7241_v39, %v25368_v49  ;;  %v7458_v50 = vcombine.low %v7232_v22, %v7239_v0  ;;  %v5020_v38 = vshrl.u32 %v4948_v3, 16 }
 0x301   : > { %24291 = vmatprep.subr.msk.bf16.mxu0 %vm3502_vm2, %v26469_v42  ;;  %24238 = vmatmul.mubr.msk.bf16.vlgmr.msra.gmra.mrb[72].mxu1 %vm3498_vm3, %v26239_v47  ;;  %v5015_v31 = vshrl.u32 %v4997_v60, 16  ;;  %v7306_v42 = vcombine.low %v26571_v59, %v26591_v17  ;;  %v5021_v51 = vshrl.u32 %v4998_v35, 16  ;;  %v24323_v54 = vcombine.high %v7232_v22, %v7239_v0 }
 0x302   : > { %4215 = vmatpush1.bf16.msra.mxu1 %v3594_v55  ;;  %4246 = vmatprep.mubr.bf16.mxu1 %v31328_v33  ;;  %v7508_v55 = vcombine.low %v26607_v53, %v26610_v43  ;;  %v5118_v40 = vcombine.high %v26448_v58, %v31328_v33  ;;  %v24325_v61 = vcombine.high %v26607_v53, %v26610_v43 }
 0x303   : > { %24293 = vmatprep.subr.msk.bf16.mxu1 %vm3502_vm2, %v26503_v57  ;;  %v5013_v18 = vpack.i.b16 %v4997_v60, %v26482_v1  ;;  %v7474_v36 = vcombine.low %v7248_v5, %v7255_v15  ;;  %v24324_v4 = vcombine.high %v7248_v5, %v7255_v15  ;;  %v5016_v28 = vpack.i.b16 %v5015_v31, %v5014_v2 }
 0x304   : > { %v5019_v57 = vpack.i.b16 %v4998_v35, %v4948_v3  ;;  %v5184_v39 = vcombine.high %v26489_v44, %v31328_v33  ;;  %v5175_v22 = vrot.slane %v5167_v48, %v25368_v49  ;;  %v5022_v0 = vpack.i.b16 %v5021_v51, %v5020_v38 }
 0x305   : > { %v5043_v26 = vshrl.u32 %v5013_v18, 16  ;;  %v5044_v62 = vshrl.u32 %v5016_v28, 16  ;;  %v5041_v60 = vpack.i.b16 %v5016_v28, %v5013_v18  ;;  %v7465_v5 = vrot.slane %v7458_v50, %v25351_v9 }
 0x306   : > { %v5051_v1 = vshrl.u32 %v5019_v57, 16  ;;  %v5052_v3 = vshrl.u32 %v5022_v0, 16  ;;  %v5049_v35 = vpack.i.b16 %v5022_v0, %v5019_v57  ;;  %v7473_v2 = vrot.slane %v24323_v54, %v25351_v9  ;;  %v26668_v54 = vld [vmem:[%s31218_s3] sm:$0xf] }
 0x307   : > { %24240 = vmatmul.mubr.msk.bf16.vlgmr.msra.gmra.mrb[60].mxu0 %vm3498_vm3, %v26239_v47  ;;  %v7481_v48 = vrot.slane %v7474_v36, %v25351_v9  ;;  %v5873_v28 = vsel %vm3502_vm2, %v26493_v20, 0  ;;  %v5045_v31 = vpack.i.b16 %v5044_v62, %v5043_v26  ;;  %v5187_v51 = vcombine.high %v5041_v60, %v25348_v8 }
 0x308   : > { %5963 = vmatpush1.bf16.msra.mxu0 %v26552_v34  ;;  %5994 = vmatprep.mubr.bf16.mxu0 %v31328_v33  ;;  %v26648_v34 = vrot.slane %v5041_v60, %v25351_v9  ;;  %v5053_v15 = vpack.i.b16 %v5052_v3, %v5051_v1  ;;  %v26653_v50 = vrot.slane %v5049_v35, %v25351_v9 }
 0x309   : > { %24295 = vmatprep.subr.msk.bf16.mxu0 %vm3502_vm2, %v26489_v44  ;;  %24242 = vmatmul.mubr.msk.bf16.vlgmr.msra.gmra.mrb[76].mxu1 %vm3498_vm3, %v26239_v47  ;;  %v5202_v44 = vcombine.high %v5049_v35, %v25348_v8  ;;  %v26658_v47 = vrot.slane %v5045_v31, %v25351_v9  ;;  %v5253_v20 = vcombine.high %v5045_v31, %v25348_v8  ;;  %v5879_v35 = vsel %vm3502_vm2, %v26448_v58, 0 }
 0x30a   : > { %6004 = vmatpush1.bf16.msra.mxu1 %v5873_v28  ;;  %6035 = vmatprep.mubr.bf16.mxu1 %v31328_v33  ;;  %v26662_v62 = vrot.slane %v5187_v51, %v25351_v9  ;;  %v7489_v26 = vrot.slane %v24324_v4, %v25351_v9  ;;  %v26671_v18 = vrot.slane %v5053_v15, %v25351_v9  ;;  %v5885_v51 = vsel %vm3502_vm2, %v5118_v40, 0 }
 0x30b   : > { %24297 = vmatprep.subr.msk.bf16.mxu1 %vm3502_vm2, %v5184_v39  ;;  %v5217_v38 = vcombine.low %v26648_v34, %v26653_v50  ;;  %v5218_v36 = vcombine.high %v26648_v34, %v26653_v50  ;;  %v5268_v57 = vcombine.high %v5053_v15, %v25348_v8  ;;  %v26679_v39 = vrot.slane %v5253_v20, %v25351_v9 }
 0x30c   : > { %v26682_v4 = vrot.slane %v5202_v44, %v25351_v9  ;;  %v7490_v0 = vcombine.low %v7465_v5, %v7473_v2  ;;  %v7498_v1 = vcombine.low %v7481_v48, %v7489_v26  ;;  %v5283_v60 = vcombine.low %v26658_v47, %v26671_v18 }
 0x30d   : > { %v5284_v3 = vcombine.high %v26658_v47, %v26671_v18  ;;  %v26693_v28 = vrot.slane %v5268_v57, %v25351_v9  ;;  %v5185_v2 = vcombine.high %v5175_v22, %v31328_v33  ;;  %v5109_v48 = vrot.slane %v5101_v24, %v25368_v49 }
 0x30e   : > { %v5233_v31 = vcombine.low %v26662_v62, %v26682_v4  ;;  %v5234_v5 = vcombine.high %v26662_v62, %v26682_v4  ;;  %v5182_v58 = vrot.slane %v5168_v23, %v25368_v49  ;;  %v7314_v15 = vrot.slane %v7306_v42, %v25368_v49  ;;  %v25006_v4 = vld [vmem:[%s25340_s12] sm:$0xff]  }
 0x30f   : > { %24292 = vmatmul.mubr.msk.bf16.vlgmr.msra.gmra.mrb[64].mxu0 %vm3498_vm3, %v26668_v54  ;;  %v7321_v24 = vrot.slane %v7307_v63, %v25368_v49  ;;  %v5299_v10 = vcombine.low %v26679_v39, %v26693_v28  ;;  %v5300_v41 = vcombine.high %v26679_v39, %v26693_v28  ;;  %v7497_v23 = vrot.slane %v7490_v0, %v25368_v49 }
 0x310   : > { %6045 = vmatpush1.bf16.msra.mxu0 %v5879_v35  ;;  %6076 = vmatprep.mubr.bf16.mxu0 %v31328_v33  ;;  %v5186_v42 = vcombine.high %v5182_v58, %v31328_v33  ;;  %v7505_v40 = vrot.slane %v7498_v1, %v25368_v49  ;;  %v7515_v59 = vrot.slane %v7508_v55, %v25351_v9  ;;  %v5891_v20 = vsel %vm3502_vm2, %v5109_v48, 0 }
 0x311   : > { %24299 = vmatprep.subr.msk.bf16.mxu0 %vm3502_vm2, %v5175_v22  ;;  %24294 = vmatmul.mubr.msk.bf16.vlgmr.msra.gmra.mrb[80].mxu1 %vm3498_vm3, %v26668_v54  ;;  %v5119_v17 = vcombine.high %v5109_v48, %v31328_v33  ;;  %v5116_v63 = vrot.slane %v5102_v45, %v25368_v49  ;;  %v7523_v22 = vrot.slane %v24325_v61, %v25351_v9 }
 0x312   : > { %6086 = vmatpush1.bf16.msra.mxu1 %v5885_v51  ;;  %6117 = vmatprep.mubr.bf16.mxu1 %v31328_v33  ;;  %v7524_v44 = vcombine.low %v7314_v15, %v7321_v24  ;;  %v7446_v55 = vrot.slane %v7438_v27, %v25368_v49  ;;  %v7506_v26 = vcombine.low %v7497_v23, %v7505_v40 }
 0x313   : > { %24301 = vmatprep.subr.msk.bf16.mxu1 %vm3502_vm2, %v5185_v2  ;;  %v24326_v57 = vcombine.high %v7314_v15, %v7321_v24  ;;  %v7453_v56 = vrot.slane %v7439_v46, %v25368_v49  ;;  %v7540_v45 = vcombine.low %v7515_v59, %v7523_v22  ;;  %v7507_v53 = vcombine.high %v7497_v23, %v7505_v40 }
 0x314   : > { %v7531_v32 = vrot.slane %v7524_v44, %v25351_v9  ;;  %v7565_v27 = vrot.slane %v7558_v21, %v25351_v9  ;;  %v7573_v11 = vrot.slane %v24327_v6, %v25351_v9  ;;  %v5897_v25 = vsel %vm3502_vm2, %v5119_v17, 0 }
 0x315   : > { %v7539_v43 = vrot.slane %v24326_v57, %v25351_v9  ;;  %v5291_v46 = vrot.slane %v5283_v60, %v25368_v49  ;;  %v7547_v61 = vrot.slane %v7540_v45, %v25368_v49  ;;  %v31365_v21 = vcombine.low %v26528_v7, %v26531_v14 }
 0x316   : > { %v5903_v37 = vsel %vm3502_vm2, %v5116_v63, 0  ;;  %v31366_v6 = vcombine.high %v26528_v7, %v26531_v14  ;;  %v7590_v35 = vcombine.low %v7565_v27, %v7573_v11  ;;  %v31367_v60 = vcombine.low %v26542_v30, %v26545_v16 }
 0x317   : > { %24296 = vmatmul.mubr.msk.bf16.vlgmr.msra.gmra.mrb[68].mxu0 %vm3498_vm3, %v26668_v54  ;;  %v7581_v0 = vrot.slane %v31365_v21, %v25351_v9  ;;  %v7548_v52 = vcombine.low %v7531_v32, %v7539_v43  ;;  %v31368_v48 = vcombine.high %v26542_v30, %v26545_v16  ;;  %v7624_v51 = vcombine.low %v7446_v55, %v7453_v56 }
 0x318   : > { %6127 = vmatpush1.bf16.msra.mxu0 %v5891_v20  ;;  %6158 = vmatprep.mubr.bf16.mxu0 %v31328_v33  ;;  %v7589_v1 = vrot.slane %v31366_v6, %v25351_v9  ;;  %v7615_v2 = vrot.slane %v31367_v60, %v25351_v9  ;;  %v24330_v15 = vcombine.high %v7446_v55, %v7453_v56  ;;  %v7670_v20 = vshrl.u32 %v7507_v53, 16 }
 0x319   : > { %24303 = vmatprep.subr.msk.bf16.mxu0 %vm3502_vm2, %v5182_v58  ;;  %24298 = vmatmul.mubr.msk.bf16.vlgmr.msra.gmra.mrb[84].mxu1 %vm3498_vm3, %v26668_v54  ;;  %v7623_v58 = vrot.slane %v31368_v48, %v25351_v9  ;;  %v5120_v24 = vcombine.high %v5116_v63, %v31328_v33  ;;  %v7555_v7 = vrot.slane %v7548_v52, %v25368_v49 }
 0x31a   : > { %6168 = vmatpush1.bf16.msra.mxu1 %v5897_v25  ;;  %6199 = vmatprep.mubr.bf16.mxu1 %v31328_v33  ;;  %v7597_v14 = vrot.slane %v7590_v35, %v25368_v49  ;;  %v7598_v23 = vcombine.low %v7581_v0, %v7589_v1  ;;  %v7631_v40 = vrot.slane %v7624_v51, %v25351_v9 }
 0x31b   : > { %24305 = vmatprep.subr.msk.bf16.mxu1 %vm3502_vm2, %v5186_v42  ;;  %v7662_v42 = vshrl.u32 %v7506_v26, 16  ;;  %v7639_v59 = vrot.slane %v24330_v15, %v25351_v9  ;;  %v7640_v17 = vcombine.low %v7615_v2, %v7623_v58  ;;  %v7556_v22 = vcombine.low %v7547_v61, %v7555_v7 }
 0x31c   : > { %v7557_v44 = vcombine.high %v7547_v61, %v7555_v7  ;;  %v7605_v30 = vrot.slane %v7598_v23, %v25368_v49  ;;  %v5315_v16 = vcombine.high %v5291_v46, %v31328_v33  ;;  %v5225_v63 = vrot.slane %v5217_v38, %v25368_v49 }
 0x31d   : > { %v7647_v55 = vrot.slane %v7640_v17, %v25368_v49  ;;  %v7648_v57 = vcombine.low %v7631_v40, %v7639_v59  ;;  %v7663_v56 = vshrl.u32 %v7556_v22, 16  ;;  %v26805_v45 = vpack.i.b16 %v7556_v22, %v7506_v26  ;;  %v31377_v22 = vld [vmem:[#allocation25_spill] sm:$0xff] }
 0x31e   : > { %v7671_v32 = vshrl.u32 %v7557_v44, 16  ;;  %v7606_v43 = vcombine.low %v7597_v14, %v7605_v30  ;;  %v5909_v27 = vsel %vm3502_vm2, %v5120_v24, 0  ;;  %v26812_v11 = vpack.i.b16 %v7557_v44, %v7507_v53 }
 0x31f   : > { %24300 = vmatmul.mubr.msk.bf16.vlgmr.msra.gmra.mrb[72].mxu0 %vm3498_vm3, %v26668_v54  ;;  %31369 = vst [vmem:[#allocation28_spill] sm:$0xff] %v26805_v45  ;;  %v7655_v38 = vrot.slane %v7648_v57, %v25368_v49  ;;  %v7607_v25 = vcombine.high %v7597_v14, %v7605_v30  ;;  %v26815_v61 = vpack.i.b16 %v7663_v56, %v7662_v42  ;;  %v5915_v2 = vsel %vm3502_vm2, %v5225_v63, 0 }
 0x320   : > { %6209 = vmatpush1.bf16.msra.mxu0 %v5903_v37  ;;  %6240 = vmatprep.mubr.bf16.mxu0 %v31328_v33  ;;  %31370 = vst [vmem:[#allocation31_spill] sm:$0xff] %v26812_v11  ;;  %v26817_v26 = vpack.i.b16 %v7671_v32, %v7670_v20  ;;  %v7678_v21 = vshrl.u32 %v7606_v43, 16  ;;  %v5298_v53 = vrot.slane %v5284_v3, %v25368_v49 }
 0x321   : > { %24307 = vmatprep.subr.msk.bf16.mxu0 %vm3502_vm2, %v5291_v46  ;;  %24302 = vmatmul.mubr.msk.bf16.vlgmr.msra.gmra.mrb[88].mxu1 %vm3498_vm3, %v26668_v54  ;;  %31371 = vst [vmem:[#allocation32_spill] sm:$0xff] %v26815_v61  ;;  %v7656_v46 = vcombine.low %v7647_v55, %v7655_v38  ;;  %v7657_v0 = vcombine.high %v7647_v55, %v7655_v38  ;;  %v7686_v37 = vshrl.u32 %v7607_v25, 16 }
 0x322   : > { %6250 = vmatpush1.bf16.msra.mxu1 %v5909_v27  ;;  %6281 = vmatprep.mubr.bf16.mxu1 %v31328_v33  ;;  %31372 = vst [vmem:[#allocation34_spill] sm:$0xff] %v26817_v26  ;;  %v5249_v52 = vcombine.high %v5225_v63, %v31328_v33  ;;  %v5316_v18 = vcombine.high %v5298_v53, %v31328_v33 }
 0x323   : > { %24309 = vmatprep.subr.msk.bf16.mxu1 %vm3502_vm2, %v5315_v16  ;;  %v7679_v6 = vshrl.u32 %v7656_v46, 16  ;;  %v7687_v1 = vshrl.u32 %v7657_v0, 16  ;;  %v26825_v35 = vpack.i.b16 %v7656_v46, %v7606_v43  ;;  %v26827_v60 = vpack.i.b16 %v7657_v0, %v7607_v25 }
 0x324   : > { %v5921_v47 = vsel %vm3502_vm2, %v5249_v52, 0  ;;  %v5232_v3 = vrot.slane %v5218_v36, %v25368_v49  ;;  %v5307_v51 = vrot.slane %v5299_v10, %v25368_v49  ;;  %v5241_v36 = vrot.slane %v5233_v31, %v25368_v49 }
 0x325   : > { %31373 = vst [vmem:[#allocation33_spill] sm:$0xff] %v26825_v35  ;;  %31374 = vst [vmem:[#allocation35_spill] sm:$0xff] %v26827_v60  ;;  %v26832_v48 = vpack.i.b16 %v7679_v6, %v7678_v21  ;;  %v26834_v58 = vpack.i.b16 %v7687_v1, %v7686_v37  ;;  %v5314_v10 = vrot.slane %v5300_v41, %v25368_v49 }
 0x326   : > { %v5250_v15 = vcombine.high %v5232_v3, %v31328_v33  ;;  %v5927_v24 = vsel %vm3502_vm2, %v5232_v3, 0  ;;  %v5317_v50 = vcombine.high %v5307_v51, %v31328_v33  ;;  %v5251_v7 = vcombine.high %v5241_v36, %v31328_v33 }
 0x327   : > { %24304 = vmatmul.mubr.msk.bf16.vlgmr.msra.gmra.mrb[76].mxu0 %vm3498_vm3, %v26668_v54  ;;  %31375 = vst [vmem:[#allocation26_spill] sm:$0xff] %v26832_v48  ;;  %31376 = vst [vmem:[#allocation27_spill] sm:$0xff] %v26834_v58  ;;  %v5939_v14 = vsel %vm3502_vm2, %v5241_v36, 0  ;;  %v5318_v39 = vcombine.high %v5314_v10, %v31328_v33  ;;  %v5248_v28 = vrot.slane %v5234_v5, %v25368_v49 }
 0x328   : > { %6291 = vmatpush1.bf16.msra.mxu0 %v5915_v2  ;;  %6322 = vmatprep.mubr.bf16.mxu0 %v31328_v33  ;;  %v5933_v34 = vsel %vm3502_vm2, %v5250_v15, 0  ;;  %v5945_v31 = vsel %vm3502_vm2, %v5251_v7, 0  ;;  %v3470_v5 = vcombine.high %v31348_v19, %v31348_v19 }
 0x329   : > { %24311 = vmatprep.subr.msk.bf16.mxu0 %vm3502_vm2, %v5298_v53  ;;  %24306 = vmatmul.mubr.msk.bf16.vlgmr.msra.gmra.mrb[92].mxu1 %vm3498_vm3, %v26668_v54  ;;  %v5252_v41 = vcombine.high %v5248_v28, %v31328_v33  ;;  %v5951_v23 = vsel %vm3502_vm2, %v5248_v28, 0 }
 0x32a   : > { %6332 = vmatpush1.bf16.msra.mxu1 %v5921_v47  ;;  %6363 = vmatprep.mubr.bf16.mxu1 %v31328_v33  ;;  %v3477_v42 = vrot.slane %v3470_v5, %v25351_v9 }
 0x32b   : > { %24313 = vmatprep.subr.msk.bf16.mxu1 %vm3502_vm2, %v5316_v18  ;;  %v5957_v62 = vsel %vm3502_vm2, %v5252_v41, 0 }
 0x32c   : > { %v3478_v40 = vcombine.low %v3477_v42, %v3477_v42  ;;  %v3479_v59 = vcombine.high %v3477_v42, %v3477_v42 }
 0x32e   : > { %v3486_v30 = vrot.slane %v3478_v40, %v25368_v49  ;;  %v3493_v43 = vrot.slane %v3479_v59, %v25368_v49 }
 0x32f   : > { %24308 = vmatmul.mubr.msk.bf16.vlgmr.msra.gmra.mrb[80].mxu0 %vm3498_vm3, %v26668_v54 }
 0x330   : > { %6373 = vmatpush1.bf16.msra.mxu0 %v5927_v24  ;;  %6404 = vmatprep.mubr.bf16.mxu0 %v31328_v33  ;;  %v26930_v0 = vcombine.low %v3486_v30, %v3486_v30  ;;  %v26934_v1 = vcombine.low %v3493_v43, %v3493_v43  ;;  %v26936_v2 = vcombine.high %v3486_v30, %v3486_v30 }
 0x331   : > { %24315 = vmatprep.subr.msk.bf16.mxu0 %vm3502_vm2, %v5307_v51  ;;  %24310 = vmatmul.mubr.msk.bf16.vlgmr.msra.gmra.mrb[96].mxu1 %vm3498_vm3, %v26668_v54  ;;  %v26941_v24 = vcombine.high %v3493_v43, %v3493_v43 }
 0x332   : > { %6414 = vmatpush1.bf16.msra.mxu1 %v5933_v34  ;;  %6445 = vmatprep.mubr.bf16.mxu1 %v31328_v33 }
 0x333   : > { %24317 = vmatprep.subr.msk.bf16.mxu1 %vm3502_vm2, %v5317_v50 }
 0x337   : > { %24312 = vmatmul.mubr.msk.bf16.vlgmr.msra.gmra.mrb[84].mxu0 %vm3498_vm3, %v26668_v54 }
 0x338   : > { %6455 = vmatpush1.bf16.msra.mxu0 %v5939_v14  ;;  %6486 = vmatprep.mubr.bf16.mxu0 %v31328_v33 }
 0x339   : > { %24319 = vmatprep.subr.msk.bf16.mxu0 %vm3502_vm2, %v5314_v10  ;;  %24314 = vmatmul.mubr.msk.bf16.vlgmr.msra.gmra.mrb[100].mxu1 %vm3498_vm3, %v26668_v54 }
 0x33a   : > { %6496 = vmatpush1.bf16.msra.mxu1 %v5945_v31  ;;  %6527 = vmatprep.mubr.bf16.mxu1 %v31328_v33 }
 0x33b   : > { %24321 = vmatprep.subr.msk.bf16.mxu1 %vm3502_vm2, %v5318_v39 }
 0x33f   : > { %24316 = vmatmul.mubr.msk.bf16.vlgmr.msra.gmra.mrb[88].mxu0 %vm3498_vm3, %v26668_v54 }
 0x340   : > { %6537 = vmatpush1.bf16.msra.mxu0 %v5951_v23  ;;  %6568 = vmatprep.mubr.bf16.mxu0 %v31328_v33 }
 0x341   : > { %7690 = vmatprep.subr.bf16.mxu0 %v26815_v61  ;;  %24318 = vmatmul.mubr.msk.bf16.vlgmr.msra.gmra.mrb[104].mxu1 %vm3498_vm3, %v26668_v54 }
 0x342   : > { %6578 = vmatpush1.bf16.msra.mxu1 %v5957_v62  ;;  %6609 = vmatprep.mubr.bf16.mxu1 %v31328_v33 }
 0x343   : > { %7743 = vmatprep.subr.bf16.mxu1 %v26817_v26 }
 0x347   : > { %24320 = vmatmul.mubr.msk.bf16.vlgmr.msra.gmra.mrb[92].mxu0 %vm3498_vm3, %v26668_v54 }
 0x348   : > { %7691 = vmatpush1.bf16.msra.mxu0 %v26805_v45  ;;  %7722 = vmatprep.mubr.bf16.mxu0 %v31328_v33 }
 0x349   : > { %7692 = vmatprep.subr.bf16.mxu0 %v26832_v48  ;;  %24322 = vmatmul.mubr.msk.bf16.vlgmr.msra.gmra.mrb[108].mxu1 %vm3498_vm3, %v26668_v54  ;;  %v25007_v54 = vld [vmem:[%s25340_s12 + $0x8] sm:$0xff]  }
 0x34a   : > { %7744 = vmatpush1.bf16.msra.mxu1 %v26812_v11  ;;  %7775 = vmatprep.mubr.bf16.mxu1 %v31328_v33 }
 0x34b   : > { %7745 = vmatprep.subr.bf16.mxu1 %v26834_v58 }
 0x34c   : > { %7693 = vmatpush1.bf16.msra.mxu0 %v26825_v35 }
 0x34e   : > { %7746 = vmatpush1.bf16.msra.mxu1 %v26827_v60 }
 0x34f   : > { %24331 = vmatmul.mubr.msk.bf16.vlgmr.msra.gmra.mrb[96].mxu0 %vm1592_vm1, %v25006_v4 }
 0x350   : > { %7732 = vmatprep.mubr.bf16.mxu0 %v31328_v33 }
 0x351   : > { %24333 = vmatmul.mubr.msk.bf16.vlgmr.msra.gmra.mrb[112].mxu1 %vm1592_vm1, %v25006_v4 }
 0x352   : > { %7785 = vmatprep.mubr.bf16.mxu1 %v31328_v33 }
 0x357   : > { %24332 = vmatmul.mubr.msk.bf16.gmra.mrb[100].mxu0 %vm1592_vm1, %v25007_v54 }
 0x358   : > { %8753 = vmatprep.mubr.bf16.mxu0 %v31328_v33 }
 0x359   : > { %24334 = vmatmul.mubr.msk.bf16.gmra.mrb[116].mxu1 %vm1592_vm1, %v25007_v54 }
 0x35a   : > { %8794 = vmatprep.mubr.bf16.mxu1 %v31328_v33 }
 0x3a2   : > { %v3633_v17 = vpop.f32.mrb[32].mxu0 }
 0x3a3   : > { %v3634_v44 = vadd.f32 %v3633_v17, %v31377_v22  ;;  %v3635_v20 = vpop.f32.mrb[33].mxu0 }
 0x3a4   : > { %v3674_v16 = vpop.f32.mrb[48].mxu1  ;;  %v3636_v63 = vadd.f32 %v3635_v20, %v25920_v12  ;;  %v3637_v55 = vpop.f32.mrb[34].mxu0 }
 0x3a5   : > { %v3675_v57 = vadd.f32 %v3674_v16, %v25918_v13  ;;  %v3676_v56 = vpop.f32.mrb[49].mxu1  ;;  %v3638_v32 = vpop.f32.mrb[35].mxu0 }
 0x3a6   : > { %v3677_v27 = vadd.f32 %v3676_v56, %v25922_v29  ;;  %v3678_v38 = vpop.f32.mrb[50].mxu1 }
 0x3a7   : > { %v4255_v25 = vcombine.low %v3634_v44, %v3675_v57  ;;  %v4256_v46 = vcombine.high %v3634_v44, %v3675_v57  ;;  %v3679_v21 = vpop.f32.mrb[51].mxu1 }
 0x3a8   : > { %v4271_v37 = vcombine.low %v3636_v63, %v3677_v27  ;;  %v4272_v53 = vcombine.high %v3636_v63, %v3677_v27 }
 0x3a9   : > { %v4263_v52 = vrot.slane %v4255_v25, %v25351_v9  ;;  %v4270_v6 = vrot.slane %v4256_v46, %v25351_v9 }
 0x3aa   : > { %v4279_v47 = vrot.slane %v4271_v37, %v25351_v9  ;;  %v4286_v18 = vrot.slane %v4272_v53, %v25351_v9  ;;  %v3715_v3 = vpop.f32.mrb[36].mxu0 }
 0x3ab   : > { %v3716_v51 = vadd.f32 %v3715_v3, %v26930_v0  ;;  %v3717_v15 = vpop.f32.mrb[37].mxu0 }
 0x3ac   : > { %v4319_v34 = vcombine.low %v4263_v52, %v4279_v47  ;;  %v4320_v50 = vcombine.high %v4263_v52, %v4279_v47  ;;  %v4335_v36 = vcombine.low %v4270_v6, %v4286_v18  ;;  %v4336_v10 = vcombine.high %v4270_v6, %v4286_v18  ;;  %v3756_v7 = vpop.f32.mrb[52].mxu1  ;;  %v3719_v14 = vpop.f32.mrb[38].mxu0 }
 0x3ad   : > { %v3757_v31 = vadd.f32 %v3756_v7, %v26934_v1  ;;  %v3718_v39 = vadd.f32 %v3717_v15, %v26936_v2  ;;  %v3758_v28 = vpop.f32.mrb[53].mxu1  ;;  %v3720_v41 = vpop.f32.mrb[39].mxu0 }
 0x3ae   : > { %v4327_v23 = vrot.slane %v4319_v34, %v25368_v49  ;;  %v4334_v62 = vrot.slane %v4320_v50, %v25368_v49  ;;  %v4343_v4 = vrot.slane %v4335_v36, %v25368_v49  ;;  %v4350_v54 = vrot.slane %v4336_v10, %v25368_v49  ;;  %v3760_v5 = vpop.f32.mrb[54].mxu1 }
 0x3af   : > { %v4287_v42 = vcombine.low %v3716_v51, %v3757_v31  ;;  %v4288_v40 = vcombine.high %v3716_v51, %v3757_v31  ;;  %v3759_v59 = vadd.f32 %v3758_v28, %v26941_v24  ;;  %v3761_v17 = vpop.f32.mrb[55].mxu1 }
 0x3b0   : > { %v24259_v44 = vcombine.low %v4327_v23, %v4334_v62  ;;  %v24261_v20 = vcombine.high %v4327_v23, %v4334_v62  ;;  %v24263_v30 = vcombine.low %v4343_v4, %v4350_v54  ;;  %v24265_v16 = vcombine.high %v4343_v4, %v4350_v54 }
 0x3b1   : > { %v4295_v63 = vrot.slane %v4287_v42, %v25351_v9  ;;  %v4302_v55 = vrot.slane %v4288_v40, %v25351_v9  ;;  %v4303_v57 = vcombine.low %v3718_v39, %v3759_v59  ;;  %v4304_v56 = vcombine.high %v3718_v39, %v3759_v59 }
 0x3b2   : > { %v3797_v32 = vpop.f32.mrb[40].mxu0  ;;  %v5327_v43 = vrot.slane %v24259_v44, %v25351_v9  ;;  %v5343_v27 = vrot.slane %v24261_v20, %v25351_v9  ;;  %v5359_v38 = vrot.slane %v24263_v30, %v25351_v9  ;;  %v5375_v25 = vrot.slane %v24265_v16, %v25351_v9 }
 0x3b3   : > { %v4311_v46 = vrot.slane %v4303_v57, %v25351_v9  ;;  %v4318_v21 = vrot.slane %v4304_v56, %v25351_v9  ;;  %v3798_v37 = vadd.f32 %v3797_v32, %v31377_v22  ;;  %v3799_v53 = vpop.f32.mrb[41].mxu0 }
 0x3b4   : > { %v3838_v52 = vpop.f32.mrb[56].mxu1  ;;  %v3800_v6 = vadd.f32 %v3799_v53, %v25920_v12  ;;  %v3801_v47 = vpop.f32.mrb[42].mxu0  ;;  %v5383_v18 = vcombine.low %v5327_v43, %v5343_v27  ;;  %v5415_v3 = vcombine.low %v5359_v38, %v5375_v25  ;;  %v5384_v51 = vcombine.high %v5327_v43, %v5343_v27 }
 0x3b5   : > { %v4351_v15 = vcombine.low %v4295_v63, %v4311_v46  ;;  %v4352_v34 = vcombine.high %v4295_v63, %v4311_v46  ;;  %v4367_v50 = vcombine.low %v4302_v55, %v4318_v21  ;;  %v4368_v36 = vcombine.high %v4302_v55, %v4318_v21  ;;  %v3840_v10 = vpop.f32.mrb[57].mxu1  ;;  %v3802_v7 = vpop.f32.mrb[43].mxu0 }
 0x3b6   : > { %v3839_v14 = vadd.f32 %v3838_v52, %v25918_v13  ;;  %v3841_v31 = vadd.f32 %v3840_v10, %v25922_v29  ;;  %v3842_v39 = vpop.f32.mrb[58].mxu1  ;;  %v26963_v28 = vrot.slane %v5383_v18, %v25368_v49  ;;  %v26966_v41 = vrot.slane %v5415_v3, %v25368_v49 }
 0x3b7   : > { %v4359_v23 = vrot.slane %v4351_v15, %v25368_v49  ;;  %v4366_v62 = vrot.slane %v4352_v34, %v25368_v49  ;;  %v4375_v4 = vrot.slane %v4367_v50, %v25368_v49  ;;  %v4382_v54 = vrot.slane %v4368_v36, %v25368_v49  ;;  %v3843_v5 = vpop.f32.mrb[59].mxu1 }
 0x3b8   : > { %v4391_v42 = vcombine.low %v3798_v37, %v3839_v14  ;;  %v4392_v40 = vcombine.high %v3798_v37, %v3839_v14  ;;  %v4407_v59 = vcombine.low %v3800_v6, %v3841_v31  ;;  %v4408_v17 = vcombine.high %v3800_v6, %v3841_v31 }
 0x3b9   : > { %v26977_v30 = vrot.slane %v5384_v51, %v25368_v49  ;;  %v5416_v16 = vcombine.high %v5359_v38, %v5375_v25  ;;  %v24260_v21 = vcombine.low %v4359_v23, %v4366_v62  ;;  %v24262_v37 = vcombine.high %v4359_v23, %v4366_v62 }
 0x3ba   : > { %v4399_v63 = vrot.slane %v4391_v42, %v25351_v9  ;;  %v4406_v55 = vrot.slane %v4392_v40, %v25351_v9  ;;  %v4415_v57 = vrot.slane %v4407_v59, %v25351_v9  ;;  %v4422_v56 = vrot.slane %v4408_v17, %v25351_v9  ;;  %v3879_v32 = vpop.f32.mrb[44].mxu0 }
 0x3bb   : > { %v3880_v43 = vadd.f32 %v3879_v32, %v26930_v0  ;;  %v3881_v27 = vpop.f32.mrb[45].mxu0  ;;  %v26985_v46 = vrot.slane %v5416_v16, %v25368_v49  ;;  %v5334_v42 = vrot.slane %v24260_v21, %v25351_v9  ;;  %v5350_v40 = vrot.slane %v24262_v37, %v25351_v9 }
 0x3bc   : > { %v4455_v53 = vcombine.low %v4399_v63, %v4415_v57  ;;  %v4456_v52 = vcombine.high %v4399_v63, %v4415_v57  ;;  %v4471_v38 = vcombine.low %v4406_v55, %v4422_v56  ;;  %v4472_v25 = vcombine.high %v4406_v55, %v4422_v56  ;;  %v3920_v6 = vpop.f32.mrb[60].mxu1  ;;  %v3883_v47 = vpop.f32.mrb[46].mxu0 }
 0x3bd   : > { %v3921_v18 = vadd.f32 %v3920_v6, %v26934_v1  ;;  %v3882_v3 = vadd.f32 %v3881_v27, %v26936_v2  ;;  %v3922_v51 = vpop.f32.mrb[61].mxu1  ;;  %v3884_v15 = vpop.f32.mrb[47].mxu0  ;;  %v24264_v59 = vcombine.low %v4375_v4, %v4382_v54  ;;  %v24266_v17 = vcombine.high %v4375_v4, %v4382_v54 }
 0x3be   : > { %v26994_v36 = vrot.slane %v4455_v53, %v25368_v49  ;;  %v26997_v10 = vrot.slane %v4456_v52, %v25368_v49  ;;  %v27000_v7 = vrot.slane %v4471_v38, %v25368_v49  ;;  %v27003_v14 = vrot.slane %v4472_v25, %v25368_v49  ;;  %v3924_v31 = vpop.f32.mrb[62].mxu1 }
 0x3bf   : > { %v4423_v39 = vcombine.low %v3880_v43, %v3921_v18  ;;  %v4424_v23 = vcombine.high %v3880_v43, %v3921_v18  ;;  %v3923_v62 = vadd.f32 %v3922_v51, %v26941_v24  ;;  %v3925_v5 = vpop.f32.mrb[63].mxu1  ;;  %v5366_v43 = vrot.slane %v24264_v59, %v25351_v9 }
 0x3c0   : > { %v24267_v16 = vcombine.low %v26994_v36, %v26997_v10  ;;  %v5382_v27 = vrot.slane %v24266_v17, %v25351_v9  ;;  %v5399_v53 = vcombine.low %v5334_v42, %v5350_v40  ;;  %v5400_v21 = vcombine.high %v5334_v42, %v5350_v40 }
 0x3c1   : > { %v4431_v63 = vrot.slane %v4423_v39, %v25351_v9  ;;  %v4438_v55 = vrot.slane %v4424_v23, %v25351_v9  ;;  %v4439_v57 = vcombine.low %v3882_v3, %v3923_v62  ;;  %v4440_v56 = vcombine.high %v3882_v3, %v3923_v62 }
 0x3c2   : > { %v3961_v32 = vpop.f32.mrb[48].mxu0  ;;  %v27018_v38 = vrot.slane %v24267_v16, %v25351_v9  ;;  %v27022_v18 = vrot.slane %v5399_v53, %v25368_v49  ;;  %v5431_v3 = vcombine.low %v5366_v43, %v5382_v27  ;;  %v27025_v51 = vrot.slane %v5400_v21, %v25368_v49 }
 0x3c3   : > { %v4447_v37 = vrot.slane %v4439_v57, %v25351_v9  ;;  %v4454_v4 = vrot.slane %v4440_v56, %v25351_v9  ;;  %v3962_v54 = vadd.f32 %v3961_v32, %v31377_v22  ;;  %v3963_v52 = vpop.f32.mrb[49].mxu0  ;;  %v5432_v16 = vcombine.high %v5366_v43, %v5382_v27 }
 0x3c4   : > { %v4002_v25 = vpop.f32.mrb[64].mxu1  ;;  %v3964_v6 = vadd.f32 %v3963_v52, %v25920_v12  ;;  %v3965_v47 = vpop.f32.mrb[50].mxu0  ;;  %v27030_v17 = vrot.slane %v5431_v3, %v25368_v49 }
 0x3c5   : > { %v4487_v15 = vcombine.low %v4431_v63, %v4447_v37  ;;  %v4488_v31 = vcombine.high %v4431_v63, %v4447_v37  ;;  %v4503_v39 = vcombine.low %v4438_v55, %v4454_v4  ;;  %v4504_v23 = vcombine.high %v4438_v55, %v4454_v4  ;;  %v4004_v62 = vpop.f32.mrb[65].mxu1  ;;  %v3966_v5 = vpop.f32.mrb[51].mxu0 }
 0x3c6   : > { %v4003_v42 = vadd.f32 %v4002_v25, %v25918_v13  ;;  %v4005_v40 = vadd.f32 %v4004_v62, %v25922_v29  ;;  %v4006_v59 = vpop.f32.mrb[66].mxu1  ;;  %v27049_v52 = vrot.slane %v5432_v16, %v25368_v49  ;;  %v24269_v25 = vcombine.high %v26994_v36, %v26997_v10 }
 0x3c7   : > { %v27033_v57 = vrot.slane %v4487_v15, %v25368_v49  ;;  %v27036_v56 = vrot.slane %v4488_v31, %v25368_v49  ;;  %v27039_v63 = vrot.slane %v4503_v39, %v25368_v49  ;;  %v27042_v55 = vrot.slane %v4504_v23, %v25368_v49  ;;  %v4007_v32 = vpop.f32.mrb[67].mxu1 }
 0x3c8   : > { %v4527_v53 = vcombine.low %v3962_v54, %v4003_v42  ;;  %v4528_v21 = vcombine.high %v3962_v54, %v4003_v42  ;;  %v4543_v37 = vcombine.low %v3964_v6, %v4005_v40  ;;  %v4544_v4 = vcombine.high %v3964_v6, %v4005_v40 }
 0x3c9   : > { %v5479_v36 = vrot.slane %v24269_v25, %v25351_v9 }
 0x3ca   : > { %v4535_v47 = vrot.slane %v4527_v53, %v25351_v9  ;;  %v4542_v3 = vrot.slane %v4528_v21, %v25351_v9  ;;  %v4551_v54 = vrot.slane %v4543_v37, %v25351_v9  ;;  %v4558_v6 = vrot.slane %v4544_v4, %v25351_v9  ;;  %v4043_v15 = vpop.f32.mrb[52].mxu0 }
 0x3cb   : > { %v4044_v31 = vadd.f32 %v4043_v15, %v26930_v0  ;;  %v4045_v39 = vpop.f32.mrb[53].mxu0  ;;  %v24271_v4 = vcombine.low %v27000_v7, %v27003_v14  ;;  %v24273_v15 = vcombine.high %v27000_v7, %v27003_v14 }
 0x3cc   : > { %v4591_v10 = vcombine.low %v4535_v47, %v4551_v54  ;;  %v4592_v5 = vcombine.high %v4535_v47, %v4551_v54  ;;  %v4607_v42 = vcombine.low %v4542_v3, %v4558_v6  ;;  %v4608_v40 = vcombine.high %v4542_v3, %v4558_v6  ;;  %v4084_v59 = vpop.f32.mrb[68].mxu1  ;;  %v4047_v16 = vpop.f32.mrb[54].mxu0 }
 0x3cd   : > { %v4046_v32 = vadd.f32 %v4045_v39, %v26936_v2  ;;  %v4085_v53 = vadd.f32 %v4084_v59, %v26934_v1  ;;  %v4086_v21 = vpop.f32.mrb[69].mxu1  ;;  %v4048_v37 = vpop.f32.mrb[55].mxu0  ;;  %v5495_v7 = vrot.slane %v24271_v4, %v25351_v9  ;;  %v5511_v14 = vrot.slane %v24273_v15, %v25351_v9 }
 0x3ce   : > { %v27070_v25 = vrot.slane %v4591_v10, %v25368_v49  ;;  %v27073_v47 = vrot.slane %v4592_v5, %v25368_v49  ;;  %v27076_v3 = vrot.slane %v4607_v42, %v25368_v49  ;;  %v27079_v54 = vrot.slane %v4608_v40, %v25368_v49  ;;  %v4088_v6 = vpop.f32.mrb[70].mxu1 }
 0x3cf   : > { %v4559_v39 = vcombine.low %v4044_v31, %v4085_v53  ;;  %v4560_v59 = vcombine.high %v4044_v31, %v4085_v53  ;;  %v4087_v16 = vadd.f32 %v4086_v21, %v26941_v24  ;;  %v4089_v37 = vpop.f32.mrb[71].mxu1  ;;  %v5519_v10 = vcombine.low %v27018_v38, %v5479_v36 }
 0x3d0   : > { %v5520_v5 = vcombine.high %v27018_v38, %v5479_v36  ;;  %v24268_v42 = vcombine.low %v27033_v57, %v27036_v56  ;;  %v5551_v4 = vcombine.low %v5495_v7, %v5511_v14  ;;  %v5552_v37 = vcombine.high %v5495_v7, %v5511_v14 }
 0x3d1   : > { %v4567_v40 = vrot.slane %v4559_v39, %v25351_v9  ;;  %v4574_v6 = vrot.slane %v4560_v59, %v25351_v9  ;;  %v4575_v62 = vcombine.low %v4046_v32, %v4087_v16  ;;  %v4576_v31 = vcombine.high %v4046_v32, %v4087_v16 }
 0x3d2   : > { %v4125_v53 = vpop.f32.mrb[56].mxu0  ;;  %v27091_v21 = vrot.slane %v5519_v10, %v25368_v49  ;;  %v27094_v15 = vrot.slane %v5520_v5, %v25368_v49  ;;  %v27100_v59 = vrot.slane %v24268_v42, %v25351_v9  ;;  %v27104_v27 = vrot.slane %v5551_v4, %v25368_v49 }
 0x3d3   : > { %v4583_v38 = vrot.slane %v4575_v62, %v25351_v9  ;;  %v4590_v36 = vrot.slane %v4576_v31, %v25351_v9  ;;  %v4126_v23 = vadd.f32 %v4125_v53, %v31377_v22  ;;  %v4127_v39 = vpop.f32.mrb[57].mxu0  ;;  %v27107_v5 = vrot.slane %v5552_v37, %v25368_v49 }
 0x3d4   : > { %v4128_v32 = vadd.f32 %v4127_v39, %v25920_v12  ;;  %v4129_v16 = vpop.f32.mrb[58].mxu0  ;;  %v4166_v10 = vpop.f32.mrb[72].mxu1  ;;  %v24270_v62 = vcombine.high %v27033_v57, %v27036_v56 }
 0x3d5   : > { %v4623_v7 = vcombine.low %v4567_v40, %v4583_v38  ;;  %v4624_v14 = vcombine.high %v4567_v40, %v4583_v38  ;;  %v4639_v31 = vcombine.low %v4574_v6, %v4590_v36  ;;  %v4640_v53 = vcombine.high %v4574_v6, %v4590_v36  ;;  %v4130_v43 = vpop.f32.mrb[59].mxu0  ;;  %v4168_v42 = vpop.f32.mrb[73].mxu1 }
 0x3d6   : > { %v4167_v50 = vadd.f32 %v4166_v10, %v25918_v13  ;;  %v4169_v39 = vadd.f32 %v4168_v42, %v25922_v29  ;;  %v4170_v16 = vpop.f32.mrb[74].mxu1 }
 0x3d7   : > { %v27118_v34 = vrot.slane %v4623_v7, %v25368_v49  ;;  %v27121_v57 = vrot.slane %v4624_v14, %v25368_v49  ;;  %v27124_v56 = vrot.slane %v4639_v31, %v25368_v49  ;;  %v27127_v43 = vrot.slane %v4640_v53, %v25368_v49  ;;  %v4171_v40 = vpop.f32.mrb[75].mxu1 }
 0x3d8   : > { %v4663_v6 = vcombine.low %v4126_v23, %v4167_v50  ;;  %v4664_v38 = vcombine.high %v4126_v23, %v4167_v50  ;;  %v4679_v36 = vcombine.low %v4128_v32, %v4169_v39  ;;  %v4680_v10 = vcombine.high %v4128_v32, %v4169_v39 }
 0x3d9   : > { %v5486_v14 = vrot.slane %v24270_v62, %v25351_v9  ;;  %v24272_v31 = vcombine.low %v27039_v63, %v27042_v55  ;;  %v24274_v62 = vcombine.high %v27039_v63, %v27042_v55 }
 0x3da   : > { %v4671_v16 = vrot.slane %v4663_v6, %v25351_v9  ;;  %v4678_v53 = vrot.slane %v4664_v38, %v25351_v9  ;;  %v4687_v40 = vrot.slane %v4679_v36, %v25351_v9  ;;  %v4694_v50 = vrot.slane %v4680_v10, %v25351_v9  ;;  %v4207_v23 = vpop.f32.mrb[60].mxu0 }
 0x3db   : > { %v4208_v32 = vadd.f32 %v4207_v23, %v26930_v0  ;;  %v4209_v39 = vpop.f32.mrb[61].mxu0  ;;  %v5502_v42 = vrot.slane %v24272_v31, %v25351_v9  ;;  %v5535_v7 = vcombine.low %v27100_v59, %v5486_v14  ;;  %v5518_v35 = vrot.slane %v24274_v62, %v25351_v9 }
 0x3dc   : > { %v4727_v37 = vcombine.low %v4671_v16, %v4687_v40  ;;  %v4728_v4 = vcombine.high %v4671_v16, %v4687_v40  ;;  %v4743_v6 = vcombine.low %v4678_v53, %v4694_v50  ;;  %v4744_v20 = vcombine.high %v4678_v53, %v4694_v50  ;;  %v4211_v38 = vpop.f32.mrb[62].mxu0  ;;  %v4248_v44 = vpop.f32.mrb[76].mxu1 }
 0x3dd   : > { %v4210_v36 = vadd.f32 %v4209_v39, %v26936_v2  ;;  %v4249_v10 = vadd.f32 %v4248_v44, %v26934_v1  ;;  %v4212_v60 = vpop.f32.mrb[63].mxu0  ;;  %v4250_v23 = vpop.f32.mrb[77].mxu1  ;;  %v27149_v31 = vrot.slane %v5535_v7, %v25368_v49  ;;  %v5567_v7 = vcombine.low %v5502_v42, %v5518_v35 }
 0x3de   : > { %v27152_v63 = vrot.slane %v4727_v37, %v25368_v49  ;;  %v27155_v55 = vrot.slane %v4728_v4, %v25368_v49  ;;  %v27158_v16 = vrot.slane %v4743_v6, %v25368_v49  ;;  %v27161_v53 = vrot.slane %v4744_v20, %v25368_v49  ;;  %v4252_v44 = vpop.f32.mrb[78].mxu1 }
 0x3df   : > { %v4695_v60 = vcombine.low %v4208_v32, %v4249_v10  ;;  %v4696_v40 = vcombine.high %v4208_v32, %v4249_v10  ;;  %v4251_v50 = vadd.f32 %v4250_v23, %v26941_v24  ;;  %v4253_v39 = vpop.f32.mrb[79].mxu1  ;;  %v5536_v62 = vcombine.high %v27100_v59, %v5486_v14 }
 0x3e0   : > { %v5568_v37 = vcombine.high %v5502_v42, %v5518_v35  ;;  %v24275_v4 = vcombine.low %v27070_v25, %v27073_v47  ;;  %v24277_v6 = vcombine.high %v27070_v25, %v27073_v47  ;;  %v27172_v10 = vrot.slane %v5567_v7, %v25368_v49 }
 0x3e1   : > { %v4703_v38 = vrot.slane %v4695_v60, %v25351_v9  ;;  %v4710_v20 = vrot.slane %v4696_v40, %v25351_v9  ;;  %v4711_v44 = vcombine.low %v4210_v36, %v4251_v50  ;;  %v4712_v58 = vcombine.high %v4210_v36, %v4251_v50 }
 0x3e2   : > { %v5996_v32 = vpop.f32.mrb[64].mxu0  ;;  %v27175_v23 = vrot.slane %v5536_v62, %v25368_v49  ;;  %v27178_v35 = vrot.slane %v5568_v37, %v25368_v49  ;;  %v5599_v59 = vrot.slane %v24275_v4, %v25351_v9  ;;  %v31378_v42 = vcombine.low %v26963_v28, %v26966_v41 }
 0x3e3   : > { %v4719_v25 = vrot.slane %v4711_v44, %v25351_v9  ;;  %v4726_v47 = vrot.slane %v4712_v58, %v25351_v9  ;;  %v5998_v36 = vpop.f32.mrb[65].mxu0  ;;  %v5615_v60 = vrot.slane %v24277_v6, %v25351_v9  ;;  %v31379_v40 = vcombine.high %v26963_v28, %v26966_v41 }
 0x3e4   : > { %v5997_v14 = vadd.f32 %v5996_v32, %v31378_v42  ;;  %v6037_v39 = vpop.f32.mrb[80].mxu1  ;;  %v6000_v7 = vpop.f32.mrb[66].mxu0  ;;  %v31380_v28 = vcombine.low %v26977_v30, %v26985_v46  ;;  %v24279_v58 = vcombine.low %v27076_v3, %v27079_v54 }
 0x3e5   : > { %v5999_v50 = vadd.f32 %v5998_v36, %v31379_v40  ;;  %v4759_v4 = vcombine.low %v4703_v38, %v4719_v25  ;;  %v4760_v44 = vcombine.high %v4703_v38, %v4719_v25  ;;  %v4775_v32 = vcombine.low %v4710_v20, %v4726_v47  ;;  %v6039_v6 = vpop.f32.mrb[81].mxu1  ;;  %v6001_v11 = vpop.f32.mrb[67].mxu0 }
 0x3e6   : > { %v4776_v42 = vcombine.high %v4710_v20, %v4726_v47  ;;  %v6038_v41 = vadd.f32 %v6037_v39, %v31380_v28  ;;  %v31381_v36 = vcombine.high %v26977_v30, %v26985_v46  ;;  %v6041_v7 = vpop.f32.mrb[82].mxu1  ;;  %v5631_v28 = vrot.slane %v24279_v58, %v25351_v9 }
 0x3e7   : > { %v27207_v38 = vrot.slane %v4759_v4, %v25368_v49  ;;  %v27210_v11 = vrot.slane %v4760_v44, %v25368_v49  ;;  %v27213_v20 = vrot.slane %v4775_v32, %v25368_v49  ;;  %v6042_v30 = vpop.f32.mrb[83].mxu1  ;;  %v24281_v4 = vcombine.high %v27076_v3, %v27079_v54 }
 0x3e8   : > { %v6040_v40 = vadd.f32 %v6039_v6, %v31381_v36  ;;  %v27216_v25 = vrot.slane %v4776_v42, %v25368_v49  ;;  %v6618_v46 = vcombine.low %v5997_v14, %v6038_v41  ;;  %v6619_v47 = vcombine.high %v5997_v14, %v6038_v41 }
 0x3e9   : > { %v5655_v36 = vcombine.low %v5599_v59, %v5615_v60  ;;  %v5656_v7 = vcombine.high %v5599_v59, %v5615_v60  ;;  %v31382_v14 = vcombine.low %v27022_v18, %v27030_v17  ;;  %v5647_v58 = vrot.slane %v24281_v4, %v25351_v9 }
 0x3ea   : > { %v6634_v39 = vcombine.low %v5999_v50, %v6040_v40  ;;  %v6635_v6 = vcombine.high %v5999_v50, %v6040_v40  ;;  %v6626_v44 = vrot.slane %v6618_v46, %v25351_v9  ;;  %v6633_v32 = vrot.slane %v6619_v47, %v25351_v9  ;;  %v6078_v30 = vpop.f32.mrb[68].mxu0 }
 0x3eb   : > { %v6079_v50 = vadd.f32 %v6078_v30, %v31382_v14  ;;  %v6080_v41 = vpop.f32.mrb[69].mxu0  ;;  %v27230_v3 = vrot.slane %v5655_v36, %v25368_v49  ;;  %v27233_v54 = vrot.slane %v5656_v7, %v25368_v49  ;;  %v31384_v30 = vcombine.low %v27025_v51, %v27049_v52 }
 0x3ec   : > { %v6642_v37 = vrot.slane %v6634_v39, %v25351_v9  ;;  %v6649_v42 = vrot.slane %v6635_v6, %v25351_v9  ;;  %v6119_v47 = vpop.f32.mrb[84].mxu1  ;;  %v6082_v39 = vpop.f32.mrb[70].mxu0  ;;  %v31383_v6 = vcombine.high %v27022_v18, %v27030_v17  ;;  %v5687_v48 = vcombine.low %v5631_v28, %v5647_v58 }
 0x3ed   : > { %v6120_v4 = vadd.f32 %v6119_v47, %v31384_v30  ;;  %v6121_v14 = vpop.f32.mrb[85].mxu1  ;;  %v6083_v36 = vpop.f32.mrb[71].mxu0  ;;  %v5688_v45 = vcombine.high %v5631_v28, %v5647_v58 }
 0x3ee   : > { %v6682_v59 = vcombine.low %v6626_v44, %v6642_v37  ;;  %v6683_v60 = vcombine.high %v6626_v44, %v6642_v37  ;;  %v6698_v40 = vcombine.low %v6633_v32, %v6649_v42  ;;  %v6699_v46 = vcombine.high %v6633_v32, %v6649_v42  ;;  %v6123_v17 = vpop.f32.mrb[86].mxu1 }
 0x3ef   : > { %v6081_v62 = vadd.f32 %v6080_v41, %v31383_v6  ;;  %v6650_v32 = vcombine.low %v6079_v50, %v6120_v4  ;;  %v6651_v42 = vcombine.high %v6079_v50, %v6120_v4  ;;  %v31385_v41 = vcombine.high %v27025_v51, %v27049_v52  ;;  %v6124_v28 = vpop.f32.mrb[87].mxu1 }
 0x3f0   : > { %v27242_v7 = vrot.slane %v6682_v59, %v25368_v49  ;;  %v27245_v37 = vrot.slane %v6683_v60, %v25368_v49  ;;  %v27248_v44 = vrot.slane %v6698_v40, %v25368_v49  ;;  %v27251_v18 = vrot.slane %v6699_v46, %v25368_v49 }
 0x3f1   : > { %v6122_v47 = vadd.f32 %v6121_v14, %v31385_v41  ;;  %v27257_v58 = vrot.slane %v5687_v48, %v25368_v49  ;;  %v27260_v59 = vrot.slane %v5688_v45, %v25368_v49  ;;  %v24276_v60 = vcombine.low %v27118_v34, %v27121_v57 }
 0x3f2   : > { %v24278_v40 = vcombine.high %v27118_v34, %v27121_v57  ;;  %v24280_v50 = vcombine.low %v27124_v56, %v27127_v43  ;;  %v6658_v46 = vrot.slane %v6650_v32, %v25351_v9  ;;  %v6665_v51 = vrot.slane %v6651_v42, %v25351_v9  ;;  %v6160_v48 = vpop.f32.mrb[72].mxu0 }
 0x3f3   : > { %v6666_v52 = vcombine.low %v6081_v62, %v6122_v47  ;;  %v6667_v39 = vcombine.high %v6081_v62, %v6122_v47  ;;  %v31386_v62 = vcombine.low %v27091_v21, %v27104_v27  ;;  %v6162_v36 = vpop.f32.mrb[73].mxu0  ;;  %v27284_v17 = vrot.slane %v24276_v60, %v25351_v9 }
 0x3f4   : > { %v31387_v32 = vcombine.high %v27091_v21, %v27104_v27  ;;  %v6201_v41 = vpop.f32.mrb[88].mxu1  ;;  %v6164_v47 = vpop.f32.mrb[74].mxu0  ;;  %v27290_v28 = vrot.slane %v24278_v40, %v25351_v9  ;;  %v31388_v27 = vcombine.low %v27094_v15, %v27107_v5  ;;  %v31389_v40 = vcombine.high %v27094_v15, %v27107_v5 }
 0x3f5   : > { %v6674_v57 = vrot.slane %v6666_v52, %v25351_v9  ;;  %v6681_v4 = vrot.slane %v6667_v39, %v25351_v9  ;;  %v6161_v14 = vadd.f32 %v6160_v48, %v31386_v62  ;;  %v27293_v52 = vrot.slane %v24280_v50, %v25351_v9  ;;  %v6203_v30 = vpop.f32.mrb[89].mxu1  ;;  %v6165_v6 = vpop.f32.mrb[75].mxu0 }
 0x3f6   : > { %v6163_v42 = vadd.f32 %v6162_v36, %v31387_v32  ;;  %v24282_v39 = vcombine.high %v27124_v56, %v27127_v43  ;;  %v6202_v21 = vadd.f32 %v6201_v41, %v31388_v27  ;;  %v6204_v36 = vadd.f32 %v6203_v30, %v31389_v40  ;;  %v6205_v32 = vpop.f32.mrb[90].mxu1 }
 0x3f7   : > { %v6714_v48 = vcombine.low %v6658_v46, %v6674_v57  ;;  %v6715_v62 = vcombine.high %v6658_v46, %v6674_v57  ;;  %v6730_v34 = vcombine.low %v6665_v51, %v6681_v4  ;;  %v6731_v60 = vcombine.high %v6665_v51, %v6681_v4  ;;  %v6206_v15 = vpop.f32.mrb[91].mxu1 }
 0x3f8   : > { %v27304_v50 = vrot.slane %v24282_v39, %v25351_v9  ;;  %v5671_v56 = vcombine.low %v27284_v17, %v27290_v28  ;;  %v6754_v5 = vcombine.low %v6161_v14, %v6202_v21  ;;  %v6755_v30 = vcombine.high %v6161_v14, %v6202_v21 }
 0x3f9   : > { %v27309_v43 = vrot.slane %v6714_v48, %v25368_v49  ;;  %v27312_v46 = vrot.slane %v6715_v62, %v25368_v49  ;;  %v27315_v51 = vrot.slane %v6730_v34, %v25368_v49  ;;  %v27318_v6 = vrot.slane %v6731_v60, %v25368_v49 }
 0x3fa   : > { %v6770_v57 = vcombine.low %v6163_v42, %v6204_v36  ;;  %v6771_v4 = vcombine.high %v6163_v42, %v6204_v36  ;;  %v6242_v60 = vpop.f32.mrb[76].mxu0  ;;  %v6762_v27 = vrot.slane %v6754_v5, %v25351_v9  ;;  %v6769_v21 = vrot.slane %v6755_v30, %v25351_v9 }
 0x3fb   : > { %v6244_v32 = vpop.f32.mrb[77].mxu0  ;;  %v31390_v15 = vcombine.low %v27149_v31, %v27172_v10  ;;  %v31391_v42 = vcombine.high %v27149_v31, %v27172_v10  ;;  %v27347_v39 = vrot.slane %v5671_v56, %v25368_v49  ;;  %v5703_v5 = vcombine.low %v27293_v52, %v27304_v50 }
 0x3fc   : > { %v6778_v40 = vrot.slane %v6770_v57, %v25351_v9  ;;  %v6785_v36 = vrot.slane %v6771_v4, %v25351_v9  ;;  %v6283_v34 = vpop.f32.mrb[92].mxu1  ;;  %v6246_v62 = vpop.f32.mrb[78].mxu0  ;;  %v31393_v31 = vcombine.high %v27175_v23, %v27178_v35 }
 0x3fd   : > { %v6243_v14 = vadd.f32 %v6242_v60, %v31390_v15  ;;  %v6245_v48 = vadd.f32 %v6244_v32, %v31391_v42  ;;  %v6285_v41 = vpop.f32.mrb[93].mxu1  ;;  %v6247_v45 = vpop.f32.mrb[79].mxu0  ;;  %v31392_v60 = vcombine.low %v27175_v23, %v27178_v35  ;;  %v27358_v56 = vrot.slane %v5703_v5, %v25368_v49 }
 0x3fe   : > { %v6818_v30 = vcombine.low %v6762_v27, %v6778_v40  ;;  %v6819_v57 = vcombine.high %v6762_v27, %v6778_v40  ;;  %v6834_v4 = vcombine.low %v6769_v21, %v6785_v36  ;;  %v6835_v47 = vcombine.high %v6769_v21, %v6785_v36  ;;  %v6287_v42 = vpop.f32.mrb[94].mxu1 }
 0x3ff   : > { %v6284_v15 = vadd.f32 %v6283_v34, %v31392_v60  ;;  %v6286_v10 = vadd.f32 %v6285_v41, %v31393_v31  ;;  %v5672_v62 = vcombine.high %v27284_v17, %v27290_v28  ;;  %v6288_v23 = vpop.f32.mrb[95].mxu1  ;;  %v5723_v17 = vcombine.low %v27347_v39, %v27358_v56 }
 0x400   : > { %v27363_v27 = vrot.slane %v6818_v30, %v25368_v49  ;;  %v27366_v45 = vrot.slane %v6819_v57, %v25368_v49  ;;  %v27369_v21 = vrot.slane %v6834_v4, %v25368_v49  ;;  %v27372_v34 = vrot.slane %v6835_v47, %v25368_v49 }
 0x401   : > { %v6786_v35 = vcombine.low %v6243_v14, %v6284_v15  ;;  %v6787_v41 = vcombine.high %v6243_v14, %v6284_v15  ;;  %v6802_v40 = vcombine.low %v6245_v48, %v6286_v10  ;;  %v6803_v36 = vcombine.high %v6245_v48, %v6286_v10 }
 0x402   : > { %v5724_v28 = vcombine.high %v27347_v39, %v27358_v56  ;;  %v27379_v32 = vrot.slane %v5672_v62, %v25368_v49  ;;  %v5704_v5 = vcombine.high %v27293_v52, %v27304_v50  ;;  %v6324_v57 = vpop.f32.mrb[80].mxu0  ;;  %v31394_v4 = vcombine.low %v27230_v3, %v27257_v58 }
 0x403   : > { %v6794_v47 = vrot.slane %v6786_v35, %v25351_v9  ;;  %v6801_v30 = vrot.slane %v6787_v41, %v25351_v9  ;;  %v6810_v14 = vrot.slane %v6802_v40, %v25351_v9  ;;  %v6817_v48 = vrot.slane %v6803_v36, %v25351_v9  ;;  %v6326_v39 = vpop.f32.mrb[81].mxu0 }
 0x404   : > { %v6325_v60 = vadd.f32 %v6324_v57, %v31394_v4  ;;  %v27391_v15 = vrot.slane %v5704_v5, %v25368_v49  ;;  %v24283_v52 = vcombine.low %v27152_v63, %v27155_v55  ;;  %v24285_v50 = vcombine.high %v27152_v63, %v27155_v55  ;;  %v6365_v62 = vpop.f32.mrb[96].mxu1  ;;  %v6328_v23 = vpop.f32.mrb[82].mxu0 }
 0x405   : > { %v6850_v31 = vcombine.low %v6794_v47, %v6810_v14  ;;  %v6851_v10 = vcombine.high %v6794_v47, %v6810_v14  ;;  %v6866_v42 = vcombine.low %v6801_v30, %v6817_v48  ;;  %v6867_v56 = vcombine.high %v6801_v30, %v6817_v48  ;;  %v6367_v5 = vpop.f32.mrb[97].mxu1  ;;  %v6329_v57 = vpop.f32.mrb[83].mxu0 }
 0x406   : > { %v31395_v35 = vcombine.high %v27230_v3, %v27257_v58  ;;  %v31396_v40 = vcombine.low %v27233_v54, %v27260_v59  ;;  %v5725_v4 = vcombine.low %v27379_v32, %v27391_v15  ;;  %v5726_v63 = vcombine.high %v27379_v32, %v27391_v15  ;;  %v6369_v30 = vpop.f32.mrb[98].mxu1 }
 0x407   : > { %v27408_v55 = vrot.slane %v6850_v31, %v25368_v49  ;;  %v27411_v47 = vrot.slane %v6851_v10, %v25368_v49  ;;  %v27414_v3 = vrot.slane %v6866_v42, %v25368_v49  ;;  %v27417_v58 = vrot.slane %v6867_v56, %v25368_v49  ;;  %v6370_v32 = vpop.f32.mrb[99].mxu1 }
 0x408   : > { %v6327_v41 = vadd.f32 %v6326_v39, %v31395_v35  ;;  %v6366_v36 = vadd.f32 %v6365_v62, %v31396_v40  ;;  %v31397_v39 = vcombine.high %v27233_v54, %v27260_v59  ;;  %v5735_v15 = vrot.slane %v24283_v52, %v25351_v9 }
 0x409   : > { %v24287_v32 = vcombine.low %v27158_v16, %v27161_v53  ;;  %v24289_v59 = vcombine.high %v27158_v16, %v27161_v53 }
 0x40a   : > { %v6890_v14 = vcombine.low %v6325_v60, %v6366_v36  ;;  %v6891_v48 = vcombine.high %v6325_v60, %v6366_v36  ;;  %v6368_v62 = vadd.f32 %v6367_v5, %v31397_v39  ;;  %v6406_v5 = vpop.f32.mrb[84].mxu0  ;;  %v5751_v39 = vrot.slane %v24285_v50, %v25351_v9 }
 0x40b   : > { %v6407_v57 = vadd.f32 %v6406_v5, %v5723_v17  ;;  %v6408_v30 = vpop.f32.mrb[85].mxu0  ;;  %v5767_v50 = vrot.slane %v24287_v32, %v25351_v9  ;;  %v5783_v56 = vrot.slane %v24289_v59, %v25351_v9 }
 0x40c   : > { %v6898_v23 = vrot.slane %v6890_v14, %v25351_v9  ;;  %v6905_v35 = vrot.slane %v6891_v48, %v25351_v9  ;;  %v6906_v40 = vcombine.low %v6327_v41, %v6368_v62  ;;  %v6907_v36 = vcombine.high %v6327_v41, %v6368_v62  ;;  %v6447_v60 = vpop.f32.mrb[100].mxu1  ;;  %v6410_v48 = vpop.f32.mrb[86].mxu0 }
 0x40d   : > { %v6409_v14 = vadd.f32 %v6408_v30, %v5724_v28  ;;  %v24284_v41 = vcombine.low %v27207_v38, %v27210_v11  ;;  %v6448_v17 = vadd.f32 %v6447_v60, %v5725_v4  ;;  %v6449_v62 = vpop.f32.mrb[101].mxu1  ;;  %v6411_v5 = vpop.f32.mrb[87].mxu0  ;;  %v5791_v42 = vcombine.low %v5735_v15, %v5751_v39 }
 0x40e   : > { %v6914_v54 = vrot.slane %v6906_v40, %v25351_v9  ;;  %v6921_v52 = vrot.slane %v6907_v36, %v25351_v9  ;;  %v6451_v31 = vpop.f32.mrb[102].mxu1  ;;  %v6450_v30 = vadd.f32 %v6449_v62, %v5726_v63  ;;  %v24286_v5 = vcombine.high %v27207_v38, %v27210_v11 }
 0x40f   : > { %v6922_v36 = vcombine.low %v6407_v57, %v6448_v17  ;;  %v6923_v28 = vcombine.high %v6407_v57, %v6448_v17  ;;  %v5799_v48 = vrot.slane %v5791_v42, %v25368_v49  ;;  %v6452_v26 = vpop.f32.mrb[103].mxu1  ;;  %v5823_v42 = vcombine.low %v5767_v50, %v5783_v56 }
 0x410   : > { %v6954_v10 = vcombine.low %v6898_v23, %v6914_v54  ;;  %v6955_v16 = vcombine.high %v6898_v23, %v6914_v54  ;;  %v6970_v53 = vcombine.low %v6905_v35, %v6921_v52  ;;  %v6971_v40 = vcombine.high %v6905_v35, %v6921_v52 }
 0x411   : > { %v6930_v31 = vrot.slane %v6922_v36, %v25351_v9  ;;  %v6937_v52 = vrot.slane %v6923_v28, %v25351_v9  ;;  %v6938_v63 = vcombine.low %v6409_v14, %v6450_v30  ;;  %v6939_v23 = vcombine.high %v6409_v14, %v6450_v30 }
 0x412   : > { %v27454_v4 = vrot.slane %v6954_v10, %v25368_v49  ;;  %v27457_v60 = vrot.slane %v6955_v16, %v25368_v49  ;;  %v27460_v59 = vrot.slane %v6970_v53, %v25368_v49  ;;  %v27463_v54 = vrot.slane %v6971_v40, %v25368_v49  ;;  %v6488_v26 = vpop.f32.mrb[88].mxu0 }
 0x413   : > { %v5792_v35 = vcombine.high %v5735_v15, %v5751_v39  ;;  %v5824_v10 = vcombine.high %v5767_v50, %v5783_v56  ;;  %v27468_v57 = vrot.slane %v24284_v41, %v25351_v9  ;;  %v6946_v32 = vrot.slane %v6938_v63, %v25351_v9  ;;  %v6490_v62 = vpop.f32.mrb[89].mxu0 }
 0x414   : > { %31398 = vst [vmem:[#allocation29_spill] sm:$0xff] %v27457_v60  ;;  %31399 = vst [vmem:[#allocation30_spill] sm:$0xff] %v27460_v59  ;;  %v6953_v17 = vrot.slane %v6939_v23, %v25351_v9  ;;  %v24288_v16 = vcombine.low %v27213_v20, %v27216_v25  ;;  %v5831_v14 = vrot.slane %v5823_v42, %v25368_v49  ;;  %v6529_v56 = vpop.f32.mrb[104].mxu1  ;;  %v6492_v39 = vpop.f32.mrb[90].mxu0 }
 0x415   : > { %31400 = vst [vmem:[#allocation25_spill] sm:$0xff] %v27463_v54  ;;  %v5806_v53 = vrot.slane %v5792_v35, %v25368_v49  ;;  %v5838_v15 = vrot.slane %v5824_v10, %v25368_v49  ;;  %v24290_v41 = vcombine.high %v27213_v20, %v27216_v25  ;;  %v6986_v50 = vcombine.low %v6930_v31, %v6946_v32  ;;  %v6531_v30 = vpop.f32.mrb[105].mxu1  ;;  %v6493_v38 = vpop.f32.mrb[91].mxu0 }
 0x416   : > { %v6987_v40 = vcombine.high %v6930_v31, %v6946_v32  ;;  %v7002_v36 = vcombine.low %v6937_v52, %v6953_v17  ;;  %v7003_v28 = vcombine.high %v6937_v52, %v6953_v17  ;;  %v5855_v11 = vcombine.low %v5799_v48, %v5831_v14  ;;  %v6533_v42 = vpop.f32.mrb[106].mxu1 }
 0x417   : > { %v5856_v63 = vcombine.high %v5799_v48, %v5831_v14  ;;  %v5857_v23 = vcombine.low %v5806_v53, %v5838_v15  ;;  %v5858_v61 = vcombine.high %v5806_v53, %v5838_v15  ;;  %v27482_v35 = vrot.slane %v6986_v50, %v25368_v49  ;;  %v6534_v25 = vpop.f32.mrb[107].mxu1 }
 0x418   : > { %v27485_v10 = vrot.slane %v6987_v40, %v25368_v49  ;;  %v27488_v39 = vrot.slane %v7002_v36, %v25368_v49  ;;  %v27491_v20 = vrot.slane %v7003_v28, %v25368_v49  ;;  %v6489_v31 = vadd.f32 %v6488_v26, %v5855_v11 }
 0x419   : > { %v6491_v52 = vadd.f32 %v6490_v62, %v5856_v63  ;;  %v6530_v32 = vadd.f32 %v6529_v56, %v5857_v23  ;;  %v6532_v48 = vadd.f32 %v6531_v30, %v5858_v61  ;;  %v5758_v11 = vrot.slane %v24286_v5, %v25351_v9 }
 0x41a   : > { %31401 = vst [vmem:[#allocation36_spill] sm:$0xff] %v27485_v10  ;;  %31402 = vst [vmem:[#allocation37_spill] sm:$0xff] %v27488_v39  ;;  %v6570_v56 = vpop.f32.mrb[92].mxu0  ;;  %v5774_v63 = vrot.slane %v24288_v16, %v25351_v9  ;;  %v5790_v23 = vrot.slane %v24290_v41, %v25351_v9 }
 0x41b   : > { %31403 = vst [vmem:[#allocation38_spill] sm:$0xff] %v27491_v20  ;;  %v7026_v40 = vcombine.low %v6489_v31, %v6530_v32  ;;  %v7027_v36 = vcombine.high %v6489_v31, %v6530_v32  ;;  %v7042_v28 = vcombine.low %v6491_v52, %v6532_v48  ;;  %v7043_v30 = vcombine.high %v6491_v52, %v6532_v48  ;;  %v6572_v38 = vpop.f32.mrb[93].mxu0 }
 0x41c   : > { %v6611_v42 = vpop.f32.mrb[108].mxu1  ;;  %v6574_v25 = vpop.f32.mrb[94].mxu0  ;;  %v5807_v52 = vcombine.low %v27468_v57, %v5758_v11  ;;  %v5839_v48 = vcombine.low %v5774_v63, %v5790_v23  ;;  %v5808_v5 = vcombine.high %v27468_v57, %v5758_v11  ;;  %v5840_v16 = vcombine.high %v5774_v63, %v5790_v23 }
 0x41d   : > { %v7034_v26 = vrot.slane %v7026_v40, %v25351_v9  ;;  %v7041_v61 = vrot.slane %v7027_v36, %v25351_v9  ;;  %v7050_v62 = vrot.slane %v7042_v28, %v25351_v9  ;;  %v7057_v50 = vrot.slane %v7043_v30, %v25351_v9  ;;  %v6613_v31 = vpop.f32.mrb[109].mxu1  ;;  %v6575_v32 = vpop.f32.mrb[95].mxu0 }
 0x41e   : > { %v6615_v15 = vpop.f32.mrb[110].mxu1  ;;  %v5815_v36 = vrot.slane %v5807_v52, %v25368_v49  ;;  %v5847_v28 = vrot.slane %v5839_v48, %v25368_v49  ;;  %v5822_v30 = vrot.slane %v5808_v5, %v25368_v49  ;;  %v5854_v32 = vrot.slane %v5840_v16, %v25368_v49 }
 0x41f   : > { %v7090_v41 = vcombine.low %v7034_v26, %v7050_v62  ;;  %v7091_v53 = vcombine.high %v7034_v26, %v7050_v62  ;;  %v7106_v25 = vcombine.low %v7041_v61, %v7057_v50  ;;  %v7107_v14 = vcombine.high %v7041_v61, %v7057_v50  ;;  %v6616_v40 = vpop.f32.mrb[111].mxu1 }
 0x420   : > { %v5859_v17 = vcombine.low %v5815_v36, %v5847_v28  ;;  %v5860_v20 = vcombine.high %v5815_v36, %v5847_v28  ;;  %v5861_v54 = vcombine.low %v5822_v30, %v5854_v32  ;;  %v5862_v39 = vcombine.high %v5822_v30, %v5854_v32 }
 0x421   : > { %v27523_v15 = vrot.slane %v7090_v41, %v25368_v49  ;;  %v27526_v26 = vrot.slane %v7091_v53, %v25368_v49  ;;  %v27529_v50 = vrot.slane %v7106_v25, %v25368_v49  ;;  %v27533_v16 = vrot.slane %v7107_v14, %v25368_v49 }
 0x422   : > { %v7724_v57 = vpop.f32.mrb[96].mxu0  ;;  %v6571_v11 = vadd.f32 %v6570_v56, %v5859_v17  ;;  %v6573_v63 = vadd.f32 %v6572_v38, %v5860_v20  ;;  %v6612_v23 = vadd.f32 %v6611_v42, %v5861_v54  ;;  %v6614_v52 = vadd.f32 %v6613_v31, %v5862_v39 }
 0x423   : > { %31404 = vst [vmem:[#allocation39_spill] sm:$0xff] %v27523_v15  ;;  %31405 = vst [vmem:[#allocation40_spill] sm:$0xff] %v27526_v26  ;;  %v7725_v61 = vadd.f32 %v7724_v57, %v31377_v22  ;;  %v7726_v62 = vpop.f32.mrb[97].mxu0 }
 0x424   : > { %31406 = vst [vmem:[#allocation41_spill] sm:$0xff] %v27529_v50  ;;  %v7777_v48 = vpop.f32.mrb[112].mxu1  ;;  %v7728_v5 = vpop.f32.mrb[98].mxu0  ;;  %31407 = vst [vmem:[#allocation42_spill] sm:$0xff] %v27533_v16  ;;  %v7727_v53 = vadd.f32 %v7726_v62, %v25920_v12  ;;  %v7058_v28 = vcombine.low %v6571_v11, %v6612_v23  ;;  %v7059_v30 = vcombine.high %v6571_v11, %v6612_v23 }
 0x425   : > { %v7778_v41 = vadd.f32 %v7777_v48, %v25918_v13  ;;  %v7779_v40 = vpop.f32.mrb[113].mxu1  ;;  %v7729_v25 = vadd.f32 %v7728_v5, %v31377_v22  ;;  %v7730_v36 = vpop.f32.mrb[99].mxu0  ;;  %v7074_v32 = vcombine.low %v6573_v63, %v6614_v52  ;;  %v7075_v17 = vcombine.high %v6573_v63, %v6614_v52 }
 0x426   : > { %v7781_v20 = vpop.f32.mrb[114].mxu1  ;;  %v7780_v56 = vadd.f32 %v7779_v40, %v25922_v29  ;;  %v7066_v42 = vrot.slane %v7058_v28, %v25351_v9  ;;  %v7073_v31 = vrot.slane %v7059_v30, %v25351_v9 }
 0x427   : > { %v7796_v54 = vcombine.low %v7725_v61, %v7778_v41  ;;  %v7797_v39 = vcombine.high %v7725_v61, %v7778_v41  ;;  %v7782_v14 = vadd.f32 %v7781_v20, %v25918_v13  ;;  %v7783_v38 = vpop.f32.mrb[115].mxu1  ;;  %v7082_v57 = vrot.slane %v7074_v32, %v25351_v9 }
 0x428   : > { %v7089_v62 = vrot.slane %v7075_v17, %v25351_v9  ;;  %v7812_v23 = vcombine.low %v7727_v53, %v7780_v56  ;;  %v7813_v52 = vcombine.high %v7727_v53, %v7780_v56 }
 0x429   : > { %v7804_v11 = vrot.slane %v7796_v54, %v25351_v9  ;;  %v7811_v63 = vrot.slane %v7797_v39, %v25351_v9  ;;  %v7122_v61 = vcombine.low %v7066_v42, %v7082_v57  ;;  %v7123_v48 = vcombine.high %v7066_v42, %v7082_v57 }
 0x42a   : > { %v7138_v5 = vcombine.low %v7073_v31, %v7089_v62  ;;  %v7139_v41 = vcombine.high %v7073_v31, %v7089_v62  ;;  %v7734_v40 = vpop.f32.mrb[100].mxu0  ;;  %v7820_v20 = vrot.slane %v7812_v23, %v25351_v9  ;;  %v7827_v28 = vrot.slane %v7813_v52, %v25351_v9 }
 0x42b   : > { %v7864_v30 = vcombine.low %v7729_v25, %v7782_v14  ;;  %v7865_v59 = vcombine.high %v7729_v25, %v7782_v14  ;;  %v27548_v32 = vpop.f32.mrb[101].mxu0  ;;  %v27551_v17 = vrot.slane %v7122_v61, %v25368_v49  ;;  %v27554_v54 = vrot.slane %v7123_v48, %v25368_v49 }
 0x42c   : > { %v27557_v53 = vrot.slane %v7138_v5, %v25368_v49  ;;  %v27560_v39 = vrot.slane %v7139_v41, %v25368_v49  ;;  %v7787_v56 = vpop.f32.mrb[116].mxu1  ;;  %v7738_v42 = vpop.f32.mrb[102].mxu0  ;;  %v7828_v31 = vcombine.low %v7804_v11, %v7820_v20  ;;  %v7829_v57 = vcombine.high %v7804_v11, %v7820_v20 }
 0x42d   : > { %31408 = vst [vmem:[#allocation43_spill] sm:$0xff] %v27551_v17  ;;  %31409 = vst [vmem:[#allocation44_spill] sm:$0xff] %v27554_v54  ;;  %v7844_v62 = vcombine.low %v7811_v63, %v7827_v28  ;;  %v7845_v25 = vcombine.high %v7811_v63, %v7827_v28  ;;  %v7789_v14 = vpop.f32.mrb[117].mxu1  ;;  %v27562_v23 = vpop.f32.mrb[103].mxu0  ;;  %v7872_v11 = vrot.slane %v7864_v30, %v25351_v9 }
 0x42e   : > { %31410 = vst [vmem:[#allocation45_spill] sm:$0xff] %v27557_v53  ;;  %31411 = vst [vmem:[#allocation46_spill] sm:$0xff] %v27560_v39  ;;  %v7791_v41 = vpop.f32.mrb[118].mxu1  ;;  %v7836_v48 = vrot.slane %v7828_v31, %v25368_v49  ;;  %v7843_v52 = vrot.slane %v7829_v57, %v25368_v49  ;;  %v7879_v63 = vrot.slane %v7865_v59, %v25351_v9 }
 0x42f   : > { %v27580_v61 = vpop.f32.mrb[119].mxu1  ;;  %v7852_v5 = vrot.slane %v7844_v62, %v25368_v49  ;;  %v7859_v54 = vrot.slane %v7845_v25, %v25368_v49  ;;  %v7731_v53 = vadd.f32 %v7730_v36, %v25920_v12  ;;  %v7784_v20 = vadd.f32 %v7783_v38, %v25922_v29 }
 0x430   : > { %v7860_v28 = vcombine.high %v7836_v48, %v31348_v19  ;;  %v7861_v39 = vcombine.high %v7843_v52, %v31348_v19  ;;  %v7735_v59 = vadd.f32 %v7734_v40, %v31377_v22  ;;  %v7788_v36 = vadd.f32 %v7787_v56, %v25918_v13 }
 0x431   : > { %v7862_v31 = vcombine.high %v7852_v5, %v31348_v19  ;;  %v7863_v57 = vcombine.high %v7859_v54, %v31348_v19  ;;  %v24336_v16 = vpack.c.bf16 %v7852_v5, %v7836_v48  ;;  %v24337_v62 = vpack.c.bf16 %v7859_v54, %v7843_v52 }
 0x432   : > { %v7880_v50 = vcombine.low %v7731_v53, %v7784_v20  ;;  %v7881_v25 = vcombine.high %v7731_v53, %v7784_v20  ;;  %v7932_v53 = vcombine.low %v7735_v59, %v7788_v36 }
 0x433   : > { %v24340_v26 = vpack.c.bf16 %v7862_v31, %v7860_v28  ;;  %v24341_v30 = vpack.c.bf16 %v7863_v57, %v7861_v39  ;;  %v8109_v38 = vrot.slane %v24336_v16, %v25351_v9  ;;  %v8117_v17 = vrot.slane %v24337_v62, %v25351_v9 }
 0x434   : > { %v7888_v15 = vrot.slane %v7880_v50, %v25351_v9  ;;  %v7895_v10 = vrot.slane %v7881_v25, %v25351_v9  ;;  %v7933_v39 = vcombine.high %v7735_v59, %v7788_v36  ;;  %v7940_v50 = vrot.slane %v7932_v53, %v25351_v9 }
 0x435   : > { %v27601_v60 = vrot.slane %v24340_v26, %v25351_v9  ;;  %v27604_v54 = vrot.slane %v24341_v30, %v25351_v9  ;;  %v8134_v52 = vcombine.low %v8109_v38, %v8117_v17 }
 0x436   : > { %v7896_v40 = vcombine.low %v7872_v11, %v7888_v15  ;;  %v7897_v48 = vcombine.high %v7872_v11, %v7888_v15  ;;  %v7912_v56 = vcombine.low %v7879_v63, %v7895_v10  ;;  %v7913_v5 = vcombine.high %v7879_v63, %v7895_v10 }
 0x437   : > { %v8184_v16 = vcombine.low %v27601_v60, %v27604_v54  ;;  %v7947_v20 = vrot.slane %v7933_v39, %v25351_v9  ;;  %v8141_v26 = vrot.slane %v8134_v52, %v25368_v49  ;;  %v7737_v15 = vadd.f32 %v27548_v32, %v25920_v12 }
 0x438   : > { %v7904_v28 = vrot.slane %v7896_v40, %v25368_v49  ;;  %v7911_v31 = vrot.slane %v7897_v48, %v25368_v49  ;;  %v7920_v57 = vrot.slane %v7912_v56, %v25368_v49  ;;  %v7927_v17 = vrot.slane %v7913_v5, %v25368_v49 }
 0x439   : > { %v7790_v60 = vadd.f32 %v7789_v14, %v25922_v29  ;;  %v7739_v10 = vadd.f32 %v7738_v42, %v31377_v22  ;;  %v7792_v32 = vadd.f32 %v7791_v41, %v25918_v13  ;;  %v7741_v42 = vadd.f32 %v27562_v23, %v25920_v12 }
 0x43a   : > { %v7928_v11 = vcombine.high %v7904_v28, %v31348_v19  ;;  %v7929_v63 = vcombine.high %v7911_v31, %v31348_v19  ;;  %v7930_v62 = vcombine.high %v7920_v57, %v31348_v19  ;;  %v24338_v25 = vpack.c.bf16 %v7920_v57, %v7904_v28 }
 0x43b   : > { %v7931_v30 = vcombine.high %v7927_v17, %v31348_v19  ;;  %v24339_v59 = vpack.c.bf16 %v7927_v17, %v7911_v31  ;;  %v7948_v36 = vcombine.low %v7737_v15, %v7790_v60  ;;  %v7949_v38 = vcombine.high %v7737_v15, %v7790_v60 }
 0x43c   : > { %v8125_v54 = vrot.slane %v24338_v25, %v25351_v9  ;;  %v24342_v53 = vpack.c.bf16 %v7930_v62, %v7928_v11  ;;  %v8000_v56 = vcombine.low %v7739_v10, %v7792_v32  ;;  %v8001_v5 = vcombine.high %v7739_v10, %v7792_v32 }
 0x43d   : > { %v8133_v14 = vrot.slane %v24339_v59, %v25351_v9  ;;  %v24343_v39 = vpack.c.bf16 %v7931_v30, %v7929_v63  ;;  %v7956_v52 = vrot.slane %v7948_v36, %v25351_v9  ;;  %v7963_v40 = vrot.slane %v7949_v38, %v25351_v9 }
 0x43e   : > { %v8175_v48 = vrot.slane %v24342_v53, %v25351_v9  ;;  %v7794_v28 = vadd.f32 %v27580_v61, %v25922_v29  ;;  %v8008_v60 = vrot.slane %v8000_v56, %v25351_v9  ;;  %v8015_v11 = vrot.slane %v8001_v5, %v25351_v9 }
 0x43f   : > { %v8142_v31 = vcombine.low %v8125_v54, %v8133_v14  ;;  %v8183_v41 = vrot.slane %v24343_v39, %v25351_v9  ;;  %v7964_v57 = vcombine.low %v7940_v50, %v7956_v52  ;;  %v7965_v17 = vcombine.high %v7940_v50, %v7956_v52 }
 0x440   : > { %v7980_v23 = vcombine.low %v7947_v20, %v7963_v40  ;;  %v7981_v15 = vcombine.high %v7947_v20, %v7963_v40  ;;  %v8016_v59 = vcombine.low %v7741_v42, %v7794_v28  ;;  %v8017_v36 = vcombine.high %v7741_v42, %v7794_v28 }
 0x441   : > { %v8149_v63 = vrot.slane %v8142_v31, %v25368_v49  ;;  %v8192_v62 = vcombine.low %v8175_v48, %v8183_v41  ;;  %v7972_v25 = vrot.slane %v7964_v57, %v25368_v49  ;;  %v7979_v10 = vrot.slane %v7965_v17, %v25368_v49 }
 0x442   : > { %v7988_v61 = vrot.slane %v7980_v23, %v25368_v49  ;;  %v7995_v30 = vrot.slane %v7981_v15, %v25368_v49  ;;  %v8024_v52 = vrot.slane %v8016_v59, %v25351_v9  ;;  %v8031_v40 = vrot.slane %v8017_v36, %v25351_v9 }
 0x443   : > { %v7996_v50 = vcombine.high %v7972_v25, %v31348_v19  ;;  %v7997_v20 = vcombine.high %v7979_v10, %v31348_v19  ;;  %v8150_v38 = vcombine.low %v8141_v26, %v8149_v63  ;;  %v8151_v54 = vcombine.high %v8141_v26, %v8149_v63 }
 0x444   : > { %v7998_v53 = vcombine.high %v7988_v61, %v31348_v19  ;;  %v7999_v32 = vcombine.high %v7995_v30, %v31348_v19  ;;  %v24344_v14 = vpack.c.bf16 %v7988_v61, %v7972_v25  ;;  %v24345_v39 = vpack.c.bf16 %v7995_v30, %v7979_v10 }
 0x445   : > { %v8191_v48 = vrot.slane %v8184_v16, %v25368_v49  ;;  %v8199_v42 = vrot.slane %v8192_v62, %v25368_v49  ;;  %v8032_v31 = vcombine.low %v8008_v60, %v8024_v52  ;;  %v8033_v41 = vcombine.high %v8008_v60, %v8024_v52 }
 0x446   : > { %v8209_v56 = vrot.slane %v24344_v14, %v25351_v9  ;;  %v8217_v5 = vrot.slane %v24345_v39, %v25351_v9  ;;  %v24348_v28 = vpack.c.bf16 %v7998_v53, %v7996_v50  ;;  %v24349_v26 = vpack.c.bf16 %v7999_v32, %v7997_v20 }
 0x447   : > { %v8048_v57 = vcombine.low %v8015_v11, %v8031_v40  ;;  %v8049_v17 = vcombine.high %v8015_v11, %v8031_v40  ;;  %v8200_v25 = vcombine.low %v8191_v48, %v8199_v42  ;;  %v8040_v16 = vrot.slane %v8032_v31, %v25368_v49 }
 0x448   : > { %v8234_v23 = vcombine.low %v8209_v56, %v8217_v5  ;;  %v8259_v15 = vrot.slane %v24348_v28, %v25351_v9  ;;  %v8267_v63 = vrot.slane %v24349_v26, %v25351_v9  ;;  %v8047_v62 = vrot.slane %v8033_v41, %v25368_v49 }
 0x449   : > { %v8056_v10 = vrot.slane %v8048_v57, %v25368_v49  ;;  %v8063_v61 = vrot.slane %v8049_v17, %v25368_v49  ;;  %v8201_v59 = vcombine.high %v8191_v48, %v8199_v42  ;;  %v8304_v36 = vpack.i.b16 %v8200_v25, %v8150_v38 }
 0x44a   : > { %v8284_v30 = vcombine.low %v8259_v15, %v8267_v63  ;;  %v8064_v60 = vcombine.high %v8040_v16, %v31348_v19  ;;  %v8065_v11 = vcombine.high %v8047_v62, %v31348_v19  ;;  %v8305_v14 = vshrl.u32 %v8150_v38, 16 }
 0x44b   : > { %v8066_v50 = vcombine.high %v8056_v10, %v31348_v19  ;;  %v8067_v20 = vcombine.high %v8063_v61, %v31348_v19  ;;  %v24346_v53 = vpack.c.bf16 %v8056_v10, %v8040_v16  ;;  %v24347_v32 = vpack.c.bf16 %v8063_v61, %v8047_v62 }
 0x44c   : > { %v8306_v39 = vshrl.u32 %v8200_v25, 16  ;;  %v8310_v56 = vpack.i.b16 %v8201_v59, %v8151_v54  ;;  %v8311_v5 = vshrl.u32 %v8151_v54, 16  ;;  %v8312_v26 = vshrl.u32 %v8201_v59, 16 }
 0x44d   : > { %v24350_v52 = vpack.c.bf16 %v8066_v50, %v8064_v60  ;;  %v24351_v40 = vpack.c.bf16 %v8067_v20, %v8065_v11  ;;  %v8225_v28 = vrot.slane %v24346_v53, %v25351_v9  ;;  %v8233_v48 = vrot.slane %v24347_v32, %v25351_v9 }
 0x44e   : > { %v8307_v42 = vpack.i.b16 %v8306_v39, %v8305_v14  ;;  %v8330_v57 = vshrl.u32 %v8304_v36, 16  ;;  %v8313_v15 = vpack.i.b16 %v8312_v26, %v8311_v5  ;;  %v8241_v25 = vrot.slane %v8234_v23, %v25368_v49 }
 0x44f   : > { %v8275_v31 = vrot.slane %v24350_v52, %v25351_v9  ;;  %v8283_v41 = vrot.slane %v24351_v40, %v25351_v9  ;;  %v8242_v17 = vcombine.low %v8225_v28, %v8233_v48  ;;  %v8338_v62 = vshrl.u32 %v8310_v56, 16 }
 0x450   : > { %v8331_v63 = vshrl.u32 %v8307_v42, 16  ;;  %v8328_v38 = vpack.i.b16 %v8307_v42, %v8304_v36  ;;  %v8339_v61 = vshrl.u32 %v8313_v15, 16  ;;  %v8336_v60 = vpack.i.b16 %v8313_v15, %v8310_v56 }
 0x451   : > { %v8292_v16 = vcombine.low %v8275_v31, %v8283_v41  ;;  %v8249_v54 = vrot.slane %v8242_v17, %v25368_v49  ;;  %v8291_v50 = vrot.slane %v8284_v30, %v25368_v49 }
 0x452   : > { %v8332_v10 = vpack.i.b16 %v8331_v63, %v8330_v57  ;;  %v8365_v59 = vrot.slane %v8328_v38, %v25351_v9  ;;  %v8358_v11 = vcombine.high %v8328_v38, %v25348_v8  ;;  %v8340_v53 = vpack.i.b16 %v8339_v61, %v8338_v62 }
 0x453   : > { %v8299_v20 = vrot.slane %v8292_v16, %v25368_v49  ;;  %v8380_v23 = vrot.slane %v8336_v60, %v25351_v9  ;;  %v8373_v39 = vcombine.high %v8336_v60, %v25348_v8  ;;  %v8250_v52 = vcombine.low %v8241_v25, %v8249_v54 }
 0x454   : > { %v8431_v36 = vrot.slane %v8332_v10, %v25351_v9  ;;  %v8424_v32 = vcombine.high %v8332_v10, %v25348_v8  ;;  %v27675_v14 = vrot.slane %v8358_v11, %v25351_v9  ;;  %v8251_v40 = vcombine.high %v8241_v25, %v8249_v54 }
 0x455   : > { %v8446_v56 = vrot.slane %v8340_v53, %v25351_v9  ;;  %v8388_v5 = vcombine.low %v8365_v59, %v8380_v23  ;;  %v8389_v30 = vcombine.high %v8365_v59, %v8380_v23  ;;  %v8439_v48 = vcombine.high %v8340_v53, %v25348_v8 }
 0x456   : > { %v8438_v28 = vrot.slane %v8424_v32, %v25351_v9  ;;  %v27682_v42 = vrot.slane %v8373_v39, %v25351_v9  ;;  %v8300_v26 = vcombine.low %v8291_v50, %v8299_v20  ;;  %v8301_v31 = vcombine.high %v8291_v50, %v8299_v20  ;;  %v27701_v20 = vld [vmem:[%s31218_s3 + $0x8] sm:$0xf] }
 0x457   : > { %v8454_v41 = vcombine.low %v8431_v36, %v8446_v56  ;;  %v8396_v57 = vrot.slane %v8388_v5, %v25368_v49  ;;  %v8455_v17 = vcombine.high %v8431_v36, %v8446_v56  ;;  %v8403_v15 = vrot.slane %v8389_v30, %v25368_v49 }
 0x458   : > { %v8453_v63 = vrot.slane %v8439_v48, %v25351_v9  ;;  %v8404_v38 = vcombine.low %v27675_v14, %v27682_v42  ;;  %v8405_v25 = vcombine.high %v27675_v14, %v27682_v42  ;;  %v8316_v16 = vpack.i.b16 %v8300_v26, %v8250_v52 }
 0x459   : > { %v8462_v62 = vrot.slane %v8454_v41, %v25368_v49  ;;  %v8420_v54 = vcombine.high %v8396_v57, %v31328_v33  ;;  %v8469_v10 = vrot.slane %v8455_v17, %v25368_v49  ;;  %v8626_v60 = vsel %vm3502_vm2, %v8396_v57, 0 }
 0x45a   : > { %v8470_v61 = vcombine.low %v8438_v28, %v8453_v63  ;;  %v8471_v11 = vcombine.high %v8438_v28, %v8453_v63  ;;  %v8421_v53 = vcombine.high %v8403_v15, %v31328_v33  ;;  %v8317_v32 = vshrl.u32 %v8250_v52, 16 }
 0x45b   : > { %24352 = vmatprep.subr.msk.bf16.mxu0 %vm3502_vm2, %v8462_v62  ;;  %v8486_v59 = vcombine.high %v8462_v62, %v31328_v33  ;;  %v8632_v50 = vsel %vm3502_vm2, %v8420_v54, 0  ;;  %v8487_v36 = vcombine.high %v8469_v10, %v31328_v33  ;;  %v8318_v14 = vshrl.u32 %v8300_v26, 16 }
 0x45c   : > { %8722 = vmatpush1.bf16.msra.mxu0 %v8626_v60  ;;  %v8478_v23 = vrot.slane %v8470_v61, %v25368_v49  ;;  %v8322_v39 = vpack.i.b16 %v8301_v31, %v8251_v40  ;;  %v8323_v56 = vshrl.u32 %v8251_v40, 16  ;;  %v8638_v5 = vsel %vm3502_vm2, %v8403_v15, 0 }
 0x45d   : > { %24354 = vmatprep.subr.msk.bf16.mxu1 %vm3502_vm2, %v8486_v59  ;;  %24356 = vmatprep.subr.msk.bf16.mxu0 %vm3502_vm2, %v8469_v10  ;;  %v8319_v30 = vpack.i.b16 %v8318_v14, %v8317_v32  ;;  %v8412_v28 = vrot.slane %v8404_v38, %v25368_v49  ;;  %v8324_v48 = vshrl.u32 %v8301_v31, 16  ;;  %v8346_v42 = vshrl.u32 %v8316_v16, 16 }
 0x45e   : > { %8763 = vmatpush1.bf16.msra.mxu1 %v8632_v50  ;;  %v8644_v52 = vsel %vm3502_vm2, %v8421_v53, 0  ;;  %v8488_v40 = vcombine.high %v8478_v23, %v31328_v33  ;;  %v8354_v17 = vshrl.u32 %v8322_v39, 16  ;;  %v8485_v31 = vrot.slane %v8471_v11, %v25368_v49 }
 0x45f   : > { %24353 = vmatmul.mubr.msk.bf16.vlgmr.msra.gmra.mrb[104].mxu0 %vm3498_vm3, %v27701_v20  ;;  %24358 = vmatprep.subr.msk.bf16.mxu1 %vm3502_vm2, %v8487_v36  ;;  %v8347_v26 = vshrl.u32 %v8319_v30, 16  ;;  %v8344_v41 = vpack.i.b16 %v8319_v30, %v8316_v16  ;;  %v8325_v57 = vpack.i.b16 %v8324_v48, %v8323_v56  ;;  %v8422_v10 = vcombine.high %v8412_v28, %v31328_v33 }
 0x460   : > { %8804 = vmatpush1.bf16.msra.mxu0 %v8638_v5  ;;  %8835 = vmatprep.mubr.bf16.mxu0 %v31328_v33  ;;  %v8650_v11 = vsel %vm3502_vm2, %v8412_v28, 0  ;;  %v8489_v53 = vcombine.high %v8485_v31, %v31328_v33  ;;  %v8419_v36 = vrot.slane %v8405_v25, %v25368_v49 }
 0x461   : > { %24355 = vmatmul.mubr.msk.bf16.vlgmr.msra.gmra.mrb[120].mxu1 %vm3498_vm3, %v27701_v20  ;;  %24360 = vmatprep.subr.msk.bf16.mxu0 %vm3502_vm2, %v8478_v23  ;;  %v8348_v15 = vpack.i.b16 %v8347_v26, %v8346_v42  ;;  %v8490_v63 = vcombine.high %v8344_v41, %v25348_v8  ;;  %v8355_v38 = vshrl.u32 %v8325_v57, 16  ;;  %v8352_v62 = vpack.i.b16 %v8325_v57, %v8322_v39 }
 0x462   : > { %8845 = vmatpush1.bf16.msra.mxu1 %v8644_v52  ;;  %8876 = vmatprep.mubr.bf16.mxu1 %v31328_v33  ;;  %v8497_v54 = vrot.slane %v8344_v41, %v25351_v9  ;;  %v8656_v56 = vsel %vm3502_vm2, %v8422_v10, 0  ;;  %v8423_v41 = vcombine.high %v8419_v36, %v31328_v33 }
 0x463   : > { %24362 = vmatprep.subr.msk.bf16.mxu1 %vm3502_vm2, %v8488_v40  ;;  %v8556_v16 = vcombine.high %v8348_v15, %v25348_v8  ;;  %v8356_v61 = vpack.i.b16 %v8355_v38, %v8354_v17  ;;  %v8563_v60 = vrot.slane %v8348_v15, %v25351_v9  ;;  %v8512_v59 = vrot.slane %v8352_v62, %v25351_v9 }
 0x464   : > { %v8505_v50 = vcombine.high %v8352_v62, %v25348_v8  ;;  %v27735_v23 = vrot.slane %v8490_v63, %v25351_v9  ;;  %v8668_v63 = vsel %vm3502_vm2, %v8423_v41, 0  ;;  %v31416_v41 = vld [vmem:[#allocation10_spill] sm:$0xff] }
 0x465   : > { %v8578_v32 = vrot.slane %v8356_v61, %v25351_v9  ;;  %v8520_v14 = vcombine.low %v8497_v54, %v8512_v59  ;;  %v8521_v39 = vcombine.high %v8497_v54, %v8512_v59  ;;  %v8570_v5 = vrot.slane %v8556_v16, %v25351_v9 }
 0x466   : > { %v8571_v25 = vcombine.high %v8356_v61, %v25348_v8  ;;  %v27746_v30 = vrot.slane %v8505_v50, %v25351_v9 }
 0x467   : > { %24357 = vmatmul.mubr.msk.bf16.vlgmr.msra.gmra.mrb[108].mxu0 %vm3498_vm3, %v27701_v20  ;;  %v8586_v28 = vcombine.low %v8563_v60, %v8578_v32  ;;  %v8587_v48 = vcombine.high %v8563_v60, %v8578_v32  ;;  %v8528_v38 = vrot.slane %v8520_v14, %v25368_v49  ;;  %v8535_v61 = vrot.slane %v8521_v39, %v25368_v49 }
 0x468   : > { %8886 = vmatpush1.bf16.msra.mxu0 %v8650_v11  ;;  %8917 = vmatprep.mubr.bf16.mxu0 %v31328_v33  ;;  %v8585_v42 = vrot.slane %v8571_v25, %v25351_v9  ;;  %v8536_v52 = vcombine.low %v27735_v23, %v27746_v30  ;;  %v8537_v40 = vcombine.high %v27735_v23, %v27746_v30 }
 0x469   : > { %24364 = vmatprep.subr.msk.bf16.mxu0 %vm3502_vm2, %v8485_v31  ;;  %24359 = vmatmul.mubr.msk.bf16.vlgmr.msra.gmra.mrb[124].mxu1 %vm3498_vm3, %v27701_v20  ;;  %v8594_v26 = vrot.slane %v8586_v28, %v25368_v49  ;;  %v8662_v31 = vsel %vm3502_vm2, %v8419_v36, 0  ;;  %v8552_v62 = vcombine.high %v8528_v38, %v31328_v33  ;;  %v8601_v54 = vrot.slane %v8587_v48, %v25368_v49  ;;  %v31412_v48 = vld [vmem:[#allocation11_spill] sm:$0xff] }
 0x46a   : > { %8927 = vmatpush1.bf16.msra.mxu1 %v8656_v56  ;;  %8958 = vmatprep.mubr.bf16.mxu1 %v31328_v33  ;;  %v8602_v57 = vcombine.low %v8570_v5, %v8585_v42  ;;  %v8603_v17 = vcombine.high %v8570_v5, %v8585_v42  ;;  %v8674_v10 = vsel %vm3502_vm2, %v8528_v38, 0  ;;  %v8553_v59 = vcombine.high %v8535_v61, %v31328_v33 }
 0x46b   : > { %24366 = vmatprep.subr.msk.bf16.mxu1 %vm3502_vm2, %v8489_v53  ;;  %v8618_v15 = vcombine.high %v8594_v26, %v31328_v33  ;;  %v8680_v16 = vsel %vm3502_vm2, %v8552_v62, 0  ;;  %v8619_v60 = vcombine.high %v8601_v54, %v31328_v33  ;;  %v8686_v11 = vsel %vm3502_vm2, %v8535_v61, 0 }
 0x46c   : > { %v8610_v50 = vrot.slane %v8602_v57, %v25368_v49  ;;  %v8692_v53 = vsel %vm3502_vm2, %v8553_v59, 0  ;;  %v8544_v23 = vrot.slane %v8536_v52, %v25368_v49  ;;  %v8617_v32 = vrot.slane %v8603_v17, %v25368_v49  ;;  %v31413_v52 = vld [vmem:[#allocation12_spill] sm:$0xff] }
 0x46d   : > { %v8551_v25 = vrot.slane %v8537_v40, %v25368_v49  ;;  %v31414_v40 = vld [vmem:[#allocation9_spill] sm:$0xff]  ;;  %v31417_v57 = vld [vmem:[#allocation16_spill] sm:$0xff] }
 0x46e   : > { %v8620_v36 = vcombine.high %v8610_v50, %v31328_v33  ;;  %v8554_v14 = vcombine.high %v8544_v23, %v31328_v33  ;;  %v8698_v39 = vsel %vm3502_vm2, %v8544_v23, 0  ;;  %v8621_v5 = vcombine.high %v8617_v32, %v31328_v33  ;;  %v25000_v17 = vld [vmem:[%s25340_s12 + $0x10] sm:$0xff]  }
 0x46f   : > { %24361 = vmatmul.mubr.msk.bf16.vlgmr.msra.gmra.mrb[112].mxu0 %vm3498_vm3, %v27701_v20  ;;  %v8555_v30 = vcombine.high %v8551_v25, %v31328_v33  ;;  %v8710_v28 = vsel %vm3502_vm2, %v8551_v25, 0 }
 0x470   : > { %8968 = vmatpush1.bf16.msra.mxu0 %v8662_v31  ;;  %8999 = vmatprep.mubr.bf16.mxu0 %v31328_v33  ;;  %v8704_v56 = vsel %vm3502_vm2, %v8554_v14, 0  ;;  %v31418_v31 = vld [vmem:[#allocation13_spill] sm:$0xff] }
 0x471   : > { %24363 = vmatmul.mubr.msk.bf16.vlgmr.msra.gmra.mrb[128].mxu1 %vm3498_vm3, %v27701_v20  ;;  %24368 = vmatprep.subr.msk.bf16.mxu0 %vm3502_vm2, %v8594_v26  ;;  %v8716_v42 = vsel %vm3502_vm2, %v8555_v30, 0  ;;  %v31415_v26 = vld [vmem:[#allocation15_spill] sm:$0xff] }
 0x472   : > { %9009 = vmatpush1.bf16.msra.mxu1 %v8668_v63  ;;  %9040 = vmatprep.mubr.bf16.mxu1 %v31328_v33 }
 0x473   : > { %24370 = vmatprep.subr.msk.bf16.mxu1 %vm3502_vm2, %v8618_v15  ;;  %v31419_v15 = vld [vmem:[#allocation14_spill] sm:$0xff] }
 0x477   : > { %24365 = vmatmul.mubr.msk.bf16.vlgmr.msra.gmra.mrb[116].mxu0 %vm3498_vm3, %v27701_v20 }
 0x478   : > { %9050 = vmatpush1.bf16.msra.mxu0 %v8674_v10  ;;  %9081 = vmatprep.mubr.bf16.mxu0 %v31328_v33 }
 0x479   : > { %24367 = vmatmul.mubr.msk.bf16.vlgmr.msra.gmra.mrb[132].mxu1 %vm3498_vm3, %v27701_v20  ;;  %24372 = vmatprep.subr.msk.bf16.mxu0 %vm3502_vm2, %v8601_v54 }
 0x47a   : > { %9091 = vmatpush1.bf16.msra.mxu1 %v8680_v16  ;;  %9122 = vmatprep.mubr.bf16.mxu1 %v31328_v33 }
 0x47b   : > { %24374 = vmatprep.subr.msk.bf16.mxu1 %vm3502_vm2, %v8619_v60 }
 0x47f   : > { %24369 = vmatmul.mubr.msk.bf16.vlgmr.msra.gmra.mrb[120].mxu0 %vm3498_vm3, %v27701_v20 }
 0x480   : > { %9132 = vmatpush1.bf16.msra.mxu0 %v8686_v11  ;;  %9163 = vmatprep.mubr.bf16.mxu0 %v31328_v33 }
 0x481   : > { %24371 = vmatmul.mubr.msk.bf16.vlgmr.msra.gmra.mrb[136].mxu1 %vm3498_vm3, %v27701_v20  ;;  %24376 = vmatprep.subr.msk.bf16.mxu0 %vm3502_vm2, %v8610_v50 }
 0x482   : > { %9173 = vmatpush1.bf16.msra.mxu1 %v8692_v53  ;;  %9204 = vmatprep.mubr.bf16.mxu1 %v31328_v33 }
 0x483   : > { %24378 = vmatprep.subr.msk.bf16.mxu1 %vm3502_vm2, %v8620_v36 }
 0x487   : > { %24373 = vmatmul.mubr.msk.bf16.vlgmr.msra.gmra.mrb[124].mxu0 %vm3498_vm3, %v27701_v20 }
 0x488   : > { %9214 = vmatpush1.bf16.msra.mxu0 %v8698_v39  ;;  %9245 = vmatprep.mubr.bf16.mxu0 %v31328_v33 }
 0x489   : > { %24380 = vmatprep.subr.msk.bf16.mxu0 %vm3502_vm2, %v8617_v32  ;;  %24375 = vmatmul.mubr.msk.bf16.vlgmr.msra.gmra.mrb[140].mxu1 %vm3498_vm3, %v27701_v20 }
 0x48a   : > { %9255 = vmatpush1.bf16.msra.mxu1 %v8704_v56  ;;  %9286 = vmatprep.mubr.bf16.mxu1 %v31328_v33 }
 0x48b   : > { %24382 = vmatprep.subr.msk.bf16.mxu1 %vm3502_vm2, %v8621_v5 }
 0x48f   : > { %24377 = vmatmul.mubr.msk.bf16.vlgmr.msra.gmra.mrb[128].mxu0 %vm3498_vm3, %v27701_v20 }
 0x490   : > { %9296 = vmatpush1.bf16.msra.mxu0 %v8710_v28  ;;  %9327 = vmatprep.mubr.bf16.mxu0 %v31328_v33 }
 0x491   : > { %9974 = vmatprep.subr.bf16.mxu0 %v31412_v48  ;;  %24379 = vmatmul.mubr.msk.bf16.vlgmr.msra.gmra.mrb[144].mxu1 %vm3498_vm3, %v27701_v20 }
 0x492   : > { %9337 = vmatpush1.bf16.msra.mxu1 %v8716_v42  ;;  %9368 = vmatprep.mubr.bf16.mxu1 %v31328_v33 }
 0x493   : > { %10027 = vmatprep.subr.bf16.mxu1 %v31413_v52 }
 0x497   : > { %24381 = vmatmul.mubr.msk.bf16.vlgmr.msra.gmra.mrb[132].mxu0 %vm3498_vm3, %v27701_v20 }
 0x498   : > { %9975 = vmatpush1.bf16.msra.mxu0 %v31414_v40  ;;  %10006 = vmatprep.mubr.bf16.mxu0 %v31328_v33 }
 0x499   : > { %9976 = vmatprep.subr.bf16.mxu0 %v31415_v26  ;;  %24383 = vmatmul.mubr.msk.bf16.vlgmr.msra.gmra.mrb[148].mxu1 %vm3498_vm3, %v27701_v20  ;;  %v25001_v20 = vld [vmem:[%s25340_s12 + $0x18] sm:$0xff]  }
 0x49a   : > { %10028 = vmatpush1.bf16.msra.mxu1 %v31416_v41  ;;  %10059 = vmatprep.mubr.bf16.mxu1 %v31328_v33 }
 0x49b   : > { %10029 = vmatprep.subr.bf16.mxu1 %v31417_v57 }
 0x49c   : > { %9977 = vmatpush1.bf16.msra.mxu0 %v31418_v31 }
 0x49e   : > { %10030 = vmatpush1.bf16.msra.mxu1 %v31419_v15 }
 0x49f   : > { %24390 = vmatmul.mubr.msk.bf16.vlgmr.msra.gmra.mrb[136].mxu0 %vm1592_vm1, %v25000_v17 }
 0x4a0   : > { %10016 = vmatprep.mubr.bf16.mxu0 %v31328_v33 }
 0x4a1   : > { %24392 = vmatmul.mubr.msk.bf16.vlgmr.msra.gmra.mrb[152].mxu1 %vm1592_vm1, %v25000_v17 }
 0x4a2   : > { %10069 = vmatprep.mubr.bf16.mxu1 %v31328_v33 }
 0x4a7   : > { %24391 = vmatmul.mubr.msk.bf16.gmra.mrb[140].mxu0 %vm1592_vm1, %v25001_v20 }
 0x4a8   : > { %11037 = vmatprep.mubr.bf16.mxu0 %v31328_v33 }
 0x4a9   : > { %24393 = vmatmul.mubr.msk.bf16.gmra.mrb[156].mxu1 %vm1592_vm1, %v25001_v20 }
 0x4aa   : > { %11078 = vmatprep.mubr.bf16.mxu1 %v31328_v33 }
 0x532   : > { %v8755_v63 = vpop.f32.mrb[104].mxu0 }
 0x533   : > { %v8756_v38 = vadd.f32 %v8755_v63, %v31377_v22  ;;  %v8757_v62 = vpop.f32.mrb[105].mxu0 }
 0x534   : > { %v8796_v54 = vpop.f32.mrb[120].mxu1  ;;  %v8758_v10 = vadd.f32 %v8757_v62, %v25920_v12  ;;  %v8759_v16 = vpop.f32.mrb[106].mxu0 }
 0x535   : > { %v8797_v61 = vadd.f32 %v8796_v54, %v25918_v13  ;;  %v8798_v60 = vpop.f32.mrb[121].mxu1  ;;  %v8760_v59 = vpop.f32.mrb[107].mxu0 }
 0x536   : > { %v8799_v50 = vadd.f32 %v8798_v60, %v25922_v29  ;;  %v8800_v11 = vpop.f32.mrb[122].mxu1 }
 0x537   : > { %v9377_v53 = vcombine.low %v8756_v38, %v8797_v61  ;;  %v9378_v36 = vcombine.high %v8756_v38, %v8797_v61  ;;  %v8801_v23 = vpop.f32.mrb[123].mxu1 }
 0x538   : > { %v9393_v32 = vcombine.low %v8758_v10, %v8799_v50  ;;  %v9394_v14 = vcombine.high %v8758_v10, %v8799_v50 }
 0x539   : > { %v9385_v39 = vrot.slane %v9377_v53, %v25351_v9  ;;  %v9392_v56 = vrot.slane %v9378_v36, %v25351_v9 }
 0x53a   : > { %v9401_v5 = vrot.slane %v9393_v32, %v25351_v9  ;;  %v9408_v25 = vrot.slane %v9394_v14, %v25351_v9  ;;  %v8837_v30 = vpop.f32.mrb[108].mxu0 }
 0x53b   : > { %v8838_v28 = vadd.f32 %v8837_v30, %v26930_v0  ;;  %v8839_v42 = vpop.f32.mrb[109].mxu0 }
 0x53c   : > { %v9441_v17 = vcombine.low %v9385_v39, %v9401_v5  ;;  %v9442_v20 = vcombine.high %v9385_v39, %v9401_v5  ;;  %v9457_v63 = vcombine.low %v9392_v56, %v9408_v25  ;;  %v9458_v62 = vcombine.high %v9392_v56, %v9408_v25  ;;  %v8878_v38 = vpop.f32.mrb[124].mxu1  ;;  %v8841_v54 = vpop.f32.mrb[110].mxu0 }
 0x53d   : > { %v8879_v10 = vadd.f32 %v8878_v38, %v26934_v1  ;;  %v8840_v16 = vadd.f32 %v8839_v42, %v26936_v2  ;;  %v8880_v61 = vpop.f32.mrb[125].mxu1  ;;  %v8842_v60 = vpop.f32.mrb[111].mxu0 }
 0x53e   : > { %v8882_v59 = vpop.f32.mrb[126].mxu1  ;;  %v8881_v53 = vadd.f32 %v8880_v61, %v26941_v24  ;;  %v9449_v42 = vrot.slane %v9441_v17, %v25368_v49  ;;  %v9456_v38 = vrot.slane %v9442_v20, %v25368_v49 }
 0x53f   : > { %v9409_v50 = vcombine.low %v8838_v28, %v8879_v10  ;;  %v9410_v11 = vcombine.high %v8838_v28, %v8879_v10  ;;  %v8883_v36 = vpop.f32.mrb[127].mxu1 }
 0x540   : > { %v9425_v14 = vcombine.low %v8840_v16, %v8881_v53  ;;  %v9426_v39 = vcombine.high %v8840_v16, %v8881_v53  ;;  %v9465_v36 = vrot.slane %v9457_v63, %v25368_v49 }
 0x541   : > { %v9417_v23 = vrot.slane %v9409_v50, %v25351_v9  ;;  %v9424_v32 = vrot.slane %v9410_v11, %v25351_v9 }
 0x542   : > { %v8919_v56 = vpop.f32.mrb[112].mxu0  ;;  %v9433_v5 = vrot.slane %v9425_v14, %v25351_v9  ;;  %v9440_v25 = vrot.slane %v9426_v39, %v25351_v9  ;;  %v9472_v14 = vrot.slane %v9458_v62, %v25368_v49 }
 0x543   : > { %v8921_v30 = vpop.f32.mrb[113].mxu0  ;;  %v8920_v28 = vadd.f32 %v8919_v56, %v31377_v22 }
 0x544   : > { %v8960_v54 = vpop.f32.mrb[128].mxu1  ;;  %v8922_v10 = vadd.f32 %v8921_v30, %v25920_v12  ;;  %v8923_v61 = vpop.f32.mrb[114].mxu0  ;;  %v9473_v60 = vcombine.low %v9417_v23, %v9433_v5  ;;  %v9474_v59 = vcombine.high %v9417_v23, %v9433_v5  ;;  %v9489_v50 = vcombine.low %v9424_v32, %v9440_v25 }
 0x545   : > { %v9490_v16 = vcombine.high %v9424_v32, %v9440_v25  ;;  %v8962_v11 = vpop.f32.mrb[129].mxu1  ;;  %v8924_v53 = vpop.f32.mrb[115].mxu0  ;;  %v8961_v17 = vadd.f32 %v8960_v54, %v25918_v13 }
 0x546   : > { %v8963_v20 = vadd.f32 %v8962_v11, %v25922_v29  ;;  %v8964_v39 = vpop.f32.mrb[130].mxu1  ;;  %v9481_v56 = vrot.slane %v9473_v60, %v25368_v49  ;;  %v9488_v30 = vrot.slane %v9474_v59, %v25368_v49  ;;  %v9497_v61 = vrot.slane %v9489_v50, %v25368_v49 }
 0x547   : > { %v9504_v23 = vrot.slane %v9490_v16, %v25368_v49  ;;  %v8965_v32 = vpop.f32.mrb[131].mxu1  ;;  %v9513_v5 = vcombine.low %v8920_v28, %v8961_v17  ;;  %v9514_v25 = vcombine.high %v8920_v28, %v8961_v17 }
 0x548   : > { %v9529_v53 = vcombine.low %v8922_v10, %v8963_v20  ;;  %v9530_v63 = vcombine.high %v8922_v10, %v8963_v20  ;;  %v9505_v15 = vcombine.low %v9449_v42, %v9481_v56  ;;  %v9506_v62 = vcombine.high %v9449_v42, %v9481_v56 }
 0x549   : > { %v9507_v31 = vcombine.low %v9456_v38, %v9488_v30  ;;  %v9508_v54 = vcombine.high %v9456_v38, %v9488_v30  ;;  %v9509_v57 = vcombine.low %v9465_v36, %v9497_v61  ;;  %v9510_v11 = vcombine.high %v9465_v36, %v9497_v61 }
 0x54a   : > { %v9511_v39 = vcombine.low %v9472_v14, %v9504_v23  ;;  %v9512_v41 = vcombine.high %v9472_v14, %v9504_v23  ;;  %v9001_v60 = vpop.f32.mrb[116].mxu0  ;;  %v9521_v59 = vrot.slane %v9513_v5, %v25351_v9  ;;  %v9528_v50 = vrot.slane %v9514_v25, %v25351_v9 }
 0x54b   : > { %v9537_v16 = vrot.slane %v9529_v53, %v25351_v9  ;;  %v9544_v32 = vrot.slane %v9530_v63, %v25351_v9  ;;  %v9003_v28 = vpop.f32.mrb[117].mxu0  ;;  %v9002_v10 = vadd.f32 %v9001_v60, %v26930_v0  ;;  %v31420_v36 = vcombine.low %v27242_v7, %v27309_v43 }
 0x54c   : > { %v9042_v17 = vpop.f32.mrb[132].mxu1  ;;  %v9004_v42 = vadd.f32 %v9003_v28, %v26936_v2  ;;  %v9005_v38 = vpop.f32.mrb[118].mxu0  ;;  %v31421_v20 = vcombine.high %v27242_v7, %v27309_v43  ;;  %v31423_v7 = vcombine.high %v27245_v37, %v27312_v46 }
 0x54d   : > { %v27881_v14 = vadd.f32 %v9505_v15, %v31420_v36  ;;  %v9577_v30 = vcombine.low %v9521_v59, %v9537_v16  ;;  %v9578_v61 = vcombine.high %v9521_v59, %v9537_v16  ;;  %v9593_v23 = vcombine.low %v9528_v50, %v9544_v32  ;;  %v9044_v25 = vpop.f32.mrb[133].mxu1  ;;  %v9006_v53 = vpop.f32.mrb[119].mxu0 }
 0x54e   : > { %v27886_v56 = vadd.f32 %v9506_v62, %v31421_v20  ;;  %v9594_v5 = vcombine.high %v9528_v50, %v9544_v32  ;;  %v9043_v63 = vadd.f32 %v9042_v17, %v26934_v1  ;;  %v9045_v60 = vadd.f32 %v9044_v25, %v26941_v24  ;;  %v9046_v28 = vpop.f32.mrb[134].mxu1 }
 0x54f   : > { %v31422_v15 = vcombine.low %v27245_v37, %v27312_v46  ;;  %v27898_v43 = vadd.f32 %v9508_v54, %v31423_v7  ;;  %v9047_v62 = vpop.f32.mrb[135].mxu1  ;;  %v31424_v17 = vcombine.low %v27248_v44, %v27315_v51  ;;  %v31425_v20 = vcombine.high %v27248_v44, %v27315_v51 }
 0x550   : > { %v9545_v59 = vcombine.low %v9002_v10, %v9043_v63  ;;  %v9546_v50 = vcombine.high %v9002_v10, %v9043_v63  ;;  %v9561_v16 = vcombine.low %v9004_v42, %v9045_v60  ;;  %v9562_v32 = vcombine.high %v9004_v42, %v9045_v60 }
 0x551   : > { %v27893_v38 = vadd.f32 %v9507_v31, %v31422_v15  ;;  %v27903_v36 = vadd.f32 %v9509_v57, %v31424_v17  ;;  %v27908_v31 = vadd.f32 %v9510_v11, %v31425_v20  ;;  %v31426_v37 = vcombine.low %v27251_v18, %v27318_v6 }
 0x552   : > { %v31427_v54 = vcombine.high %v27251_v18, %v27318_v6  ;;  %v9553_v42 = vrot.slane %v9545_v59, %v25351_v9  ;;  %v9560_v57 = vrot.slane %v9546_v50, %v25351_v9  ;;  %v9569_v25 = vrot.slane %v9561_v16, %v25351_v9  ;;  %v9083_v51 = vpop.f32.mrb[120].mxu0 }
 0x553   : > { %v27913_v46 = vadd.f32 %v9511_v39, %v31426_v37  ;;  %v9576_v44 = vrot.slane %v9562_v32, %v25351_v9  ;;  %v9585_v11 = vrot.slane %v9577_v30, %v25368_v49  ;;  %v9084_v53 = vadd.f32 %v9083_v51, %v31377_v22  ;;  %v9085_v39 = vpop.f32.mrb[121].mxu0 }
 0x554   : > { %v27918_v10 = vadd.f32 %v9512_v41, %v31427_v54  ;;  %v9609_v63 = vcombine.low %v9553_v42, %v9569_v25  ;;  %v9610_v60 = vcombine.high %v9553_v42, %v9569_v25  ;;  %v9124_v6 = vpop.f32.mrb[136].mxu1  ;;  %v9087_v41 = vpop.f32.mrb[122].mxu0  ;;  %v9592_v15 = vrot.slane %v9578_v61, %v25368_v49 }
 0x555   : > { %v9625_v28 = vcombine.low %v9560_v57, %v9576_v44  ;;  %v9626_v18 = vcombine.high %v9560_v57, %v9576_v44  ;;  %v9601_v7 = vrot.slane %v9593_v23, %v25368_v49  ;;  %v9125_v62 = vadd.f32 %v9124_v6, %v25918_v13  ;;  %v9126_v50 = vpop.f32.mrb[137].mxu1  ;;  %v9088_v16 = vpop.f32.mrb[123].mxu0 }
 0x556   : > { %v9086_v59 = vadd.f32 %v9085_v39, %v25920_v12  ;;  %v9617_v30 = vrot.slane %v9609_v63, %v25368_v49  ;;  %v9624_v32 = vrot.slane %v9610_v60, %v25368_v49  ;;  %v9128_v37 = vpop.f32.mrb[138].mxu1  ;;  %v9608_v54 = vrot.slane %v9594_v5, %v25368_v49 }
 0x557   : > { %v9633_v17 = vrot.slane %v9625_v28, %v25368_v49  ;;  %v9640_v20 = vrot.slane %v9626_v18, %v25368_v49  ;;  %v9649_v61 = vcombine.low %v9084_v53, %v9125_v62  ;;  %v9650_v42 = vcombine.high %v9084_v53, %v9125_v62  ;;  %v9129_v57 = vpop.f32.mrb[139].mxu1 }
 0x558   : > { %v9127_v23 = vadd.f32 %v9126_v50, %v25922_v29  ;;  %v9641_v25 = vcombine.low %v9585_v11, %v9617_v30  ;;  %v9642_v44 = vcombine.high %v9585_v11, %v9617_v30  ;;  %v9643_v51 = vcombine.low %v9592_v15, %v9624_v32 }
 0x559   : > { %v9644_v39 = vcombine.high %v9592_v15, %v9624_v32  ;;  %v9645_v6 = vcombine.low %v9601_v7, %v9633_v17  ;;  %v9646_v63 = vcombine.high %v9601_v7, %v9633_v17  ;;  %v9647_v41 = vcombine.low %v9608_v54, %v9640_v20 }
 0x55a   : > { %v9648_v60 = vcombine.high %v9608_v54, %v9640_v20  ;;  %v9657_v28 = vrot.slane %v9649_v61, %v25351_v9  ;;  %v9664_v18 = vrot.slane %v9650_v42, %v25351_v9  ;;  %v9665_v16 = vcombine.low %v9086_v59, %v9127_v23  ;;  %v9165_v5 = vpop.f32.mrb[124].mxu0 }
 0x55b   : > { %v9666_v37 = vcombine.high %v9086_v59, %v9127_v23  ;;  %v9166_v53 = vadd.f32 %v9165_v5, %v26930_v0  ;;  %v9167_v62 = vpop.f32.mrb[125].mxu0  ;;  %v31428_v50 = vcombine.low %v27363_v27, %v27408_v55  ;;  %v31429_v15 = vcombine.high %v27363_v27, %v27408_v55 }
 0x55c   : > { %v31430_v30 = vcombine.low %v27366_v45, %v27411_v47  ;;  %v9673_v59 = vrot.slane %v9665_v16, %v25351_v9  ;;  %v9206_v20 = vpop.f32.mrb[140].mxu1  ;;  %v9168_v54 = vadd.f32 %v9167_v62, %v26936_v2  ;;  %v9169_v61 = vpop.f32.mrb[126].mxu0  ;;  %v31431_v42 = vcombine.high %v27366_v45, %v27411_v47 }
 0x55d   : > { %v27942_v11 = vadd.f32 %v9641_v25, %v31428_v50  ;;  %v27947_v7 = vadd.f32 %v9642_v44, %v31429_v15  ;;  %v9680_v17 = vrot.slane %v9666_v37, %v25351_v9  ;;  %v9207_v27 = vadd.f32 %v9206_v20, %v26934_v1  ;;  %v9208_v55 = vpop.f32.mrb[141].mxu1  ;;  %v9170_v57 = vpop.f32.mrb[127].mxu0 }
 0x55e   : > { %v27952_v32 = vadd.f32 %v9643_v51, %v31430_v30  ;;  %v27960_v23 = vadd.f32 %v9644_v39, %v31431_v42  ;;  %v31432_v25 = vcombine.low %v27369_v21, %v27414_v3  ;;  %v31433_v51 = vcombine.high %v27369_v21, %v27414_v3  ;;  %v9210_v50 = vpop.f32.mrb[142].mxu1 }
 0x55f   : > { %v31434_v37 = vcombine.low %v27372_v34, %v27417_v58  ;;  %v9713_v47 = vcombine.low %v9657_v28, %v9673_v59  ;;  %v9714_v39 = vcombine.high %v9657_v28, %v9673_v59  ;;  %v9729_v5 = vcombine.low %v9664_v18, %v9680_v17  ;;  %v9211_v20 = vpop.f32.mrb[143].mxu1 }
 0x560   : > { %v27966_v44 = vadd.f32 %v9645_v6, %v31432_v25  ;;  %v27971_v16 = vadd.f32 %v9646_v63, %v31433_v51  ;;  %v9730_v62 = vcombine.high %v9664_v18, %v9680_v17  ;;  %v9681_v15 = vcombine.low %v9166_v53, %v9207_v27 }
 0x561   : > { %v27976_v45 = vadd.f32 %v9647_v41, %v31434_v37  ;;  %v9682_v30 = vcombine.high %v9166_v53, %v9207_v27  ;;  %v9209_v6 = vadd.f32 %v9208_v55, %v26941_v24  ;;  %v31435_v21 = vcombine.high %v27372_v34, %v27417_v58 }
 0x562   : > { %v9689_v63 = vrot.slane %v9681_v15, %v25351_v9  ;;  %v9247_v28 = vpop.f32.mrb[128].mxu0  ;;  %v9721_v17 = vrot.slane %v9713_v47, %v25368_v49  ;;  %v9728_v27 = vrot.slane %v9714_v39, %v25368_v49  ;;  %v9737_v15 = vrot.slane %v9729_v5, %v25368_v49 }
 0x563   : > { %v27982_v3 = vadd.f32 %v9648_v60, %v31435_v21  ;;  %v9696_v41 = vrot.slane %v9682_v30, %v25351_v9  ;;  %v9697_v61 = vcombine.low %v9168_v54, %v9209_v6  ;;  %v9698_v42 = vcombine.high %v9168_v54, %v9209_v6  ;;  %v9249_v53 = vpop.f32.mrb[129].mxu0 }
 0x564   : > { %v9248_v34 = vadd.f32 %v9247_v28, %v31377_v22  ;;  %v9288_v58 = vpop.f32.mrb[144].mxu1  ;;  %v9250_v60 = vadd.f32 %v9249_v53, %v25920_v12  ;;  %v9251_v55 = vpop.f32.mrb[130].mxu0  ;;  %v9744_v30 = vrot.slane %v9730_v62, %v25368_v49 }
 0x565   : > { %v9705_v18 = vrot.slane %v9697_v61, %v25351_v9  ;;  %v9712_v59 = vrot.slane %v9698_v42, %v25351_v9  ;;  %v9290_v37 = vpop.f32.mrb[145].mxu1  ;;  %v9252_v50 = vpop.f32.mrb[131].mxu0  ;;  %v9289_v47 = vadd.f32 %v9288_v58, %v25918_v13 }
 0x566   : > { %v9291_v39 = vadd.f32 %v9290_v37, %v25922_v29  ;;  %v9292_v6 = vpop.f32.mrb[146].mxu1 }
 0x567   : > { %v9745_v57 = vcombine.low %v9689_v63, %v9705_v18  ;;  %v9746_v25 = vcombine.high %v9689_v63, %v9705_v18  ;;  %v9761_v51 = vcombine.low %v9696_v41, %v9712_v59  ;;  %v9762_v54 = vcombine.high %v9696_v41, %v9712_v59  ;;  %v9293_v41 = vpop.f32.mrb[147].mxu1 }
 0x568   : > { %v9785_v42 = vcombine.low %v9248_v34, %v9289_v47  ;;  %v9786_v28 = vcombine.high %v9248_v34, %v9289_v47  ;;  %v9801_v18 = vcombine.low %v9250_v60, %v9291_v39  ;;  %v9802_v5 = vcombine.high %v9250_v60, %v9291_v39  ;;  %v31438_v60 = vld [vmem:[#allocation29_spill] sm:$0xff]  ;;  %v31439_v47 = vld [vmem:[#allocation36_spill] sm:$0xff] }
 0x569   : > { %v9753_v20 = vrot.slane %v9745_v57, %v25368_v49  ;;  %v9760_v21 = vrot.slane %v9746_v25, %v25368_v49  ;;  %v9769_v61 = vrot.slane %v9761_v51, %v25368_v49  ;;  %v9776_v63 = vrot.slane %v9762_v54, %v25368_v49  ;;  %v31450_v41 = vld [vmem:[#allocation25_spill] sm:$0xff] }
 0x56a   : > { %v9329_v57 = vpop.f32.mrb[132].mxu0  ;;  %v31436_v25 = vcombine.low %v27454_v4, %v27482_v35  ;;  %v31437_v54 = vcombine.high %v27454_v4, %v27482_v35 }
 0x56b   : > { %v9777_v59 = vcombine.low %v9721_v17, %v9753_v20  ;;  %v9778_v62 = vcombine.high %v9721_v17, %v9753_v20  ;;  %v9779_v53 = vcombine.low %v9728_v27, %v9760_v21  ;;  %v9780_v58 = vcombine.high %v9728_v27, %v9760_v21  ;;  %v31444_v20 = vld [vmem:[#allocation30_spill] sm:$0xff]  ;;  %v31445_v21 = vld [vmem:[#allocation37_spill] sm:$0xff] }
 0x56c   : > { %v9781_v55 = vcombine.low %v9737_v15, %v9769_v61  ;;  %v9782_v37 = vcombine.high %v9737_v15, %v9769_v61  ;;  %v9783_v50 = vcombine.low %v9744_v30, %v9776_v63  ;;  %v9784_v6 = vcombine.high %v9744_v30, %v9776_v63  ;;  %v9331_v30 = vpop.f32.mrb[133].mxu0 }
 0x56d   : > { %v28003_v51 = vadd.f32 %v9777_v59, %v31436_v25  ;;  %v28008_v34 = vadd.f32 %v9778_v62, %v31437_v54  ;;  %v31440_v17 = vcombine.low %v31438_v60, %v31439_v47  ;;  %v31442_v27 = vcombine.high %v31438_v60, %v31439_v47  ;;  %v31451_v59 = vld [vmem:[#allocation38_spill] sm:$0xff]  ;;  %v9370_v54 = vpop.f32.mrb[148].mxu1  ;;  %v9333_v60 = vpop.f32.mrb[134].mxu0 }
 0x56e   : > { %v31446_v61 = vcombine.low %v31444_v20, %v31445_v21  ;;  %v31448_v4 = vcombine.high %v31444_v20, %v31445_v21  ;;  %v31452_v62 = vcombine.low %v31450_v41, %v31451_v59  ;;  %v9800_v47 = vrot.slane %v9786_v28, %v25351_v9  ;;  %v9334_v20 = vpop.f32.mrb[135].mxu0 }
 0x56f   : > { %v28013_v39 = vadd.f32 %v9779_v53, %v31440_v17  ;;  %v28018_v15 = vadd.f32 %v9780_v58, %v31442_v27  ;;  %v31454_v58 = vcombine.high %v31450_v41, %v31451_v59  ;;  %v9809_v17 = vrot.slane %v9801_v18, %v25351_v9  ;;  %v9372_v27 = vpop.f32.mrb[149].mxu1 }
 0x570   : > { %v28023_v63 = vadd.f32 %v9781_v55, %v31446_v61  ;;  %v28028_v35 = vadd.f32 %v9782_v37, %v31448_v4  ;;  %v28033_v53 = vadd.f32 %v9783_v50, %v31452_v62  ;;  %v9793_v55 = vrot.slane %v9785_v42, %v25351_v9  ;;  %v9374_v4 = vpop.f32.mrb[150].mxu1 }
 0x571   : > { %31441 = vst [vmem:[#allocation29_spill] sm:$0xff] %v28013_v39  ;;  %31443 = vst [vmem:[#allocation36_spill] sm:$0xff] %v28018_v15  ;;  %v28038_v25 = vadd.f32 %v9784_v6, %v31454_v58  ;;  %v9816_v37 = vrot.slane %v9802_v5, %v25351_v9  ;;  %v9330_v50 = vadd.f32 %v9329_v57, %v26930_v0  ;;  %v9375_v28 = vpop.f32.mrb[151].mxu1 }
 0x572   : > { %31447 = vst [vmem:[#allocation30_spill] sm:$0xff] %v28023_v63  ;;  %31449 = vst [vmem:[#allocation37_spill] sm:$0xff] %v28028_v35  ;;  %v9371_v21 = vadd.f32 %v9370_v54, %v26934_v1  ;;  %v9332_v61 = vadd.f32 %v9331_v30, %v26936_v2  ;;  %v9373_v6 = vadd.f32 %v9372_v27, %v26941_v24  ;;  %v10008_v26 = vpop.f32.mrb[136].mxu0  ;;  %v31456_v63 = vld [vmem:[#allocation39_spill] sm:$0xff] }
 0x573   : > { %31453 = vst [vmem:[#allocation25_spill] sm:$0xff] %v28033_v53  ;;  %31455 = vst [vmem:[#allocation38_spill] sm:$0xff] %v28038_v25  ;;  %v9849_v41 = vcombine.low %v9793_v55, %v9809_v17  ;;  %v9850_v59 = vcombine.high %v9793_v55, %v9809_v17  ;;  %v9865_v42 = vcombine.low %v9800_v47, %v9816_v37 }
 0x574   : > { %v9866_v62 = vcombine.high %v9800_v47, %v9816_v37  ;;  %v9817_v58 = vcombine.low %v9330_v50, %v9371_v21  ;;  %v9818_v18 = vcombine.high %v9330_v50, %v9371_v21  ;;  %v9833_v60 = vcombine.low %v9332_v61, %v9373_v6  ;;  %v10010_v37 = vpop.f32.mrb[137].mxu0  ;;  %v10061_v4 = vpop.f32.mrb[152].mxu1 }
 0x575   : > { %v9834_v5 = vcombine.high %v9332_v61, %v9373_v6  ;;  %v9857_v27 = vrot.slane %v9849_v41, %v25368_v49  ;;  %v9864_v55 = vrot.slane %v9850_v59, %v25368_v49  ;;  %v9873_v47 = vrot.slane %v9865_v42, %v25368_v49  ;;  %v10012_v28 = vpop.f32.mrb[138].mxu0  ;;  %v10063_v41 = vpop.f32.mrb[153].mxu1 }
 0x576   : > { %v9825_v20 = vrot.slane %v9817_v58, %v25351_v9  ;;  %v9832_v57 = vrot.slane %v9818_v18, %v25351_v9  ;;  %v9841_v54 = vrot.slane %v9833_v60, %v25351_v9  ;;  %v10009_v17 = vadd.f32 %v10008_v26, %v31377_v22 }
 0x577   : > { %v9848_v30 = vrot.slane %v9834_v5, %v25351_v9  ;;  %v9880_v58 = vrot.slane %v9866_v62, %v25368_v49  ;;  %v10062_v18 = vadd.f32 %v10061_v4, %v25918_v13  ;;  %v10011_v60 = vadd.f32 %v10010_v37, %v25920_v12  ;;  %v10014_v5 = vpop.f32.mrb[139].mxu0 }
 0x578   : > { %v9881_v50 = vcombine.low %v9825_v20, %v9841_v54  ;;  %v9882_v21 = vcombine.high %v9825_v20, %v9841_v54  ;;  %v10013_v59 = vadd.f32 %v10012_v28, %v31377_v22  ;;  %v10065_v54 = vpop.f32.mrb[154].mxu1  ;;  %v10064_v62 = vadd.f32 %v10063_v41, %v25922_v29  ;;  %v31461_v41 = vld [vmem:[#allocation40_spill] sm:$0xff] }
 0x579   : > { %v9897_v61 = vcombine.low %v9832_v57, %v9848_v30  ;;  %v9898_v6 = vcombine.high %v9832_v57, %v9848_v30  ;;  %v10080_v30 = vcombine.low %v10009_v17, %v10062_v18  ;;  %v10081_v40 = vcombine.high %v10009_v17, %v10062_v18  ;;  %v10067_v37 = vpop.f32.mrb[155].mxu1 }
 0x57a   : > { %v9889_v42 = vrot.slane %v9881_v50, %v25368_v49  ;;  %v9896_v26 = vrot.slane %v9882_v21, %v25368_v49  ;;  %v10066_v4 = vadd.f32 %v10065_v54, %v25918_v13  ;;  %v31462_v54 = vld [vmem:[#allocation44_spill] sm:$0xff] }
 0x57b   : > { %v9905_v20 = vrot.slane %v9897_v61, %v25368_v49  ;;  %v9912_v57 = vrot.slane %v9898_v6, %v25368_v49  ;;  %v31457_v61 = vld [vmem:[#allocation43_spill] sm:$0xff]  ;;  %v31463_v39 = vcombine.low %v31461_v41, %v31462_v54 }
 0x57c   : > { %v9913_v52 = vcombine.low %v9857_v27, %v9889_v42  ;;  %v9914_v48 = vcombine.high %v9857_v27, %v9889_v42  ;;  %v9915_v28 = vcombine.low %v9864_v55, %v9896_v26  ;;  %v9916_v25 = vcombine.high %v9864_v55, %v9896_v26  ;;  %v31467_v42 = vld [vmem:[#allocation41_spill] sm:$0xff] }
 0x57d   : > { %v9917_v53 = vcombine.low %v9873_v47, %v9905_v20  ;;  %v9918_v50 = vcombine.high %v9873_v47, %v9905_v20  ;;  %v9919_v35 = vcombine.low %v9880_v58, %v9912_v57  ;;  %v9920_v21 = vcombine.high %v9880_v58, %v9912_v57  ;;  %v10018_v58 = vpop.f32.mrb[140].mxu0  ;;  %v31468_v26 = vld [vmem:[#allocation45_spill] sm:$0xff]  ;;  %v31473_v20 = vld [vmem:[#allocation42_spill] sm:$0xff] }
 0x57e   : > { %v31458_v15 = vcombine.low %v31456_v63, %v31457_v61  ;;  %v31459_v17 = vcombine.high %v31456_v63, %v31457_v61  ;;  %v28079_v27 = vadd.f32 %v9915_v28, %v31463_v39  ;;  %v31465_v55 = vcombine.high %v31461_v41, %v31462_v54  ;;  %v31474_v57 = vld [vmem:[#allocation46_spill] sm:$0xff] }
 0x57f   : > { %v31475_v39 = vcombine.low %v31473_v20, %v31474_v57  ;;  %v10095_v41 = vrot.slane %v10081_v40, %v25351_v9  ;;  %v10096_v54 = vcombine.low %v10011_v60, %v10064_v62  ;;  %v10019_v40 = vadd.f32 %v10018_v58, %v31377_v22 }
 0x580   : > { %v28069_v6 = vadd.f32 %v9913_v52, %v31458_v15  ;;  %v28074_v18 = vadd.f32 %v9914_v48, %v31459_v17  ;;  %31464 = vst [vmem:[#allocation43_spill] sm:$0xff] %v28079_v27  ;;  %v28084_v47 = vadd.f32 %v9916_v25, %v31465_v55  ;;  %v31469_v52 = vcombine.low %v31467_v42, %v31468_v26  ;;  %v28106_v17 = vpop.f32.mrb[141].mxu0 }
 0x581   : > { %v31471_v48 = vcombine.high %v31467_v42, %v31468_v26  ;;  %v28099_v28 = vadd.f32 %v9919_v35, %v31475_v39  ;;  %v31477_v25 = vcombine.high %v31473_v20, %v31474_v57  ;;  %v10097_v55 = vcombine.high %v10011_v60, %v10064_v62  ;;  %v28110_v42 = vpop.f32.mrb[142].mxu0 }
 0x582   : > { %31460 = vst [vmem:[#allocation39_spill] sm:$0xff] %v28074_v18  ;;  %31466 = vst [vmem:[#allocation40_spill] sm:$0xff] %v28084_v47  ;;  %v28089_v15 = vadd.f32 %v9917_v53, %v31469_v52  ;;  %v10088_v53 = vrot.slane %v10080_v30, %v25351_v9  ;;  %v10148_v26 = vcombine.low %v10013_v59, %v10066_v4 }
 0x583   : > { %v28094_v63 = vadd.f32 %v9918_v50, %v31471_v48  ;;  %31476 = vst [vmem:[#allocation45_spill] sm:$0xff] %v28099_v28  ;;  %v28104_v61 = vadd.f32 %v9920_v21, %v31477_v25  ;;  %v10071_v50 = vpop.f32.mrb[156].mxu1  ;;  %v10149_v52 = vcombine.high %v10013_v59, %v10066_v4  ;;  %v10015_v35 = vadd.f32 %v10014_v5, %v25920_v12  ;;  %v28114_v21 = vpop.f32.mrb[143].mxu0 }
 0x584   : > { %31470 = vst [vmem:[#allocation44_spill] sm:$0xff] %v28089_v15  ;;  %v10068_v48 = vadd.f32 %v10067_v37, %v25922_v29  ;;  %v10073_v20 = vpop.f32.mrb[157].mxu1  ;;  %v10104_v57 = vrot.slane %v10096_v54, %v25351_v9  ;;  %v10111_v30 = vrot.slane %v10097_v55, %v25351_v9  ;;  %v10072_v60 = vadd.f32 %v10071_v50, %v25918_v13 }
 0x585   : > { %31472 = vst [vmem:[#allocation41_spill] sm:$0xff] %v28094_v63  ;;  %31478 = vst [vmem:[#allocation42_spill] sm:$0xff] %v28104_v61  ;;  %v10075_v62 = vpop.f32.mrb[158].mxu1  ;;  %v10156_v39 = vrot.slane %v10148_v26, %v25351_v9  ;;  %v10163_v59 = vrot.slane %v10149_v52, %v25351_v9 }
 0x586   : > { %v10164_v4 = vcombine.low %v10015_v35, %v10068_v48  ;;  %v10165_v5 = vcombine.high %v10015_v35, %v10068_v48  ;;  %v10077_v25 = vpop.f32.mrb[159].mxu1  ;;  %v10112_v37 = vcombine.low %v10088_v53, %v10104_v57  ;;  %v10113_v61 = vcombine.high %v10088_v53, %v10104_v57 }
 0x587   : > { %v10128_v28 = vcombine.low %v10095_v41, %v10111_v30  ;;  %v10129_v63 = vcombine.high %v10095_v41, %v10111_v30  ;;  %v10216_v15 = vcombine.low %v10019_v40, %v10072_v60  ;;  %v10217_v58 = vcombine.high %v10019_v40, %v10072_v60 }
 0x588   : > { %v10172_v54 = vrot.slane %v10164_v4, %v25351_v9  ;;  %v10179_v55 = vrot.slane %v10165_v5, %v25351_v9  ;;  %v10120_v50 = vrot.slane %v10112_v37, %v25368_v49  ;;  %v10127_v47 = vrot.slane %v10113_v61, %v25368_v49 }
 0x589   : > { %v10136_v26 = vrot.slane %v10128_v28, %v25368_v49  ;;  %v10143_v52 = vrot.slane %v10129_v63, %v25368_v49 }
 0x58a   : > { %v10180_v35 = vcombine.low %v10156_v39, %v10172_v54  ;;  %v10181_v48 = vcombine.high %v10156_v39, %v10172_v54  ;;  %v10196_v27 = vcombine.low %v10163_v59, %v10179_v55  ;;  %v10197_v53 = vcombine.high %v10163_v59, %v10179_v55 }
 0x58b   : > { %v10144_v41 = vcombine.high %v10120_v50, %v31348_v19  ;;  %v10145_v57 = vcombine.high %v10127_v47, %v31348_v19  ;;  %v10146_v30 = vcombine.high %v10136_v26, %v31348_v19  ;;  %v10147_v40 = vcombine.high %v10143_v52, %v31348_v19 }
 0x58c   : > { %v24395_v60 = vpack.c.bf16 %v10136_v26, %v10120_v50  ;;  %v24396_v4 = vpack.c.bf16 %v10143_v52, %v10127_v47  ;;  %v10188_v61 = vrot.slane %v10180_v35, %v25368_v49  ;;  %v10195_v28 = vrot.slane %v10181_v48, %v25368_v49 }
 0x58d   : > { %v24399_v5 = vpack.c.bf16 %v10146_v30, %v10144_v41  ;;  %v24400_v63 = vpack.c.bf16 %v10147_v40, %v10145_v57  ;;  %v10204_v39 = vrot.slane %v10196_v27, %v25368_v49  ;;  %v10211_v59 = vrot.slane %v10197_v53, %v25368_v49 }
 0x58e   : > { %v10393_v37 = vrot.slane %v24395_v60, %v25351_v9  ;;  %v10401_v54 = vrot.slane %v24396_v4, %v25351_v9  ;;  %v10212_v55 = vcombine.high %v10188_v61, %v31348_v19  ;;  %v10213_v18 = vcombine.high %v10195_v28, %v31348_v19 }
 0x58f   : > { %v10443_v47 = vrot.slane %v24399_v5, %v25351_v9  ;;  %v10451_v50 = vrot.slane %v24400_v63, %v25351_v9  ;;  %v10214_v26 = vcombine.high %v10204_v39, %v31348_v19  ;;  %v10215_v52 = vcombine.high %v10211_v59, %v31348_v19 }
 0x590   : > { %v10418_v35 = vcombine.low %v10393_v37, %v10401_v54  ;;  %v24397_v27 = vpack.c.bf16 %v10204_v39, %v10188_v61  ;;  %v24398_v48 = vpack.c.bf16 %v10211_v59, %v10195_v28  ;;  %v10224_v30 = vrot.slane %v10216_v15, %v25351_v9 }
 0x591   : > { %v10468_v53 = vcombine.low %v10443_v47, %v10451_v50  ;;  %v24401_v41 = vpack.c.bf16 %v10214_v26, %v10212_v55  ;;  %v24402_v57 = vpack.c.bf16 %v10215_v52, %v10213_v18  ;;  %v10231_v4 = vrot.slane %v10217_v58, %v25351_v9 }
 0x592   : > { %v10409_v40 = vrot.slane %v24397_v27, %v25351_v9  ;;  %v10417_v60 = vrot.slane %v24398_v48, %v25351_v9  ;;  %v10021_v5 = vadd.f32 %v28106_v17, %v25920_v12  ;;  %v10425_v63 = vrot.slane %v10418_v35, %v25368_v49 }
 0x593   : > { %v10459_v37 = vrot.slane %v24401_v41, %v25351_v9  ;;  %v10467_v61 = vrot.slane %v24402_v57, %v25351_v9  ;;  %v10074_v28 = vadd.f32 %v10073_v20, %v25922_v29  ;;  %v10023_v15 = vadd.f32 %v28110_v42, %v31377_v22 }
 0x594   : > { %v10426_v18 = vcombine.low %v10409_v40, %v10417_v60  ;;  %v10076_v39 = vadd.f32 %v10075_v62, %v25918_v13  ;;  %v10025_v58 = vadd.f32 %v28114_v21, %v25920_v12  ;;  %v10078_v55 = vadd.f32 %v10077_v25, %v25922_v29 }
 0x595   : > { %v10476_v59 = vcombine.low %v10459_v37, %v10467_v61  ;;  %v10232_v54 = vcombine.low %v10021_v5, %v10074_v28  ;;  %v10233_v17 = vcombine.high %v10021_v5, %v10074_v28  ;;  %v10475_v47 = vrot.slane %v10468_v53, %v25368_v49 }
 0x596   : > { %v10433_v50 = vrot.slane %v10426_v18, %v25368_v49  ;;  %v10284_v26 = vcombine.low %v10023_v15, %v10076_v39  ;;  %v10285_v20 = vcombine.high %v10023_v15, %v10076_v39  ;;  %v10300_v35 = vcombine.low %v10025_v58, %v10078_v55 }
 0x597   : > { %v10483_v52 = vrot.slane %v10476_v59, %v25368_v49  ;;  %v10240_v42 = vrot.slane %v10232_v54, %v25351_v9  ;;  %v10247_v62 = vrot.slane %v10233_v17, %v25351_v9  ;;  %v10301_v60 = vcombine.high %v10025_v58, %v10078_v55 }
 0x598   : > { %v10434_v27 = vcombine.low %v10425_v63, %v10433_v50  ;;  %v28165_v21 = vcombine.high %v10425_v63, %v10433_v50  ;;  %v10292_v48 = vrot.slane %v10284_v26, %v25351_v9  ;;  %v10299_v25 = vrot.slane %v10285_v20, %v25351_v9 }
 0x599   : > { %v10248_v41 = vcombine.low %v10224_v30, %v10240_v42  ;;  %v10249_v53 = vcombine.high %v10224_v30, %v10240_v42  ;;  %v10264_v57 = vcombine.low %v10231_v4, %v10247_v62  ;;  %v10265_v40 = vcombine.high %v10231_v4, %v10247_v62 }
 0x59a   : > { %v10308_v5 = vrot.slane %v10300_v35, %v25351_v9  ;;  %v10484_v37 = vcombine.low %v10475_v47, %v10483_v52  ;;  %v10485_v61 = vcombine.high %v10475_v47, %v10483_v52  ;;  %v10315_v39 = vrot.slane %v10301_v60, %v25351_v9 }
 0x59b   : > { %v10256_v28 = vrot.slane %v10248_v41, %v25368_v49  ;;  %v10263_v18 = vrot.slane %v10249_v53, %v25368_v49  ;;  %v10272_v63 = vrot.slane %v10264_v57, %v25368_v49  ;;  %v10279_v15 = vrot.slane %v10265_v40, %v25368_v49 }
 0x59c   : > { %v10316_v59 = vcombine.low %v10292_v48, %v10308_v5  ;;  %v10317_v54 = vcombine.high %v10292_v48, %v10308_v5  ;;  %v10588_v30 = vpack.i.b16 %v10484_v37, %v10434_v27  ;;  %v10332_v62 = vcombine.low %v10299_v25, %v10315_v39 }
 0x59d   : > { %v10280_v4 = vcombine.high %v10256_v28, %v31348_v19  ;;  %v10281_v58 = vcombine.high %v10263_v18, %v31348_v19  ;;  %v10282_v17 = vcombine.high %v10272_v63, %v31348_v19  ;;  %v10283_v55 = vcombine.high %v10279_v15, %v31348_v19 }
 0x59e   : > { %v24403_v47 = vpack.c.bf16 %v10272_v63, %v10256_v28  ;;  %v24404_v50 = vpack.c.bf16 %v10279_v15, %v10263_v18  ;;  %v10324_v26 = vrot.slane %v10316_v59, %v25368_v49  ;;  %v10331_v20 = vrot.slane %v10317_v54, %v25368_v49 }
 0x59f   : > { %v24407_v52 = vpack.c.bf16 %v10282_v17, %v10280_v4  ;;  %v24408_v42 = vpack.c.bf16 %v10283_v55, %v10281_v58  ;;  %v10333_v35 = vcombine.high %v10299_v25, %v10315_v39  ;;  %v10340_v5 = vrot.slane %v10332_v62, %v25368_v49 }
 0x5a0   : > { %v10493_v48 = vrot.slane %v24403_v47, %v25351_v9  ;;  %v10501_v41 = vrot.slane %v24404_v50, %v25351_v9  ;;  %v10348_v53 = vcombine.high %v10324_v26, %v31348_v19  ;;  %v10349_v57 = vcombine.high %v10331_v20, %v31348_v19 }
 0x5a1   : > { %v10543_v40 = vrot.slane %v24407_v52, %v25351_v9  ;;  %v10551_v60 = vrot.slane %v24408_v42, %v25351_v9  ;;  %v10347_v28 = vrot.slane %v10333_v35, %v25368_v49  ;;  %v10589_v63 = vshrl.u32 %v10434_v27, 16 }
 0x5a2   : > { %v10518_v18 = vcombine.low %v10493_v48, %v10501_v41  ;;  %v10590_v15 = vshrl.u32 %v10484_v37, 16  ;;  %v10594_v25 = vpack.i.b16 %v10485_v61, %v28165_v21  ;;  %v10350_v59 = vcombine.high %v10340_v5, %v31348_v19 }
 0x5a3   : > { %v10568_v39 = vcombine.low %v10543_v40, %v10551_v60  ;;  %v10351_v54 = vcombine.high %v10347_v28, %v31348_v19  ;;  %v24405_v4 = vpack.c.bf16 %v10340_v5, %v10324_v26  ;;  %v24406_v58 = vpack.c.bf16 %v10347_v28, %v10331_v20 }
 0x5a4   : > { %v10591_v17 = vpack.i.b16 %v10590_v15, %v10589_v63  ;;  %v24409_v47 = vpack.c.bf16 %v10350_v59, %v10348_v53  ;;  %v10595_v52 = vshrl.u32 %v28165_v21, 16  ;;  %v10596_v27 = vshrl.u32 %v10485_v61, 16 }
 0x5a5   : > { %v10509_v55 = vrot.slane %v24405_v4, %v25351_v9  ;;  %v24410_v50 = vpack.c.bf16 %v10351_v54, %v10349_v57  ;;  %v10517_v42 = vrot.slane %v24406_v58, %v25351_v9  ;;  %v10614_v37 = vshrl.u32 %v10588_v30, 16 }
 0x5a6   : > { %v10615_v62 = vshrl.u32 %v10591_v17, 16  ;;  %v10559_v35 = vrot.slane %v24409_v47, %v25351_v9  ;;  %v10612_v41 = vpack.i.b16 %v10591_v17, %v10588_v30  ;;  %v10525_v26 = vrot.slane %v10518_v18, %v25368_v49 }
 0x5a7   : > { %v10567_v48 = vrot.slane %v24410_v50, %v25351_v9  ;;  %v10526_v20 = vcombine.low %v10509_v55, %v10517_v42  ;;  %v10597_v40 = vpack.i.b16 %v10596_v27, %v10595_v52  ;;  %v10575_v53 = vrot.slane %v10568_v39, %v25368_v49 }
 0x5a8   : > { %v10616_v60 = vpack.i.b16 %v10615_v62, %v10614_v37  ;;  %v10622_v5 = vshrl.u32 %v10594_v25, 16  ;;  %v10642_v21 = vcombine.high %v10612_v41, %v25348_v8  ;;  %v10649_v15 = vrot.slane %v10612_v41, %v25351_v9 }
 0x5a9   : > { %v10576_v57 = vcombine.low %v10559_v35, %v10567_v48  ;;  %v10533_v61 = vrot.slane %v10526_v20, %v25368_v49  ;;  %v10623_v28 = vshrl.u32 %v10597_v40, 16  ;;  %v10620_v63 = vpack.i.b16 %v10597_v40, %v10594_v25 }
 0x5aa   : > { %v10715_v30 = vrot.slane %v10616_v60, %v25351_v9  ;;  %v10708_v18 = vcombine.high %v10616_v60, %v25348_v8  ;;  %v28206_v54 = vrot.slane %v10642_v21, %v25351_v9 }
 0x5ab   : > { %v10583_v59 = vrot.slane %v10576_v57, %v25368_v49  ;;  %v10534_v39 = vcombine.low %v10525_v26, %v10533_v61  ;;  %v10535_v4 = vcombine.high %v10525_v26, %v10533_v61  ;;  %v10624_v58 = vpack.i.b16 %v10623_v28, %v10622_v5 }
 0x5ac   : > { %v10664_v17 = vrot.slane %v10620_v63, %v25351_v9  ;;  %v28210_v55 = vrot.slane %v10708_v18, %v25351_v9  ;;  %v10657_v25 = vcombine.high %v10620_v63, %v25348_v8 }
 0x5ad   : > { %v10584_v47 = vcombine.low %v10575_v53, %v10583_v59  ;;  %v10585_v50 = vcombine.high %v10575_v53, %v10583_v59  ;;  %v10730_v52 = vrot.slane %v10624_v58, %v25351_v9  ;;  %v10723_v37 = vcombine.high %v10624_v58, %v25348_v8  ;;  %v28237_v58 = vld [vmem:[%s31218_s3 + $0xc] sm:$0xf] }
 0x5ae   : > { %v10672_v42 = vcombine.low %v10649_v15, %v10664_v17  ;;  %v10673_v27 = vcombine.high %v10649_v15, %v10664_v17  ;;  %v28216_v62 = vrot.slane %v10657_v25, %v25351_v9  ;;  %v10601_v48 = vshrl.u32 %v10534_v39, 16 }
 0x5af   : > { %v10600_v35 = vpack.i.b16 %v10584_v47, %v10534_v39  ;;  %v10602_v41 = vshrl.u32 %v10584_v47, 16  ;;  %v10738_v26 = vcombine.low %v10715_v30, %v10730_v52  ;;  %v10739_v40 = vcombine.high %v10715_v30, %v10730_v52 }
 0x5b0   : > { %v10680_v20 = vrot.slane %v10672_v42, %v25368_v49  ;;  %v10687_v60 = vrot.slane %v10673_v27, %v25368_v49  ;;  %v10737_v53 = vrot.slane %v10723_v37, %v25351_v9  ;;  %v10688_v57 = vcombine.low %v28206_v54, %v28216_v62 }
 0x5b1   : > { %v10689_v5 = vcombine.high %v28206_v54, %v28216_v62  ;;  %v10603_v21 = vpack.i.b16 %v10602_v41, %v10601_v48  ;;  %v10746_v61 = vrot.slane %v10738_v26, %v25368_v49  ;;  %v10753_v63 = vrot.slane %v10739_v40, %v25368_v49 }
 0x5b2   : > { %v10704_v28 = vcombine.high %v10680_v20, %v31328_v33  ;;  %v10754_v15 = vcombine.low %v28210_v55, %v10737_v53  ;;  %v10910_v59 = vsel %vm3502_vm2, %v10680_v20, 0  ;;  %v10755_v18 = vcombine.high %v28210_v55, %v10737_v53 }
 0x5b3   : > { %24411 = vmatprep.subr.msk.bf16.mxu0 %vm3502_vm2, %v10746_v61  ;;  %v10770_v30 = vcombine.high %v10746_v61, %v31328_v33  ;;  %v10705_v17 = vcombine.high %v10687_v60, %v31328_v33  ;;  %v10771_v25 = vcombine.high %v10753_v63, %v31328_v33  ;;  %v10606_v52 = vpack.i.b16 %v10585_v50, %v10535_v4 }
 0x5b4   : > { %11006 = vmatpush1.bf16.msra.mxu0 %v10910_v59  ;;  %v10916_v39 = vsel %vm3502_vm2, %v10704_v28, 0  ;;  %v10762_v47 = vrot.slane %v10754_v15, %v25368_v49  ;;  %v10607_v55 = vshrl.u32 %v10535_v4, 16  ;;  %v10608_v42 = vshrl.u32 %v10585_v50, 16 }
 0x5b5   : > { %24413 = vmatprep.subr.msk.bf16.mxu1 %vm3502_vm2, %v10770_v30  ;;  %24415 = vmatprep.subr.msk.bf16.mxu0 %vm3502_vm2, %v10753_v63  ;;  %v10630_v27 = vshrl.u32 %v10600_v35, 16  ;;  %v10922_v37 = vsel %vm3502_vm2, %v10687_v60, 0  ;;  %v10631_v48 = vshrl.u32 %v10603_v21, 16  ;;  %v10638_v26 = vshrl.u32 %v10606_v52, 16 }
 0x5b6   : > { %11047 = vmatpush1.bf16.msra.mxu1 %v10916_v39  ;;  %v10609_v41 = vpack.i.b16 %v10608_v42, %v10607_v55  ;;  %v10628_v20 = vpack.i.b16 %v10603_v21, %v10600_v35  ;;  %v10928_v4 = vsel %vm3502_vm2, %v10705_v17, 0  ;;  %v10772_v50 = vcombine.high %v10762_v47, %v31328_v33 }
 0x5b7   : > { %24412 = vmatmul.mubr.msk.bf16.vlgmr.msra.gmra.mrb[144].mxu0 %vm3498_vm3, %v28237_v58  ;;  %24417 = vmatprep.subr.msk.bf16.mxu1 %vm3502_vm2, %v10771_v25  ;;  %v10696_v40 = vrot.slane %v10688_v57, %v25368_v49  ;;  %v10632_v60 = vpack.i.b16 %v10631_v48, %v10630_v27  ;;  %v10769_v30 = vrot.slane %v10755_v18, %v25368_v49 }
 0x5b8   : > { %11088 = vmatpush1.bf16.msra.mxu0 %v10922_v37  ;;  %11119 = vmatprep.mubr.bf16.mxu0 %v31328_v33  ;;  %v10639_v53 = vshrl.u32 %v10609_v41, 16  ;;  %v10636_v61 = vpack.i.b16 %v10609_v41, %v10606_v52  ;;  %v10781_v28 = vrot.slane %v10628_v20, %v25351_v9  ;;  %v10774_v35 = vcombine.high %v10628_v20, %v25348_v8 }
 0x5b9   : > { %24414 = vmatmul.mubr.msk.bf16.vlgmr.msra.gmra.mrb[160].mxu1 %vm3498_vm3, %v28237_v58  ;;  %24419 = vmatprep.subr.msk.bf16.mxu0 %vm3502_vm2, %v10762_v47  ;;  %v10840_v21 = vcombine.high %v10632_v60, %v25348_v8  ;;  %v10847_v15 = vrot.slane %v10632_v60, %v25351_v9  ;;  %v10706_v39 = vcombine.high %v10696_v40, %v31328_v33  ;;  %v10934_v42 = vsel %vm3502_vm2, %v10696_v40, 0 }
 0x5ba   : > { %11129 = vmatpush1.bf16.msra.mxu1 %v10928_v4  ;;  %11160 = vmatprep.mubr.bf16.mxu1 %v31328_v33  ;;  %v10640_v63 = vpack.i.b16 %v10639_v53, %v10638_v26  ;;  %v10796_v59 = vrot.slane %v10636_v61, %v25351_v9  ;;  %v10789_v57 = vcombine.high %v10636_v61, %v25348_v8 }
 0x5bb   : > { %24421 = vmatprep.subr.msk.bf16.mxu1 %vm3502_vm2, %v10772_v50  ;;  %v28266_v17 = vrot.slane %v10774_v35, %v25351_v9  ;;  %v10854_v27 = vrot.slane %v10840_v21, %v25351_v9  ;;  %v10703_v37 = vrot.slane %v10689_v5, %v25368_v49  ;;  %v10940_v26 = vsel %vm3502_vm2, %v10706_v39, 0 }
 0x5bc   : > { %v10862_v25 = vrot.slane %v10640_v63, %v25351_v9  ;;  %v10804_v47 = vcombine.low %v10781_v28, %v10796_v59  ;;  %v10805_v52 = vcombine.high %v10781_v28, %v10796_v59  ;;  %v10855_v55 = vcombine.high %v10640_v63, %v25348_v8 }
 0x5bd   : > { %v28275_v18 = vrot.slane %v10789_v57, %v25351_v9  ;;  %v10773_v20 = vcombine.high %v10769_v30, %v31328_v33  ;;  %v10707_v40 = vcombine.high %v10703_v37, %v31328_v33  ;;  %v10946_v53 = vsel %vm3502_vm2, %v10703_v37, 0 }
 0x5be   : > { %v10870_v48 = vcombine.low %v10847_v15, %v10862_v25  ;;  %v10871_v41 = vcombine.high %v10847_v15, %v10862_v25  ;;  %v10869_v4 = vrot.slane %v10855_v55, %v25351_v9  ;;  %v10812_v35 = vrot.slane %v10804_v47, %v25368_v49 }
 0x5bf   : > { %24416 = vmatmul.mubr.msk.bf16.vlgmr.msra.gmra.mrb[148].mxu0 %vm3498_vm3, %v28237_v58  ;;  %v10820_v50 = vcombine.low %v28266_v17, %v28275_v18  ;;  %v10821_v60 = vcombine.high %v28266_v17, %v28275_v18  ;;  %v10952_v28 = vsel %vm3502_vm2, %v10707_v40, 0  ;;  %v10819_v57 = vrot.slane %v10805_v52, %v25368_v49  ;;  %v31483_v40 = vld [vmem:[#allocation18_spill] sm:$0xff] }
 0x5c0   : > { %11170 = vmatpush1.bf16.msra.mxu0 %v10934_v42  ;;  %11201 = vmatprep.mubr.bf16.mxu0 %v31328_v33  ;;  %v10878_v54 = vrot.slane %v10870_v48, %v25368_v49  ;;  %v10886_v62 = vcombine.low %v10854_v27, %v10869_v4  ;;  %v10887_v5 = vcombine.high %v10854_v27, %v10869_v4  ;;  %v10958_v15 = vsel %vm3502_vm2, %v10812_v35, 0  ;;  %v31479_v4 = vld [vmem:[#allocation19_spill] sm:$0xff] }
 0x5c1   : > { %24423 = vmatprep.subr.msk.bf16.mxu0 %vm3502_vm2, %v10769_v30  ;;  %24418 = vmatmul.mubr.msk.bf16.vlgmr.msra.gmra.mrb[164].mxu1 %vm3498_vm3, %v28237_v58  ;;  %v10836_v21 = vcombine.high %v10812_v35, %v31328_v33  ;;  %v10885_v63 = vrot.slane %v10871_v41, %v25368_v49  ;;  %v10837_v39 = vcombine.high %v10819_v57, %v31328_v33  ;;  %v10970_v25 = vsel %vm3502_vm2, %v10819_v57, 0 }
 0x5c2   : > { %11211 = vmatpush1.bf16.msra.mxu1 %v10940_v26  ;;  %11242 = vmatprep.mubr.bf16.mxu1 %v31328_v33  ;;  %v10902_v61 = vcombine.high %v10878_v54, %v31328_v33  ;;  %v10894_v17 = vrot.slane %v10886_v62, %v25368_v49  ;;  %v10828_v55 = vrot.slane %v10820_v50, %v25368_v49  ;;  %v31481_v62 = vld [vmem:[#allocation17_spill] sm:$0xff] }
 0x5c3   : > { %24425 = vmatprep.subr.msk.bf16.mxu1 %vm3502_vm2, %v10773_v20  ;;  %v10964_v59 = vsel %vm3502_vm2, %v10836_v21, 0  ;;  %v10903_v30 = vcombine.high %v10885_v63, %v31328_v33  ;;  %v10976_v47 = vsel %vm3502_vm2, %v10837_v39, 0  ;;  %v10901_v42 = vrot.slane %v10887_v5, %v25368_v49  ;;  %v31482_v5 = vld [vmem:[#allocation23_spill] sm:$0xff] }
 0x5c4   : > { %v10904_v52 = vcombine.high %v10894_v17, %v31328_v33  ;;  %v10838_v27 = vcombine.high %v10828_v55, %v31328_v33  ;;  %v10982_v18 = vsel %vm3502_vm2, %v10828_v55, 0  ;;  %v10835_v41 = vrot.slane %v10821_v60, %v25368_v49  ;;  %v31484_v60 = vld [vmem:[#allocation24_spill] sm:$0xff] }
 0x5c5   : > { %v10905_v48 = vcombine.high %v10901_v42, %v31328_v33 }
 0x5c6   : > { %v10988_v37 = vsel %vm3502_vm2, %v10838_v27, 0  ;;  %v10839_v26 = vcombine.high %v10835_v41, %v31328_v33  ;;  %v10994_v20 = vsel %vm3502_vm2, %v10835_v41, 0 }
 0x5c7   : > { %24420 = vmatmul.mubr.msk.bf16.vlgmr.msra.gmra.mrb[152].mxu0 %vm3498_vm3, %v28237_v58 }
 0x5c8   : > { %11252 = vmatpush1.bf16.msra.mxu0 %v10946_v53  ;;  %11283 = vmatprep.mubr.bf16.mxu0 %v31328_v33  ;;  %v11000_v50 = vsel %vm3502_vm2, %v10839_v26, 0  ;;  %v31485_v53 = vld [vmem:[#allocation21_spill] sm:$0xff] }
 0x5c9   : > { %24422 = vmatmul.mubr.msk.bf16.vlgmr.msra.gmra.mrb[168].mxu1 %vm3498_vm3, %v28237_v58  ;;  %24427 = vmatprep.subr.msk.bf16.mxu0 %vm3502_vm2, %v10878_v54  ;;  %v31480_v54 = vld [vmem:[#allocation20_spill] sm:$0xff] }
 0x5ca   : > { %11293 = vmatpush1.bf16.msra.mxu1 %v10952_v28  ;;  %11324 = vmatprep.mubr.bf16.mxu1 %v31328_v33  ;;  %v25008_v28 = vld [vmem:[%s25340_s12 + $0x10] sm:$0xff]  }
 0x5cb   : > { %24429 = vmatprep.subr.msk.bf16.mxu1 %vm3502_vm2, %v10902_v61  ;;  %v31486_v61 = vld [vmem:[#allocation22_spill] sm:$0xff] }
 0x5cf   : > { %24424 = vmatmul.mubr.msk.bf16.vlgmr.msra.gmra.mrb[156].mxu0 %vm3498_vm3, %v28237_v58 }
 0x5d0   : > { %11334 = vmatpush1.bf16.msra.mxu0 %v10958_v15  ;;  %11365 = vmatprep.mubr.bf16.mxu0 %v31328_v33 }
 0x5d1   : > { %24426 = vmatmul.mubr.msk.bf16.vlgmr.msra.gmra.mrb[172].mxu1 %vm3498_vm3, %v28237_v58  ;;  %24431 = vmatprep.subr.msk.bf16.mxu0 %vm3502_vm2, %v10885_v63 }
 0x5d2   : > { %11375 = vmatpush1.bf16.msra.mxu1 %v10964_v59  ;;  %11406 = vmatprep.mubr.bf16.mxu1 %v31328_v33 }
 0x5d3   : > { %24433 = vmatprep.subr.msk.bf16.mxu1 %vm3502_vm2, %v10903_v30 }
 0x5d7   : > { %24428 = vmatmul.mubr.msk.bf16.vlgmr.msra.gmra.mrb[160].mxu0 %vm3498_vm3, %v28237_v58 }
 0x5d8   : > { %11416 = vmatpush1.bf16.msra.mxu0 %v10970_v25  ;;  %11447 = vmatprep.mubr.bf16.mxu0 %v31328_v33 }
 0x5d9   : > { %24430 = vmatmul.mubr.msk.bf16.vlgmr.msra.gmra.mrb[176].mxu1 %vm3498_vm3, %v28237_v58  ;;  %24435 = vmatprep.subr.msk.bf16.mxu0 %vm3502_vm2, %v10894_v17 }
 0x5da   : > { %11457 = vmatpush1.bf16.msra.mxu1 %v10976_v47  ;;  %11488 = vmatprep.mubr.bf16.mxu1 %v31328_v33 }
 0x5db   : > { %24437 = vmatprep.subr.msk.bf16.mxu1 %vm3502_vm2, %v10904_v52 }
 0x5df   : > { %24432 = vmatmul.mubr.msk.bf16.vlgmr.msra.gmra.mrb[164].mxu0 %vm3498_vm3, %v28237_v58 }
 0x5e0   : > { %11498 = vmatpush1.bf16.msra.mxu0 %v10982_v18  ;;  %11529 = vmatprep.mubr.bf16.mxu0 %v31328_v33 }
 0x5e1   : > { %24439 = vmatprep.subr.msk.bf16.mxu0 %vm3502_vm2, %v10901_v42  ;;  %24434 = vmatmul.mubr.msk.bf16.vlgmr.msra.gmra.mrb[180].mxu1 %vm3498_vm3, %v28237_v58 }
 0x5e2   : > { %11539 = vmatpush1.bf16.msra.mxu1 %v10988_v37  ;;  %11570 = vmatprep.mubr.bf16.mxu1 %v31328_v33 }
 0x5e3   : > { %24441 = vmatprep.subr.msk.bf16.mxu1 %vm3502_vm2, %v10905_v48 }
 0x5e7   : > { %24436 = vmatmul.mubr.msk.bf16.vlgmr.msra.gmra.mrb[168].mxu0 %vm3498_vm3, %v28237_v58 }
 0x5e8   : > { %11580 = vmatpush1.bf16.msra.mxu0 %v10994_v20  ;;  %11611 = vmatprep.mubr.bf16.mxu0 %v31328_v33 }
 0x5e9   : > { %12237 = vmatprep.subr.bf16.mxu0 %v31479_v4  ;;  %24438 = vmatmul.mubr.msk.bf16.vlgmr.msra.gmra.mrb[184].mxu1 %vm3498_vm3, %v28237_v58 }
 0x5ea   : > { %11621 = vmatpush1.bf16.msra.mxu1 %v11000_v50  ;;  %11652 = vmatprep.mubr.bf16.mxu1 %v31328_v33 }
 0x5eb   : > { %12290 = vmatprep.subr.bf16.mxu1 %v31480_v54 }
 0x5ef   : > { %24440 = vmatmul.mubr.msk.bf16.vlgmr.msra.gmra.mrb[172].mxu0 %vm3498_vm3, %v28237_v58 }
 0x5f0   : > { %12238 = vmatpush1.bf16.msra.mxu0 %v31481_v62  ;;  %12269 = vmatprep.mubr.bf16.mxu0 %v31328_v33 }
 0x5f1   : > { %12239 = vmatprep.subr.bf16.mxu0 %v31482_v5  ;;  %24442 = vmatmul.mubr.msk.bf16.vlgmr.msra.gmra.mrb[188].mxu1 %vm3498_vm3, %v28237_v58  ;;  %v25009_v58 = vld [vmem:[%s25340_s12 + $0x18] sm:$0xff]  }
 0x5f2   : > { %12291 = vmatpush1.bf16.msra.mxu1 %v31483_v40  ;;  %12322 = vmatprep.mubr.bf16.mxu1 %v31328_v33 }
 0x5f3   : > { %12292 = vmatprep.subr.bf16.mxu1 %v31484_v60 }
 0x5f4   : > { %12240 = vmatpush1.bf16.msra.mxu0 %v31485_v53 }
 0x5f6   : > { %12293 = vmatpush1.bf16.msra.mxu1 %v31486_v61 }
 0x5f7   : > { %24443 = vmatmul.mubr.msk.bf16.vlgmr.msra.gmra.mrb[176].mxu0 %vm1592_vm1, %v25008_v28 }
 0x5f8   : > { %12279 = vmatprep.mubr.bf16.mxu0 %v31328_v33 }
 0x5f9   : > { %24445 = vmatmul.mubr.msk.bf16.vlgmr.msra.gmra.mrb[192].mxu1 %vm1592_vm1, %v25008_v28 }
 0x5fa   : > { %12332 = vmatprep.mubr.bf16.mxu1 %v31328_v33 }
 0x5ff   : > { %24444 = vmatmul.mubr.msk.bf16.gmra.mrb[180].mxu0 %vm1592_vm1, %v25009_v58 }
 0x600   : > { %13300 = vmatprep.mubr.bf16.mxu0 %v31328_v33 }
 0x601   : > { %24446 = vmatmul.mubr.msk.bf16.gmra.mrb[196].mxu1 %vm1592_vm1, %v25009_v58 }
 0x602   : > { %13341 = vmatprep.mubr.bf16.mxu1 %v31328_v33 }
 0x68a   : > { %v11039_v35 = vpop.f32.mrb[144].mxu0 }
 0x68b   : > { %v11040_v21 = vadd.f32 %v11039_v35, %v31377_v22  ;;  %v11041_v63 = vpop.f32.mrb[145].mxu0 }
 0x68c   : > { %v11080_v15 = vpop.f32.mrb[160].mxu1  ;;  %v11042_v59 = vadd.f32 %v11041_v63, %v25920_v12  ;;  %v11043_v57 = vpop.f32.mrb[146].mxu0 }
 0x68d   : > { %v11081_v30 = vadd.f32 %v11080_v15, %v25918_v13  ;;  %v11082_v39 = vpop.f32.mrb[161].mxu1  ;;  %v11044_v17 = vpop.f32.mrb[147].mxu0 }
 0x68e   : > { %v11083_v25 = vadd.f32 %v11082_v39, %v25922_v29  ;;  %v11084_v47 = vpop.f32.mrb[162].mxu1 }
 0x68f   : > { %v11661_v52 = vcombine.low %v11040_v21, %v11081_v30  ;;  %v11662_v55 = vcombine.high %v11040_v21, %v11081_v30  ;;  %v11085_v42 = vpop.f32.mrb[163].mxu1 }
 0x690   : > { %v11677_v27 = vcombine.low %v11042_v59, %v11083_v25  ;;  %v11678_v18 = vcombine.high %v11042_v59, %v11083_v25 }
 0x691   : > { %v11669_v37 = vrot.slane %v11661_v52, %v25351_v9  ;;  %v11676_v48 = vrot.slane %v11662_v55, %v25351_v9 }
 0x692   : > { %v11685_v41 = vrot.slane %v11677_v27, %v25351_v9  ;;  %v11692_v26 = vrot.slane %v11678_v18, %v25351_v9  ;;  %v11121_v20 = vpop.f32.mrb[148].mxu0 }
 0x693   : > { %v11122_v50 = vadd.f32 %v11121_v20, %v26930_v0  ;;  %v11123_v28 = vpop.f32.mrb[149].mxu0 }
 0x694   : > { %v11725_v58 = vcombine.low %v11669_v37, %v11685_v41  ;;  %v11726_v35 = vcombine.high %v11669_v37, %v11685_v41  ;;  %v11741_v63 = vcombine.low %v11676_v48, %v11692_v26  ;;  %v11742_v15 = vcombine.high %v11676_v48, %v11692_v26  ;;  %v11162_v21 = vpop.f32.mrb[164].mxu1  ;;  %v11125_v57 = vpop.f32.mrb[150].mxu0 }
 0x695   : > { %v11163_v59 = vadd.f32 %v11162_v21, %v26934_v1  ;;  %v11124_v30 = vadd.f32 %v11123_v28, %v26936_v2  ;;  %v11164_v39 = vpop.f32.mrb[165].mxu1  ;;  %v11126_v17 = vpop.f32.mrb[151].mxu0 }
 0x696   : > { %v11166_v25 = vpop.f32.mrb[166].mxu1  ;;  %v11165_v55 = vadd.f32 %v11164_v39, %v26941_v24  ;;  %v11733_v21 = vrot.slane %v11725_v58, %v25368_v49  ;;  %v11740_v57 = vrot.slane %v11726_v35, %v25368_v49 }
 0x697   : > { %v11693_v47 = vcombine.low %v11122_v50, %v11163_v59  ;;  %v11694_v52 = vcombine.high %v11122_v50, %v11163_v59  ;;  %v11167_v42 = vpop.f32.mrb[167].mxu1 }
 0x698   : > { %v11709_v37 = vcombine.low %v11124_v30, %v11165_v55  ;;  %v11710_v48 = vcombine.high %v11124_v30, %v11165_v55 }
 0x699   : > { %v11701_v27 = vrot.slane %v11693_v47, %v25351_v9  ;;  %v11708_v18 = vrot.slane %v11694_v52, %v25351_v9 }
 0x69a   : > { %v11203_v41 = vpop.f32.mrb[152].mxu0  ;;  %v11717_v26 = vrot.slane %v11709_v37, %v25351_v9  ;;  %v11724_v20 = vrot.slane %v11710_v48, %v25351_v9  ;;  %v11749_v37 = vrot.slane %v11741_v63, %v25368_v49  ;;  %v11756_v48 = vrot.slane %v11742_v15, %v25368_v49 }
 0x69b   : > { %v11205_v28 = vpop.f32.mrb[153].mxu0  ;;  %v11204_v50 = vadd.f32 %v11203_v41, %v31377_v22 }
 0x69c   : > { %v11244_v59 = vpop.f32.mrb[168].mxu1  ;;  %v11206_v39 = vadd.f32 %v11205_v28, %v25920_v12  ;;  %v11207_v17 = vpop.f32.mrb[154].mxu0  ;;  %v11757_v25 = vcombine.low %v11701_v27, %v11717_v26  ;;  %v11758_v47 = vcombine.high %v11701_v27, %v11717_v26  ;;  %v11773_v52 = vcombine.low %v11708_v18, %v11724_v20 }
 0x69d   : > { %v11774_v30 = vcombine.high %v11708_v18, %v11724_v20  ;;  %v11246_v55 = vpop.f32.mrb[169].mxu1  ;;  %v11208_v42 = vpop.f32.mrb[155].mxu0  ;;  %v11245_v58 = vadd.f32 %v11244_v59, %v25918_v13 }
 0x69e   : > { %v11247_v35 = vadd.f32 %v11246_v55, %v25922_v29  ;;  %v11248_v61 = vpop.f32.mrb[170].mxu1  ;;  %v11765_v41 = vrot.slane %v11757_v25, %v25368_v49  ;;  %v11772_v28 = vrot.slane %v11758_v47, %v25368_v49  ;;  %v11781_v17 = vrot.slane %v11773_v52, %v25368_v49 }
 0x69f   : > { %v11788_v27 = vrot.slane %v11774_v30, %v25368_v49  ;;  %v11249_v18 = vpop.f32.mrb[171].mxu1  ;;  %v11797_v26 = vcombine.low %v11204_v50, %v11245_v58  ;;  %v11798_v20 = vcombine.high %v11204_v50, %v11245_v58 }
 0x6a0   : > { %v11813_v42 = vcombine.low %v11206_v39, %v11247_v35  ;;  %v11814_v63 = vcombine.high %v11206_v39, %v11247_v35  ;;  %v11789_v53 = vcombine.low %v11733_v21, %v11765_v41  ;;  %v11790_v15 = vcombine.high %v11733_v21, %v11765_v41 }
 0x6a1   : > { %v11791_v60 = vcombine.low %v11740_v57, %v11772_v28  ;;  %v11792_v59 = vcombine.high %v11740_v57, %v11772_v28  ;;  %v11793_v40 = vcombine.low %v11749_v37, %v11781_v17  ;;  %v11794_v55 = vcombine.high %v11749_v37, %v11781_v17 }
 0x6a2   : > { %v11795_v61 = vcombine.low %v11756_v48, %v11788_v27  ;;  %v11796_v5 = vcombine.high %v11756_v48, %v11788_v27  ;;  %v11285_v25 = vpop.f32.mrb[156].mxu0  ;;  %v28412_v47 = vadd.f32 %v11789_v53, %v27881_v14  ;;  %v28415_v52 = vadd.f32 %v11790_v15, %v27886_v56 }
 0x6a3   : > { %v28418_v30 = vadd.f32 %v11791_v60, %v27893_v38  ;;  %v28421_v50 = vadd.f32 %v11792_v59, %v27898_v43  ;;  %v11287_v21 = vpop.f32.mrb[157].mxu0  ;;  %v28424_v57 = vadd.f32 %v11793_v40, %v27903_v36  ;;  %v28427_v39 = vadd.f32 %v11794_v55, %v27908_v31 }
 0x6a4   : > { %v28430_v37 = vadd.f32 %v11795_v61, %v27913_v46  ;;  %v28433_v14 = vadd.f32 %v11796_v5, %v27918_v10  ;;  %v11326_v56 = vpop.f32.mrb[172].mxu1  ;;  %v11289_v53 = vpop.f32.mrb[158].mxu0  ;;  %v11805_v38 = vrot.slane %v11797_v26, %v25351_v9  ;;  %v11812_v43 = vrot.slane %v11798_v20, %v25351_v9 }
 0x6a5   : > { %v11821_v60 = vrot.slane %v11813_v42, %v25351_v9  ;;  %v11828_v36 = vrot.slane %v11814_v63, %v25351_v9  ;;  %v11328_v40 = vpop.f32.mrb[173].mxu1  ;;  %v11290_v48 = vpop.f32.mrb[159].mxu0  ;;  %v11286_v31 = vadd.f32 %v11285_v25, %v26930_v0  ;;  %v11327_v46 = vadd.f32 %v11326_v56, %v26934_v1 }
 0x6a6   : > { %v11288_v58 = vadd.f32 %v11287_v21, %v26936_v2  ;;  %v11329_v10 = vadd.f32 %v11328_v40, %v26941_v24  ;;  %v11330_v5 = vpop.f32.mrb[174].mxu1 }
 0x6a7   : > { %v11861_v35 = vcombine.low %v11805_v38, %v11821_v60  ;;  %v11862_v41 = vcombine.high %v11805_v38, %v11821_v60  ;;  %v11877_v28 = vcombine.low %v11812_v43, %v11828_v36  ;;  %v11878_v17 = vcombine.high %v11812_v43, %v11828_v36  ;;  %v11331_v27 = vpop.f32.mrb[175].mxu1 }
 0x6a8   : > { %v11829_v18 = vcombine.low %v11286_v31, %v11327_v46  ;;  %v11830_v26 = vcombine.high %v11286_v31, %v11327_v46  ;;  %v11845_v20 = vcombine.low %v11288_v58, %v11329_v10  ;;  %v11846_v42 = vcombine.high %v11288_v58, %v11329_v10 }
 0x6a9   : > { %v11869_v25 = vrot.slane %v11861_v35, %v25368_v49  ;;  %v11876_v48 = vrot.slane %v11862_v41, %v25368_v49  ;;  %v11885_v31 = vrot.slane %v11877_v28, %v25368_v49  ;;  %v11892_v46 = vrot.slane %v11878_v17, %v25368_v49 }
 0x6aa   : > { %v11837_v63 = vrot.slane %v11829_v18, %v25351_v9  ;;  %v11844_v15 = vrot.slane %v11830_v26, %v25351_v9  ;;  %v11853_v59 = vrot.slane %v11845_v20, %v25351_v9  ;;  %v11860_v55 = vrot.slane %v11846_v42, %v25351_v9  ;;  %v11367_v61 = vpop.f32.mrb[160].mxu0 }
 0x6ab   : > { %v11368_v21 = vadd.f32 %v11367_v61, %v31377_v22  ;;  %v11369_v56 = vpop.f32.mrb[161].mxu0 }
 0x6ac   : > { %v11893_v53 = vcombine.low %v11837_v63, %v11853_v59  ;;  %v11894_v38 = vcombine.high %v11837_v63, %v11853_v59  ;;  %v11909_v43 = vcombine.low %v11844_v15, %v11860_v55  ;;  %v11910_v60 = vcombine.high %v11844_v15, %v11860_v55  ;;  %v11408_v36 = vpop.f32.mrb[176].mxu1  ;;  %v11371_v40 = vpop.f32.mrb[162].mxu0 }
 0x6ad   : > { %v11409_v58 = vadd.f32 %v11408_v36, %v25918_v13  ;;  %v11410_v10 = vpop.f32.mrb[177].mxu1  ;;  %v11372_v5 = vpop.f32.mrb[163].mxu0  ;;  %v11370_v41 = vadd.f32 %v11369_v56, %v25920_v12 }
 0x6ae   : > { %v11901_v35 = vrot.slane %v11893_v53, %v25368_v49  ;;  %v11908_v27 = vrot.slane %v11894_v38, %v25368_v49  ;;  %v11917_v18 = vrot.slane %v11909_v43, %v25368_v49  ;;  %v11924_v26 = vrot.slane %v11910_v60, %v25368_v49  ;;  %v11412_v20 = vpop.f32.mrb[178].mxu1 }
 0x6af   : > { %v11933_v42 = vcombine.low %v11368_v21, %v11409_v58  ;;  %v11934_v63 = vcombine.high %v11368_v21, %v11409_v58  ;;  %v11411_v28 = vadd.f32 %v11410_v10, %v25922_v29  ;;  %v11413_v17 = vpop.f32.mrb[179].mxu1 }
 0x6b0   : > { %v11925_v15 = vcombine.low %v11869_v25, %v11901_v35  ;;  %v11926_v59 = vcombine.high %v11869_v25, %v11901_v35  ;;  %v11927_v55 = vcombine.low %v11876_v48, %v11908_v27  ;;  %v11928_v61 = vcombine.high %v11876_v48, %v11908_v27 }
 0x6b1   : > { %v11929_v36 = vcombine.low %v11885_v31, %v11917_v18  ;;  %v11930_v53 = vcombine.high %v11885_v31, %v11917_v18  ;;  %v11931_v40 = vcombine.low %v11892_v46, %v11924_v26  ;;  %v11932_v38 = vcombine.high %v11892_v46, %v11924_v26 }
 0x6b2   : > { %v28460_v43 = vadd.f32 %v11925_v15, %v27942_v11  ;;  %v28463_v60 = vadd.f32 %v11926_v59, %v27947_v7  ;;  %v28466_v21 = vadd.f32 %v11927_v55, %v27952_v32  ;;  %v28469_v56 = vadd.f32 %v11928_v61, %v27960_v23  ;;  %v11449_v58 = vpop.f32.mrb[164].mxu0 }
 0x6b3   : > { %v28472_v25 = vadd.f32 %v11929_v36, %v27966_v44  ;;  %v28475_v48 = vadd.f32 %v11930_v53, %v27971_v16  ;;  %v28478_v31 = vadd.f32 %v11931_v40, %v27976_v45  ;;  %v28481_v11 = vadd.f32 %v11932_v38, %v27982_v3  ;;  %v11451_v7 = vpop.f32.mrb[165].mxu0 }
 0x6b4   : > { %v11941_v32 = vrot.slane %v11933_v42, %v25351_v9  ;;  %v11948_v46 = vrot.slane %v11934_v63, %v25351_v9  ;;  %v11949_v23 = vcombine.low %v11370_v41, %v11411_v28  ;;  %v11950_v10 = vcombine.high %v11370_v41, %v11411_v28  ;;  %v11490_v5 = vpop.f32.mrb[180].mxu1  ;;  %v11453_v35 = vpop.f32.mrb[166].mxu0 }
 0x6b5   : > { %v11450_v44 = vadd.f32 %v11449_v58, %v26930_v0  ;;  %v11491_v16 = vadd.f32 %v11490_v5, %v26934_v1  ;;  %v11452_v27 = vadd.f32 %v11451_v7, %v26936_v2  ;;  %v11492_v45 = vpop.f32.mrb[181].mxu1  ;;  %v11454_v18 = vpop.f32.mrb[167].mxu0 }
 0x6b6   : > { %v11957_v3 = vrot.slane %v11949_v23, %v25351_v9  ;;  %v11964_v26 = vrot.slane %v11950_v10, %v25351_v9  ;;  %v11493_v20 = vadd.f32 %v11492_v45, %v26941_v24  ;;  %v11494_v42 = vpop.f32.mrb[182].mxu1 }
 0x6b7   : > { %v11965_v63 = vcombine.low %v11450_v44, %v11491_v16  ;;  %v11966_v17 = vcombine.high %v11450_v44, %v11491_v16  ;;  %v11495_v41 = vpop.f32.mrb[183].mxu1 }
 0x6b8   : > { %v11997_v28 = vcombine.low %v11941_v32, %v11957_v3  ;;  %v11998_v15 = vcombine.high %v11941_v32, %v11957_v3  ;;  %v12013_v59 = vcombine.low %v11948_v46, %v11964_v26  ;;  %v12014_v55 = vcombine.high %v11948_v46, %v11964_v26 }
 0x6b9   : > { %v11973_v61 = vrot.slane %v11965_v63, %v25351_v9  ;;  %v11980_v36 = vrot.slane %v11966_v17, %v25351_v9  ;;  %v11981_v53 = vcombine.low %v11452_v27, %v11493_v20  ;;  %v11982_v40 = vcombine.high %v11452_v27, %v11493_v20 }
 0x6ba   : > { %v11531_v38 = vpop.f32.mrb[168].mxu0  ;;  %v12005_v10 = vrot.slane %v11997_v28, %v25368_v49  ;;  %v12012_v5 = vrot.slane %v11998_v15, %v25368_v49  ;;  %v12021_v20 = vrot.slane %v12013_v59, %v25368_v49  ;;  %v12028_v42 = vrot.slane %v12014_v55, %v25368_v49 }
 0x6bb   : > { %v11989_v58 = vrot.slane %v11981_v53, %v25351_v9  ;;  %v11996_v7 = vrot.slane %v11982_v40, %v25351_v9  ;;  %v11533_v23 = vpop.f32.mrb[169].mxu0  ;;  %v11532_v32 = vadd.f32 %v11531_v38, %v31377_v22 }
 0x6bc   : > { %v11572_v35 = vpop.f32.mrb[184].mxu1  ;;  %v11534_v46 = vadd.f32 %v11533_v23, %v25920_v12  ;;  %v11535_v44 = vpop.f32.mrb[170].mxu0 }
 0x6bd   : > { %v12029_v16 = vcombine.low %v11973_v61, %v11989_v58  ;;  %v12030_v45 = vcombine.high %v11973_v61, %v11989_v58  ;;  %v12045_v18 = vcombine.low %v11980_v36, %v11996_v7  ;;  %v12046_v27 = vcombine.high %v11980_v36, %v11996_v7  ;;  %v11574_v3 = vpop.f32.mrb[185].mxu1  ;;  %v11536_v26 = vpop.f32.mrb[171].mxu0 }
 0x6be   : > { %v11573_v63 = vadd.f32 %v11572_v35, %v25918_v13  ;;  %v11575_v17 = vadd.f32 %v11574_v3, %v25922_v29  ;;  %v11576_v41 = vpop.f32.mrb[186].mxu1 }
 0x6bf   : > { %v12037_v28 = vrot.slane %v12029_v16, %v25368_v49  ;;  %v12044_v15 = vrot.slane %v12030_v45, %v25368_v49  ;;  %v12053_v53 = vrot.slane %v12045_v18, %v25368_v49  ;;  %v12060_v61 = vrot.slane %v12046_v27, %v25368_v49  ;;  %v11577_v36 = vpop.f32.mrb[187].mxu1  ;;  %v31487_v27 = vld [vmem:[#allocation29_spill] sm:$0xff] }
 0x6c0   : > { %v12069_v40 = vcombine.low %v11532_v32, %v11573_v63  ;;  %v12070_v38 = vcombine.high %v11532_v32, %v11573_v63  ;;  %v12085_v58 = vcombine.low %v11534_v46, %v11575_v17  ;;  %v12086_v59 = vcombine.high %v11534_v46, %v11575_v17  ;;  %v31489_v32 = vld [vmem:[#allocation36_spill] sm:$0xff]  ;;  %v31491_v63 = vld [vmem:[#allocation30_spill] sm:$0xff] }
 0x6c1   : > { %v12061_v7 = vcombine.low %v12005_v10, %v12037_v28  ;;  %v12062_v55 = vcombine.high %v12005_v10, %v12037_v28  ;;  %v12063_v23 = vcombine.low %v12012_v5, %v12044_v15  ;;  %v12064_v35 = vcombine.high %v12012_v5, %v12044_v15 }
 0x6c2   : > { %v12065_v44 = vcombine.low %v12021_v20, %v12053_v53  ;;  %v12066_v3 = vcombine.high %v12021_v20, %v12053_v53  ;;  %v12067_v26 = vcombine.low %v12028_v42, %v12060_v61  ;;  %v12068_v41 = vcombine.high %v12028_v42, %v12060_v61  ;;  %v11613_v16 = vpop.f32.mrb[172].mxu0  ;;  %v31493_v20 = vld [vmem:[#allocation37_spill] sm:$0xff] }
 0x6c3   : > { %v28508_v45 = vadd.f32 %v12061_v7, %v28003_v51  ;;  %v28511_v18 = vadd.f32 %v12062_v55, %v28008_v34  ;;  %v28514_v36 = vadd.f32 %v12063_v23, %v31487_v27  ;;  %v28517_v46 = vadd.f32 %v12064_v35, %v31489_v32  ;;  %v11615_v10 = vpop.f32.mrb[173].mxu0  ;;  %v31495_v42 = vld [vmem:[#allocation25_spill] sm:$0xff]  ;;  %v31497_v51 = vld [vmem:[#allocation38_spill] sm:$0xff] }
 0x6c4   : > { %v28520_v5 = vadd.f32 %v12065_v44, %v31491_v63  ;;  %v28523_v17 = vadd.f32 %v12066_v3, %v31493_v20  ;;  %v28526_v28 = vadd.f32 %v12067_v26, %v31495_v42  ;;  %v28529_v15 = vadd.f32 %v12068_v41, %v31497_v51  ;;  %v11654_v34 = vpop.f32.mrb[188].mxu1  ;;  %v11617_v53 = vpop.f32.mrb[174].mxu0 }
 0x6c5   : > { %31488 = vst [vmem:[#allocation46_spill] sm:$0xff] %v28514_v36  ;;  %31490 = vst [vmem:[#allocation29_spill] sm:$0xff] %v28517_v46  ;;  %v12077_v61 = vrot.slane %v12069_v40, %v25351_v9  ;;  %v12084_v7 = vrot.slane %v12070_v38, %v25351_v9  ;;  %v12093_v55 = vrot.slane %v12085_v58, %v25351_v9  ;;  %v11656_v35 = vpop.f32.mrb[189].mxu1  ;;  %v11618_v44 = vpop.f32.mrb[175].mxu0 }
 0x6c6   : > { %31492 = vst [vmem:[#allocation36_spill] sm:$0xff] %v28520_v5  ;;  %31494 = vst [vmem:[#allocation30_spill] sm:$0xff] %v28523_v17  ;;  %v12100_v23 = vrot.slane %v12086_v59, %v25351_v9  ;;  %v11614_v3 = vadd.f32 %v11613_v16, %v26930_v0  ;;  %v11655_v26 = vadd.f32 %v11654_v34, %v26934_v1  ;;  %v11658_v32 = vpop.f32.mrb[190].mxu1 }
 0x6c7   : > { %31496 = vst [vmem:[#allocation37_spill] sm:$0xff] %v28526_v28  ;;  %31498 = vst [vmem:[#allocation25_spill] sm:$0xff] %v28529_v15  ;;  %v11616_v27 = vadd.f32 %v11615_v10, %v26936_v2  ;;  %v11657_v41 = vadd.f32 %v11656_v35, %v26941_v24  ;;  %v12133_v63 = vcombine.low %v12077_v61, %v12093_v55  ;;  %v11659_v38 = vpop.f32.mrb[191].mxu1 }
 0x6c8   : > { %v12134_v20 = vcombine.high %v12077_v61, %v12093_v55  ;;  %v12149_v40 = vcombine.low %v12084_v7, %v12100_v23  ;;  %v12150_v42 = vcombine.high %v12084_v7, %v12100_v23  ;;  %v12101_v51 = vcombine.low %v11614_v3, %v11655_v26 }
 0x6c9   : > { %v12102_v58 = vcombine.high %v11614_v3, %v11655_v26  ;;  %v12117_v53 = vcombine.low %v11616_v27, %v11657_v41  ;;  %v12118_v59 = vcombine.high %v11616_v27, %v11657_v41  ;;  %v12141_v35 = vrot.slane %v12133_v63, %v25368_v49 }
 0x6ca   : > { %v12109_v44 = vrot.slane %v12101_v51, %v25351_v9  ;;  %v12271_v62 = vpop.f32.mrb[176].mxu0  ;;  %v12148_v61 = vrot.slane %v12134_v20, %v25368_v49  ;;  %v12157_v7 = vrot.slane %v12149_v40, %v25368_v49  ;;  %v12164_v51 = vrot.slane %v12150_v42, %v25368_v49 }
 0x6cb   : > { %v12116_v16 = vrot.slane %v12102_v58, %v25351_v9  ;;  %v12125_v34 = vrot.slane %v12117_v53, %v25351_v9  ;;  %v12132_v10 = vrot.slane %v12118_v59, %v25351_v9  ;;  %v12272_v55 = vadd.f32 %v12271_v62, %v31377_v22  ;;  %v12273_v23 = vpop.f32.mrb[177].mxu0 }
 0x6cc   : > { %v12324_v32 = vpop.f32.mrb[192].mxu1  ;;  %v12275_v38 = vpop.f32.mrb[178].mxu0  ;;  %v12274_v53 = vadd.f32 %v12273_v23, %v25920_v12 }
 0x6cd   : > { %v12165_v3 = vcombine.low %v12109_v44, %v12125_v34  ;;  %v12166_v26 = vcombine.high %v12109_v44, %v12125_v34  ;;  %v12181_v27 = vcombine.low %v12116_v16, %v12132_v10  ;;  %v12182_v41 = vcombine.high %v12116_v16, %v12132_v10  ;;  %v12326_v63 = vpop.f32.mrb[193].mxu1  ;;  %v12277_v59 = vpop.f32.mrb[179].mxu0 }
 0x6ce   : > { %v12325_v58 = vadd.f32 %v12324_v32, %v25918_v13  ;;  %v12276_v20 = vadd.f32 %v12275_v38, %v31377_v22  ;;  %v12328_v34 = vpop.f32.mrb[194].mxu1  ;;  %v12327_v42 = vadd.f32 %v12326_v63, %v25922_v29  ;;  %v31503_v63 = vld [vmem:[#allocation40_spill] sm:$0xff] }
 0x6cf   : > { %v12173_v40 = vrot.slane %v12165_v3, %v25368_v49  ;;  %v12180_v62 = vrot.slane %v12166_v26, %v25368_v49  ;;  %v12189_v44 = vrot.slane %v12181_v27, %v25368_v49  ;;  %v12196_v16 = vrot.slane %v12182_v41, %v25368_v49  ;;  %v12330_v23 = vpop.f32.mrb[195].mxu1  ;;  %v31499_v41 = vld [vmem:[#allocation39_spill] sm:$0xff] }
 0x6d0   : > { %v12343_v10 = vcombine.low %v12272_v55, %v12325_v58  ;;  %v12344_v54 = vcombine.high %v12272_v55, %v12325_v58  ;;  %v12329_v32 = vadd.f32 %v12328_v34, %v25918_v13  ;;  %v31501_v55 = vld [vmem:[#allocation43_spill] sm:$0xff] }
 0x6d1   : > { %v12197_v4 = vcombine.low %v12141_v35, %v12173_v40  ;;  %v12198_v15 = vcombine.high %v12141_v35, %v12173_v40  ;;  %v12199_v38 = vcombine.low %v12148_v61, %v12180_v62  ;;  %v12200_v28 = vcombine.high %v12148_v61, %v12180_v62  ;;  %v31505_v35 = vld [vmem:[#allocation44_spill] sm:$0xff]  ;;  %v31507_v61 = vld [vmem:[#allocation41_spill] sm:$0xff] }
 0x6d2   : > { %v12201_v17 = vcombine.low %v12157_v7, %v12189_v44  ;;  %v12202_v3 = vcombine.high %v12157_v7, %v12189_v44  ;;  %v12203_v5 = vcombine.low %v12164_v51, %v12196_v16  ;;  %v12204_v26 = vcombine.high %v12164_v51, %v12196_v16  ;;  %v12281_v36 = vpop.f32.mrb[180].mxu0  ;;  %v31509_v51 = vld [vmem:[#allocation45_spill] sm:$0xff] }
 0x6d3   : > { %v28558_v27 = vadd.f32 %v12197_v4, %v28069_v6  ;;  %v28561_v46 = vadd.f32 %v12198_v15, %v31499_v41  ;;  %v28564_v58 = vadd.f32 %v12199_v38, %v31501_v55  ;;  %v28567_v34 = vadd.f32 %v12200_v28, %v31503_v63  ;;  %v31511_v6 = vld [vmem:[#allocation42_spill] sm:$0xff]  ;;  %v28581_v15 = vpop.f32.mrb[181].mxu0 }
 0x6d4   : > { %v28570_v40 = vadd.f32 %v12201_v17, %v31505_v35  ;;  %v28573_v7 = vadd.f32 %v12202_v3, %v31507_v61  ;;  %v28576_v62 = vadd.f32 %v12203_v5, %v31509_v51  ;;  %v28579_v4 = vadd.f32 %v12204_v26, %v31511_v6  ;;  %v12334_v41 = vpop.f32.mrb[196].mxu1  ;;  %v28585_v17 = vpop.f32.mrb[182].mxu0 }
 0x6d5   : > { %31500 = vst [vmem:[#allocation38_spill] sm:$0xff] %v28561_v46  ;;  %31502 = vst [vmem:[#allocation39_spill] sm:$0xff] %v28564_v58  ;;  %v12351_v44 = vrot.slane %v12343_v10, %v25351_v9  ;;  %v12358_v28 = vrot.slane %v12344_v54, %v25351_v9  ;;  %v12359_v16 = vcombine.low %v12274_v53, %v12327_v42  ;;  %v12336_v35 = vpop.f32.mrb[197].mxu1  ;;  %v28589_v26 = vpop.f32.mrb[183].mxu0 }
 0x6d6   : > { %31504 = vst [vmem:[#allocation43_spill] sm:$0xff] %v28567_v34  ;;  %31506 = vst [vmem:[#allocation40_spill] sm:$0xff] %v28570_v40  ;;  %v12360_v38 = vcombine.high %v12274_v53, %v12327_v42  ;;  %v12411_v55 = vcombine.low %v12276_v20, %v12329_v32  ;;  %v12412_v3 = vcombine.high %v12276_v20, %v12329_v32  ;;  %v12338_v42 = vpop.f32.mrb[198].mxu1 }
 0x6d7   : > { %31508 = vst [vmem:[#allocation44_spill] sm:$0xff] %v28573_v7  ;;  %31510 = vst [vmem:[#allocation41_spill] sm:$0xff] %v28576_v62  ;;  %v12278_v63 = vadd.f32 %v12277_v59, %v25920_v12  ;;  %v12331_v5 = vadd.f32 %v12330_v23, %v25922_v29  ;;  %v12367_v61 = vrot.slane %v12359_v16, %v25351_v9  ;;  %v12340_v6 = vpop.f32.mrb[199].mxu1 }
 0x6d8   : > { %31512 = vst [vmem:[#allocation45_spill] sm:$0xff] %v28579_v4  ;;  %v12374_v10 = vrot.slane %v12360_v38, %v25351_v9  ;;  %v12282_v54 = vadd.f32 %v12281_v36, %v31377_v22  ;;  %v12335_v53 = vadd.f32 %v12334_v41, %v25918_v13  ;;  %v12419_v51 = vrot.slane %v12411_v55, %v25351_v9 }
 0x6d9   : > { %v12426_v20 = vrot.slane %v12412_v3, %v25351_v9  ;;  %v12427_v32 = vcombine.low %v12278_v63, %v12331_v5  ;;  %v12428_v59 = vcombine.high %v12278_v63, %v12331_v5  ;;  %v12375_v23 = vcombine.low %v12351_v44, %v12367_v61 }
 0x6da   : > { %v12376_v4 = vcombine.high %v12351_v44, %v12367_v61  ;;  %v12391_v62 = vcombine.low %v12358_v28, %v12374_v10  ;;  %v12392_v7 = vcombine.high %v12358_v28, %v12374_v10  ;;  %v12479_v40 = vcombine.low %v12282_v54, %v12335_v53 }
 0x6db   : > { %v12435_v16 = vrot.slane %v12427_v32, %v25351_v9  ;;  %v12442_v38 = vrot.slane %v12428_v59, %v25351_v9  ;;  %v12480_v36 = vcombine.high %v12282_v54, %v12335_v53  ;;  %v12383_v41 = vrot.slane %v12375_v23, %v25368_v49 }
 0x6dc   : > { %v12390_v34 = vrot.slane %v12376_v4, %v25368_v49  ;;  %v12399_v55 = vrot.slane %v12391_v62, %v25368_v49  ;;  %v12406_v3 = vrot.slane %v12392_v7, %v25368_v49 }
 0x6dd   : > { %v12443_v63 = vcombine.low %v12419_v51, %v12435_v16  ;;  %v12444_v5 = vcombine.high %v12419_v51, %v12435_v16  ;;  %v12459_v58 = vcombine.low %v12426_v20, %v12442_v38  ;;  %v12460_v44 = vcombine.high %v12426_v20, %v12442_v38 }
 0x6de   : > { %v12407_v28 = vcombine.high %v12383_v41, %v31348_v19  ;;  %v12408_v61 = vcombine.high %v12390_v34, %v31348_v19  ;;  %v12409_v10 = vcombine.high %v12399_v55, %v31348_v19  ;;  %v12410_v54 = vcombine.high %v12406_v3, %v31348_v19 }
 0x6df   : > { %v24448_v53 = vpack.c.bf16 %v12399_v55, %v12383_v41  ;;  %v24449_v32 = vpack.c.bf16 %v12406_v3, %v12390_v34  ;;  %v12451_v4 = vrot.slane %v12443_v63, %v25368_v49  ;;  %v12458_v62 = vrot.slane %v12444_v5, %v25368_v49 }
 0x6e0   : > { %v24452_v59 = vpack.c.bf16 %v12409_v10, %v12407_v28  ;;  %v24453_v7 = vpack.c.bf16 %v12410_v54, %v12408_v61  ;;  %v12467_v51 = vrot.slane %v12459_v58, %v25368_v49  ;;  %v12474_v20 = vrot.slane %v12460_v44, %v25368_v49 }
 0x6e1   : > { %v12656_v23 = vrot.slane %v24448_v53, %v25351_v9  ;;  %v12664_v16 = vrot.slane %v24449_v32, %v25351_v9  ;;  %v12475_v38 = vcombine.high %v12451_v4, %v31348_v19  ;;  %v12476_v46 = vcombine.high %v12458_v62, %v31348_v19 }
 0x6e2   : > { %v12706_v34 = vrot.slane %v24452_v59, %v25351_v9  ;;  %v12714_v41 = vrot.slane %v24453_v7, %v25351_v9  ;;  %v12477_v55 = vcombine.high %v12467_v51, %v31348_v19  ;;  %v12478_v3 = vcombine.high %v12474_v20, %v31348_v19 }
 0x6e3   : > { %v12681_v63 = vcombine.low %v12656_v23, %v12664_v16  ;;  %v24450_v58 = vpack.c.bf16 %v12467_v51, %v12451_v4  ;;  %v24451_v5 = vpack.c.bf16 %v12474_v20, %v12458_v62  ;;  %v12487_v10 = vrot.slane %v12479_v40, %v25351_v9 }
 0x6e4   : > { %v12731_v44 = vcombine.low %v12706_v34, %v12714_v41  ;;  %v24454_v28 = vpack.c.bf16 %v12477_v55, %v12475_v38  ;;  %v24455_v61 = vpack.c.bf16 %v12478_v3, %v12476_v46  ;;  %v12494_v32 = vrot.slane %v12480_v36, %v25351_v9 }
 0x6e5   : > { %v12672_v54 = vrot.slane %v24450_v58, %v25351_v9  ;;  %v12680_v53 = vrot.slane %v24451_v5, %v25351_v9  ;;  %v12284_v59 = vadd.f32 %v28581_v15, %v25920_v12  ;;  %v12688_v7 = vrot.slane %v12681_v63, %v25368_v49 }
 0x6e6   : > { %v12722_v23 = vrot.slane %v24454_v28, %v25351_v9  ;;  %v12730_v4 = vrot.slane %v24455_v61, %v25351_v9  ;;  %v12337_v62 = vadd.f32 %v12336_v35, %v25922_v29  ;;  %v12286_v40 = vadd.f32 %v28585_v17, %v31377_v22 }
 0x6e7   : > { %v12689_v46 = vcombine.low %v12672_v54, %v12680_v53  ;;  %v12339_v51 = vadd.f32 %v12338_v42, %v25918_v13  ;;  %v12288_v36 = vadd.f32 %v28589_v26, %v25920_v12  ;;  %v12341_v38 = vadd.f32 %v12340_v6, %v25922_v29 }
 0x6e8   : > { %v12739_v20 = vcombine.low %v12722_v23, %v12730_v4  ;;  %v12495_v16 = vcombine.low %v12284_v59, %v12337_v62  ;;  %v12496_v15 = vcombine.high %v12284_v59, %v12337_v62  ;;  %v12738_v34 = vrot.slane %v12731_v44, %v25368_v49 }
 0x6e9   : > { %v12696_v41 = vrot.slane %v12689_v46, %v25368_v49  ;;  %v12547_v55 = vcombine.low %v12286_v40, %v12339_v51  ;;  %v12548_v35 = vcombine.high %v12286_v40, %v12339_v51  ;;  %v12563_v63 = vcombine.low %v12288_v36, %v12341_v38 }
 0x6ea   : > { %v12746_v3 = vrot.slane %v12739_v20, %v25368_v49  ;;  %v12503_v17 = vrot.slane %v12495_v16, %v25351_v9  ;;  %v12510_v42 = vrot.slane %v12496_v15, %v25351_v9  ;;  %v12564_v53 = vcombine.high %v12288_v36, %v12341_v38 }
 0x6eb   : > { %v12697_v58 = vcombine.low %v12688_v7, %v12696_v41  ;;  %v28640_v26 = vcombine.high %v12688_v7, %v12696_v41  ;;  %v12555_v5 = vrot.slane %v12547_v55, %v25351_v9  ;;  %v12562_v6 = vrot.slane %v12548_v35, %v25351_v9 }
 0x6ec   : > { %v12511_v28 = vcombine.low %v12487_v10, %v12503_v17  ;;  %v12512_v44 = vcombine.high %v12487_v10, %v12503_v17  ;;  %v12527_v61 = vcombine.low %v12494_v32, %v12510_v42  ;;  %v12528_v54 = vcombine.high %v12494_v32, %v12510_v42 }
 0x6ed   : > { %v12571_v59 = vrot.slane %v12563_v63, %v25351_v9  ;;  %v12747_v23 = vcombine.low %v12738_v34, %v12746_v3  ;;  %v12748_v4 = vcombine.high %v12738_v34, %v12746_v3  ;;  %v12578_v51 = vrot.slane %v12564_v53, %v25351_v9 }
 0x6ee   : > { %v12519_v62 = vrot.slane %v12511_v28, %v25368_v49  ;;  %v12526_v46 = vrot.slane %v12512_v44, %v25368_v49  ;;  %v12535_v7 = vrot.slane %v12527_v61, %v25368_v49  ;;  %v12542_v40 = vrot.slane %v12528_v54, %v25368_v49 }
 0x6ef   : > { %v12579_v20 = vcombine.low %v12555_v5, %v12571_v59  ;;  %v12580_v16 = vcombine.high %v12555_v5, %v12571_v59  ;;  %v12851_v10 = vpack.i.b16 %v12747_v23, %v12697_v58  ;;  %v12595_v42 = vcombine.low %v12562_v6, %v12578_v51 }
 0x6f0   : > { %v12543_v32 = vcombine.high %v12519_v62, %v31348_v19  ;;  %v12544_v36 = vcombine.high %v12526_v46, %v31348_v19  ;;  %v12545_v15 = vcombine.high %v12535_v7, %v31348_v19  ;;  %v12546_v38 = vcombine.high %v12542_v40, %v31348_v19 }
 0x6f1   : > { %v24456_v34 = vpack.c.bf16 %v12535_v7, %v12519_v62  ;;  %v24457_v41 = vpack.c.bf16 %v12542_v40, %v12526_v46  ;;  %v12587_v55 = vrot.slane %v12579_v20, %v25368_v49  ;;  %v12594_v35 = vrot.slane %v12580_v16, %v25368_v49 }
 0x6f2   : > { %v24460_v3 = vpack.c.bf16 %v12545_v15, %v12543_v32  ;;  %v24461_v17 = vpack.c.bf16 %v12546_v38, %v12544_v36  ;;  %v12596_v63 = vcombine.high %v12562_v6, %v12578_v51  ;;  %v12603_v59 = vrot.slane %v12595_v42, %v25368_v49 }
 0x6f3   : > { %v12756_v5 = vrot.slane %v24456_v34, %v25351_v9  ;;  %v12764_v28 = vrot.slane %v24457_v41, %v25351_v9  ;;  %v12611_v44 = vcombine.high %v12587_v55, %v31348_v19  ;;  %v12612_v61 = vcombine.high %v12594_v35, %v31348_v19 }
 0x6f4   : > { %v12806_v54 = vrot.slane %v24460_v3, %v25351_v9  ;;  %v12814_v53 = vrot.slane %v24461_v17, %v25351_v9  ;;  %v12610_v62 = vrot.slane %v12596_v63, %v25368_v49  ;;  %v12852_v7 = vshrl.u32 %v12697_v58, 16 }
 0x6f5   : > { %v12781_v46 = vcombine.low %v12756_v5, %v12764_v28  ;;  %v12853_v40 = vshrl.u32 %v12747_v23, 16  ;;  %v12857_v6 = vpack.i.b16 %v12748_v4, %v28640_v26  ;;  %v12613_v20 = vcombine.high %v12603_v59, %v31348_v19 }
 0x6f6   : > { %v12831_v51 = vcombine.low %v12806_v54, %v12814_v53  ;;  %v12614_v16 = vcombine.high %v12610_v62, %v31348_v19  ;;  %v24458_v32 = vpack.c.bf16 %v12603_v59, %v12587_v55  ;;  %v24459_v36 = vpack.c.bf16 %v12610_v62, %v12594_v35 }
 0x6f7   : > { %v12854_v15 = vpack.i.b16 %v12853_v40, %v12852_v7  ;;  %v24462_v34 = vpack.c.bf16 %v12613_v20, %v12611_v44  ;;  %v12858_v3 = vshrl.u32 %v28640_v26, 16  ;;  %v12859_v58 = vshrl.u32 %v12748_v4, 16 }
 0x6f8   : > { %v12772_v38 = vrot.slane %v24458_v32, %v25351_v9  ;;  %v24463_v41 = vpack.c.bf16 %v12614_v16, %v12612_v61  ;;  %v12780_v17 = vrot.slane %v24459_v36, %v25351_v9  ;;  %v12877_v23 = vshrl.u32 %v12851_v10, 16 }
 0x6f9   : > { %v12878_v42 = vshrl.u32 %v12854_v15, 16  ;;  %v12822_v63 = vrot.slane %v24462_v34, %v25351_v9  ;;  %v12875_v28 = vpack.i.b16 %v12854_v15, %v12851_v10  ;;  %v12788_v55 = vrot.slane %v12781_v46, %v25368_v49 }
 0x6fa   : > { %v12830_v5 = vrot.slane %v24463_v41, %v25351_v9  ;;  %v12789_v35 = vcombine.low %v12772_v38, %v12780_v17  ;;  %v12860_v54 = vpack.i.b16 %v12859_v58, %v12858_v3  ;;  %v12838_v44 = vrot.slane %v12831_v51, %v25368_v49 }
 0x6fb   : > { %v12879_v53 = vpack.i.b16 %v12878_v42, %v12877_v23  ;;  %v12885_v59 = vshrl.u32 %v12857_v6, 16  ;;  %v12905_v26 = vcombine.high %v12875_v28, %v25348_v8  ;;  %v12912_v40 = vrot.slane %v12875_v28, %v25351_v9 }
 0x6fc   : > { %v12839_v61 = vcombine.low %v12822_v63, %v12830_v5  ;;  %v12796_v4 = vrot.slane %v12789_v35, %v25368_v49  ;;  %v12886_v62 = vshrl.u32 %v12860_v54, 16  ;;  %v12883_v7 = vpack.i.b16 %v12860_v54, %v12857_v6 }
 0x6fd   : > { %v12978_v10 = vrot.slane %v12879_v53, %v25351_v9  ;;  %v12971_v46 = vcombine.high %v12879_v53, %v25348_v8  ;;  %v28681_v16 = vrot.slane %v12905_v26, %v25351_v9 }
 0x6fe   : > { %v12846_v20 = vrot.slane %v12839_v61, %v25368_v49  ;;  %v12797_v51 = vcombine.low %v12788_v55, %v12796_v4  ;;  %v12798_v32 = vcombine.high %v12788_v55, %v12796_v4  ;;  %v12887_v36 = vpack.i.b16 %v12886_v62, %v12885_v59 }
 0x6ff   : > { %v12927_v15 = vrot.slane %v12883_v7, %v25351_v9  ;;  %v28685_v38 = vrot.slane %v12971_v46, %v25351_v9  ;;  %v12920_v6 = vcombine.high %v12883_v7, %v25348_v8 }
 0x700   : > { %v12847_v34 = vcombine.low %v12838_v44, %v12846_v20  ;;  %v12848_v41 = vcombine.high %v12838_v44, %v12846_v20  ;;  %v12993_v3 = vrot.slane %v12887_v36, %v25351_v9  ;;  %v12986_v23 = vcombine.high %v12887_v36, %v25348_v8  ;;  %v28712_v36 = vld [vmem:[%s31218_s3 + $0x10] sm:$0xf] }
 0x701   : > { %v12935_v17 = vcombine.low %v12912_v40, %v12927_v15  ;;  %v12936_v58 = vcombine.high %v12912_v40, %v12927_v15  ;;  %v28691_v42 = vrot.slane %v12920_v6, %v25351_v9  ;;  %v12864_v5 = vshrl.u32 %v12797_v51, 16 }
 0x702   : > { %v12863_v63 = vpack.i.b16 %v12847_v34, %v12797_v51  ;;  %v12865_v28 = vshrl.u32 %v12847_v34, 16  ;;  %v13001_v55 = vcombine.low %v12978_v10, %v12993_v3  ;;  %v13002_v54 = vcombine.high %v12978_v10, %v12993_v3 }
 0x703   : > { %v12943_v35 = vrot.slane %v12935_v17, %v25368_v49  ;;  %v12950_v53 = vrot.slane %v12936_v58, %v25368_v49  ;;  %v13000_v44 = vrot.slane %v12986_v23, %v25351_v9  ;;  %v12951_v61 = vcombine.low %v28681_v16, %v28691_v42 }
 0x704   : > { %v12952_v59 = vcombine.high %v28681_v16, %v28691_v42  ;;  %v12866_v26 = vpack.i.b16 %v12865_v28, %v12864_v5  ;;  %v13009_v4 = vrot.slane %v13001_v55, %v25368_v49  ;;  %v13016_v7 = vrot.slane %v13002_v54, %v25368_v49 }
 0x705   : > { %v12967_v62 = vcombine.high %v12943_v35, %v31328_v33  ;;  %v13017_v40 = vcombine.low %v28685_v38, %v13000_v44  ;;  %v13173_v20 = vsel %vm3502_vm2, %v12943_v35, 0  ;;  %v13018_v46 = vcombine.high %v28685_v38, %v13000_v44 }
 0x706   : > { %24464 = vmatprep.subr.msk.bf16.mxu0 %vm3502_vm2, %v13009_v4  ;;  %v13033_v10 = vcombine.high %v13009_v4, %v31328_v33  ;;  %v12968_v15 = vcombine.high %v12950_v53, %v31328_v33  ;;  %v13034_v6 = vcombine.high %v13016_v7, %v31328_v33  ;;  %v12869_v3 = vpack.i.b16 %v12848_v41, %v12798_v32 }
 0x707   : > { %13269 = vmatpush1.bf16.msra.mxu0 %v13173_v20  ;;  %v13179_v51 = vsel %vm3502_vm2, %v12967_v62, 0  ;;  %v13025_v34 = vrot.slane %v13017_v40, %v25368_v49  ;;  %v12870_v38 = vshrl.u32 %v12798_v32, 16  ;;  %v12871_v17 = vshrl.u32 %v12848_v41, 16 }
 0x708   : > { %24466 = vmatprep.subr.msk.bf16.mxu1 %vm3502_vm2, %v13033_v10  ;;  %24468 = vmatprep.subr.msk.bf16.mxu0 %vm3502_vm2, %v13016_v7  ;;  %v12893_v58 = vshrl.u32 %v12863_v63, 16  ;;  %v13185_v23 = vsel %vm3502_vm2, %v12950_v53, 0  ;;  %v12894_v5 = vshrl.u32 %v12866_v26, 16  ;;  %v12901_v55 = vshrl.u32 %v12869_v3, 16 }
 0x709   : > { %13310 = vmatpush1.bf16.msra.mxu1 %v13179_v51  ;;  %v12872_v28 = vpack.i.b16 %v12871_v17, %v12870_v38  ;;  %v12891_v35 = vpack.i.b16 %v12866_v26, %v12863_v63  ;;  %v13191_v32 = vsel %vm3502_vm2, %v12968_v15, 0  ;;  %v13035_v41 = vcombine.high %v13025_v34, %v31328_v33 }
 0x70a   : > { %24465 = vmatmul.mubr.msk.bf16.vlgmr.msra.gmra.mrb[184].mxu0 %vm3498_vm3, %v28712_v36  ;;  %24470 = vmatprep.subr.msk.bf16.mxu1 %vm3502_vm2, %v13034_v6  ;;  %v12959_v54 = vrot.slane %v12951_v61, %v25368_v49  ;;  %v12895_v53 = vpack.i.b16 %v12894_v5, %v12893_v58  ;;  %v13032_v10 = vrot.slane %v13018_v46, %v25368_v49 }
 0x70b   : > { %13351 = vmatpush1.bf16.msra.mxu0 %v13185_v23  ;;  %13382 = vmatprep.mubr.bf16.mxu0 %v31328_v33  ;;  %v12902_v44 = vshrl.u32 %v12872_v28, 16  ;;  %v12899_v4 = vpack.i.b16 %v12872_v28, %v12869_v3  ;;  %v13044_v62 = vrot.slane %v12891_v35, %v25351_v9  ;;  %v13037_v63 = vcombine.high %v12891_v35, %v25348_v8 }
 0x70c   : > { %24467 = vmatmul.mubr.msk.bf16.vlgmr.msra.gmra.mrb[200].mxu1 %vm3498_vm3, %v28712_v36  ;;  %24472 = vmatprep.subr.msk.bf16.mxu0 %vm3502_vm2, %v13025_v34  ;;  %v13103_v26 = vcombine.high %v12895_v53, %v25348_v8  ;;  %v13110_v40 = vrot.slane %v12895_v53, %v25351_v9  ;;  %v12969_v51 = vcombine.high %v12959_v54, %v31328_v33  ;;  %v13197_v17 = vsel %vm3502_vm2, %v12959_v54, 0 }
 0x70d   : > { %13392 = vmatpush1.bf16.msra.mxu1 %v13191_v32  ;;  %13423 = vmatprep.mubr.bf16.mxu1 %v31328_v33  ;;  %v12903_v7 = vpack.i.b16 %v12902_v44, %v12901_v55  ;;  %v13059_v20 = vrot.slane %v12899_v4, %v25351_v9  ;;  %v13052_v61 = vcombine.high %v12899_v4, %v25348_v8 }
 0x70e   : > { %24474 = vmatprep.subr.msk.bf16.mxu1 %vm3502_vm2, %v13035_v41  ;;  %v28741_v15 = vrot.slane %v13037_v63, %v25351_v9  ;;  %v13117_v58 = vrot.slane %v13103_v26, %v25351_v9  ;;  %v12966_v23 = vrot.slane %v12952_v59, %v25368_v49  ;;  %v13203_v55 = vsel %vm3502_vm2, %v12969_v51, 0 }
 0x70f   : > { %v13125_v6 = vrot.slane %v12903_v7, %v25351_v9  ;;  %v13067_v34 = vcombine.low %v13044_v62, %v13059_v20  ;;  %v13068_v3 = vcombine.high %v13044_v62, %v13059_v20  ;;  %v13118_v38 = vcombine.high %v12903_v7, %v25348_v8 }
 0x710   : > { %v28750_v46 = vrot.slane %v13052_v61, %v25351_v9  ;;  %v13036_v35 = vcombine.high %v13032_v10, %v31328_v33  ;;  %v12970_v54 = vcombine.high %v12966_v23, %v31328_v33  ;;  %v13209_v44 = vsel %vm3502_vm2, %v12966_v23, 0 }
 0x711   : > { %v13133_v5 = vcombine.low %v13110_v40, %v13125_v6  ;;  %v13134_v28 = vcombine.high %v13110_v40, %v13125_v6  ;;  %v13132_v32 = vrot.slane %v13118_v38, %v25351_v9  ;;  %v13075_v63 = vrot.slane %v13067_v34, %v25368_v49 }
 0x712   : > { %24469 = vmatmul.mubr.msk.bf16.vlgmr.msra.gmra.mrb[188].mxu0 %vm3498_vm3, %v28712_v36  ;;  %v13083_v41 = vcombine.low %v28741_v15, %v28750_v46  ;;  %v13084_v53 = vcombine.high %v28741_v15, %v28750_v46  ;;  %v13215_v62 = vsel %vm3502_vm2, %v12970_v54, 0  ;;  %v13082_v61 = vrot.slane %v13068_v3, %v25368_v49  ;;  %v31517_v54 = vld [vmem:[#allocation31_spill] sm:$0xff] }
 0x713   : > { %13433 = vmatpush1.bf16.msra.mxu0 %v13197_v17  ;;  %13464 = vmatprep.mubr.bf16.mxu0 %v31328_v33  ;;  %v13141_v16 = vrot.slane %v13133_v5, %v25368_v49  ;;  %v13149_v42 = vcombine.low %v13117_v58, %v13132_v32  ;;  %v13150_v59 = vcombine.high %v13117_v58, %v13132_v32  ;;  %v13221_v40 = vsel %vm3502_vm2, %v13075_v63, 0  ;;  %v31513_v32 = vld [vmem:[#allocation32_spill] sm:$0xff] }
 0x714   : > { %24476 = vmatprep.subr.msk.bf16.mxu0 %vm3502_vm2, %v13032_v10  ;;  %24471 = vmatmul.mubr.msk.bf16.vlgmr.msra.gmra.mrb[204].mxu1 %vm3498_vm3, %v28712_v36  ;;  %v13099_v26 = vcombine.high %v13075_v63, %v31328_v33  ;;  %v13148_v7 = vrot.slane %v13134_v28, %v25368_v49  ;;  %v13100_v51 = vcombine.high %v13082_v61, %v31328_v33  ;;  %v13233_v6 = vsel %vm3502_vm2, %v13082_v61, 0 }
 0x715   : > { %13474 = vmatpush1.bf16.msra.mxu1 %v13203_v55  ;;  %13505 = vmatprep.mubr.bf16.mxu1 %v31328_v33  ;;  %v13165_v4 = vcombine.high %v13141_v16, %v31328_v33  ;;  %v13157_v15 = vrot.slane %v13149_v42, %v25368_v49  ;;  %v13091_v38 = vrot.slane %v13083_v41, %v25368_v49  ;;  %v31515_v42 = vld [vmem:[#allocation28_spill] sm:$0xff] }
 0x716   : > { %24478 = vmatprep.subr.msk.bf16.mxu1 %vm3502_vm2, %v13036_v35  ;;  %v13227_v20 = vsel %vm3502_vm2, %v13099_v26, 0  ;;  %v13166_v10 = vcombine.high %v13148_v7, %v31328_v33  ;;  %v13239_v34 = vsel %vm3502_vm2, %v13100_v51, 0  ;;  %v13164_v17 = vrot.slane %v13150_v59, %v25368_v49  ;;  %v31516_v59 = vld [vmem:[#allocation26_spill] sm:$0xff] }
 0x717   : > { %v13167_v3 = vcombine.high %v13157_v15, %v31328_v33  ;;  %v13101_v58 = vcombine.high %v13091_v38, %v31328_v33  ;;  %v13245_v46 = vsel %vm3502_vm2, %v13091_v38, 0  ;;  %v13098_v28 = vrot.slane %v13084_v53, %v25368_v49  ;;  %v31518_v53 = vld [vmem:[#allocation27_spill] sm:$0xff] }
 0x718   : > { %v13168_v5 = vcombine.high %v13164_v17, %v31328_v33 }
 0x719   : > { %v13251_v23 = vsel %vm3502_vm2, %v13101_v58, 0  ;;  %v13102_v55 = vcombine.high %v13098_v28, %v31328_v33  ;;  %v13257_v35 = vsel %vm3502_vm2, %v13098_v28, 0 }
 0x71a   : > { %24473 = vmatmul.mubr.msk.bf16.vlgmr.msra.gmra.mrb[192].mxu0 %vm3498_vm3, %v28712_v36 }
 0x71b   : > { %13515 = vmatpush1.bf16.msra.mxu0 %v13209_v44  ;;  %13546 = vmatprep.mubr.bf16.mxu0 %v31328_v33  ;;  %v13263_v41 = vsel %vm3502_vm2, %v13102_v55, 0  ;;  %v31519_v44 = vld [vmem:[#allocation33_spill] sm:$0xff] }
 0x71c   : > { %24475 = vmatmul.mubr.msk.bf16.vlgmr.msra.gmra.mrb[208].mxu1 %vm3498_vm3, %v28712_v36  ;;  %24480 = vmatprep.subr.msk.bf16.mxu0 %vm3502_vm2, %v13141_v16  ;;  %v31514_v16 = vld [vmem:[#allocation34_spill] sm:$0xff] }
 0x71d   : > { %13556 = vmatpush1.bf16.msra.mxu1 %v13215_v62  ;;  %13587 = vmatprep.mubr.bf16.mxu1 %v31328_v33  ;;  %v25010_v62 = vld [vmem:[%s25340_s12 + $0x10] sm:$0xff]  }
 0x71e   : > { %24482 = vmatprep.subr.msk.bf16.mxu1 %vm3502_vm2, %v13165_v4  ;;  %v31520_v4 = vld [vmem:[#allocation35_spill] sm:$0xff] }
 0x722   : > { %24477 = vmatmul.mubr.msk.bf16.vlgmr.msra.gmra.mrb[196].mxu0 %vm3498_vm3, %v28712_v36 }
 0x723   : > { %13597 = vmatpush1.bf16.msra.mxu0 %v13221_v40  ;;  %13628 = vmatprep.mubr.bf16.mxu0 %v31328_v33 }
 0x724   : > { %24479 = vmatmul.mubr.msk.bf16.vlgmr.msra.gmra.mrb[212].mxu1 %vm3498_vm3, %v28712_v36  ;;  %24484 = vmatprep.subr.msk.bf16.mxu0 %vm3502_vm2, %v13148_v7 }
 0x725   : > { %13638 = vmatpush1.bf16.msra.mxu1 %v13227_v20  ;;  %13669 = vmatprep.mubr.bf16.mxu1 %v31328_v33 }
 0x726   : > { %24486 = vmatprep.subr.msk.bf16.mxu1 %vm3502_vm2, %v13166_v10 }
 0x72a   : > { %24481 = vmatmul.mubr.msk.bf16.vlgmr.msra.gmra.mrb[200].mxu0 %vm3498_vm3, %v28712_v36 }
 0x72b   : > { %13679 = vmatpush1.bf16.msra.mxu0 %v13233_v6  ;;  %13710 = vmatprep.mubr.bf16.mxu0 %v31328_v33 }
 0x72c   : > { %24483 = vmatmul.mubr.msk.bf16.vlgmr.msra.gmra.mrb[216].mxu1 %vm3498_vm3, %v28712_v36  ;;  %24488 = vmatprep.subr.msk.bf16.mxu0 %vm3502_vm2, %v13157_v15 }
 0x72d   : > { %13720 = vmatpush1.bf16.msra.mxu1 %v13239_v34  ;;  %13751 = vmatprep.mubr.bf16.mxu1 %v31328_v33 }
 0x72e   : > { %24490 = vmatprep.subr.msk.bf16.mxu1 %vm3502_vm2, %v13167_v3 }
 0x732   : > { %24485 = vmatmul.mubr.msk.bf16.vlgmr.msra.gmra.mrb[204].mxu0 %vm3498_vm3, %v28712_v36 }
 0x733   : > { %13761 = vmatpush1.bf16.msra.mxu0 %v13245_v46  ;;  %13792 = vmatprep.mubr.bf16.mxu0 %v31328_v33 }
 0x734   : > { %24492 = vmatprep.subr.msk.bf16.mxu0 %vm3502_vm2, %v13164_v17  ;;  %24487 = vmatmul.mubr.msk.bf16.vlgmr.msra.gmra.mrb[220].mxu1 %vm3498_vm3, %v28712_v36 }
 0x735   : > { %13802 = vmatpush1.bf16.msra.mxu1 %v13251_v23  ;;  %13833 = vmatprep.mubr.bf16.mxu1 %v31328_v33 }
 0x736   : > { %24494 = vmatprep.subr.msk.bf16.mxu1 %vm3502_vm2, %v13168_v5 }
 0x73a   : > { %24489 = vmatmul.mubr.msk.bf16.vlgmr.msra.gmra.mrb[208].mxu0 %vm3498_vm3, %v28712_v36 }
 0x73b   : > { %13843 = vmatpush1.bf16.msra.mxu0 %v13257_v35  ;;  %13874 = vmatprep.mubr.bf16.mxu0 %v31328_v33 }
 0x73c   : > { %14500 = vmatprep.subr.bf16.mxu0 %v31513_v32  ;;  %24491 = vmatmul.mubr.msk.bf16.vlgmr.msra.gmra.mrb[224].mxu1 %vm3498_vm3, %v28712_v36 }
 0x73d   : > { %13884 = vmatpush1.bf16.msra.mxu1 %v13263_v41  ;;  %13915 = vmatprep.mubr.bf16.mxu1 %v31328_v33 }
 0x73e   : > { %14553 = vmatprep.subr.bf16.mxu1 %v31514_v16 }
 0x742   : > { %24493 = vmatmul.mubr.msk.bf16.vlgmr.msra.gmra.mrb[212].mxu0 %vm3498_vm3, %v28712_v36 }
 0x743   : > { %14501 = vmatpush1.bf16.msra.mxu0 %v31515_v42  ;;  %14532 = vmatprep.mubr.bf16.mxu0 %v31328_v33 }
 0x744   : > { %14502 = vmatprep.subr.bf16.mxu0 %v31516_v59  ;;  %24495 = vmatmul.mubr.msk.bf16.vlgmr.msra.gmra.mrb[228].mxu1 %vm3498_vm3, %v28712_v36  ;;  %v25011_v36 = vld [vmem:[%s25340_s12 + $0x18] sm:$0xff]  }
 0x745   : > { %14554 = vmatpush1.bf16.msra.mxu1 %v31517_v54  ;;  %14585 = vmatprep.mubr.bf16.mxu1 %v31328_v33 }
 0x746   : > { %14555 = vmatprep.subr.bf16.mxu1 %v31518_v53 }
 0x747   : > { %14503 = vmatpush1.bf16.msra.mxu0 %v31519_v44 }
 0x749   : > { %14556 = vmatpush1.bf16.msra.mxu1 %v31520_v4 }
 0x74a   : > { %24496 = vmatmul.mubr.msk.bf16.vlgmr.msra.gmra.mrb[216].mxu0 %vm1592_vm1, %v25010_v62 }
 0x74b   : > { %14542 = vmatprep.mubr.bf16.mxu0 %v31328_v33 }
 0x74c   : > { %24498 = vmatmul.mubr.msk.bf16.vlgmr.msra.gmra.mrb[232].mxu1 %vm1592_vm1, %v25010_v62 }
 0x74d   : > { %14595 = vmatprep.mubr.bf16.mxu1 %v31328_v33 }
 0x752   : > { %24497 = vmatmul.mubr.msk.bf16.gmra.mrb[220].mxu0 %vm1592_vm1, %v25011_v36 }
 0x753   : > { %15563 = vmatprep.mubr.bf16.mxu0 %v31328_v33 }
 0x754   : > { %24499 = vmatmul.mubr.msk.bf16.gmra.mrb[236].mxu1 %vm1592_vm1, %v25011_v36 }
 0x755   : > { %15604 = vmatprep.mubr.bf16.mxu1 %v31328_v33 }
 0x7dd   : > { %v13302_v63 = vpop.f32.mrb[184].mxu0 }
 0x7de   : > { %v13303_v26 = vadd.f32 %v13302_v63, %v31377_v22  ;;  %v13304_v7 = vpop.f32.mrb[185].mxu0 }
 0x7df   : > { %v13343_v40 = vpop.f32.mrb[200].mxu1  ;;  %v13305_v20 = vadd.f32 %v13304_v7, %v25920_v12  ;;  %v13306_v61 = vpop.f32.mrb[186].mxu0 }
 0x7e0   : > { %v13344_v10 = vadd.f32 %v13343_v40, %v25918_v13  ;;  %v13345_v51 = vpop.f32.mrb[201].mxu1  ;;  %v13307_v15 = vpop.f32.mrb[187].mxu0 }
 0x7e1   : > { %v13346_v6 = vadd.f32 %v13345_v51, %v25922_v29  ;;  %v13347_v34 = vpop.f32.mrb[202].mxu1 }
 0x7e2   : > { %v13924_v3 = vcombine.low %v13303_v26, %v13344_v10  ;;  %v13925_v38 = vcombine.high %v13303_v26, %v13344_v10  ;;  %v13348_v17 = vpop.f32.mrb[203].mxu1 }
 0x7e3   : > { %v13940_v58 = vcombine.low %v13305_v20, %v13346_v6  ;;  %v13941_v46 = vcombine.high %v13305_v20, %v13346_v6 }
 0x7e4   : > { %v13932_v23 = vrot.slane %v13924_v3, %v25351_v9  ;;  %v13939_v5 = vrot.slane %v13925_v38, %v25351_v9 }
 0x7e5   : > { %v13948_v28 = vrot.slane %v13940_v58, %v25351_v9  ;;  %v13955_v55 = vrot.slane %v13941_v46, %v25351_v9  ;;  %v13384_v35 = vpop.f32.mrb[188].mxu0 }
 0x7e6   : > { %v13385_v41 = vadd.f32 %v13384_v35, %v26930_v0  ;;  %v13386_v62 = vpop.f32.mrb[189].mxu0 }
 0x7e7   : > { %v13988_v36 = vcombine.low %v13932_v23, %v13948_v28  ;;  %v13989_v63 = vcombine.high %v13932_v23, %v13948_v28  ;;  %v14004_v7 = vcombine.low %v13939_v5, %v13955_v55  ;;  %v14005_v40 = vcombine.high %v13939_v5, %v13955_v55  ;;  %v13425_v26 = vpop.f32.mrb[204].mxu1  ;;  %v13388_v61 = vpop.f32.mrb[190].mxu0 }
 0x7e8   : > { %v13426_v20 = vadd.f32 %v13425_v26, %v26934_v1  ;;  %v13387_v10 = vadd.f32 %v13386_v62, %v26936_v2  ;;  %v13427_v51 = vpop.f32.mrb[205].mxu1  ;;  %v13389_v15 = vpop.f32.mrb[191].mxu0 }
 0x7e9   : > { %v13429_v6 = vpop.f32.mrb[206].mxu1  ;;  %v13428_v38 = vadd.f32 %v13427_v51, %v26941_v24  ;;  %v13996_v26 = vrot.slane %v13988_v36, %v25368_v49  ;;  %v14003_v61 = vrot.slane %v13989_v63, %v25368_v49 }
 0x7ea   : > { %v13956_v34 = vcombine.low %v13385_v41, %v13426_v20  ;;  %v13957_v3 = vcombine.high %v13385_v41, %v13426_v20  ;;  %v13430_v17 = vpop.f32.mrb[207].mxu1 }
 0x7eb   : > { %v13972_v23 = vcombine.low %v13387_v10, %v13428_v38  ;;  %v13973_v5 = vcombine.high %v13387_v10, %v13428_v38 }
 0x7ec   : > { %v13964_v58 = vrot.slane %v13956_v34, %v25351_v9  ;;  %v13971_v46 = vrot.slane %v13957_v3, %v25351_v9 }
 0x7ed   : > { %v13466_v28 = vpop.f32.mrb[192].mxu0  ;;  %v13980_v55 = vrot.slane %v13972_v23, %v25351_v9  ;;  %v13987_v35 = vrot.slane %v13973_v5, %v25351_v9  ;;  %v14012_v23 = vrot.slane %v14004_v7, %v25368_v49  ;;  %v14019_v5 = vrot.slane %v14005_v40, %v25368_v49 }
 0x7ee   : > { %v13468_v62 = vpop.f32.mrb[193].mxu0  ;;  %v13467_v41 = vadd.f32 %v13466_v28, %v31377_v22 }
 0x7ef   : > { %v13507_v20 = vpop.f32.mrb[208].mxu1  ;;  %v13469_v51 = vadd.f32 %v13468_v62, %v25920_v12  ;;  %v13470_v15 = vpop.f32.mrb[194].mxu0  ;;  %v14020_v6 = vcombine.low %v13964_v58, %v13980_v55  ;;  %v14021_v34 = vcombine.high %v13964_v58, %v13980_v55  ;;  %v14036_v3 = vcombine.low %v13971_v46, %v13987_v35 }
 0x7f0   : > { %v14037_v10 = vcombine.high %v13971_v46, %v13987_v35  ;;  %v13509_v38 = vpop.f32.mrb[209].mxu1  ;;  %v13471_v17 = vpop.f32.mrb[195].mxu0  ;;  %v13508_v36 = vadd.f32 %v13507_v20, %v25918_v13 }
 0x7f1   : > { %v13510_v63 = vadd.f32 %v13509_v38, %v25922_v29  ;;  %v13511_v4 = vpop.f32.mrb[210].mxu1  ;;  %v14028_v28 = vrot.slane %v14020_v6, %v25368_v49  ;;  %v14035_v62 = vrot.slane %v14021_v34, %v25368_v49  ;;  %v14044_v15 = vrot.slane %v14036_v3, %v25368_v49 }
 0x7f2   : > { %v14051_v58 = vrot.slane %v14037_v10, %v25368_v49  ;;  %v13512_v46 = vpop.f32.mrb[211].mxu1  ;;  %v14060_v55 = vcombine.low %v13467_v41, %v13508_v36  ;;  %v14061_v35 = vcombine.high %v13467_v41, %v13508_v36 }
 0x7f3   : > { %v14076_v17 = vcombine.low %v13469_v51, %v13510_v63  ;;  %v14077_v7 = vcombine.high %v13469_v51, %v13510_v63  ;;  %v14052_v44 = vcombine.low %v13996_v26, %v14028_v28  ;;  %v14053_v40 = vcombine.high %v13996_v26, %v14028_v28 }
 0x7f4   : > { %v14054_v53 = vcombine.low %v14003_v61, %v14035_v62  ;;  %v14055_v20 = vcombine.high %v14003_v61, %v14035_v62  ;;  %v14056_v54 = vcombine.low %v14012_v23, %v14044_v15  ;;  %v14057_v38 = vcombine.high %v14012_v23, %v14044_v15 }
 0x7f5   : > { %v14058_v4 = vcombine.low %v14019_v5, %v14051_v58  ;;  %v14059_v59 = vcombine.high %v14019_v5, %v14051_v58  ;;  %v13548_v6 = vpop.f32.mrb[196].mxu0  ;;  %v28887_v34 = vadd.f32 %v14052_v44, %v28412_v47  ;;  %v28890_v3 = vadd.f32 %v14053_v40, %v28415_v52 }
 0x7f6   : > { %v28893_v10 = vadd.f32 %v14054_v53, %v28418_v30  ;;  %v28896_v41 = vadd.f32 %v14055_v20, %v28421_v50  ;;  %v13550_v26 = vpop.f32.mrb[197].mxu0  ;;  %v28899_v61 = vadd.f32 %v14056_v54, %v28424_v57  ;;  %v28902_v51 = vadd.f32 %v14057_v38, %v28427_v39 }
 0x7f7   : > { %v28905_v23 = vadd.f32 %v14058_v4, %v28430_v37  ;;  %v28908_v47 = vadd.f32 %v14059_v59, %v28433_v14  ;;  %v13589_v52 = vpop.f32.mrb[212].mxu1  ;;  %v13552_v44 = vpop.f32.mrb[198].mxu0  ;;  %v14068_v30 = vrot.slane %v14060_v55, %v25351_v9  ;;  %v14075_v50 = vrot.slane %v14061_v35, %v25351_v9 }
 0x7f8   : > { %v14084_v53 = vrot.slane %v14076_v17, %v25351_v9  ;;  %v14091_v57 = vrot.slane %v14077_v7, %v25351_v9  ;;  %v13591_v54 = vpop.f32.mrb[213].mxu1  ;;  %v13553_v5 = vpop.f32.mrb[199].mxu0  ;;  %v13549_v39 = vadd.f32 %v13548_v6, %v26930_v0  ;;  %v13590_v37 = vadd.f32 %v13589_v52, %v26934_v1 }
 0x7f9   : > { %v13551_v36 = vadd.f32 %v13550_v26, %v26936_v2  ;;  %v13592_v14 = vadd.f32 %v13591_v54, %v26941_v24  ;;  %v13593_v59 = vpop.f32.mrb[214].mxu1 }
 0x7fa   : > { %v14124_v63 = vcombine.low %v14068_v30, %v14084_v53  ;;  %v14125_v28 = vcombine.high %v14068_v30, %v14084_v53  ;;  %v14140_v62 = vcombine.low %v14075_v50, %v14091_v57  ;;  %v14141_v15 = vcombine.high %v14075_v50, %v14091_v57  ;;  %v13594_v58 = vpop.f32.mrb[215].mxu1 }
 0x7fb   : > { %v14092_v46 = vcombine.low %v13549_v39, %v13590_v37  ;;  %v14093_v55 = vcombine.high %v13549_v39, %v13590_v37  ;;  %v14108_v35 = vcombine.low %v13551_v36, %v13592_v14  ;;  %v14109_v17 = vcombine.high %v13551_v36, %v13592_v14 }
 0x7fc   : > { %v14132_v6 = vrot.slane %v14124_v63, %v25368_v49  ;;  %v14139_v5 = vrot.slane %v14125_v28, %v25368_v49  ;;  %v14148_v39 = vrot.slane %v14140_v62, %v25368_v49  ;;  %v14155_v37 = vrot.slane %v14141_v15, %v25368_v49 }
 0x7fd   : > { %v14100_v7 = vrot.slane %v14092_v46, %v25351_v9  ;;  %v14107_v40 = vrot.slane %v14093_v55, %v25351_v9  ;;  %v14116_v20 = vrot.slane %v14108_v35, %v25351_v9  ;;  %v14123_v38 = vrot.slane %v14109_v17, %v25351_v9  ;;  %v13630_v4 = vpop.f32.mrb[200].mxu0 }
 0x7fe   : > { %v13631_v26 = vadd.f32 %v13630_v4, %v31377_v22  ;;  %v13632_v52 = vpop.f32.mrb[201].mxu0 }
 0x7ff   : > { %v14156_v44 = vcombine.low %v14100_v7, %v14116_v20  ;;  %v14157_v30 = vcombine.high %v14100_v7, %v14116_v20  ;;  %v14172_v50 = vcombine.low %v14107_v40, %v14123_v38  ;;  %v14173_v53 = vcombine.high %v14107_v40, %v14123_v38  ;;  %v13671_v57 = vpop.f32.mrb[216].mxu1  ;;  %v13634_v54 = vpop.f32.mrb[202].mxu0 }
 0x800   : > { %v13672_v36 = vadd.f32 %v13671_v57, %v25918_v13  ;;  %v13673_v14 = vpop.f32.mrb[217].mxu1  ;;  %v13635_v59 = vpop.f32.mrb[203].mxu0  ;;  %v13633_v28 = vadd.f32 %v13632_v52, %v25920_v12 }
 0x801   : > { %v14164_v63 = vrot.slane %v14156_v44, %v25368_v49  ;;  %v14171_v58 = vrot.slane %v14157_v30, %v25368_v49  ;;  %v14180_v46 = vrot.slane %v14172_v50, %v25368_v49  ;;  %v14187_v55 = vrot.slane %v14173_v53, %v25368_v49  ;;  %v13675_v35 = vpop.f32.mrb[218].mxu1 }
 0x802   : > { %v14196_v17 = vcombine.low %v13631_v26, %v13672_v36  ;;  %v14197_v7 = vcombine.high %v13631_v26, %v13672_v36  ;;  %v13674_v62 = vadd.f32 %v13673_v14, %v25922_v29  ;;  %v13676_v15 = vpop.f32.mrb[219].mxu1 }
 0x803   : > { %v14188_v40 = vcombine.low %v14132_v6, %v14164_v63  ;;  %v14189_v20 = vcombine.high %v14132_v6, %v14164_v63  ;;  %v14190_v38 = vcombine.low %v14139_v5, %v14171_v58  ;;  %v14191_v4 = vcombine.high %v14139_v5, %v14171_v58 }
 0x804   : > { %v14192_v57 = vcombine.low %v14148_v39, %v14180_v46  ;;  %v14193_v44 = vcombine.high %v14148_v39, %v14180_v46  ;;  %v14194_v54 = vcombine.low %v14155_v37, %v14187_v55  ;;  %v14195_v30 = vcombine.high %v14155_v37, %v14187_v55 }
 0x805   : > { %v28935_v50 = vadd.f32 %v14188_v40, %v28460_v43  ;;  %v28938_v53 = vadd.f32 %v14189_v20, %v28463_v60  ;;  %v28941_v26 = vadd.f32 %v14190_v38, %v28466_v21  ;;  %v28944_v52 = vadd.f32 %v14191_v4, %v28469_v56  ;;  %v13712_v36 = vpop.f32.mrb[204].mxu0 }
 0x806   : > { %v28947_v6 = vadd.f32 %v14192_v57, %v28472_v25  ;;  %v28950_v5 = vadd.f32 %v14193_v44, %v28475_v48  ;;  %v28953_v39 = vadd.f32 %v14194_v54, %v28478_v31  ;;  %v28956_v43 = vadd.f32 %v14195_v30, %v28481_v11  ;;  %v13714_v60 = vpop.f32.mrb[205].mxu0 }
 0x807   : > { %v14204_v21 = vrot.slane %v14196_v17, %v25351_v9  ;;  %v14211_v37 = vrot.slane %v14197_v7, %v25351_v9  ;;  %v14212_v56 = vcombine.low %v13633_v28, %v13674_v62  ;;  %v14213_v14 = vcombine.high %v13633_v28, %v13674_v62  ;;  %v13753_v59 = vpop.f32.mrb[220].mxu1  ;;  %v13716_v63 = vpop.f32.mrb[206].mxu0 }
 0x808   : > { %v13713_v25 = vadd.f32 %v13712_v36, %v26930_v0  ;;  %v13754_v48 = vadd.f32 %v13753_v59, %v26934_v1  ;;  %v13715_v58 = vadd.f32 %v13714_v60, %v26936_v2  ;;  %v13755_v31 = vpop.f32.mrb[221].mxu1  ;;  %v13717_v46 = vpop.f32.mrb[207].mxu0 }
 0x809   : > { %v14220_v11 = vrot.slane %v14212_v56, %v25351_v9  ;;  %v14227_v55 = vrot.slane %v14213_v14, %v25351_v9  ;;  %v13756_v35 = vadd.f32 %v13755_v31, %v26941_v24  ;;  %v13757_v17 = vpop.f32.mrb[222].mxu1 }
 0x80a   : > { %v14228_v7 = vcombine.low %v13713_v25, %v13754_v48  ;;  %v14229_v15 = vcombine.high %v13713_v25, %v13754_v48  ;;  %v13758_v28 = vpop.f32.mrb[223].mxu1 }
 0x80b   : > { %v14260_v62 = vcombine.low %v14204_v21, %v14220_v11  ;;  %v14261_v40 = vcombine.high %v14204_v21, %v14220_v11  ;;  %v14276_v20 = vcombine.low %v14211_v37, %v14227_v55  ;;  %v14277_v38 = vcombine.high %v14211_v37, %v14227_v55 }
 0x80c   : > { %v14236_v4 = vrot.slane %v14228_v7, %v25351_v9  ;;  %v14243_v57 = vrot.slane %v14229_v15, %v25351_v9  ;;  %v14244_v44 = vcombine.low %v13715_v58, %v13756_v35  ;;  %v14245_v54 = vcombine.high %v13715_v58, %v13756_v35 }
 0x80d   : > { %v13794_v30 = vpop.f32.mrb[208].mxu0  ;;  %v14268_v14 = vrot.slane %v14260_v62, %v25368_v49  ;;  %v14275_v59 = vrot.slane %v14261_v40, %v25368_v49  ;;  %v14284_v35 = vrot.slane %v14276_v20, %v25368_v49  ;;  %v14291_v17 = vrot.slane %v14277_v38, %v25368_v49 }
 0x80e   : > { %v14252_v36 = vrot.slane %v14244_v44, %v25351_v9  ;;  %v14259_v60 = vrot.slane %v14245_v54, %v25351_v9  ;;  %v13796_v56 = vpop.f32.mrb[209].mxu0  ;;  %v13795_v21 = vadd.f32 %v13794_v30, %v31377_v22 }
 0x80f   : > { %v13835_v63 = vpop.f32.mrb[224].mxu1  ;;  %v13797_v37 = vadd.f32 %v13796_v56, %v25920_v12  ;;  %v13798_v25 = vpop.f32.mrb[210].mxu0 }
 0x810   : > { %v14292_v48 = vcombine.low %v14236_v4, %v14252_v36  ;;  %v14293_v31 = vcombine.high %v14236_v4, %v14252_v36  ;;  %v14308_v46 = vcombine.low %v14243_v57, %v14259_v60  ;;  %v14309_v58 = vcombine.high %v14243_v57, %v14259_v60  ;;  %v13837_v11 = vpop.f32.mrb[225].mxu1  ;;  %v13799_v55 = vpop.f32.mrb[211].mxu0 }
 0x811   : > { %v13836_v7 = vadd.f32 %v13835_v63, %v25918_v13  ;;  %v13838_v15 = vadd.f32 %v13837_v11, %v25922_v29  ;;  %v13839_v28 = vpop.f32.mrb[226].mxu1 }
 0x812   : > { %v14300_v62 = vrot.slane %v14292_v48, %v25368_v49  ;;  %v14307_v40 = vrot.slane %v14293_v31, %v25368_v49  ;;  %v14316_v44 = vrot.slane %v14308_v46, %v25368_v49  ;;  %v14323_v4 = vrot.slane %v14309_v58, %v25368_v49  ;;  %v13840_v57 = vpop.f32.mrb[227].mxu1  ;;  %v31521_v58 = vld [vmem:[#allocation46_spill] sm:$0xff] }
 0x813   : > { %v14332_v54 = vcombine.low %v13795_v21, %v13836_v7  ;;  %v14333_v30 = vcombine.high %v13795_v21, %v13836_v7  ;;  %v14348_v36 = vcombine.low %v13797_v37, %v13838_v15  ;;  %v14349_v20 = vcombine.high %v13797_v37, %v13838_v15  ;;  %v31523_v21 = vld [vmem:[#allocation29_spill] sm:$0xff]  ;;  %v31525_v7 = vld [vmem:[#allocation36_spill] sm:$0xff] }
 0x814   : > { %v14324_v60 = vcombine.low %v14268_v14, %v14300_v62  ;;  %v14325_v38 = vcombine.high %v14268_v14, %v14300_v62  ;;  %v14326_v56 = vcombine.low %v14275_v59, %v14307_v40  ;;  %v14327_v63 = vcombine.high %v14275_v59, %v14307_v40 }
 0x815   : > { %v14328_v25 = vcombine.low %v14284_v35, %v14316_v44  ;;  %v14329_v11 = vcombine.high %v14284_v35, %v14316_v44  ;;  %v14330_v55 = vcombine.low %v14291_v17, %v14323_v4  ;;  %v14331_v28 = vcombine.high %v14291_v17, %v14323_v4  ;;  %v13876_v48 = vpop.f32.mrb[212].mxu0  ;;  %v31527_v35 = vld [vmem:[#allocation30_spill] sm:$0xff]  ;;  %v31529_v17 = vld [vmem:[#allocation37_spill] sm:$0xff] }
 0x816   : > { %v28983_v31 = vadd.f32 %v14324_v60, %v28508_v45  ;;  %v28986_v46 = vadd.f32 %v14325_v38, %v28511_v18  ;;  %v28989_v57 = vadd.f32 %v14326_v56, %v31521_v58  ;;  %v28992_v37 = vadd.f32 %v14327_v63, %v31523_v21  ;;  %v13878_v14 = vpop.f32.mrb[213].mxu0  ;;  %v31531_v45 = vld [vmem:[#allocation25_spill] sm:$0xff] }
 0x817   : > { %v28995_v59 = vadd.f32 %v14328_v25, %v31525_v7  ;;  %v28998_v15 = vadd.f32 %v14329_v11, %v31527_v35  ;;  %v29001_v62 = vadd.f32 %v14330_v55, %v31529_v17  ;;  %v29004_v40 = vadd.f32 %v14331_v28, %v31531_v45  ;;  %v13917_v18 = vpop.f32.mrb[228].mxu1  ;;  %v13880_v44 = vpop.f32.mrb[214].mxu0 }
 0x818   : > { %31522 = vst [vmem:[#allocation42_spill] sm:$0xff] %v28989_v57  ;;  %31524 = vst [vmem:[#allocation46_spill] sm:$0xff] %v28992_v37  ;;  %v14340_v4 = vrot.slane %v14332_v54, %v25351_v9  ;;  %v14347_v60 = vrot.slane %v14333_v30, %v25351_v9  ;;  %v14356_v38 = vrot.slane %v14348_v36, %v25351_v9  ;;  %v13919_v63 = vpop.f32.mrb[229].mxu1  ;;  %v13881_v25 = vpop.f32.mrb[215].mxu0 }
 0x819   : > { %31526 = vst [vmem:[#allocation29_spill] sm:$0xff] %v28995_v59  ;;  %31528 = vst [vmem:[#allocation36_spill] sm:$0xff] %v28998_v15  ;;  %v14363_v56 = vrot.slane %v14349_v20, %v25351_v9  ;;  %v13877_v11 = vadd.f32 %v13876_v48, %v26930_v0  ;;  %v13918_v55 = vadd.f32 %v13917_v18, %v26934_v1  ;;  %v13921_v21 = vpop.f32.mrb[230].mxu1 }
 0x81a   : > { %31530 = vst [vmem:[#allocation30_spill] sm:$0xff] %v29001_v62  ;;  %31532 = vst [vmem:[#allocation37_spill] sm:$0xff] %v29004_v40  ;;  %v13879_v58 = vadd.f32 %v13878_v14, %v26936_v2  ;;  %v13920_v28 = vadd.f32 %v13919_v63, %v26941_v24  ;;  %v14396_v7 = vcombine.low %v14340_v4, %v14356_v38  ;;  %v13922_v30 = vpop.f32.mrb[231].mxu1 }
 0x81b   : > { %v14397_v35 = vcombine.high %v14340_v4, %v14356_v38  ;;  %v14412_v54 = vcombine.low %v14347_v60, %v14363_v56  ;;  %v14413_v17 = vcombine.high %v14347_v60, %v14363_v56  ;;  %v14364_v45 = vcombine.low %v13877_v11, %v13918_v55 }
 0x81c   : > { %v14365_v36 = vcombine.high %v13877_v11, %v13918_v55  ;;  %v14380_v44 = vcombine.low %v13879_v58, %v13920_v28  ;;  %v14381_v20 = vcombine.high %v13879_v58, %v13920_v28  ;;  %v14404_v63 = vrot.slane %v14396_v7, %v25368_v49 }
 0x81d   : > { %v14372_v25 = vrot.slane %v14364_v45, %v25351_v9  ;;  %v14534_v42 = vpop.f32.mrb[216].mxu0  ;;  %v14411_v4 = vrot.slane %v14397_v35, %v25368_v49  ;;  %v14420_v60 = vrot.slane %v14412_v54, %v25368_v49  ;;  %v14427_v45 = vrot.slane %v14413_v17, %v25368_v49 }
 0x81e   : > { %v14379_v48 = vrot.slane %v14365_v36, %v25351_v9  ;;  %v14388_v18 = vrot.slane %v14380_v44, %v25351_v9  ;;  %v14395_v14 = vrot.slane %v14381_v20, %v25351_v9  ;;  %v14535_v38 = vadd.f32 %v14534_v42, %v31377_v22  ;;  %v14536_v56 = vpop.f32.mrb[217].mxu0 }
 0x81f   : > { %v14587_v21 = vpop.f32.mrb[232].mxu1  ;;  %v14538_v30 = vpop.f32.mrb[218].mxu0  ;;  %v14537_v44 = vadd.f32 %v14536_v56, %v25920_v12 }
 0x820   : > { %v14428_v11 = vcombine.low %v14372_v25, %v14388_v18  ;;  %v14429_v55 = vcombine.high %v14372_v25, %v14388_v18  ;;  %v14444_v58 = vcombine.low %v14379_v48, %v14395_v14  ;;  %v14445_v28 = vcombine.high %v14379_v48, %v14395_v14  ;;  %v14589_v7 = vpop.f32.mrb[233].mxu1  ;;  %v14540_v20 = vpop.f32.mrb[219].mxu0 }
 0x821   : > { %v14588_v36 = vadd.f32 %v14587_v21, %v25918_v13  ;;  %v14539_v35 = vadd.f32 %v14538_v30, %v31377_v22  ;;  %v14591_v18 = vpop.f32.mrb[234].mxu1  ;;  %v14590_v17 = vadd.f32 %v14589_v7, %v25922_v29  ;;  %v31537_v7 = vld [vmem:[#allocation43_spill] sm:$0xff] }
 0x822   : > { %v14436_v54 = vrot.slane %v14428_v11, %v25368_v49  ;;  %v14443_v42 = vrot.slane %v14429_v55, %v25368_v49  ;;  %v14452_v25 = vrot.slane %v14444_v58, %v25368_v49  ;;  %v14459_v48 = vrot.slane %v14445_v28, %v25368_v49  ;;  %v14593_v56 = vpop.f32.mrb[235].mxu1  ;;  %v31533_v28 = vld [vmem:[#allocation38_spill] sm:$0xff] }
 0x823   : > { %v14606_v14 = vcombine.low %v14535_v38, %v14588_v36  ;;  %v14607_v16 = vcombine.high %v14535_v38, %v14588_v36  ;;  %v14592_v21 = vadd.f32 %v14591_v18, %v25918_v13  ;;  %v31535_v38 = vld [vmem:[#allocation39_spill] sm:$0xff] }
 0x824   : > { %v14460_v32 = vcombine.low %v14404_v63, %v14436_v54  ;;  %v14461_v40 = vcombine.high %v14404_v63, %v14436_v54  ;;  %v14462_v30 = vcombine.low %v14411_v4, %v14443_v42  ;;  %v14463_v62 = vcombine.high %v14411_v4, %v14443_v42  ;;  %v31539_v63 = vld [vmem:[#allocation40_spill] sm:$0xff] }
 0x825   : > { %v14464_v15 = vcombine.low %v14420_v60, %v14452_v25  ;;  %v14465_v11 = vcombine.high %v14420_v60, %v14452_v25  ;;  %v14466_v59 = vcombine.low %v14427_v45, %v14459_v48  ;;  %v14467_v55 = vcombine.high %v14427_v45, %v14459_v48  ;;  %v14544_v57 = vpop.f32.mrb[220].mxu0  ;;  %v31541_v4 = vld [vmem:[#allocation44_spill] sm:$0xff]  ;;  %v31543_v45 = vld [vmem:[#allocation41_spill] sm:$0xff] }
 0x826   : > { %v29033_v58 = vadd.f32 %v14460_v32, %v28558_v27  ;;  %v29036_v37 = vadd.f32 %v14461_v40, %v31533_v28  ;;  %v29039_v36 = vadd.f32 %v14462_v30, %v31535_v38  ;;  %v29042_v18 = vadd.f32 %v14463_v62, %v31537_v7  ;;  %v31545_v27 = vld [vmem:[#allocation45_spill] sm:$0xff]  ;;  %v29056_v40 = vpop.f32.mrb[221].mxu0 }
 0x827   : > { %v29045_v54 = vadd.f32 %v14464_v15, %v31539_v63  ;;  %v29048_v60 = vadd.f32 %v14465_v11, %v31541_v4  ;;  %v29051_v42 = vadd.f32 %v14466_v59, %v31543_v45  ;;  %v29054_v32 = vadd.f32 %v14467_v55, %v31545_v27  ;;  %v14597_v28 = vpop.f32.mrb[236].mxu1  ;;  %v29060_v15 = vpop.f32.mrb[222].mxu0 }
 0x828   : > { %31534 = vst [vmem:[#allocation25_spill] sm:$0xff] %v29036_v37  ;;  %31536 = vst [vmem:[#allocation38_spill] sm:$0xff] %v29039_v36  ;;  %v14614_v25 = vrot.slane %v14606_v14, %v25351_v9  ;;  %v14621_v62 = vrot.slane %v14607_v16, %v25351_v9  ;;  %v14622_v48 = vcombine.low %v14537_v44, %v14590_v17  ;;  %v14599_v63 = vpop.f32.mrb[237].mxu1  ;;  %v29064_v55 = vpop.f32.mrb[223].mxu0 }
 0x829   : > { %31538 = vst [vmem:[#allocation39_spill] sm:$0xff] %v29042_v18  ;;  %31540 = vst [vmem:[#allocation43_spill] sm:$0xff] %v29045_v54  ;;  %v14623_v30 = vcombine.high %v14537_v44, %v14590_v17  ;;  %v14674_v38 = vcombine.low %v14539_v35, %v14592_v21  ;;  %v14675_v11 = vcombine.high %v14539_v35, %v14592_v21  ;;  %v14601_v17 = vpop.f32.mrb[238].mxu1 }
 0x82a   : > { %31542 = vst [vmem:[#allocation40_spill] sm:$0xff] %v29048_v60  ;;  %31544 = vst [vmem:[#allocation44_spill] sm:$0xff] %v29051_v42  ;;  %v14541_v7 = vadd.f32 %v14540_v20, %v25920_v12  ;;  %v14594_v59 = vadd.f32 %v14593_v56, %v25922_v29  ;;  %v14630_v4 = vrot.slane %v14622_v48, %v25351_v9  ;;  %v14603_v27 = vpop.f32.mrb[239].mxu1 }
 0x82b   : > { %31546 = vst [vmem:[#allocation41_spill] sm:$0xff] %v29054_v32  ;;  %v14637_v14 = vrot.slane %v14623_v30, %v25351_v9  ;;  %v14545_v16 = vadd.f32 %v14544_v57, %v31377_v22  ;;  %v14598_v44 = vadd.f32 %v14597_v28, %v25918_v13  ;;  %v14682_v45 = vrot.slane %v14674_v38, %v25351_v9 }
 0x82c   : > { %v14689_v35 = vrot.slane %v14675_v11, %v25351_v9  ;;  %v14690_v21 = vcombine.low %v14541_v7, %v14594_v59  ;;  %v14691_v20 = vcombine.high %v14541_v7, %v14594_v59  ;;  %v14638_v56 = vcombine.low %v14614_v25, %v14630_v4 }
 0x82d   : > { %v14639_v32 = vcombine.high %v14614_v25, %v14630_v4  ;;  %v14654_v42 = vcombine.low %v14621_v62, %v14637_v14  ;;  %v14655_v60 = vcombine.high %v14621_v62, %v14637_v14  ;;  %v14742_v54 = vcombine.low %v14545_v16, %v14598_v44 }
 0x82e   : > { %v14698_v48 = vrot.slane %v14690_v21, %v25351_v9  ;;  %v14705_v30 = vrot.slane %v14691_v20, %v25351_v9  ;;  %v14743_v57 = vcombine.high %v14545_v16, %v14598_v44  ;;  %v14646_v28 = vrot.slane %v14638_v56, %v25368_v49 }
 0x82f   : > { %v14653_v18 = vrot.slane %v14639_v32, %v25368_v49  ;;  %v14662_v38 = vrot.slane %v14654_v42, %v25368_v49  ;;  %v14669_v11 = vrot.slane %v14655_v60, %v25368_v49 }
 0x830   : > { %v14706_v7 = vcombine.low %v14682_v45, %v14698_v48  ;;  %v14707_v59 = vcombine.high %v14682_v45, %v14698_v48  ;;  %v14722_v36 = vcombine.low %v14689_v35, %v14705_v30  ;;  %v14723_v25 = vcombine.high %v14689_v35, %v14705_v30 }
 0x831   : > { %v14670_v62 = vcombine.high %v14646_v28, %v31348_v19  ;;  %v14671_v4 = vcombine.high %v14653_v18, %v31348_v19  ;;  %v14672_v14 = vcombine.high %v14662_v38, %v31348_v19  ;;  %v14673_v16 = vcombine.high %v14669_v11, %v31348_v19 }
 0x832   : > { %v24501_v44 = vpack.c.bf16 %v14662_v38, %v14646_v28  ;;  %v24502_v21 = vpack.c.bf16 %v14669_v11, %v14653_v18  ;;  %v14714_v32 = vrot.slane %v14706_v7, %v25368_v49  ;;  %v14721_v42 = vrot.slane %v14707_v59, %v25368_v49 }
 0x833   : > { %v24505_v20 = vpack.c.bf16 %v14672_v14, %v14670_v62  ;;  %v24506_v60 = vpack.c.bf16 %v14673_v16, %v14671_v4  ;;  %v14730_v45 = vrot.slane %v14722_v36, %v25368_v49  ;;  %v14737_v35 = vrot.slane %v14723_v25, %v25368_v49 }
 0x834   : > { %v14919_v56 = vrot.slane %v24501_v44, %v25351_v9  ;;  %v14927_v48 = vrot.slane %v24502_v21, %v25351_v9  ;;  %v14738_v30 = vcombine.high %v14714_v32, %v31348_v19  ;;  %v14739_v37 = vcombine.high %v14721_v42, %v31348_v19 }
 0x835   : > { %v14969_v18 = vrot.slane %v24505_v20, %v25351_v9  ;;  %v14977_v28 = vrot.slane %v24506_v60, %v25351_v9  ;;  %v14740_v38 = vcombine.high %v14730_v45, %v31348_v19  ;;  %v14741_v11 = vcombine.high %v14737_v35, %v31348_v19 }
 0x836   : > { %v14944_v7 = vcombine.low %v14919_v56, %v14927_v48  ;;  %v24503_v36 = vpack.c.bf16 %v14730_v45, %v14714_v32  ;;  %v24504_v59 = vpack.c.bf16 %v14737_v35, %v14721_v42  ;;  %v14750_v14 = vrot.slane %v14742_v54, %v25351_v9 }
 0x837   : > { %v14994_v25 = vcombine.low %v14969_v18, %v14977_v28  ;;  %v24507_v62 = vpack.c.bf16 %v14740_v38, %v14738_v30  ;;  %v24508_v4 = vpack.c.bf16 %v14741_v11, %v14739_v37  ;;  %v14757_v21 = vrot.slane %v14743_v57, %v25351_v9 }
 0x838   : > { %v14935_v16 = vrot.slane %v24503_v36, %v25351_v9  ;;  %v14943_v44 = vrot.slane %v24504_v59, %v25351_v9  ;;  %v14547_v20 = vadd.f32 %v29056_v40, %v25920_v12  ;;  %v14951_v60 = vrot.slane %v14944_v7, %v25368_v49 }
 0x839   : > { %v14985_v56 = vrot.slane %v24507_v62, %v25351_v9  ;;  %v14993_v32 = vrot.slane %v24508_v4, %v25351_v9  ;;  %v14600_v42 = vadd.f32 %v14599_v63, %v25922_v29  ;;  %v14549_v54 = vadd.f32 %v29060_v15, %v31377_v22 }
 0x83a   : > { %v14952_v37 = vcombine.low %v14935_v16, %v14943_v44  ;;  %v14602_v45 = vadd.f32 %v14601_v17, %v25918_v13  ;;  %v14551_v57 = vadd.f32 %v29064_v55, %v25920_v12  ;;  %v14604_v30 = vadd.f32 %v14603_v27, %v25922_v29 }
 0x83b   : > { %v15002_v35 = vcombine.low %v14985_v56, %v14993_v32  ;;  %v14758_v48 = vcombine.low %v14547_v20, %v14600_v42  ;;  %v14759_v40 = vcombine.high %v14547_v20, %v14600_v42  ;;  %v15001_v18 = vrot.slane %v14994_v25, %v25368_v49 }
 0x83c   : > { %v14959_v28 = vrot.slane %v14952_v37, %v25368_v49  ;;  %v14810_v38 = vcombine.low %v14549_v54, %v14602_v45  ;;  %v14811_v63 = vcombine.high %v14549_v54, %v14602_v45  ;;  %v14826_v7 = vcombine.low %v14551_v57, %v14604_v30 }
 0x83d   : > { %v15009_v11 = vrot.slane %v15002_v35, %v25368_v49  ;;  %v14766_v15 = vrot.slane %v14758_v48, %v25351_v9  ;;  %v14773_v17 = vrot.slane %v14759_v40, %v25351_v9  ;;  %v14827_v44 = vcombine.high %v14551_v57, %v14604_v30 }
 0x83e   : > { %v14960_v36 = vcombine.low %v14951_v60, %v14959_v28  ;;  %v29115_v55 = vcombine.high %v14951_v60, %v14959_v28  ;;  %v14818_v59 = vrot.slane %v14810_v38, %v25351_v9  ;;  %v14825_v27 = vrot.slane %v14811_v63, %v25351_v9 }
 0x83f   : > { %v14774_v62 = vcombine.low %v14750_v14, %v14766_v15  ;;  %v14775_v25 = vcombine.high %v14750_v14, %v14766_v15  ;;  %v14790_v4 = vcombine.low %v14757_v21, %v14773_v17  ;;  %v14791_v16 = vcombine.high %v14757_v21, %v14773_v17 }
 0x840   : > { %v14834_v20 = vrot.slane %v14826_v7, %v25351_v9  ;;  %v15010_v56 = vcombine.low %v15001_v18, %v15009_v11  ;;  %v15011_v32 = vcombine.high %v15001_v18, %v15009_v11  ;;  %v14841_v45 = vrot.slane %v14827_v44, %v25351_v9 }
 0x841   : > { %v14782_v42 = vrot.slane %v14774_v62, %v25368_v49  ;;  %v14789_v37 = vrot.slane %v14775_v25, %v25368_v49  ;;  %v14798_v60 = vrot.slane %v14790_v4, %v25368_v49  ;;  %v14805_v54 = vrot.slane %v14791_v16, %v25368_v49 }
 0x842   : > { %v14842_v35 = vcombine.low %v14818_v59, %v14834_v20  ;;  %v14843_v48 = vcombine.high %v14818_v59, %v14834_v20  ;;  %v15114_v14 = vpack.i.b16 %v15010_v56, %v14960_v36  ;;  %v14858_v17 = vcombine.low %v14825_v27, %v14841_v45 }
 0x843   : > { %v14806_v21 = vcombine.high %v14782_v42, %v31348_v19  ;;  %v14807_v57 = vcombine.high %v14789_v37, %v31348_v19  ;;  %v14808_v40 = vcombine.high %v14798_v60, %v31348_v19  ;;  %v14809_v30 = vcombine.high %v14805_v54, %v31348_v19 }
 0x844   : > { %v24509_v18 = vpack.c.bf16 %v14798_v60, %v14782_v42  ;;  %v24510_v28 = vpack.c.bf16 %v14805_v54, %v14789_v37  ;;  %v14850_v38 = vrot.slane %v14842_v35, %v25368_v49  ;;  %v14857_v63 = vrot.slane %v14843_v48, %v25368_v49 }
 0x845   : > { %v24513_v11 = vpack.c.bf16 %v14808_v40, %v14806_v21  ;;  %v24514_v15 = vpack.c.bf16 %v14809_v30, %v14807_v57  ;;  %v14859_v7 = vcombine.high %v14825_v27, %v14841_v45  ;;  %v14866_v20 = vrot.slane %v14858_v17, %v25368_v49 }
 0x846   : > { %v15019_v59 = vrot.slane %v24509_v18, %v25351_v9  ;;  %v15027_v62 = vrot.slane %v24510_v28, %v25351_v9  ;;  %v14874_v25 = vcombine.high %v14850_v38, %v31348_v19  ;;  %v14875_v4 = vcombine.high %v14857_v63, %v31348_v19 }
 0x847   : > { %v15069_v16 = vrot.slane %v24513_v11, %v25351_v9  ;;  %v15077_v44 = vrot.slane %v24514_v15, %v25351_v9  ;;  %v14873_v42 = vrot.slane %v14859_v7, %v25368_v49  ;;  %v15115_v60 = vshrl.u32 %v14960_v36, 16 }
 0x848   : > { %v15044_v37 = vcombine.low %v15019_v59, %v15027_v62  ;;  %v15116_v54 = vshrl.u32 %v15010_v56, 16  ;;  %v15120_v27 = vpack.i.b16 %v15011_v32, %v29115_v55  ;;  %v14876_v35 = vcombine.high %v14866_v20, %v31348_v19 }
 0x849   : > { %v15094_v45 = vcombine.low %v15069_v16, %v15077_v44  ;;  %v14877_v48 = vcombine.high %v14873_v42, %v31348_v19  ;;  %v24511_v21 = vpack.c.bf16 %v14866_v20, %v14850_v38  ;;  %v24512_v57 = vpack.c.bf16 %v14873_v42, %v14857_v63 }
 0x84a   : > { %v15117_v40 = vpack.i.b16 %v15116_v54, %v15115_v60  ;;  %v24515_v18 = vpack.c.bf16 %v14876_v35, %v14874_v25  ;;  %v15121_v11 = vshrl.u32 %v29115_v55, 16  ;;  %v15122_v36 = vshrl.u32 %v15011_v32, 16 }
 0x84b   : > { %v15035_v30 = vrot.slane %v24511_v21, %v25351_v9  ;;  %v24516_v28 = vpack.c.bf16 %v14877_v48, %v14875_v4  ;;  %v15043_v15 = vrot.slane %v24512_v57, %v25351_v9  ;;  %v15140_v56 = vshrl.u32 %v15114_v14, 16 }
 0x84c   : > { %v15141_v17 = vshrl.u32 %v15117_v40, 16  ;;  %v15085_v7 = vrot.slane %v24515_v18, %v25351_v9  ;;  %v15138_v62 = vpack.i.b16 %v15117_v40, %v15114_v14  ;;  %v15051_v38 = vrot.slane %v15044_v37, %v25368_v49 }
 0x84d   : > { %v15093_v59 = vrot.slane %v24516_v28, %v25351_v9  ;;  %v15052_v63 = vcombine.low %v15035_v30, %v15043_v15  ;;  %v15123_v16 = vpack.i.b16 %v15122_v36, %v15121_v11  ;;  %v15101_v25 = vrot.slane %v15094_v45, %v25368_v49 }
 0x84e   : > { %v15142_v44 = vpack.i.b16 %v15141_v17, %v15140_v56  ;;  %v15148_v20 = vshrl.u32 %v15120_v27, 16  ;;  %v15168_v55 = vcombine.high %v15138_v62, %v25348_v8  ;;  %v15175_v54 = vrot.slane %v15138_v62, %v25351_v9 }
 0x84f   : > { %v15102_v4 = vcombine.low %v15085_v7, %v15093_v59  ;;  %v15059_v32 = vrot.slane %v15052_v63, %v25368_v49  ;;  %v15149_v42 = vshrl.u32 %v15123_v16, 16  ;;  %v15146_v60 = vpack.i.b16 %v15123_v16, %v15120_v27 }
 0x850   : > { %v15241_v14 = vrot.slane %v15142_v44, %v25351_v9  ;;  %v15234_v37 = vcombine.high %v15142_v44, %v25348_v8  ;;  %v29156_v48 = vrot.slane %v15168_v55, %v25351_v9 }
 0x851   : > { %v15109_v35 = vrot.slane %v15102_v4, %v25368_v49  ;;  %v15060_v45 = vcombine.low %v15051_v38, %v15059_v32  ;;  %v15061_v21 = vcombine.high %v15051_v38, %v15059_v32  ;;  %v15150_v57 = vpack.i.b16 %v15149_v42, %v15148_v20 }
 0x852   : > { %v15190_v40 = vrot.slane %v15146_v60, %v25351_v9  ;;  %v29160_v30 = vrot.slane %v15234_v37, %v25351_v9  ;;  %v15183_v27 = vcombine.high %v15146_v60, %v25348_v8 }
 0x853   : > { %v15110_v18 = vcombine.low %v15101_v25, %v15109_v35  ;;  %v15111_v28 = vcombine.high %v15101_v25, %v15109_v35  ;;  %v15256_v11 = vrot.slane %v15150_v57, %v25351_v9  ;;  %v15249_v56 = vcombine.high %v15150_v57, %v25348_v8  ;;  %v29187_v57 = vld [vmem:[%s31218_s3 + $0x14] sm:$0xf] }
 0x854   : > { %v15198_v15 = vcombine.low %v15175_v54, %v15190_v40  ;;  %v15199_v36 = vcombine.high %v15175_v54, %v15190_v40  ;;  %v29166_v17 = vrot.slane %v15183_v27, %v25351_v9  ;;  %v15127_v59 = vshrl.u32 %v15060_v45, 16 }
 0x855   : > { %v15126_v7 = vpack.i.b16 %v15110_v18, %v15060_v45  ;;  %v15128_v62 = vshrl.u32 %v15110_v18, 16  ;;  %v15264_v38 = vcombine.low %v15241_v14, %v15256_v11  ;;  %v15265_v16 = vcombine.high %v15241_v14, %v15256_v11 }
 0x856   : > { %v15206_v63 = vrot.slane %v15198_v15, %v25368_v49  ;;  %v15213_v44 = vrot.slane %v15199_v36, %v25368_v49  ;;  %v15263_v25 = vrot.slane %v15249_v56, %v25351_v9  ;;  %v15214_v4 = vcombine.low %v29156_v48, %v29166_v17 }
 0x857   : > { %v15215_v20 = vcombine.high %v29156_v48, %v29166_v17  ;;  %v15129_v55 = vpack.i.b16 %v15128_v62, %v15127_v59  ;;  %v15272_v32 = vrot.slane %v15264_v38, %v25368_v49  ;;  %v15279_v60 = vrot.slane %v15265_v16, %v25368_v49 }
 0x858   : > { %v15230_v42 = vcombine.high %v15206_v63, %v31328_v33  ;;  %v15280_v54 = vcombine.low %v29160_v30, %v15263_v25  ;;  %v15436_v35 = vsel %vm3502_vm2, %v15206_v63, 0  ;;  %v15281_v37 = vcombine.high %v29160_v30, %v15263_v25 }
 0x859   : > { %24517 = vmatprep.subr.msk.bf16.mxu0 %vm3502_vm2, %v15272_v32  ;;  %v15296_v14 = vcombine.high %v15272_v32, %v31328_v33  ;;  %v15231_v40 = vcombine.high %v15213_v44, %v31328_v33  ;;  %v15297_v27 = vcombine.high %v15279_v60, %v31328_v33  ;;  %v15132_v11 = vpack.i.b16 %v15111_v28, %v15061_v21 }
 0x85a   : > { %15532 = vmatpush1.bf16.msra.mxu0 %v15436_v35  ;;  %v15442_v45 = vsel %vm3502_vm2, %v15230_v42, 0  ;;  %v15288_v18 = vrot.slane %v15280_v54, %v25368_v49  ;;  %v15133_v30 = vshrl.u32 %v15061_v21, 16  ;;  %v15134_v15 = vshrl.u32 %v15111_v28, 16 }
 0x85b   : > { %24519 = vmatprep.subr.msk.bf16.mxu1 %vm3502_vm2, %v15296_v14  ;;  %24521 = vmatprep.subr.msk.bf16.mxu0 %vm3502_vm2, %v15279_v60  ;;  %v15156_v36 = vshrl.u32 %v15126_v7, 16  ;;  %v15448_v56 = vsel %vm3502_vm2, %v15213_v44, 0  ;;  %v15157_v59 = vshrl.u32 %v15129_v55, 16  ;;  %v15164_v38 = vshrl.u32 %v15132_v11, 16 }
 0x85c   : > { %15573 = vmatpush1.bf16.msra.mxu1 %v15442_v45  ;;  %v15135_v62 = vpack.i.b16 %v15134_v15, %v15133_v30  ;;  %v15154_v63 = vpack.i.b16 %v15129_v55, %v15126_v7  ;;  %v15454_v21 = vsel %vm3502_vm2, %v15231_v40, 0  ;;  %v15298_v28 = vcombine.high %v15288_v18, %v31328_v33 }
 0x85d   : > { %24518 = vmatmul.mubr.msk.bf16.vlgmr.msra.gmra.mrb[224].mxu0 %vm3498_vm3, %v29187_v57  ;;  %24523 = vmatprep.subr.msk.bf16.mxu1 %vm3502_vm2, %v15297_v27  ;;  %v15222_v16 = vrot.slane %v15214_v4, %v25368_v49  ;;  %v15158_v44 = vpack.i.b16 %v15157_v59, %v15156_v36  ;;  %v15295_v14 = vrot.slane %v15281_v37, %v25368_v49 }
 0x85e   : > { %15614 = vmatpush1.bf16.msra.mxu0 %v15448_v56  ;;  %15645 = vmatprep.mubr.bf16.mxu0 %v31328_v33  ;;  %v15165_v25 = vshrl.u32 %v15135_v62, 16  ;;  %v15162_v32 = vpack.i.b16 %v15135_v62, %v15132_v11  ;;  %v15307_v42 = vrot.slane %v15154_v63, %v25351_v9  ;;  %v15300_v7 = vcombine.high %v15154_v63, %v25348_v8 }
 0x85f   : > { %24520 = vmatmul.mubr.msk.bf16.vlgmr.msra.gmra.mrb[240].mxu1 %vm3498_vm3, %v29187_v57  ;;  %24525 = vmatprep.subr.msk.bf16.mxu0 %vm3502_vm2, %v15288_v18  ;;  %v15366_v55 = vcombine.high %v15158_v44, %v25348_v8  ;;  %v15373_v54 = vrot.slane %v15158_v44, %v25351_v9  ;;  %v15232_v45 = vcombine.high %v15222_v16, %v31328_v33  ;;  %v15460_v15 = vsel %vm3502_vm2, %v15222_v16, 0 }
 0x860   : > { %15655 = vmatpush1.bf16.msra.mxu1 %v15454_v21  ;;  %15686 = vmatprep.mubr.bf16.mxu1 %v31328_v33  ;;  %v15166_v60 = vpack.i.b16 %v15165_v25, %v15164_v38  ;;  %v15322_v35 = vrot.slane %v15162_v32, %v25351_v9  ;;  %v15315_v4 = vcombine.high %v15162_v32, %v25348_v8 }
 0x861   : > { %24527 = vmatprep.subr.msk.bf16.mxu1 %vm3502_vm2, %v15298_v28  ;;  %v29216_v40 = vrot.slane %v15300_v7, %v25351_v9  ;;  %v15380_v36 = vrot.slane %v15366_v55, %v25351_v9  ;;  %v15229_v56 = vrot.slane %v15215_v20, %v25368_v49  ;;  %v15466_v38 = vsel %vm3502_vm2, %v15232_v45, 0 }
 0x862   : > { %v15388_v27 = vrot.slane %v15166_v60, %v25351_v9  ;;  %v15330_v18 = vcombine.low %v15307_v42, %v15322_v35  ;;  %v15331_v11 = vcombine.high %v15307_v42, %v15322_v35  ;;  %v15381_v30 = vcombine.high %v15166_v60, %v25348_v8 }
 0x863   : > { %v29225_v37 = vrot.slane %v15315_v4, %v25351_v9  ;;  %v15299_v63 = vcombine.high %v15295_v14, %v31328_v33  ;;  %v15233_v16 = vcombine.high %v15229_v56, %v31328_v33  ;;  %v15472_v25 = vsel %vm3502_vm2, %v15229_v56, 0 }
 0x864   : > { %v15396_v59 = vcombine.low %v15373_v54, %v15388_v27  ;;  %v15397_v62 = vcombine.high %v15373_v54, %v15388_v27  ;;  %v15395_v21 = vrot.slane %v15381_v30, %v25351_v9  ;;  %v15338_v7 = vrot.slane %v15330_v18, %v25368_v49 }
 0x865   : > { %24522 = vmatmul.mubr.msk.bf16.vlgmr.msra.gmra.mrb[228].mxu0 %vm3498_vm3, %v29187_v57  ;;  %v15346_v28 = vcombine.low %v29216_v40, %v29225_v37  ;;  %v15347_v44 = vcombine.high %v29216_v40, %v29225_v37  ;;  %v15478_v42 = vsel %vm3502_vm2, %v15233_v16, 0  ;;  %v15345_v4 = vrot.slane %v15331_v11, %v25368_v49  ;;  %v31551_v16 = vld [vmem:[#allocation10_spill] sm:$0xff] }
 0x866   : > { %15696 = vmatpush1.bf16.msra.mxu0 %v15460_v15  ;;  %15727 = vmatprep.mubr.bf16.mxu0 %v31328_v33  ;;  %v15404_v48 = vrot.slane %v15396_v59, %v25368_v49  ;;  %v15412_v17 = vcombine.low %v15380_v36, %v15395_v21  ;;  %v15413_v20 = vcombine.high %v15380_v36, %v15395_v21  ;;  %v15484_v54 = vsel %vm3502_vm2, %v15338_v7, 0  ;;  %v31547_v21 = vld [vmem:[#allocation11_spill] sm:$0xff] }
 0x867   : > { %24529 = vmatprep.subr.msk.bf16.mxu0 %vm3502_vm2, %v15295_v14  ;;  %24524 = vmatmul.mubr.msk.bf16.vlgmr.msra.gmra.mrb[244].mxu1 %vm3498_vm3, %v29187_v57  ;;  %v15362_v55 = vcombine.high %v15338_v7, %v31328_v33  ;;  %v15411_v60 = vrot.slane %v15397_v62, %v25368_v49  ;;  %v15363_v45 = vcombine.high %v15345_v4, %v31328_v33  ;;  %v15496_v27 = vsel %vm3502_vm2, %v15345_v4, 0 }
 0x868   : > { %15737 = vmatpush1.bf16.msra.mxu1 %v15466_v38  ;;  %15768 = vmatprep.mubr.bf16.mxu1 %v31328_v33  ;;  %v15428_v32 = vcombine.high %v15404_v48, %v31328_v33  ;;  %v15420_v40 = vrot.slane %v15412_v17, %v25368_v49  ;;  %v15354_v30 = vrot.slane %v15346_v28, %v25368_v49  ;;  %v31549_v17 = vld [vmem:[#allocation9_spill] sm:$0xff] }
 0x869   : > { %24531 = vmatprep.subr.msk.bf16.mxu1 %vm3502_vm2, %v15299_v63  ;;  %v15490_v35 = vsel %vm3502_vm2, %v15362_v55, 0  ;;  %v15429_v14 = vcombine.high %v15411_v60, %v31328_v33  ;;  %v15502_v18 = vsel %vm3502_vm2, %v15363_v45, 0  ;;  %v15427_v15 = vrot.slane %v15413_v20, %v25368_v49  ;;  %v31550_v20 = vld [vmem:[#allocation15_spill] sm:$0xff] }
 0x86a   : > { %v15430_v11 = vcombine.high %v15420_v40, %v31328_v33  ;;  %v15364_v36 = vcombine.high %v15354_v30, %v31328_v33  ;;  %v15508_v37 = vsel %vm3502_vm2, %v15354_v30, 0  ;;  %v15361_v62 = vrot.slane %v15347_v44, %v25368_v49  ;;  %v31552_v44 = vld [vmem:[#allocation16_spill] sm:$0xff] }
 0x86b   : > { %v15431_v59 = vcombine.high %v15427_v15, %v31328_v33 }
 0x86c   : > { %v15514_v56 = vsel %vm3502_vm2, %v15364_v36, 0  ;;  %v15365_v38 = vcombine.high %v15361_v62, %v31328_v33  ;;  %v15520_v63 = vsel %vm3502_vm2, %v15361_v62, 0 }
 0x86d   : > { %24526 = vmatmul.mubr.msk.bf16.vlgmr.msra.gmra.mrb[232].mxu0 %vm3498_vm3, %v29187_v57 }
 0x86e   : > { %15778 = vmatpush1.bf16.msra.mxu0 %v15472_v25  ;;  %15809 = vmatprep.mubr.bf16.mxu0 %v31328_v33  ;;  %v15526_v28 = vsel %vm3502_vm2, %v15365_v38, 0  ;;  %v25002_v25 = vld [vmem:[%s25340_s12 + $0x20] sm:$0xff]  }
 0x86f   : > { %24528 = vmatmul.mubr.msk.bf16.vlgmr.msra.gmra.mrb[248].mxu1 %vm3498_vm3, %v29187_v57  ;;  %24533 = vmatprep.subr.msk.bf16.mxu0 %vm3502_vm2, %v15404_v48  ;;  %v31548_v48 = vld [vmem:[#allocation12_spill] sm:$0xff] }
 0x870   : > { %15819 = vmatpush1.bf16.msra.mxu1 %v15478_v42  ;;  %15850 = vmatprep.mubr.bf16.mxu1 %v31328_v33  ;;  %v31554_v42 = vld [vmem:[#allocation14_spill] sm:$0xff] }
 0x871   : > { %24535 = vmatprep.subr.msk.bf16.mxu1 %vm3502_vm2, %v15428_v32  ;;  %v31553_v32 = vld [vmem:[#allocation13_spill] sm:$0xff] }
 0x875   : > { %24530 = vmatmul.mubr.msk.bf16.vlgmr.msra.gmra.mrb[236].mxu0 %vm3498_vm3, %v29187_v57 }
 0x876   : > { %15860 = vmatpush1.bf16.msra.mxu0 %v15484_v54  ;;  %15891 = vmatprep.mubr.bf16.mxu0 %v31328_v33 }
 0x877   : > { %24532 = vmatmul.mubr.msk.bf16.vlgmr.msra.gmra.mrb[252].mxu1 %vm3498_vm3, %v29187_v57  ;;  %24537 = vmatprep.subr.msk.bf16.mxu0 %vm3502_vm2, %v15411_v60 }
 0x878   : > { %15901 = vmatpush1.bf16.msra.mxu1 %v15490_v35  ;;  %15932 = vmatprep.mubr.bf16.mxu1 %v31328_v33 }
 0x879   : > { %24539 = vmatprep.subr.msk.bf16.mxu1 %vm3502_vm2, %v15429_v14 }
 0x87d   : > { %24534 = vmatmul.mubr.msk.bf16.vlgmr.msra.gmra.mrb[240].mxu0 %vm3498_vm3, %v29187_v57 }
 0x87e   : > { %15942 = vmatpush1.bf16.msra.mxu0 %v15496_v27  ;;  %15973 = vmatprep.mubr.bf16.mxu0 %v31328_v33 }
 0x87f   : > { %24536 = vmatmul.mubr.msk.bf16.vlgmr.msra.gmra.mrb[0].mxu1 %vm3498_vm3, %v29187_v57  ;;  %24541 = vmatprep.subr.msk.bf16.mxu0 %vm3502_vm2, %v15420_v40 }
 0x880   : > { %15983 = vmatpush1.bf16.msra.mxu1 %v15502_v18  ;;  %16014 = vmatprep.mubr.bf16.mxu1 %v31328_v33 }
 0x881   : > { %24543 = vmatprep.subr.msk.bf16.mxu1 %vm3502_vm2, %v15430_v11 }
 0x885   : > { %24538 = vmatmul.mubr.msk.bf16.vlgmr.msra.gmra.mrb[244].mxu0 %vm3498_vm3, %v29187_v57 }
 0x886   : > { %16024 = vmatpush1.bf16.msra.mxu0 %v15508_v37  ;;  %16055 = vmatprep.mubr.bf16.mxu0 %v31328_v33 }
 0x887   : > { %24545 = vmatprep.subr.msk.bf16.mxu0 %vm3502_vm2, %v15427_v15  ;;  %24540 = vmatmul.mubr.msk.bf16.vlgmr.msra.gmra.mrb[4].mxu1 %vm3498_vm3, %v29187_v57 }
 0x888   : > { %16065 = vmatpush1.bf16.msra.mxu1 %v15514_v56  ;;  %16096 = vmatprep.mubr.bf16.mxu1 %v31328_v33 }
 0x889   : > { %24547 = vmatprep.subr.msk.bf16.mxu1 %vm3502_vm2, %v15431_v59 }
 0x88d   : > { %24542 = vmatmul.mubr.msk.bf16.vlgmr.msra.gmra.mrb[248].mxu0 %vm3498_vm3, %v29187_v57 }
 0x88e   : > { %16106 = vmatpush1.bf16.msra.mxu0 %v15520_v63  ;;  %16137 = vmatprep.mubr.bf16.mxu0 %v31328_v33 }
 0x88f   : > { %16784 = vmatprep.subr.bf16.mxu0 %v31547_v21  ;;  %24544 = vmatmul.mubr.msk.bf16.vlgmr.msra.gmra.mrb[8].mxu1 %vm3498_vm3, %v29187_v57 }
 0x890   : > { %16147 = vmatpush1.bf16.msra.mxu1 %v15526_v28  ;;  %16178 = vmatprep.mubr.bf16.mxu1 %v31328_v33 }
 0x891   : > { %16837 = vmatprep.subr.bf16.mxu1 %v31548_v48 }
 0x895   : > { %24546 = vmatmul.mubr.msk.bf16.vlgmr.msra.gmra.mrb[252].mxu0 %vm3498_vm3, %v29187_v57 }
 0x896   : > { %16785 = vmatpush1.bf16.msra.mxu0 %v31549_v17  ;;  %16816 = vmatprep.mubr.bf16.mxu0 %v31328_v33 }
 0x897   : > { %16786 = vmatprep.subr.bf16.mxu0 %v31550_v20  ;;  %24548 = vmatmul.mubr.msk.bf16.vlgmr.msra.gmra.mrb[12].mxu1 %vm3498_vm3, %v29187_v57  ;;  %v25003_v57 = vld [vmem:[%s25340_s12 + $0x28] sm:$0xff]  }
 0x898   : > { %16838 = vmatpush1.bf16.msra.mxu1 %v31551_v16  ;;  %16869 = vmatprep.mubr.bf16.mxu1 %v31328_v33 }
 0x899   : > { %16839 = vmatprep.subr.bf16.mxu1 %v31552_v44 }
 0x89a   : > { %16787 = vmatpush1.bf16.msra.mxu0 %v31553_v32 }
 0x89c   : > { %16840 = vmatpush1.bf16.msra.mxu1 %v31554_v42 }
 0x89d   : > { %24555 = vmatmul.mubr.msk.bf16.vlgmr.msra.gmra.mrb[0].mxu0 %vm1592_vm1, %v25002_v25 }
 0x89e   : > { %16826 = vmatprep.mubr.bf16.mxu0 %v31328_v33 }
 0x89f   : > { %24557 = vmatmul.mubr.msk.bf16.vlgmr.msra.gmra.mrb[16].mxu1 %vm1592_vm1, %v25002_v25 }
 0x8a0   : > { %16879 = vmatprep.mubr.bf16.mxu1 %v31328_v33 }
 0x8a5   : > { %24556 = vmatmul.mubr.msk.bf16.gmra.mrb[4].mxu0 %vm1592_vm1, %v25003_v57 }
 0x8a6   : > { %17847 = vmatprep.mubr.bf16.mxu0 %v31328_v33 }
 0x8a7   : > { %24558 = vmatmul.mubr.msk.bf16.gmra.mrb[20].mxu1 %vm1592_vm1, %v25003_v57 }
 0x8a8   : > { %17888 = vmatprep.mubr.bf16.mxu1 %v31328_v33 }
 0x930   : > { %v15565_v7 = vpop.f32.mrb[224].mxu0 }
 0x931   : > { %v15566_v55 = vadd.f32 %v15565_v7, %v31377_v22  ;;  %v15567_v60 = vpop.f32.mrb[225].mxu0 }
 0x932   : > { %v15606_v54 = vpop.f32.mrb[240].mxu1  ;;  %v15568_v35 = vadd.f32 %v15567_v60, %v25920_v12  ;;  %v15569_v4 = vpop.f32.mrb[226].mxu0 }
 0x933   : > { %v15607_v14 = vadd.f32 %v15606_v54, %v25918_v13  ;;  %v15608_v45 = vpop.f32.mrb[241].mxu1  ;;  %v15570_v40 = vpop.f32.mrb[227].mxu0 }
 0x934   : > { %v15609_v27 = vadd.f32 %v15608_v45, %v25922_v29  ;;  %v15610_v18 = vpop.f32.mrb[242].mxu1 }
 0x935   : > { %v16187_v11 = vcombine.low %v15566_v55, %v15607_v14  ;;  %v16188_v30 = vcombine.high %v15566_v55, %v15607_v14  ;;  %v15611_v15 = vpop.f32.mrb[243].mxu1 }
 0x936   : > { %v16203_v36 = vcombine.low %v15568_v35, %v15609_v27  ;;  %v16204_v37 = vcombine.high %v15568_v35, %v15609_v27 }
 0x937   : > { %v16195_v56 = vrot.slane %v16187_v11, %v25351_v9  ;;  %v16202_v59 = vrot.slane %v16188_v30, %v25351_v9 }
 0x938   : > { %v16211_v62 = vrot.slane %v16203_v36, %v25351_v9  ;;  %v16218_v38 = vrot.slane %v16204_v37, %v25351_v9  ;;  %v15647_v63 = vpop.f32.mrb[228].mxu0 }
 0x939   : > { %v15648_v21 = vadd.f32 %v15647_v63, %v26930_v0  ;;  %v15649_v28 = vpop.f32.mrb[229].mxu0 }
 0x93a   : > { %v16251_v48 = vcombine.low %v16195_v56, %v16211_v62  ;;  %v16252_v17 = vcombine.high %v16195_v56, %v16211_v62  ;;  %v16267_v20 = vcombine.low %v16202_v59, %v16218_v38  ;;  %v16268_v16 = vcombine.high %v16202_v59, %v16218_v38  ;;  %v15688_v44 = vpop.f32.mrb[244].mxu1  ;;  %v15651_v25 = vpop.f32.mrb[230].mxu0 }
 0x93b   : > { %v15689_v32 = vadd.f32 %v15688_v44, %v26934_v1  ;;  %v15650_v42 = vadd.f32 %v15649_v28, %v26936_v2  ;;  %v15690_v57 = vpop.f32.mrb[245].mxu1  ;;  %v15652_v7 = vpop.f32.mrb[231].mxu0 }
 0x93c   : > { %v15692_v55 = vpop.f32.mrb[246].mxu1  ;;  %v15691_v35 = vadd.f32 %v15690_v57, %v26941_v24  ;;  %v16259_v36 = vrot.slane %v16251_v48, %v25368_v49  ;;  %v16266_v37 = vrot.slane %v16252_v17, %v25368_v49  ;;  %v16282_v57 = vrot.slane %v16268_v16, %v25368_v49 }
 0x93d   : > { %v16219_v60 = vcombine.low %v15648_v21, %v15689_v32  ;;  %v16220_v54 = vcombine.high %v15648_v21, %v15689_v32  ;;  %v15693_v4 = vpop.f32.mrb[247].mxu1 }
 0x93e   : > { %v16235_v40 = vcombine.low %v15650_v42, %v15691_v35  ;;  %v16236_v27 = vcombine.high %v15650_v42, %v15691_v35  ;;  %v16275_v42 = vrot.slane %v16267_v20, %v25368_v49 }
 0x93f   : > { %v16227_v14 = vrot.slane %v16219_v60, %v25351_v9  ;;  %v16234_v45 = vrot.slane %v16220_v54, %v25351_v9 }
 0x940   : > { %v15729_v18 = vpop.f32.mrb[232].mxu0  ;;  %v16243_v11 = vrot.slane %v16235_v40, %v25351_v9  ;;  %v16250_v30 = vrot.slane %v16236_v27, %v25351_v9 }
 0x941   : > { %v15731_v15 = vpop.f32.mrb[233].mxu0  ;;  %v15730_v56 = vadd.f32 %v15729_v18, %v31377_v22 }
 0x942   : > { %v15770_v59 = vpop.f32.mrb[248].mxu1  ;;  %v15732_v62 = vadd.f32 %v15731_v15, %v25920_v12  ;;  %v15733_v38 = vpop.f32.mrb[234].mxu0  ;;  %v16283_v63 = vcombine.low %v16227_v14, %v16243_v11  ;;  %v16284_v21 = vcombine.high %v16227_v14, %v16243_v11  ;;  %v16299_v28 = vcombine.low %v16234_v45, %v16250_v30 }
 0x943   : > { %v16300_v44 = vcombine.high %v16234_v45, %v16250_v30  ;;  %v15772_v25 = vpop.f32.mrb[249].mxu1  ;;  %v15734_v32 = vpop.f32.mrb[235].mxu0  ;;  %v15771_v48 = vadd.f32 %v15770_v59, %v25918_v13 }
 0x944   : > { %v15773_v17 = vadd.f32 %v15772_v25, %v25922_v29  ;;  %v15774_v7 = vpop.f32.mrb[250].mxu1  ;;  %v16291_v55 = vrot.slane %v16283_v63, %v25368_v49  ;;  %v16298_v60 = vrot.slane %v16284_v21, %v25368_v49  ;;  %v16307_v54 = vrot.slane %v16299_v28, %v25368_v49 }
 0x945   : > { %v16314_v35 = vrot.slane %v16300_v44, %v25368_v49  ;;  %v15775_v4 = vpop.f32.mrb[251].mxu1  ;;  %v16323_v14 = vcombine.low %v15730_v56, %v15771_v48  ;;  %v16324_v45 = vcombine.high %v15730_v56, %v15771_v48 }
 0x946   : > { %v16339_v40 = vcombine.low %v15732_v62, %v15773_v17  ;;  %v16340_v20 = vcombine.high %v15732_v62, %v15773_v17  ;;  %v16315_v27 = vcombine.low %v16259_v36, %v16291_v55  ;;  %v16316_v16 = vcombine.high %v16259_v36, %v16291_v55 }
 0x947   : > { %v16317_v18 = vcombine.low %v16266_v37, %v16298_v60  ;;  %v16318_v11 = vcombine.high %v16266_v37, %v16298_v60  ;;  %v16319_v30 = vcombine.low %v16275_v42, %v16307_v54  ;;  %v16320_v15 = vcombine.high %v16275_v42, %v16307_v54 }
 0x948   : > { %v16321_v59 = vcombine.low %v16282_v57, %v16314_v35  ;;  %v16322_v38 = vcombine.high %v16282_v57, %v16314_v35  ;;  %v15811_v63 = vpop.f32.mrb[236].mxu0  ;;  %v29362_v21 = vadd.f32 %v16315_v27, %v28887_v34  ;;  %v29365_v28 = vadd.f32 %v16316_v16, %v28890_v3 }
 0x949   : > { %v29368_v44 = vadd.f32 %v16317_v18, %v28893_v10  ;;  %v29371_v56 = vadd.f32 %v16318_v11, %v28896_v41  ;;  %v15813_v36 = vpop.f32.mrb[237].mxu0  ;;  %v29374_v37 = vadd.f32 %v16319_v30, %v28899_v61  ;;  %v29377_v62 = vadd.f32 %v16320_v15, %v28902_v51 }
 0x94a   : > { %v29380_v25 = vadd.f32 %v16321_v59, %v28905_v23  ;;  %v29383_v34 = vadd.f32 %v16322_v38, %v28908_v47  ;;  %v15852_v3 = vpop.f32.mrb[252].mxu1  ;;  %v15815_v32 = vpop.f32.mrb[238].mxu0  ;;  %v16331_v10 = vrot.slane %v16323_v14, %v25351_v9  ;;  %v16338_v41 = vrot.slane %v16324_v45, %v25351_v9 }
 0x94b   : > { %v16347_v42 = vrot.slane %v16339_v40, %v25351_v9  ;;  %v16354_v61 = vrot.slane %v16340_v20, %v25351_v9  ;;  %v15854_v57 = vpop.f32.mrb[253].mxu1  ;;  %v15816_v48 = vpop.f32.mrb[239].mxu0  ;;  %v15812_v51 = vadd.f32 %v15811_v63, %v26930_v0  ;;  %v15853_v23 = vadd.f32 %v15852_v3, %v26934_v1 }
 0x94c   : > { %v15814_v17 = vadd.f32 %v15813_v36, %v26936_v2  ;;  %v15855_v47 = vadd.f32 %v15854_v57, %v26941_v24  ;;  %v15856_v7 = vpop.f32.mrb[254].mxu1 }
 0x94d   : > { %v16387_v55 = vcombine.low %v16331_v10, %v16347_v42  ;;  %v16388_v60 = vcombine.high %v16331_v10, %v16347_v42  ;;  %v16403_v54 = vcombine.low %v16338_v41, %v16354_v61  ;;  %v16404_v35 = vcombine.high %v16338_v41, %v16354_v61  ;;  %v15857_v4 = vpop.f32.mrb[255].mxu1 }
 0x94e   : > { %v16355_v14 = vcombine.low %v15812_v51, %v15853_v23  ;;  %v16356_v45 = vcombine.high %v15812_v51, %v15853_v23  ;;  %v16371_v40 = vcombine.low %v15814_v17, %v15855_v47  ;;  %v16372_v20 = vcombine.high %v15814_v17, %v15855_v47 }
 0x94f   : > { %v16395_v15 = vrot.slane %v16387_v55, %v25368_v49  ;;  %v16402_v42 = vrot.slane %v16388_v60, %v25368_v49  ;;  %v16411_v61 = vrot.slane %v16403_v54, %v25368_v49  ;;  %v16418_v57 = vrot.slane %v16404_v35, %v25368_v49 }
 0x950   : > { %v16363_v27 = vrot.slane %v16355_v14, %v25351_v9  ;;  %v16370_v16 = vrot.slane %v16356_v45, %v25351_v9  ;;  %v16379_v18 = vrot.slane %v16371_v40, %v25351_v9  ;;  %v16386_v11 = vrot.slane %v16372_v20, %v25351_v9  ;;  %v15893_v30 = vpop.f32.mrb[240].mxu0 }
 0x951   : > { %v15894_v59 = vadd.f32 %v15893_v30, %v31377_v22  ;;  %v15895_v38 = vpop.f32.mrb[241].mxu0 }
 0x952   : > { %v16419_v63 = vcombine.low %v16363_v27, %v16379_v18  ;;  %v16420_v36 = vcombine.high %v16363_v27, %v16379_v18  ;;  %v16435_v3 = vcombine.low %v16370_v16, %v16386_v11  ;;  %v16436_v32 = vcombine.high %v16370_v16, %v16386_v11  ;;  %v15934_v10 = vpop.f32.mrb[0].mxu1  ;;  %v15897_v41 = vpop.f32.mrb[242].mxu0 }
 0x953   : > { %v15935_v48 = vadd.f32 %v15934_v10, %v25918_v13  ;;  %v15936_v51 = vpop.f32.mrb[1].mxu1  ;;  %v15898_v23 = vpop.f32.mrb[243].mxu0  ;;  %v15896_v60 = vadd.f32 %v15895_v38, %v25920_v12 }
 0x954   : > { %v16427_v17 = vrot.slane %v16419_v63, %v25368_v49  ;;  %v16434_v47 = vrot.slane %v16420_v36, %v25368_v49  ;;  %v16443_v7 = vrot.slane %v16435_v3, %v25368_v49  ;;  %v16450_v55 = vrot.slane %v16436_v32, %v25368_v49  ;;  %v15938_v4 = vpop.f32.mrb[2].mxu1 }
 0x955   : > { %v16459_v14 = vcombine.low %v15894_v59, %v15935_v48  ;;  %v16460_v45 = vcombine.high %v15894_v59, %v15935_v48  ;;  %v15937_v54 = vadd.f32 %v15936_v51, %v25922_v29  ;;  %v15939_v35 = vpop.f32.mrb[3].mxu1 }
 0x956   : > { %v16451_v40 = vcombine.low %v16395_v15, %v16427_v17  ;;  %v16452_v20 = vcombine.high %v16395_v15, %v16427_v17  ;;  %v16453_v27 = vcombine.low %v16402_v42, %v16434_v47  ;;  %v16454_v16 = vcombine.high %v16402_v42, %v16434_v47 }
 0x957   : > { %v16455_v18 = vcombine.low %v16411_v61, %v16443_v7  ;;  %v16456_v11 = vcombine.high %v16411_v61, %v16443_v7  ;;  %v16457_v30 = vcombine.low %v16418_v57, %v16450_v55  ;;  %v16458_v63 = vcombine.high %v16418_v57, %v16450_v55 }
 0x958   : > { %v29410_v36 = vadd.f32 %v16451_v40, %v28935_v50  ;;  %v29413_v3 = vadd.f32 %v16452_v20, %v28938_v53  ;;  %v29416_v59 = vadd.f32 %v16453_v27, %v28941_v26  ;;  %v29419_v38 = vadd.f32 %v16454_v16, %v28944_v52  ;;  %v15975_v32 = vpop.f32.mrb[244].mxu0 }
 0x959   : > { %v29422_v15 = vadd.f32 %v16455_v18, %v28947_v6  ;;  %v29425_v10 = vadd.f32 %v16456_v11, %v28950_v5  ;;  %v29428_v41 = vadd.f32 %v16457_v30, %v28953_v39  ;;  %v29431_v50 = vadd.f32 %v16458_v63, %v28956_v43  ;;  %v15977_v53 = vpop.f32.mrb[245].mxu0 }
 0x95a   : > { %v16467_v26 = vrot.slane %v16459_v14, %v25351_v9  ;;  %v16474_v42 = vrot.slane %v16460_v45, %v25351_v9  ;;  %v16475_v52 = vcombine.low %v15896_v60, %v15937_v54  ;;  %v16476_v61 = vcombine.high %v15896_v60, %v15937_v54  ;;  %v16016_v57 = vpop.f32.mrb[4].mxu1  ;;  %v15979_v48 = vpop.f32.mrb[246].mxu0 }
 0x95b   : > { %v15976_v6 = vadd.f32 %v15975_v32, %v26930_v0  ;;  %v16017_v5 = vadd.f32 %v16016_v57, %v26934_v1  ;;  %v15978_v51 = vadd.f32 %v15977_v53, %v26936_v2  ;;  %v16018_v39 = vpop.f32.mrb[5].mxu1  ;;  %v15980_v23 = vpop.f32.mrb[247].mxu0 }
 0x95c   : > { %v16483_v43 = vrot.slane %v16475_v52, %v25351_v9  ;;  %v16490_v17 = vrot.slane %v16476_v61, %v25351_v9  ;;  %v16019_v47 = vadd.f32 %v16018_v39, %v26941_v24  ;;  %v16020_v7 = vpop.f32.mrb[6].mxu1 }
 0x95d   : > { %v16491_v55 = vcombine.low %v15976_v6, %v16017_v5  ;;  %v16492_v4 = vcombine.high %v15976_v6, %v16017_v5  ;;  %v16021_v14 = vpop.f32.mrb[7].mxu1 }
 0x95e   : > { %v16523_v45 = vcombine.low %v16467_v26, %v16483_v43  ;;  %v16524_v60 = vcombine.high %v16467_v26, %v16483_v43  ;;  %v16539_v54 = vcombine.low %v16474_v42, %v16490_v17  ;;  %v16540_v35 = vcombine.high %v16474_v42, %v16490_v17 }
 0x95f   : > { %v16499_v40 = vrot.slane %v16491_v55, %v25351_v9  ;;  %v16506_v20 = vrot.slane %v16492_v4, %v25351_v9  ;;  %v16507_v27 = vcombine.low %v15978_v51, %v16019_v47  ;;  %v16508_v16 = vcombine.high %v15978_v51, %v16019_v47 }
 0x960   : > { %v16057_v18 = vpop.f32.mrb[248].mxu0  ;;  %v16531_v32 = vrot.slane %v16523_v45, %v25368_v49  ;;  %v16538_v53 = vrot.slane %v16524_v60, %v25368_v49  ;;  %v16547_v23 = vrot.slane %v16539_v54, %v25368_v49  ;;  %v16554_v43 = vrot.slane %v16540_v35, %v25368_v49 }
 0x961   : > { %v16515_v11 = vrot.slane %v16507_v27, %v25351_v9  ;;  %v16522_v30 = vrot.slane %v16508_v16, %v25351_v9  ;;  %v16059_v63 = vpop.f32.mrb[249].mxu0  ;;  %v16058_v26 = vadd.f32 %v16057_v18, %v31377_v22 }
 0x962   : > { %v16098_v52 = vpop.f32.mrb[8].mxu1  ;;  %v16060_v42 = vadd.f32 %v16059_v63, %v25920_v12  ;;  %v16061_v61 = vpop.f32.mrb[250].mxu0 }
 0x963   : > { %v16555_v57 = vcombine.low %v16499_v40, %v16515_v11  ;;  %v16556_v48 = vcombine.high %v16499_v40, %v16515_v11  ;;  %v16571_v6 = vcombine.low %v16506_v20, %v16522_v30  ;;  %v16572_v5 = vcombine.high %v16506_v20, %v16522_v30  ;;  %v16100_v51 = vpop.f32.mrb[9].mxu1  ;;  %v16062_v39 = vpop.f32.mrb[251].mxu0 }
 0x964   : > { %v16099_v17 = vadd.f32 %v16098_v52, %v25918_v13  ;;  %v16101_v47 = vadd.f32 %v16100_v51, %v25922_v29  ;;  %v16102_v7 = vpop.f32.mrb[10].mxu1  ;;  %v31559_v39 = vld [vmem:[#allocation29_spill] sm:$0xff] }
 0x965   : > { %v16563_v55 = vrot.slane %v16555_v57, %v25368_v49  ;;  %v16570_v4 = vrot.slane %v16556_v48, %v25368_v49  ;;  %v16579_v14 = vrot.slane %v16571_v6, %v25368_v49  ;;  %v16586_v45 = vrot.slane %v16572_v5, %v25368_v49  ;;  %v16103_v60 = vpop.f32.mrb[11].mxu1  ;;  %v31555_v5 = vld [vmem:[#allocation42_spill] sm:$0xff] }
 0x966   : > { %v16595_v40 = vcombine.low %v16058_v26, %v16099_v17  ;;  %v16596_v20 = vcombine.high %v16058_v26, %v16099_v17  ;;  %v16611_v27 = vcombine.low %v16060_v42, %v16101_v47  ;;  %v16612_v54 = vcombine.high %v16060_v42, %v16101_v47  ;;  %v31557_v26 = vld [vmem:[#allocation46_spill] sm:$0xff] }
 0x967   : > { %v16587_v16 = vcombine.low %v16531_v32, %v16563_v55  ;;  %v16588_v35 = vcombine.high %v16531_v32, %v16563_v55  ;;  %v16589_v18 = vcombine.low %v16538_v53, %v16570_v4  ;;  %v16590_v11 = vcombine.high %v16538_v53, %v16570_v4 }
 0x968   : > { %v16591_v30 = vcombine.low %v16547_v23, %v16579_v14  ;;  %v16592_v63 = vcombine.high %v16547_v23, %v16579_v14  ;;  %v16593_v52 = vcombine.low %v16554_v43, %v16586_v45  ;;  %v16594_v61 = vcombine.high %v16554_v43, %v16586_v45  ;;  %v16139_v57 = vpop.f32.mrb[252].mxu0  ;;  %v31561_v23 = vld [vmem:[#allocation36_spill] sm:$0xff]  ;;  %v31563_v43 = vld [vmem:[#allocation30_spill] sm:$0xff] }
 0x969   : > { %v29458_v48 = vadd.f32 %v16587_v16, %v28983_v31  ;;  %v29461_v6 = vadd.f32 %v16588_v35, %v28986_v46  ;;  %v29464_v51 = vadd.f32 %v16589_v18, %v31555_v5  ;;  %v29467_v42 = vadd.f32 %v16590_v11, %v31557_v26  ;;  %v16141_v32 = vpop.f32.mrb[253].mxu0  ;;  %v31565_v31 = vld [vmem:[#allocation37_spill] sm:$0xff] }
 0x96a   : > { %v29470_v53 = vadd.f32 %v16591_v30, %v31559_v39  ;;  %v29473_v17 = vadd.f32 %v16592_v63, %v31561_v23  ;;  %v29476_v47 = vadd.f32 %v16593_v52, %v31563_v43  ;;  %v29479_v7 = vadd.f32 %v16594_v61, %v31565_v31  ;;  %v16180_v46 = vpop.f32.mrb[12].mxu1  ;;  %v16143_v55 = vpop.f32.mrb[254].mxu0 }
 0x96b   : > { %31556 = vst [vmem:[#allocation45_spill] sm:$0xff] %v29464_v51  ;;  %31558 = vst [vmem:[#allocation11_spill] sm:$0xff] %v29467_v42  ;;  %v16603_v4 = vrot.slane %v16595_v40, %v25351_v9  ;;  %v16610_v14 = vrot.slane %v16596_v20, %v25351_v9  ;;  %v16619_v45 = vrot.slane %v16611_v27, %v25351_v9  ;;  %v16182_v16 = vpop.f32.mrb[13].mxu1  ;;  %v16144_v35 = vpop.f32.mrb[255].mxu0 }
 0x96c   : > { %31560 = vst [vmem:[#allocation12_spill] sm:$0xff] %v29470_v53  ;;  %31562 = vst [vmem:[#allocation9_spill] sm:$0xff] %v29473_v17  ;;  %v16626_v60 = vrot.slane %v16612_v54, %v25351_v9  ;;  %v16140_v18 = vadd.f32 %v16139_v57, %v26930_v0  ;;  %v16181_v11 = vadd.f32 %v16180_v46, %v26934_v1  ;;  %v16184_v52 = vpop.f32.mrb[14].mxu1 }
 0x96d   : > { %31564 = vst [vmem:[#allocation15_spill] sm:$0xff] %v29476_v47  ;;  %31566 = vst [vmem:[#allocation10_spill] sm:$0xff] %v29479_v7  ;;  %v16142_v30 = vadd.f32 %v16141_v32, %v26936_v2  ;;  %v16183_v63 = vadd.f32 %v16182_v16, %v26941_v24  ;;  %v16659_v61 = vcombine.low %v16603_v4, %v16619_v45  ;;  %v16185_v20 = vpop.f32.mrb[15].mxu1 }
 0x96e   : > { %v16660_v5 = vcombine.high %v16603_v4, %v16619_v45  ;;  %v16675_v40 = vcombine.low %v16610_v14, %v16626_v60  ;;  %v16676_v26 = vcombine.high %v16610_v14, %v16626_v60  ;;  %v16627_v39 = vcombine.low %v16140_v18, %v16181_v11 }
 0x96f   : > { %v16628_v27 = vcombine.high %v16140_v18, %v16181_v11  ;;  %v16643_v23 = vcombine.low %v16142_v30, %v16183_v63  ;;  %v16644_v54 = vcombine.high %v16142_v30, %v16183_v63  ;;  %v16667_v55 = vrot.slane %v16659_v61, %v25368_v49 }
 0x970   : > { %v16635_v43 = vrot.slane %v16627_v39, %v25351_v9  ;;  %v16818_v46 = vpop.f32.mrb[0].mxu0  ;;  %v16674_v4 = vrot.slane %v16660_v5, %v25368_v49  ;;  %v16683_v14 = vrot.slane %v16675_v40, %v25368_v49  ;;  %v16690_v52 = vrot.slane %v16676_v26, %v25368_v49 }
 0x971   : > { %v16642_v57 = vrot.slane %v16628_v27, %v25351_v9  ;;  %v16651_v31 = vrot.slane %v16643_v23, %v25351_v9  ;;  %v16658_v32 = vrot.slane %v16644_v54, %v25351_v9  ;;  %v16819_v45 = vadd.f32 %v16818_v46, %v31377_v22  ;;  %v16820_v60 = vpop.f32.mrb[1].mxu0 }
 0x972   : > { %v16871_v30 = vpop.f32.mrb[16].mxu1  ;;  %v16822_v63 = vpop.f32.mrb[2].mxu0  ;;  %v16821_v39 = vadd.f32 %v16820_v60, %v25920_v12 }
 0x973   : > { %v16691_v16 = vcombine.low %v16635_v43, %v16651_v31  ;;  %v16692_v35 = vcombine.high %v16635_v43, %v16651_v31  ;;  %v16707_v18 = vcombine.low %v16642_v57, %v16658_v32  ;;  %v16708_v11 = vcombine.high %v16642_v57, %v16658_v32  ;;  %v16873_v61 = vpop.f32.mrb[17].mxu1  ;;  %v16824_v27 = vpop.f32.mrb[3].mxu0 }
 0x974   : > { %v16872_v20 = vadd.f32 %v16871_v30, %v25918_v13  ;;  %v16823_v5 = vadd.f32 %v16822_v63, %v31377_v22  ;;  %v16875_v57 = vpop.f32.mrb[18].mxu1  ;;  %v16874_v26 = vadd.f32 %v16873_v61, %v25922_v29  ;;  %v31571_v61 = vld [vmem:[#allocation39_spill] sm:$0xff] }
 0x975   : > { %v16699_v40 = vrot.slane %v16691_v16, %v25368_v49  ;;  %v16706_v23 = vrot.slane %v16692_v35, %v25368_v49  ;;  %v16715_v54 = vrot.slane %v16707_v18, %v25368_v49  ;;  %v16722_v43 = vrot.slane %v16708_v11, %v25368_v49  ;;  %v16877_v60 = vpop.f32.mrb[19].mxu1  ;;  %v31567_v11 = vld [vmem:[#allocation25_spill] sm:$0xff] }
 0x976   : > { %v16890_v31 = vcombine.low %v16819_v45, %v16872_v20  ;;  %v16891_v32 = vcombine.high %v16819_v45, %v16872_v20  ;;  %v16876_v46 = vadd.f32 %v16875_v57, %v25918_v13  ;;  %v31569_v45 = vld [vmem:[#allocation38_spill] sm:$0xff] }
 0x977   : > { %v16723_v30 = vcombine.low %v16667_v55, %v16699_v40  ;;  %v16724_v7 = vcombine.high %v16667_v55, %v16699_v40  ;;  %v16725_v63 = vcombine.low %v16674_v4, %v16706_v23  ;;  %v16726_v47 = vcombine.high %v16674_v4, %v16706_v23  ;;  %v31573_v55 = vld [vmem:[#allocation43_spill] sm:$0xff]  ;;  %v31575_v4 = vld [vmem:[#allocation40_spill] sm:$0xff] }
 0x978   : > { %v16727_v17 = vcombine.low %v16683_v14, %v16715_v54  ;;  %v16728_v16 = vcombine.high %v16683_v14, %v16715_v54  ;;  %v16729_v53 = vcombine.low %v16690_v52, %v16722_v43  ;;  %v16730_v35 = vcombine.high %v16690_v52, %v16722_v43  ;;  %v16828_v51 = vpop.f32.mrb[4].mxu0  ;;  %v31577_v52 = vld [vmem:[#allocation44_spill] sm:$0xff] }
 0x979   : > { %v29508_v18 = vadd.f32 %v16723_v30, %v29033_v58  ;;  %v29511_v42 = vadd.f32 %v16724_v7, %v31567_v11  ;;  %v29514_v20 = vadd.f32 %v16725_v63, %v31569_v45  ;;  %v29517_v57 = vadd.f32 %v16726_v47, %v31571_v61  ;;  %v31579_v58 = vld [vmem:[#allocation41_spill] sm:$0xff]  ;;  %v29531_v7 = vpop.f32.mrb[5].mxu0 }
 0x97a   : > { %v29520_v40 = vadd.f32 %v16727_v17, %v31573_v55  ;;  %v29523_v14 = vadd.f32 %v16728_v16, %v31575_v4  ;;  %v29526_v23 = vadd.f32 %v16729_v53, %v31577_v52  ;;  %v29529_v54 = vadd.f32 %v16730_v35, %v31579_v58  ;;  %v16881_v11 = vpop.f32.mrb[20].mxu1  ;;  %v29535_v17 = vpop.f32.mrb[6].mxu0 }
 0x97b   : > { %31568 = vst [vmem:[#allocation16_spill] sm:$0xff] %v29511_v42  ;;  %31570 = vst [vmem:[#allocation13_spill] sm:$0xff] %v29514_v20  ;;  %v16898_v43 = vrot.slane %v16890_v31, %v25351_v9  ;;  %v16905_v47 = vrot.slane %v16891_v32, %v25351_v9  ;;  %v16906_v30 = vcombine.low %v16821_v39, %v16874_v26  ;;  %v16883_v55 = vpop.f32.mrb[21].mxu1  ;;  %v29539_v35 = vpop.f32.mrb[7].mxu0 }
 0x97c   : > { %31572 = vst [vmem:[#allocation14_spill] sm:$0xff] %v29517_v57  ;;  %31574 = vst [vmem:[#allocation42_spill] sm:$0xff] %v29520_v40  ;;  %v16907_v63 = vcombine.high %v16821_v39, %v16874_v26  ;;  %v16958_v45 = vcombine.low %v16823_v5, %v16876_v46  ;;  %v16959_v16 = vcombine.high %v16823_v5, %v16876_v46  ;;  %v16885_v26 = vpop.f32.mrb[22].mxu1 }
 0x97d   : > { %31576 = vst [vmem:[#allocation46_spill] sm:$0xff] %v29523_v14  ;;  %31578 = vst [vmem:[#allocation29_spill] sm:$0xff] %v29526_v23  ;;  %v16825_v61 = vadd.f32 %v16824_v27, %v25920_v12  ;;  %v16878_v53 = vadd.f32 %v16877_v60, %v25922_v29  ;;  %v16914_v4 = vrot.slane %v16906_v30, %v25351_v9  ;;  %v16887_v58 = vpop.f32.mrb[23].mxu1 }
 0x97e   : > { %31580 = vst [vmem:[#allocation36_spill] sm:$0xff] %v29529_v54  ;;  %v16921_v31 = vrot.slane %v16907_v63, %v25351_v9  ;;  %v16829_v32 = vadd.f32 %v16828_v51, %v31377_v22  ;;  %v16882_v39 = vadd.f32 %v16881_v11, %v25918_v13  ;;  %v16966_v52 = vrot.slane %v16958_v45, %v25351_v9 }
 0x97f   : > { %v16973_v5 = vrot.slane %v16959_v16, %v25351_v9  ;;  %v16974_v46 = vcombine.low %v16825_v61, %v16878_v53  ;;  %v16975_v27 = vcombine.high %v16825_v61, %v16878_v53  ;;  %v16922_v60 = vcombine.low %v16898_v43, %v16914_v4 }
 0x980   : > { %v16923_v54 = vcombine.high %v16898_v43, %v16914_v4  ;;  %v16938_v23 = vcombine.low %v16905_v47, %v16921_v31  ;;  %v16939_v14 = vcombine.high %v16905_v47, %v16921_v31  ;;  %v17026_v40 = vcombine.low %v16829_v32, %v16882_v39 }
 0x981   : > { %v16982_v30 = vrot.slane %v16974_v46, %v25351_v9  ;;  %v16989_v63 = vrot.slane %v16975_v27, %v25351_v9  ;;  %v17027_v51 = vcombine.high %v16829_v32, %v16882_v39  ;;  %v16930_v11 = vrot.slane %v16922_v60, %v25368_v49 }
 0x982   : > { %v16937_v57 = vrot.slane %v16923_v54, %v25368_v49  ;;  %v16946_v45 = vrot.slane %v16938_v23, %v25368_v49  ;;  %v16953_v16 = vrot.slane %v16939_v14, %v25368_v49 }
 0x983   : > { %v16990_v61 = vcombine.low %v16966_v52, %v16982_v30  ;;  %v16991_v53 = vcombine.high %v16966_v52, %v16982_v30  ;;  %v17006_v20 = vcombine.low %v16973_v5, %v16989_v63  ;;  %v17007_v43 = vcombine.high %v16973_v5, %v16989_v63 }
 0x984   : > { %v16954_v47 = vcombine.high %v16930_v11, %v31348_v19  ;;  %v16955_v4 = vcombine.high %v16937_v57, %v31348_v19  ;;  %v16956_v31 = vcombine.high %v16946_v45, %v31348_v19  ;;  %v16957_v32 = vcombine.high %v16953_v16, %v31348_v19 }
 0x985   : > { %v24560_v39 = vpack.c.bf16 %v16946_v45, %v16930_v11  ;;  %v24561_v46 = vpack.c.bf16 %v16953_v16, %v16937_v57  ;;  %v16998_v54 = vrot.slane %v16990_v61, %v25368_v49  ;;  %v17005_v23 = vrot.slane %v16991_v53, %v25368_v49 }
 0x986   : > { %v24564_v27 = vpack.c.bf16 %v16956_v31, %v16954_v47  ;;  %v24565_v14 = vpack.c.bf16 %v16957_v32, %v16955_v4  ;;  %v17014_v52 = vrot.slane %v17006_v20, %v25368_v49  ;;  %v17021_v5 = vrot.slane %v17007_v43, %v25368_v49 }
 0x987   : > { %v17203_v60 = vrot.slane %v24560_v39, %v25351_v9  ;;  %v17211_v30 = vrot.slane %v24561_v46, %v25351_v9  ;;  %v17022_v63 = vcombine.high %v16998_v54, %v31348_v19  ;;  %v17023_v42 = vcombine.high %v17005_v23, %v31348_v19 }
 0x988   : > { %v17253_v57 = vrot.slane %v24564_v27, %v25351_v9  ;;  %v17261_v11 = vrot.slane %v24565_v14, %v25351_v9  ;;  %v17024_v45 = vcombine.high %v17014_v52, %v31348_v19  ;;  %v17025_v16 = vcombine.high %v17021_v5, %v31348_v19 }
 0x989   : > { %v17228_v61 = vcombine.low %v17203_v60, %v17211_v30  ;;  %v24562_v20 = vpack.c.bf16 %v17014_v52, %v16998_v54  ;;  %v24563_v53 = vpack.c.bf16 %v17021_v5, %v17005_v23  ;;  %v17034_v31 = vrot.slane %v17026_v40, %v25351_v9 }
 0x98a   : > { %v17278_v43 = vcombine.low %v17253_v57, %v17261_v11  ;;  %v24566_v47 = vpack.c.bf16 %v17024_v45, %v17022_v63  ;;  %v24567_v4 = vpack.c.bf16 %v17025_v16, %v17023_v42  ;;  %v17041_v46 = vrot.slane %v17027_v51, %v25351_v9 }
 0x98b   : > { %v17219_v32 = vrot.slane %v24562_v20, %v25351_v9  ;;  %v17227_v39 = vrot.slane %v24563_v53, %v25351_v9  ;;  %v16831_v27 = vadd.f32 %v29531_v7, %v25920_v12  ;;  %v17235_v14 = vrot.slane %v17228_v61, %v25368_v49 }
 0x98c   : > { %v17269_v60 = vrot.slane %v24566_v47, %v25351_v9  ;;  %v17277_v54 = vrot.slane %v24567_v4, %v25351_v9  ;;  %v16884_v23 = vadd.f32 %v16883_v55, %v25922_v29  ;;  %v16833_v40 = vadd.f32 %v29535_v17, %v31377_v22 }
 0x98d   : > { %v17236_v42 = vcombine.low %v17219_v32, %v17227_v39  ;;  %v16886_v52 = vadd.f32 %v16885_v26, %v25918_v13  ;;  %v16835_v51 = vadd.f32 %v29539_v35, %v25920_v12  ;;  %v16888_v63 = vadd.f32 %v16887_v58, %v25922_v29 }
 0x98e   : > { %v17286_v5 = vcombine.low %v17269_v60, %v17277_v54  ;;  %v17042_v30 = vcombine.low %v16831_v27, %v16884_v23  ;;  %v17043_v7 = vcombine.high %v16831_v27, %v16884_v23  ;;  %v17285_v57 = vrot.slane %v17278_v43, %v25368_v49 }
 0x98f   : > { %v17243_v11 = vrot.slane %v17236_v42, %v25368_v49  ;;  %v17094_v45 = vcombine.low %v16833_v40, %v16886_v52  ;;  %v17095_v55 = vcombine.high %v16833_v40, %v16886_v52  ;;  %v17110_v61 = vcombine.low %v16835_v51, %v16888_v63 }
 0x990   : > { %v17293_v16 = vrot.slane %v17286_v5, %v25368_v49  ;;  %v17050_v17 = vrot.slane %v17042_v30, %v25351_v9  ;;  %v17057_v26 = vrot.slane %v17043_v7, %v25351_v9  ;;  %v17111_v39 = vcombine.high %v16835_v51, %v16888_v63 }
 0x991   : > { %v17244_v20 = vcombine.low %v17235_v14, %v17243_v11  ;;  %v29590_v35 = vcombine.high %v17235_v14, %v17243_v11  ;;  %v17102_v53 = vrot.slane %v17094_v45, %v25351_v9  ;;  %v17109_v58 = vrot.slane %v17095_v55, %v25351_v9 }
 0x992   : > { %v17058_v47 = vcombine.low %v17034_v31, %v17050_v17  ;;  %v17059_v43 = vcombine.high %v17034_v31, %v17050_v17  ;;  %v17074_v4 = vcombine.low %v17041_v46, %v17057_v26  ;;  %v17075_v32 = vcombine.high %v17041_v46, %v17057_v26 }
 0x993   : > { %v17118_v27 = vrot.slane %v17110_v61, %v25351_v9  ;;  %v17294_v60 = vcombine.low %v17285_v57, %v17293_v16  ;;  %v17295_v54 = vcombine.high %v17285_v57, %v17293_v16  ;;  %v17125_v52 = vrot.slane %v17111_v39, %v25351_v9 }
 0x994   : > { %v17066_v23 = vrot.slane %v17058_v47, %v25368_v49  ;;  %v17073_v42 = vrot.slane %v17059_v43, %v25368_v49  ;;  %v17082_v14 = vrot.slane %v17074_v4, %v25368_v49  ;;  %v17089_v40 = vrot.slane %v17075_v32, %v25368_v49 }
 0x995   : > { %v17126_v5 = vcombine.low %v17102_v53, %v17118_v27  ;;  %v17127_v30 = vcombine.high %v17102_v53, %v17118_v27  ;;  %v17398_v31 = vpack.i.b16 %v17294_v60, %v17244_v20  ;;  %v17142_v26 = vcombine.low %v17109_v58, %v17125_v52 }
 0x996   : > { %v17090_v46 = vcombine.high %v17066_v23, %v31348_v19  ;;  %v17091_v51 = vcombine.high %v17073_v42, %v31348_v19  ;;  %v17092_v7 = vcombine.high %v17082_v14, %v31348_v19  ;;  %v17093_v63 = vcombine.high %v17089_v40, %v31348_v19 }
 0x997   : > { %v24568_v57 = vpack.c.bf16 %v17082_v14, %v17066_v23  ;;  %v24569_v11 = vpack.c.bf16 %v17089_v40, %v17073_v42  ;;  %v17134_v45 = vrot.slane %v17126_v5, %v25368_v49  ;;  %v17141_v55 = vrot.slane %v17127_v30, %v25368_v49 }
 0x998   : > { %v24572_v16 = vpack.c.bf16 %v17092_v7, %v17090_v46  ;;  %v24573_v17 = vpack.c.bf16 %v17093_v63, %v17091_v51  ;;  %v17143_v61 = vcombine.high %v17109_v58, %v17125_v52  ;;  %v17150_v27 = vrot.slane %v17142_v26, %v25368_v49 }
 0x999   : > { %v17303_v53 = vrot.slane %v24568_v57, %v25351_v9  ;;  %v17311_v47 = vrot.slane %v24569_v11, %v25351_v9  ;;  %v17158_v43 = vcombine.high %v17134_v45, %v31348_v19  ;;  %v17159_v4 = vcombine.high %v17141_v55, %v31348_v19 }
 0x99a   : > { %v17353_v32 = vrot.slane %v24572_v16, %v25351_v9  ;;  %v17361_v39 = vrot.slane %v24573_v17, %v25351_v9  ;;  %v17157_v23 = vrot.slane %v17143_v61, %v25368_v49  ;;  %v17399_v14 = vshrl.u32 %v17244_v20, 16 }
 0x99b   : > { %v17328_v42 = vcombine.low %v17303_v53, %v17311_v47  ;;  %v17400_v40 = vshrl.u32 %v17294_v60, 16  ;;  %v17404_v58 = vpack.i.b16 %v17295_v54, %v29590_v35  ;;  %v17160_v5 = vcombine.high %v17150_v27, %v31348_v19 }
 0x99c   : > { %v17378_v52 = vcombine.low %v17353_v32, %v17361_v39  ;;  %v17161_v30 = vcombine.high %v17157_v23, %v31348_v19  ;;  %v24570_v46 = vpack.c.bf16 %v17150_v27, %v17134_v45  ;;  %v24571_v51 = vpack.c.bf16 %v17157_v23, %v17141_v55 }
 0x99d   : > { %v17401_v7 = vpack.i.b16 %v17400_v40, %v17399_v14  ;;  %v24574_v57 = vpack.c.bf16 %v17160_v5, %v17158_v43  ;;  %v17405_v16 = vshrl.u32 %v29590_v35, 16  ;;  %v17406_v20 = vshrl.u32 %v17295_v54, 16 }
 0x99e   : > { %v17319_v63 = vrot.slane %v24570_v46, %v25351_v9  ;;  %v24575_v11 = vpack.c.bf16 %v17161_v30, %v17159_v4  ;;  %v17327_v17 = vrot.slane %v24571_v51, %v25351_v9  ;;  %v17424_v60 = vshrl.u32 %v17398_v31, 16 }
 0x99f   : > { %v17425_v26 = vshrl.u32 %v17401_v7, 16  ;;  %v17369_v61 = vrot.slane %v24574_v57, %v25351_v9  ;;  %v17422_v47 = vpack.i.b16 %v17401_v7, %v17398_v31  ;;  %v17335_v45 = vrot.slane %v17328_v42, %v25368_v49 }
 0x9a0   : > { %v17377_v53 = vrot.slane %v24575_v11, %v25351_v9  ;;  %v17336_v55 = vcombine.low %v17319_v63, %v17327_v17  ;;  %v17407_v32 = vpack.i.b16 %v17406_v20, %v17405_v16  ;;  %v17385_v43 = vrot.slane %v17378_v52, %v25368_v49 }
 0x9a1   : > { %v17426_v39 = vpack.i.b16 %v17425_v26, %v17424_v60  ;;  %v17432_v27 = vshrl.u32 %v17404_v58, 16  ;;  %v17452_v35 = vcombine.high %v17422_v47, %v25348_v8  ;;  %v17459_v40 = vrot.slane %v17422_v47, %v25351_v9 }
 0x9a2   : > { %v17386_v4 = vcombine.low %v17369_v61, %v17377_v53  ;;  %v17343_v54 = vrot.slane %v17336_v55, %v25368_v49  ;;  %v17433_v23 = vshrl.u32 %v17407_v32, 16  ;;  %v17430_v14 = vpack.i.b16 %v17407_v32, %v17404_v58 }
 0x9a3   : > { %v17525_v31 = vrot.slane %v17426_v39, %v25351_v9  ;;  %v17518_v42 = vcombine.high %v17426_v39, %v25348_v8  ;;  %v29631_v30 = vrot.slane %v17452_v35, %v25351_v9 }
 0x9a4   : > { %v17393_v5 = vrot.slane %v17386_v4, %v25368_v49  ;;  %v17344_v52 = vcombine.low %v17335_v45, %v17343_v54  ;;  %v17345_v46 = vcombine.high %v17335_v45, %v17343_v54  ;;  %v17434_v51 = vpack.i.b16 %v17433_v23, %v17432_v27 }
 0x9a5   : > { %v17474_v7 = vrot.slane %v17430_v14, %v25351_v9  ;;  %v29635_v63 = vrot.slane %v17518_v42, %v25351_v9  ;;  %v17467_v58 = vcombine.high %v17430_v14, %v25348_v8 }
 0x9a6   : > { %v17394_v57 = vcombine.low %v17385_v43, %v17393_v5  ;;  %v17395_v11 = vcombine.high %v17385_v43, %v17393_v5  ;;  %v17540_v16 = vrot.slane %v17434_v51, %v25351_v9  ;;  %v17533_v60 = vcombine.high %v17434_v51, %v25348_v8  ;;  %v29662_v51 = vld [vmem:[%s31218_s3 + $0x18] sm:$0xf] }
 0x9a7   : > { %v17482_v17 = vcombine.low %v17459_v40, %v17474_v7  ;;  %v17483_v20 = vcombine.high %v17459_v40, %v17474_v7  ;;  %v29641_v26 = vrot.slane %v17467_v58, %v25351_v9  ;;  %v17411_v53 = vshrl.u32 %v17344_v52, 16 }
 0x9a8   : > { %v17410_v61 = vpack.i.b16 %v17394_v57, %v17344_v52  ;;  %v17412_v47 = vshrl.u32 %v17394_v57, 16  ;;  %v17548_v45 = vcombine.low %v17525_v31, %v17540_v16  ;;  %v17549_v32 = vcombine.high %v17525_v31, %v17540_v16 }
 0x9a9   : > { %v17490_v55 = vrot.slane %v17482_v17, %v25368_v49  ;;  %v17497_v39 = vrot.slane %v17483_v20, %v25368_v49  ;;  %v17547_v43 = vrot.slane %v17533_v60, %v25351_v9  ;;  %v17498_v4 = vcombine.low %v29631_v30, %v29641_v26 }
 0x9aa   : > { %v17499_v27 = vcombine.high %v29631_v30, %v29641_v26  ;;  %v17413_v35 = vpack.i.b16 %v17412_v47, %v17411_v53  ;;  %v17556_v54 = vrot.slane %v17548_v45, %v25368_v49  ;;  %v17563_v14 = vrot.slane %v17549_v32, %v25368_v49 }
 0x9ab   : > { %v17514_v23 = vcombine.high %v17490_v55, %v31328_v33  ;;  %v17564_v40 = vcombine.low %v29635_v63, %v17547_v43  ;;  %v17720_v5 = vsel %vm3502_vm2, %v17490_v55, 0  ;;  %v17565_v42 = vcombine.high %v29635_v63, %v17547_v43 }
 0x9ac   : > { %24576 = vmatprep.subr.msk.bf16.mxu0 %vm3502_vm2, %v17556_v54  ;;  %v17580_v31 = vcombine.high %v17556_v54, %v31328_v33  ;;  %v17515_v7 = vcombine.high %v17497_v39, %v31328_v33  ;;  %v17581_v58 = vcombine.high %v17563_v14, %v31328_v33  ;;  %v17416_v16 = vpack.i.b16 %v17395_v11, %v17345_v46 }
 0x9ad   : > { %17816 = vmatpush1.bf16.msra.mxu0 %v17720_v5  ;;  %v17726_v52 = vsel %vm3502_vm2, %v17514_v23, 0  ;;  %v17572_v57 = vrot.slane %v17564_v40, %v25368_v49  ;;  %v17417_v63 = vshrl.u32 %v17345_v46, 16  ;;  %v17418_v17 = vshrl.u32 %v17395_v11, 16 }
 0x9ae   : > { %24578 = vmatprep.subr.msk.bf16.mxu1 %vm3502_vm2, %v17580_v31  ;;  %24580 = vmatprep.subr.msk.bf16.mxu0 %vm3502_vm2, %v17563_v14  ;;  %v17440_v20 = vshrl.u32 %v17410_v61, 16  ;;  %v17732_v60 = vsel %vm3502_vm2, %v17497_v39, 0  ;;  %v17441_v53 = vshrl.u32 %v17413_v35, 16  ;;  %v17448_v45 = vshrl.u32 %v17416_v16, 16 }
 0x9af   : > { %17857 = vmatpush1.bf16.msra.mxu1 %v17726_v52  ;;  %v17419_v47 = vpack.i.b16 %v17418_v17, %v17417_v63  ;;  %v17438_v55 = vpack.i.b16 %v17413_v35, %v17410_v61  ;;  %v17738_v46 = vsel %vm3502_vm2, %v17515_v7, 0  ;;  %v17582_v11 = vcombine.high %v17572_v57, %v31328_v33 }
 0x9b0   : > { %24577 = vmatmul.mubr.msk.bf16.vlgmr.msra.gmra.mrb[8].mxu0 %vm3498_vm3, %v29662_v51  ;;  %24582 = vmatprep.subr.msk.bf16.mxu1 %vm3502_vm2, %v17581_v58  ;;  %v17506_v32 = vrot.slane %v17498_v4, %v25368_v49  ;;  %v17442_v39 = vpack.i.b16 %v17441_v53, %v17440_v20  ;;  %v17579_v31 = vrot.slane %v17565_v42, %v25368_v49 }
 0x9b1   : > { %17898 = vmatpush1.bf16.msra.mxu0 %v17732_v60  ;;  %17929 = vmatprep.mubr.bf16.mxu0 %v31328_v33  ;;  %v17449_v43 = vshrl.u32 %v17419_v47, 16  ;;  %v17446_v54 = vpack.i.b16 %v17419_v47, %v17416_v16  ;;  %v17591_v23 = vrot.slane %v17438_v55, %v25351_v9  ;;  %v17584_v61 = vcombine.high %v17438_v55, %v25348_v8 }
 0x9b2   : > { %24579 = vmatmul.mubr.msk.bf16.vlgmr.msra.gmra.mrb[24].mxu1 %vm3498_vm3, %v29662_v51  ;;  %24584 = vmatprep.subr.msk.bf16.mxu0 %vm3502_vm2, %v17572_v57  ;;  %v17650_v35 = vcombine.high %v17442_v39, %v25348_v8  ;;  %v17657_v40 = vrot.slane %v17442_v39, %v25351_v9  ;;  %v17516_v52 = vcombine.high %v17506_v32, %v31328_v33  ;;  %v17744_v17 = vsel %vm3502_vm2, %v17506_v32, 0 }
 0x9b3   : > { %17939 = vmatpush1.bf16.msra.mxu1 %v17738_v46  ;;  %17970 = vmatprep.mubr.bf16.mxu1 %v31328_v33  ;;  %v17450_v14 = vpack.i.b16 %v17449_v43, %v17448_v45  ;;  %v17606_v5 = vrot.slane %v17446_v54, %v25351_v9  ;;  %v17599_v4 = vcombine.high %v17446_v54, %v25348_v8 }
 0x9b4   : > { %24586 = vmatprep.subr.msk.bf16.mxu1 %vm3502_vm2, %v17582_v11  ;;  %v29691_v7 = vrot.slane %v17584_v61, %v25351_v9  ;;  %v17664_v20 = vrot.slane %v17650_v35, %v25351_v9  ;;  %v17513_v60 = vrot.slane %v17499_v27, %v25368_v49  ;;  %v17750_v45 = vsel %vm3502_vm2, %v17516_v52, 0 }
 0x9b5   : > { %v17672_v58 = vrot.slane %v17450_v14, %v25351_v9  ;;  %v17614_v57 = vcombine.low %v17591_v23, %v17606_v5  ;;  %v17615_v16 = vcombine.high %v17591_v23, %v17606_v5  ;;  %v17665_v63 = vcombine.high %v17450_v14, %v25348_v8 }
 0x9b6   : > { %v29700_v42 = vrot.slane %v17599_v4, %v25351_v9  ;;  %v17583_v55 = vcombine.high %v17579_v31, %v31328_v33  ;;  %v17517_v32 = vcombine.high %v17513_v60, %v31328_v33  ;;  %v17756_v43 = vsel %vm3502_vm2, %v17513_v60, 0 }
 0x9b7   : > { %v17680_v53 = vcombine.low %v17657_v40, %v17672_v58  ;;  %v17681_v47 = vcombine.high %v17657_v40, %v17672_v58  ;;  %v17679_v46 = vrot.slane %v17665_v63, %v25351_v9  ;;  %v17622_v61 = vrot.slane %v17614_v57, %v25368_v49 }
 0x9b8   : > { %24581 = vmatmul.mubr.msk.bf16.vlgmr.msra.gmra.mrb[12].mxu0 %vm3498_vm3, %v29662_v51  ;;  %v17630_v11 = vcombine.low %v29691_v7, %v29700_v42  ;;  %v17631_v39 = vcombine.high %v29691_v7, %v29700_v42  ;;  %v17762_v23 = vsel %vm3502_vm2, %v17517_v32, 0  ;;  %v17629_v4 = vrot.slane %v17615_v16, %v25368_v49  ;;  %v31585_v32 = vld [vmem:[#allocation18_spill] sm:$0xff] }
 0x9b9   : > { %17980 = vmatpush1.bf16.msra.mxu0 %v17744_v17  ;;  %18011 = vmatprep.mubr.bf16.mxu0 %v31328_v33  ;;  %v17688_v30 = vrot.slane %v17680_v53, %v25368_v49  ;;  %v17696_v26 = vcombine.low %v17664_v20, %v17679_v46  ;;  %v17697_v27 = vcombine.high %v17664_v20, %v17679_v46  ;;  %v17768_v40 = vsel %vm3502_vm2, %v17622_v61, 0  ;;  %v31581_v46 = vld [vmem:[#allocation19_spill] sm:$0xff] }
 0x9ba   : > { %24588 = vmatprep.subr.msk.bf16.mxu0 %vm3502_vm2, %v17579_v31  ;;  %24583 = vmatmul.mubr.msk.bf16.vlgmr.msra.gmra.mrb[28].mxu1 %vm3498_vm3, %v29662_v51  ;;  %v17646_v35 = vcombine.high %v17622_v61, %v31328_v33  ;;  %v17695_v14 = vrot.slane %v17681_v47, %v25368_v49  ;;  %v17647_v52 = vcombine.high %v17629_v4, %v31328_v33  ;;  %v17780_v58 = vsel %vm3502_vm2, %v17629_v4, 0 }
 0x9bb   : > { %18021 = vmatpush1.bf16.msra.mxu1 %v17750_v45  ;;  %18052 = vmatprep.mubr.bf16.mxu1 %v31328_v33  ;;  %v17712_v54 = vcombine.high %v17688_v30, %v31328_v33  ;;  %v17704_v7 = vrot.slane %v17696_v26, %v25368_v49  ;;  %v17638_v63 = vrot.slane %v17630_v11, %v25368_v49  ;;  %v31583_v26 = vld [vmem:[#allocation17_spill] sm:$0xff] }
 0x9bc   : > { %24590 = vmatprep.subr.msk.bf16.mxu1 %vm3502_vm2, %v17583_v55  ;;  %v17774_v5 = vsel %vm3502_vm2, %v17646_v35, 0  ;;  %v17713_v31 = vcombine.high %v17695_v14, %v31328_v33  ;;  %v17786_v57 = vsel %vm3502_vm2, %v17647_v52, 0  ;;  %v17711_v17 = vrot.slane %v17697_v27, %v25368_v49  ;;  %v31584_v27 = vld [vmem:[#allocation23_spill] sm:$0xff] }
 0x9bd   : > { %v17714_v16 = vcombine.high %v17704_v7, %v31328_v33  ;;  %v17648_v20 = vcombine.high %v17638_v63, %v31328_v33  ;;  %v17792_v42 = vsel %vm3502_vm2, %v17638_v63, 0  ;;  %v17645_v47 = vrot.slane %v17631_v39, %v25368_v49  ;;  %v31586_v39 = vld [vmem:[#allocation24_spill] sm:$0xff] }
 0x9be   : > { %v17715_v53 = vcombine.high %v17711_v17, %v31328_v33 }
 0x9bf   : > { %v17798_v60 = vsel %vm3502_vm2, %v17648_v20, 0  ;;  %v17649_v45 = vcombine.high %v17645_v47, %v31328_v33  ;;  %v17804_v55 = vsel %vm3502_vm2, %v17645_v47, 0 }
 0x9c0   : > { %24585 = vmatmul.mubr.msk.bf16.vlgmr.msra.gmra.mrb[16].mxu0 %vm3498_vm3, %v29662_v51 }
 0x9c1   : > { %18062 = vmatpush1.bf16.msra.mxu0 %v17756_v43  ;;  %18093 = vmatprep.mubr.bf16.mxu0 %v31328_v33  ;;  %v17810_v11 = vsel %vm3502_vm2, %v17649_v45, 0  ;;  %v31587_v43 = vld [vmem:[#allocation21_spill] sm:$0xff] }
 0x9c2   : > { %24587 = vmatmul.mubr.msk.bf16.vlgmr.msra.gmra.mrb[32].mxu1 %vm3498_vm3, %v29662_v51  ;;  %24592 = vmatprep.subr.msk.bf16.mxu0 %vm3502_vm2, %v17688_v30  ;;  %v31582_v30 = vld [vmem:[#allocation20_spill] sm:$0xff] }
 0x9c3   : > { %18103 = vmatpush1.bf16.msra.mxu1 %v17762_v23  ;;  %18134 = vmatprep.mubr.bf16.mxu1 %v31328_v33  ;;  %v25012_v23 = vld [vmem:[%s25340_s12 + $0x20] sm:$0xff]  }
 0x9c4   : > { %24594 = vmatprep.subr.msk.bf16.mxu1 %vm3502_vm2, %v17712_v54  ;;  %v31588_v54 = vld [vmem:[#allocation22_spill] sm:$0xff] }
 0x9c8   : > { %24589 = vmatmul.mubr.msk.bf16.vlgmr.msra.gmra.mrb[20].mxu0 %vm3498_vm3, %v29662_v51 }
 0x9c9   : > { %18144 = vmatpush1.bf16.msra.mxu0 %v17768_v40  ;;  %18175 = vmatprep.mubr.bf16.mxu0 %v31328_v33 }
 0x9ca   : > { %24591 = vmatmul.mubr.msk.bf16.vlgmr.msra.gmra.mrb[36].mxu1 %vm3498_vm3, %v29662_v51  ;;  %24596 = vmatprep.subr.msk.bf16.mxu0 %vm3502_vm2, %v17695_v14 }
 0x9cb   : > { %18185 = vmatpush1.bf16.msra.mxu1 %v17774_v5  ;;  %18216 = vmatprep.mubr.bf16.mxu1 %v31328_v33 }
 0x9cc   : > { %24598 = vmatprep.subr.msk.bf16.mxu1 %vm3502_vm2, %v17713_v31 }
 0x9d0   : > { %24593 = vmatmul.mubr.msk.bf16.vlgmr.msra.gmra.mrb[24].mxu0 %vm3498_vm3, %v29662_v51 }
 0x9d1   : > { %18226 = vmatpush1.bf16.msra.mxu0 %v17780_v58  ;;  %18257 = vmatprep.mubr.bf16.mxu0 %v31328_v33 }
 0x9d2   : > { %24595 = vmatmul.mubr.msk.bf16.vlgmr.msra.gmra.mrb[40].mxu1 %vm3498_vm3, %v29662_v51  ;;  %24600 = vmatprep.subr.msk.bf16.mxu0 %vm3502_vm2, %v17704_v7 }
 0x9d3   : > { %18267 = vmatpush1.bf16.msra.mxu1 %v17786_v57  ;;  %18298 = vmatprep.mubr.bf16.mxu1 %v31328_v33 }
 0x9d4   : > { %24602 = vmatprep.subr.msk.bf16.mxu1 %vm3502_vm2, %v17714_v16 }
 0x9d8   : > { %24597 = vmatmul.mubr.msk.bf16.vlgmr.msra.gmra.mrb[28].mxu0 %vm3498_vm3, %v29662_v51 }
 0x9d9   : > { %18308 = vmatpush1.bf16.msra.mxu0 %v17792_v42  ;;  %18339 = vmatprep.mubr.bf16.mxu0 %v31328_v33 }
 0x9da   : > { %24604 = vmatprep.subr.msk.bf16.mxu0 %vm3502_vm2, %v17711_v17  ;;  %24599 = vmatmul.mubr.msk.bf16.vlgmr.msra.gmra.mrb[44].mxu1 %vm3498_vm3, %v29662_v51 }
 0x9db   : > { %18349 = vmatpush1.bf16.msra.mxu1 %v17798_v60  ;;  %18380 = vmatprep.mubr.bf16.mxu1 %v31328_v33 }
 0x9dc   : > { %24606 = vmatprep.subr.msk.bf16.mxu1 %vm3502_vm2, %v17715_v53 }
 0x9e0   : > { %24601 = vmatmul.mubr.msk.bf16.vlgmr.msra.gmra.mrb[32].mxu0 %vm3498_vm3, %v29662_v51 }
 0x9e1   : > { %18390 = vmatpush1.bf16.msra.mxu0 %v17804_v55  ;;  %18421 = vmatprep.mubr.bf16.mxu0 %v31328_v33 }
 0x9e2   : > { %19047 = vmatprep.subr.bf16.mxu0 %v31581_v46  ;;  %24603 = vmatmul.mubr.msk.bf16.vlgmr.msra.gmra.mrb[48].mxu1 %vm3498_vm3, %v29662_v51 }
 0x9e3   : > { %18431 = vmatpush1.bf16.msra.mxu1 %v17810_v11  ;;  %18462 = vmatprep.mubr.bf16.mxu1 %v31328_v33 }
 0x9e4   : > { %19100 = vmatprep.subr.bf16.mxu1 %v31582_v30 }
 0x9e8   : > { %24605 = vmatmul.mubr.msk.bf16.vlgmr.msra.gmra.mrb[36].mxu0 %vm3498_vm3, %v29662_v51 }
 0x9e9   : > { %19048 = vmatpush1.bf16.msra.mxu0 %v31583_v26  ;;  %19079 = vmatprep.mubr.bf16.mxu0 %v31328_v33 }
 0x9ea   : > { %19049 = vmatprep.subr.bf16.mxu0 %v31584_v27  ;;  %24607 = vmatmul.mubr.msk.bf16.vlgmr.msra.gmra.mrb[52].mxu1 %vm3498_vm3, %v29662_v51  ;;  %v25013_v51 = vld [vmem:[%s25340_s12 + $0x28] sm:$0xff]  }
 0x9eb   : > { %19101 = vmatpush1.bf16.msra.mxu1 %v31585_v32  ;;  %19132 = vmatprep.mubr.bf16.mxu1 %v31328_v33 }
 0x9ec   : > { %19102 = vmatprep.subr.bf16.mxu1 %v31586_v39 }
 0x9ed   : > { %19050 = vmatpush1.bf16.msra.mxu0 %v31587_v43 }
 0x9ef   : > { %19103 = vmatpush1.bf16.msra.mxu1 %v31588_v54 }
 0x9f0   : > { %24608 = vmatmul.mubr.msk.bf16.vlgmr.msra.gmra.mrb[40].mxu0 %vm1592_vm1, %v25012_v23 }
 0x9f1   : > { %19089 = vmatprep.mubr.bf16.mxu0 %v31328_v33 }
 0x9f2   : > { %24610 = vmatmul.mubr.msk.bf16.vlgmr.msra.gmra.mrb[56].mxu1 %vm1592_vm1, %v25012_v23 }
 0x9f3   : > { %19142 = vmatprep.mubr.bf16.mxu1 %v31328_v33 }
 0x9f8   : > { %24609 = vmatmul.mubr.msk.bf16.gmra.mrb[44].mxu0 %vm1592_vm1, %v25013_v51 }
 0x9f9   : > { %20110 = vmatprep.mubr.bf16.mxu0 %v31328_v33 }
 0x9fa   : > { %24611 = vmatmul.mubr.msk.bf16.gmra.mrb[60].mxu1 %vm1592_vm1, %v25013_v51 }
 0x9fb   : > { %20151 = vmatprep.mubr.bf16.mxu1 %v31328_v33 }
 0xa83   : > { %v17849_v61 = vpop.f32.mrb[8].mxu0 }
 0xa84   : > { %v17850_v35 = vadd.f32 %v17849_v61, %v31377_v22  ;;  %v17851_v14 = vpop.f32.mrb[9].mxu0 }
 0xa85   : > { %v17890_v40 = vpop.f32.mrb[24].mxu1  ;;  %v17852_v5 = vadd.f32 %v17851_v14, %v25920_v12  ;;  %v17853_v4 = vpop.f32.mrb[10].mxu0 }
 0xa86   : > { %v17891_v31 = vadd.f32 %v17890_v40, %v25918_v13  ;;  %v17892_v52 = vpop.f32.mrb[25].mxu1  ;;  %v17854_v7 = vpop.f32.mrb[11].mxu0 }
 0xa87   : > { %v17893_v58 = vadd.f32 %v17892_v52, %v25922_v29  ;;  %v17894_v57 = vpop.f32.mrb[26].mxu1 }
 0xa88   : > { %v18471_v16 = vcombine.low %v17850_v35, %v17891_v31  ;;  %v18472_v63 = vcombine.high %v17850_v35, %v17891_v31  ;;  %v17895_v17 = vpop.f32.mrb[27].mxu1 }
 0xa89   : > { %v18487_v20 = vcombine.low %v17852_v5, %v17893_v58  ;;  %v18488_v42 = vcombine.high %v17852_v5, %v17893_v58 }
 0xa8a   : > { %v18479_v60 = vrot.slane %v18471_v16, %v25351_v9  ;;  %v18486_v53 = vrot.slane %v18472_v63, %v25351_v9 }
 0xa8b   : > { %v18495_v47 = vrot.slane %v18487_v20, %v25351_v9  ;;  %v18502_v45 = vrot.slane %v18488_v42, %v25351_v9  ;;  %v17931_v55 = vpop.f32.mrb[12].mxu0 }
 0xa8c   : > { %v17932_v46 = vadd.f32 %v17931_v55, %v26930_v0  ;;  %v17933_v11 = vpop.f32.mrb[13].mxu0 }
 0xa8d   : > { %v18535_v30 = vcombine.low %v18479_v60, %v18495_v47  ;;  %v18536_v26 = vcombine.high %v18479_v60, %v18495_v47  ;;  %v18551_v27 = vcombine.low %v18486_v53, %v18502_v45  ;;  %v18552_v32 = vcombine.high %v18486_v53, %v18502_v45  ;;  %v17972_v39 = vpop.f32.mrb[28].mxu1  ;;  %v17935_v43 = vpop.f32.mrb[14].mxu0 }
 0xa8e   : > { %v17973_v54 = vadd.f32 %v17972_v39, %v26934_v1  ;;  %v17934_v23 = vadd.f32 %v17933_v11, %v26936_v2  ;;  %v17974_v51 = vpop.f32.mrb[29].mxu1  ;;  %v17936_v61 = vpop.f32.mrb[15].mxu0 }
 0xa8f   : > { %v17976_v35 = vpop.f32.mrb[30].mxu1  ;;  %v17975_v5 = vadd.f32 %v17974_v51, %v26941_v24  ;;  %v18543_v20 = vrot.slane %v18535_v30, %v25368_v49  ;;  %v18550_v42 = vrot.slane %v18536_v26, %v25368_v49  ;;  %v18566_v51 = vrot.slane %v18552_v32, %v25368_v49 }
 0xa90   : > { %v18503_v14 = vcombine.low %v17932_v46, %v17973_v54  ;;  %v18504_v40 = vcombine.high %v17932_v46, %v17973_v54  ;;  %v17977_v4 = vpop.f32.mrb[31].mxu1 }
 0xa91   : > { %v18519_v7 = vcombine.low %v17934_v23, %v17975_v5  ;;  %v18520_v58 = vcombine.high %v17934_v23, %v17975_v5  ;;  %v18559_v23 = vrot.slane %v18551_v27, %v25368_v49 }
 0xa92   : > { %v18511_v31 = vrot.slane %v18503_v14, %v25351_v9  ;;  %v18518_v52 = vrot.slane %v18504_v40, %v25351_v9 }
 0xa93   : > { %v18013_v57 = vpop.f32.mrb[16].mxu0  ;;  %v18527_v16 = vrot.slane %v18519_v7, %v25351_v9  ;;  %v18534_v63 = vrot.slane %v18520_v58, %v25351_v9 }
 0xa94   : > { %v18015_v17 = vpop.f32.mrb[17].mxu0  ;;  %v18014_v60 = vadd.f32 %v18013_v57, %v31377_v22 }
 0xa95   : > { %v18054_v53 = vpop.f32.mrb[32].mxu1  ;;  %v18016_v47 = vadd.f32 %v18015_v17, %v25920_v12  ;;  %v18017_v45 = vpop.f32.mrb[18].mxu0  ;;  %v18567_v55 = vcombine.low %v18511_v31, %v18527_v16  ;;  %v18568_v46 = vcombine.high %v18511_v31, %v18527_v16  ;;  %v18583_v11 = vcombine.low %v18518_v52, %v18534_v63 }
 0xa96   : > { %v18584_v39 = vcombine.high %v18518_v52, %v18534_v63  ;;  %v18056_v43 = vpop.f32.mrb[33].mxu1  ;;  %v18018_v54 = vpop.f32.mrb[19].mxu0  ;;  %v18055_v30 = vadd.f32 %v18054_v53, %v25918_v13 }
 0xa97   : > { %v18057_v26 = vadd.f32 %v18056_v43, %v25922_v29  ;;  %v18058_v61 = vpop.f32.mrb[34].mxu1  ;;  %v18575_v35 = vrot.slane %v18567_v55, %v25368_v49  ;;  %v18582_v14 = vrot.slane %v18568_v46, %v25368_v49  ;;  %v18591_v40 = vrot.slane %v18583_v11, %v25368_v49 }
 0xa98   : > { %v18598_v5 = vrot.slane %v18584_v39, %v25368_v49  ;;  %v18059_v4 = vpop.f32.mrb[35].mxu1  ;;  %v18607_v31 = vcombine.low %v18014_v60, %v18055_v30  ;;  %v18608_v52 = vcombine.high %v18014_v60, %v18055_v30 }
 0xa99   : > { %v18623_v7 = vcombine.low %v18016_v47, %v18057_v26  ;;  %v18624_v27 = vcombine.high %v18016_v47, %v18057_v26  ;;  %v18599_v58 = vcombine.low %v18543_v20, %v18575_v35  ;;  %v18600_v32 = vcombine.high %v18543_v20, %v18575_v35 }
 0xa9a   : > { %v18601_v57 = vcombine.low %v18550_v42, %v18582_v14  ;;  %v18602_v16 = vcombine.high %v18550_v42, %v18582_v14  ;;  %v18603_v63 = vcombine.low %v18559_v23, %v18591_v40  ;;  %v18604_v17 = vcombine.high %v18559_v23, %v18591_v40 }
 0xa9b   : > { %v18605_v53 = vcombine.low %v18566_v51, %v18598_v5  ;;  %v18606_v45 = vcombine.high %v18566_v51, %v18598_v5  ;;  %v18095_v55 = vpop.f32.mrb[20].mxu0  ;;  %v29837_v46 = vadd.f32 %v18599_v58, %v29362_v21  ;;  %v29840_v11 = vadd.f32 %v18600_v32, %v29365_v28 }
 0xa9c   : > { %v29843_v39 = vadd.f32 %v18601_v57, %v29368_v44  ;;  %v29846_v60 = vadd.f32 %v18602_v16, %v29371_v56  ;;  %v18097_v20 = vpop.f32.mrb[21].mxu0  ;;  %v29849_v42 = vadd.f32 %v18603_v63, %v29374_v37  ;;  %v29852_v47 = vadd.f32 %v18604_v17, %v29377_v62 }
 0xa9d   : > { %v18615_v43 = vrot.slane %v18607_v31, %v25351_v9  ;;  %v18622_v21 = vrot.slane %v18608_v52, %v25351_v9  ;;  %v18136_v54 = vpop.f32.mrb[36].mxu1  ;;  %v18099_v28 = vpop.f32.mrb[22].mxu0  ;;  %v18631_v23 = vrot.slane %v18623_v7, %v25351_v9  ;;  %v18638_v44 = vrot.slane %v18624_v27, %v25351_v9 }
 0xa9e   : > { %v18096_v56 = vadd.f32 %v18095_v55, %v26930_v0  ;;  %v18137_v51 = vadd.f32 %v18136_v54, %v26934_v1  ;;  %v18138_v30 = vpop.f32.mrb[37].mxu1  ;;  %v18100_v37 = vpop.f32.mrb[23].mxu0  ;;  %v18098_v26 = vadd.f32 %v18097_v20, %v26936_v2  ;;  %v29863_v35 = vadd.f32 %v18606_v45, %v29383_v34 }
 0xa9f   : > { %v18139_v62 = vadd.f32 %v18138_v30, %v26941_v24  ;;  %v18140_v61 = vpop.f32.mrb[38].mxu1  ;;  %v29866_v14 = vadd.f32 %v18605_v53, %v29380_v25  ;;  %v18671_v40 = vcombine.low %v18615_v43, %v18631_v23  ;;  %v18672_v5 = vcombine.high %v18615_v43, %v18631_v23 }
 0xaa0   : > { %v18687_v4 = vcombine.low %v18622_v21, %v18638_v44  ;;  %v18688_v31 = vcombine.high %v18622_v21, %v18638_v44  ;;  %v18141_v52 = vpop.f32.mrb[39].mxu1  ;;  %v18639_v7 = vcombine.low %v18096_v56, %v18137_v51  ;;  %v18640_v27 = vcombine.high %v18096_v56, %v18137_v51 }
 0xaa1   : > { %v18655_v58 = vcombine.low %v18098_v26, %v18139_v62  ;;  %v18656_v32 = vcombine.high %v18098_v26, %v18139_v62  ;;  %v18679_v25 = vrot.slane %v18671_v40, %v25368_v49  ;;  %v18686_v23 = vrot.slane %v18672_v5, %v25368_v49 }
 0xaa2   : > { %v18647_v57 = vrot.slane %v18639_v7, %v25351_v9  ;;  %v18654_v16 = vrot.slane %v18640_v27, %v25351_v9  ;;  %v18695_v44 = vrot.slane %v18687_v4, %v25368_v49  ;;  %v18702_v56 = vrot.slane %v18688_v31, %v25368_v49 }
 0xaa3   : > { %v18663_v63 = vrot.slane %v18655_v58, %v25351_v9  ;;  %v18670_v34 = vrot.slane %v18656_v32, %v25351_v9  ;;  %v18177_v17 = vpop.f32.mrb[24].mxu0 }
 0xaa4   : > { %v18178_v53 = vadd.f32 %v18177_v17, %v31377_v22  ;;  %v18179_v45 = vpop.f32.mrb[25].mxu0 }
 0xaa5   : > { %v18703_v55 = vcombine.low %v18647_v57, %v18663_v63  ;;  %v18704_v20 = vcombine.high %v18647_v57, %v18663_v63  ;;  %v18719_v43 = vcombine.low %v18654_v16, %v18670_v34  ;;  %v18720_v21 = vcombine.high %v18654_v16, %v18670_v34  ;;  %v18218_v54 = vpop.f32.mrb[40].mxu1  ;;  %v18181_v28 = vpop.f32.mrb[26].mxu0 }
 0xaa6   : > { %v18219_v51 = vadd.f32 %v18218_v54, %v25918_v13  ;;  %v18220_v30 = vpop.f32.mrb[41].mxu1  ;;  %v18182_v37 = vpop.f32.mrb[27].mxu0  ;;  %v18180_v5 = vadd.f32 %v18179_v45, %v25920_v12 }
 0xaa7   : > { %v18711_v26 = vrot.slane %v18703_v55, %v25368_v49  ;;  %v18718_v62 = vrot.slane %v18704_v20, %v25368_v49  ;;  %v18727_v61 = vrot.slane %v18719_v43, %v25368_v49  ;;  %v18734_v40 = vrot.slane %v18720_v21, %v25368_v49  ;;  %v18222_v52 = vpop.f32.mrb[42].mxu1 }
 0xaa8   : > { %v18743_v7 = vcombine.low %v18178_v53, %v18219_v51  ;;  %v18744_v27 = vcombine.high %v18178_v53, %v18219_v51  ;;  %v18221_v4 = vadd.f32 %v18220_v30, %v25922_v29  ;;  %v18223_v31 = vpop.f32.mrb[43].mxu1 }
 0xaa9   : > { %v18735_v58 = vcombine.low %v18679_v25, %v18711_v26  ;;  %v18736_v32 = vcombine.high %v18679_v25, %v18711_v26  ;;  %v18737_v57 = vcombine.low %v18686_v23, %v18718_v62  ;;  %v18738_v16 = vcombine.high %v18686_v23, %v18718_v62 }
 0xaaa   : > { %v18739_v63 = vcombine.low %v18695_v44, %v18727_v61  ;;  %v18740_v34 = vcombine.high %v18695_v44, %v18727_v61  ;;  %v18741_v17 = vcombine.low %v18702_v56, %v18734_v40  ;;  %v18742_v55 = vcombine.high %v18702_v56, %v18734_v40 }
 0xaab   : > { %v29885_v20 = vadd.f32 %v18735_v58, %v29410_v36  ;;  %v29888_v43 = vadd.f32 %v18736_v32, %v29413_v3  ;;  %v29891_v53 = vadd.f32 %v18737_v57, %v29416_v59  ;;  %v29894_v45 = vadd.f32 %v18738_v16, %v29419_v38  ;;  %v18259_v21 = vpop.f32.mrb[28].mxu0 }
 0xaac   : > { %v29897_v25 = vadd.f32 %v18739_v63, %v29422_v15  ;;  %v29900_v54 = vadd.f32 %v18740_v34, %v29425_v10  ;;  %v29903_v28 = vadd.f32 %v18741_v17, %v29428_v41  ;;  %v29906_v36 = vadd.f32 %v18742_v55, %v29431_v50  ;;  %v18261_v3 = vpop.f32.mrb[29].mxu0 }
 0xaad   : > { %v18751_v59 = vrot.slane %v18743_v7, %v25351_v9  ;;  %v18758_v23 = vrot.slane %v18744_v27, %v25351_v9  ;;  %v18759_v38 = vcombine.low %v18180_v5, %v18221_v4  ;;  %v18760_v44 = vcombine.high %v18180_v5, %v18221_v4  ;;  %v18300_v56 = vpop.f32.mrb[44].mxu1  ;;  %v18263_v51 = vpop.f32.mrb[30].mxu0 }
 0xaae   : > { %v18260_v15 = vadd.f32 %v18259_v21, %v26930_v0  ;;  %v18301_v10 = vadd.f32 %v18300_v56, %v26934_v1  ;;  %v18262_v30 = vadd.f32 %v18261_v3, %v26936_v2  ;;  %v18302_v41 = vpop.f32.mrb[45].mxu1  ;;  %v18264_v37 = vpop.f32.mrb[31].mxu0 }
 0xaaf   : > { %v18767_v50 = vrot.slane %v18759_v38, %v25351_v9  ;;  %v18774_v26 = vrot.slane %v18760_v44, %v25351_v9  ;;  %v18303_v62 = vadd.f32 %v18302_v41, %v26941_v24  ;;  %v18304_v61 = vpop.f32.mrb[46].mxu1 }
 0xab0   : > { %v18775_v40 = vcombine.low %v18260_v15, %v18301_v10  ;;  %v18776_v52 = vcombine.high %v18260_v15, %v18301_v10  ;;  %v18305_v7 = vpop.f32.mrb[47].mxu1 }
 0xab1   : > { %v18807_v27 = vcombine.low %v18751_v59, %v18767_v50  ;;  %v18808_v5 = vcombine.high %v18751_v59, %v18767_v50  ;;  %v18823_v4 = vcombine.low %v18758_v23, %v18774_v26  ;;  %v18824_v31 = vcombine.high %v18758_v23, %v18774_v26 }
 0xab2   : > { %v18783_v58 = vrot.slane %v18775_v40, %v25351_v9  ;;  %v18790_v32 = vrot.slane %v18776_v52, %v25351_v9  ;;  %v18791_v57 = vcombine.low %v18262_v30, %v18303_v62  ;;  %v18792_v16 = vcombine.high %v18262_v30, %v18303_v62 }
 0xab3   : > { %v18341_v63 = vpop.f32.mrb[32].mxu0  ;;  %v18815_v21 = vrot.slane %v18807_v27, %v25368_v49  ;;  %v18822_v3 = vrot.slane %v18808_v5, %v25368_v49  ;;  %v18831_v37 = vrot.slane %v18823_v4, %v25368_v49  ;;  %v18838_v50 = vrot.slane %v18824_v31, %v25368_v49 }
 0xab4   : > { %v18799_v34 = vrot.slane %v18791_v57, %v25351_v9  ;;  %v18806_v17 = vrot.slane %v18792_v16, %v25351_v9  ;;  %v18343_v55 = vpop.f32.mrb[33].mxu0  ;;  %v18342_v59 = vadd.f32 %v18341_v63, %v31377_v22 }
 0xab5   : > { %v18382_v38 = vpop.f32.mrb[48].mxu1  ;;  %v18344_v23 = vadd.f32 %v18343_v55, %v25920_v12  ;;  %v18345_v44 = vpop.f32.mrb[34].mxu0 }
 0xab6   : > { %v18839_v56 = vcombine.low %v18783_v58, %v18799_v34  ;;  %v18840_v51 = vcombine.high %v18783_v58, %v18799_v34  ;;  %v18855_v15 = vcombine.low %v18790_v32, %v18806_v17  ;;  %v18856_v10 = vcombine.high %v18790_v32, %v18806_v17  ;;  %v18384_v30 = vpop.f32.mrb[49].mxu1  ;;  %v18346_v41 = vpop.f32.mrb[35].mxu0 }
 0xab7   : > { %v18383_v26 = vadd.f32 %v18382_v38, %v25918_v13  ;;  %v18385_v62 = vadd.f32 %v18384_v30, %v25922_v29  ;;  %v18386_v61 = vpop.f32.mrb[50].mxu1  ;;  %v31593_v41 = vld [vmem:[#allocation12_spill] sm:$0xff] }
 0xab8   : > { %v18847_v40 = vrot.slane %v18839_v56, %v25368_v49  ;;  %v18854_v52 = vrot.slane %v18840_v51, %v25368_v49  ;;  %v18863_v7 = vrot.slane %v18855_v15, %v25368_v49  ;;  %v18870_v27 = vrot.slane %v18856_v10, %v25368_v49  ;;  %v18387_v5 = vpop.f32.mrb[51].mxu1  ;;  %v31589_v10 = vld [vmem:[#allocation45_spill] sm:$0xff] }
 0xab9   : > { %v18879_v58 = vcombine.low %v18342_v59, %v18383_v26  ;;  %v18880_v32 = vcombine.high %v18342_v59, %v18383_v26  ;;  %v18895_v57 = vcombine.low %v18344_v23, %v18385_v62  ;;  %v18896_v4 = vcombine.high %v18344_v23, %v18385_v62  ;;  %v31591_v59 = vld [vmem:[#allocation11_spill] sm:$0xff] }
 0xaba   : > { %v18871_v16 = vcombine.low %v18815_v21, %v18847_v40  ;;  %v18872_v31 = vcombine.high %v18815_v21, %v18847_v40  ;;  %v18873_v63 = vcombine.low %v18822_v3, %v18854_v52  ;;  %v18874_v34 = vcombine.high %v18822_v3, %v18854_v52 }
 0xabb   : > { %v18875_v17 = vcombine.low %v18831_v37, %v18863_v7  ;;  %v18876_v55 = vcombine.high %v18831_v37, %v18863_v7  ;;  %v18877_v38 = vcombine.low %v18838_v50, %v18870_v27  ;;  %v18878_v44 = vcombine.high %v18838_v50, %v18870_v27  ;;  %v18423_v56 = vpop.f32.mrb[36].mxu0  ;;  %v31595_v37 = vld [vmem:[#allocation9_spill] sm:$0xff]  ;;  %v31597_v50 = vld [vmem:[#allocation15_spill] sm:$0xff] }
 0xabc   : > { %v29933_v51 = vadd.f32 %v18871_v16, %v29458_v48  ;;  %v29936_v15 = vadd.f32 %v18872_v31, %v29461_v6  ;;  %v29939_v30 = vadd.f32 %v18873_v63, %v31589_v10  ;;  %v29942_v23 = vadd.f32 %v18874_v34, %v31591_v59  ;;  %v18425_v21 = vpop.f32.mrb[37].mxu0  ;;  %v31599_v48 = vld [vmem:[#allocation10_spill] sm:$0xff] }
 0xabd   : > { %v29945_v3 = vadd.f32 %v18875_v17, %v31593_v41  ;;  %v29948_v26 = vadd.f32 %v18876_v55, %v31595_v37  ;;  %v29951_v62 = vadd.f32 %v18877_v38, %v31597_v50  ;;  %v29954_v61 = vadd.f32 %v18878_v44, %v31599_v48  ;;  %v18464_v6 = vpop.f32.mrb[52].mxu1  ;;  %v18427_v40 = vpop.f32.mrb[38].mxu0 }
 0xabe   : > { %31590 = vst [vmem:[#allocation30_spill] sm:$0xff] %v29939_v30  ;;  %31592 = vst [vmem:[#allocation37_spill] sm:$0xff] %v29942_v23  ;;  %v18887_v52 = vrot.slane %v18879_v58, %v25351_v9  ;;  %v18894_v7 = vrot.slane %v18880_v32, %v25351_v9  ;;  %v18903_v27 = vrot.slane %v18895_v57, %v25351_v9  ;;  %v18466_v16 = vpop.f32.mrb[53].mxu1  ;;  %v18428_v31 = vpop.f32.mrb[39].mxu0 }
 0xabf   : > { %31594 = vst [vmem:[#allocation25_spill] sm:$0xff] %v29945_v3  ;;  %31596 = vst [vmem:[#allocation38_spill] sm:$0xff] %v29948_v26  ;;  %v18910_v5 = vrot.slane %v18896_v4, %v25351_v9  ;;  %v18424_v63 = vadd.f32 %v18423_v56, %v26930_v0  ;;  %v18465_v34 = vadd.f32 %v18464_v6, %v26934_v1  ;;  %v18468_v38 = vpop.f32.mrb[54].mxu1 }
 0xac0   : > { %31598 = vst [vmem:[#allocation39_spill] sm:$0xff] %v29951_v62  ;;  %31600 = vst [vmem:[#allocation43_spill] sm:$0xff] %v29954_v61  ;;  %v18426_v17 = vadd.f32 %v18425_v21, %v26936_v2  ;;  %v18467_v55 = vadd.f32 %v18466_v16, %v26941_v24  ;;  %v18943_v44 = vcombine.low %v18887_v52, %v18903_v27  ;;  %v18469_v32 = vpop.f32.mrb[55].mxu1 }
 0xac1   : > { %v18944_v10 = vcombine.high %v18887_v52, %v18903_v27  ;;  %v18959_v58 = vcombine.low %v18894_v7, %v18910_v5  ;;  %v18960_v59 = vcombine.high %v18894_v7, %v18910_v5  ;;  %v18911_v41 = vcombine.low %v18424_v63, %v18465_v34 }
 0xac2   : > { %v18912_v57 = vcombine.high %v18424_v63, %v18465_v34  ;;  %v18927_v37 = vcombine.low %v18426_v17, %v18467_v55  ;;  %v18928_v4 = vcombine.high %v18426_v17, %v18467_v55  ;;  %v18951_v40 = vrot.slane %v18943_v44, %v25368_v49 }
 0xac3   : > { %v18919_v50 = vrot.slane %v18911_v41, %v25351_v9  ;;  %v19081_v6 = vpop.f32.mrb[40].mxu0  ;;  %v18958_v52 = vrot.slane %v18944_v10, %v25368_v49  ;;  %v18967_v7 = vrot.slane %v18959_v58, %v25368_v49  ;;  %v18974_v38 = vrot.slane %v18960_v59, %v25368_v49 }
 0xac4   : > { %v18926_v56 = vrot.slane %v18912_v57, %v25351_v9  ;;  %v18935_v48 = vrot.slane %v18927_v37, %v25351_v9  ;;  %v18942_v21 = vrot.slane %v18928_v4, %v25351_v9  ;;  %v19082_v27 = vadd.f32 %v19081_v6, %v31377_v22  ;;  %v19083_v5 = vpop.f32.mrb[41].mxu0 }
 0xac5   : > { %v19134_v17 = vpop.f32.mrb[56].mxu1  ;;  %v19085_v55 = vpop.f32.mrb[42].mxu0  ;;  %v19084_v41 = vadd.f32 %v19083_v5, %v25920_v12 }
 0xac6   : > { %v18975_v16 = vcombine.low %v18919_v50, %v18935_v48  ;;  %v18976_v31 = vcombine.high %v18919_v50, %v18935_v48  ;;  %v18991_v63 = vcombine.low %v18926_v56, %v18942_v21  ;;  %v18992_v34 = vcombine.high %v18926_v56, %v18942_v21  ;;  %v19136_v44 = vpop.f32.mrb[57].mxu1  ;;  %v19087_v57 = vpop.f32.mrb[43].mxu0 }
 0xac7   : > { %v19135_v32 = vadd.f32 %v19134_v17, %v25918_v13  ;;  %v19086_v10 = vadd.f32 %v19085_v55, %v31377_v22  ;;  %v19138_v56 = vpop.f32.mrb[58].mxu1  ;;  %v19137_v59 = vadd.f32 %v19136_v44, %v25922_v29  ;;  %v31605_v44 = vld [vmem:[#allocation14_spill] sm:$0xff] }
 0xac8   : > { %v18983_v58 = vrot.slane %v18975_v16, %v25368_v49  ;;  %v18990_v37 = vrot.slane %v18976_v31, %v25368_v49  ;;  %v18999_v4 = vrot.slane %v18991_v63, %v25368_v49  ;;  %v19006_v50 = vrot.slane %v18992_v34, %v25368_v49  ;;  %v19140_v5 = vpop.f32.mrb[59].mxu1  ;;  %v31601_v34 = vld [vmem:[#allocation16_spill] sm:$0xff] }
 0xac9   : > { %v19153_v48 = vcombine.low %v19082_v27, %v19135_v32  ;;  %v19154_v21 = vcombine.high %v19082_v27, %v19135_v32  ;;  %v19139_v6 = vadd.f32 %v19138_v56, %v25918_v13  ;;  %v31603_v27 = vld [vmem:[#allocation13_spill] sm:$0xff] }
 0xaca   : > { %v19007_v17 = vcombine.low %v18951_v40, %v18983_v58  ;;  %v19008_v61 = vcombine.high %v18951_v40, %v18983_v58  ;;  %v19009_v55 = vcombine.low %v18958_v52, %v18990_v37  ;;  %v19010_v62 = vcombine.high %v18958_v52, %v18990_v37  ;;  %v31607_v40 = vld [vmem:[#allocation42_spill] sm:$0xff] }
 0xacb   : > { %v19011_v26 = vcombine.low %v18967_v7, %v18999_v4  ;;  %v19012_v16 = vcombine.high %v18967_v7, %v18999_v4  ;;  %v19013_v3 = vcombine.low %v18974_v38, %v19006_v50  ;;  %v19014_v31 = vcombine.high %v18974_v38, %v19006_v50  ;;  %v19091_v30 = vpop.f32.mrb[44].mxu0  ;;  %v31609_v52 = vld [vmem:[#allocation46_spill] sm:$0xff]  ;;  %v31611_v38 = vld [vmem:[#allocation29_spill] sm:$0xff] }
 0xacc   : > { %v29983_v63 = vadd.f32 %v19007_v17, %v29508_v18  ;;  %v29986_v23 = vadd.f32 %v19008_v61, %v31601_v34  ;;  %v29989_v32 = vadd.f32 %v19009_v55, %v31603_v27  ;;  %v29992_v56 = vadd.f32 %v19010_v62, %v31605_v44  ;;  %v31613_v18 = vld [vmem:[#allocation36_spill] sm:$0xff]  ;;  %v30006_v61 = vpop.f32.mrb[45].mxu0 }
 0xacd   : > { %v29995_v58 = vadd.f32 %v19011_v26, %v31607_v40  ;;  %v29998_v7 = vadd.f32 %v19012_v16, %v31609_v52  ;;  %v30001_v37 = vadd.f32 %v19013_v3, %v31611_v38  ;;  %v30004_v4 = vadd.f32 %v19014_v31, %v31613_v18  ;;  %v19144_v34 = vpop.f32.mrb[60].mxu1  ;;  %v30010_v26 = vpop.f32.mrb[46].mxu0 }
 0xace   : > { %31602 = vst [vmem:[#allocation40_spill] sm:$0xff] %v29986_v23  ;;  %31604 = vst [vmem:[#allocation44_spill] sm:$0xff] %v29989_v32  ;;  %v19161_v50 = vrot.slane %v19153_v48, %v25351_v9  ;;  %v19168_v62 = vrot.slane %v19154_v21, %v25351_v9  ;;  %v19169_v17 = vcombine.low %v19084_v41, %v19137_v59  ;;  %v19146_v40 = vpop.f32.mrb[61].mxu1  ;;  %v30014_v31 = vpop.f32.mrb[47].mxu0 }
 0xacf   : > { %31606 = vst [vmem:[#allocation41_spill] sm:$0xff] %v29992_v56  ;;  %31608 = vst [vmem:[#allocation19_spill] sm:$0xff] %v29995_v58  ;;  %v19170_v55 = vcombine.high %v19084_v41, %v19137_v59  ;;  %v19221_v27 = vcombine.low %v19086_v10, %v19139_v6  ;;  %v19222_v16 = vcombine.high %v19086_v10, %v19139_v6  ;;  %v19148_v59 = vpop.f32.mrb[62].mxu1 }
 0xad0   : > { %31610 = vst [vmem:[#allocation20_spill] sm:$0xff] %v29998_v7  ;;  %31612 = vst [vmem:[#allocation17_spill] sm:$0xff] %v30001_v37  ;;  %v19088_v44 = vadd.f32 %v19087_v57, %v25920_v12  ;;  %v19141_v3 = vadd.f32 %v19140_v5, %v25922_v29  ;;  %v19177_v52 = vrot.slane %v19169_v17, %v25351_v9  ;;  %v19150_v18 = vpop.f32.mrb[63].mxu1 }
 0xad1   : > { %31614 = vst [vmem:[#allocation23_spill] sm:$0xff] %v30004_v4  ;;  %v19184_v48 = vrot.slane %v19170_v55, %v25351_v9  ;;  %v19092_v21 = vadd.f32 %v19091_v30, %v31377_v22  ;;  %v19145_v41 = vadd.f32 %v19144_v34, %v25918_v13  ;;  %v19229_v38 = vrot.slane %v19221_v27, %v25351_v9 }
 0xad2   : > { %v19236_v10 = vrot.slane %v19222_v16, %v25351_v9  ;;  %v19237_v6 = vcombine.low %v19088_v44, %v19141_v3  ;;  %v19238_v57 = vcombine.high %v19088_v44, %v19141_v3  ;;  %v19185_v5 = vcombine.low %v19161_v50, %v19177_v52 }
 0xad3   : > { %v19186_v4 = vcombine.high %v19161_v50, %v19177_v52  ;;  %v19201_v37 = vcombine.low %v19168_v62, %v19184_v48  ;;  %v19202_v7 = vcombine.high %v19168_v62, %v19184_v48  ;;  %v19289_v58 = vcombine.low %v19092_v21, %v19145_v41 }
 0xad4   : > { %v19245_v17 = vrot.slane %v19237_v6, %v25351_v9  ;;  %v19252_v55 = vrot.slane %v19238_v57, %v25351_v9  ;;  %v19290_v30 = vcombine.high %v19092_v21, %v19145_v41  ;;  %v19193_v34 = vrot.slane %v19185_v5, %v25368_v49 }
 0xad5   : > { %v19200_v56 = vrot.slane %v19186_v4, %v25368_v49  ;;  %v19209_v27 = vrot.slane %v19201_v37, %v25368_v49  ;;  %v19216_v16 = vrot.slane %v19202_v7, %v25368_v49 }
 0xad6   : > { %v19253_v44 = vcombine.low %v19229_v38, %v19245_v17  ;;  %v19254_v3 = vcombine.high %v19229_v38, %v19245_v17  ;;  %v19269_v32 = vcombine.low %v19236_v10, %v19252_v55  ;;  %v19270_v50 = vcombine.high %v19236_v10, %v19252_v55 }
 0xad7   : > { %v19217_v62 = vcombine.high %v19193_v34, %v31348_v19  ;;  %v19218_v52 = vcombine.high %v19200_v56, %v31348_v19  ;;  %v19219_v48 = vcombine.high %v19209_v27, %v31348_v19  ;;  %v19220_v21 = vcombine.high %v19216_v16, %v31348_v19 }
 0xad8   : > { %v24613_v41 = vpack.c.bf16 %v19209_v27, %v19193_v34  ;;  %v24614_v6 = vpack.c.bf16 %v19216_v16, %v19200_v56  ;;  %v19261_v4 = vrot.slane %v19253_v44, %v25368_v49  ;;  %v19268_v37 = vrot.slane %v19254_v3, %v25368_v49 }
 0xad9   : > { %v24617_v57 = vpack.c.bf16 %v19219_v48, %v19217_v62  ;;  %v24618_v7 = vpack.c.bf16 %v19220_v21, %v19218_v52  ;;  %v19277_v38 = vrot.slane %v19269_v32, %v25368_v49  ;;  %v19284_v10 = vrot.slane %v19270_v50, %v25368_v49 }
 0xada   : > { %v19466_v5 = vrot.slane %v24613_v41, %v25351_v9  ;;  %v19474_v17 = vrot.slane %v24614_v6, %v25351_v9  ;;  %v19285_v55 = vcombine.high %v19261_v4, %v31348_v19  ;;  %v19286_v23 = vcombine.high %v19268_v37, %v31348_v19 }
 0xadb   : > { %v19516_v56 = vrot.slane %v24617_v57, %v25351_v9  ;;  %v19524_v34 = vrot.slane %v24618_v7, %v25351_v9  ;;  %v19287_v27 = vcombine.high %v19277_v38, %v31348_v19  ;;  %v19288_v16 = vcombine.high %v19284_v10, %v31348_v19 }
 0xadc   : > { %v19491_v44 = vcombine.low %v19466_v5, %v19474_v17  ;;  %v24615_v32 = vpack.c.bf16 %v19277_v38, %v19261_v4  ;;  %v24616_v3 = vpack.c.bf16 %v19284_v10, %v19268_v37  ;;  %v19297_v48 = vrot.slane %v19289_v58, %v25351_v9 }
 0xadd   : > { %v19541_v50 = vcombine.low %v19516_v56, %v19524_v34  ;;  %v24619_v62 = vpack.c.bf16 %v19287_v27, %v19285_v55  ;;  %v24620_v52 = vpack.c.bf16 %v19288_v16, %v19286_v23  ;;  %v19304_v6 = vrot.slane %v19290_v30, %v25351_v9 }
 0xade   : > { %v19482_v21 = vrot.slane %v24615_v32, %v25351_v9  ;;  %v19490_v41 = vrot.slane %v24616_v3, %v25351_v9  ;;  %v19094_v57 = vadd.f32 %v30006_v61, %v25920_v12  ;;  %v19498_v7 = vrot.slane %v19491_v44, %v25368_v49 }
 0xadf   : > { %v19532_v5 = vrot.slane %v24619_v62, %v25351_v9  ;;  %v19540_v4 = vrot.slane %v24620_v52, %v25351_v9  ;;  %v19147_v37 = vadd.f32 %v19146_v40, %v25922_v29  ;;  %v19096_v58 = vadd.f32 %v30010_v26, %v31377_v22 }
 0xae0   : > { %v19499_v23 = vcombine.low %v19482_v21, %v19490_v41  ;;  %v19149_v38 = vadd.f32 %v19148_v59, %v25918_v13  ;;  %v19098_v30 = vadd.f32 %v30014_v31, %v25920_v12  ;;  %v19151_v55 = vadd.f32 %v19150_v18, %v25922_v29 }
 0xae1   : > { %v19549_v10 = vcombine.low %v19532_v5, %v19540_v4  ;;  %v19305_v17 = vcombine.low %v19094_v57, %v19147_v37  ;;  %v19306_v61 = vcombine.high %v19094_v57, %v19147_v37  ;;  %v19548_v56 = vrot.slane %v19541_v50, %v25368_v49 }
 0xae2   : > { %v19506_v34 = vrot.slane %v19499_v23, %v25368_v49  ;;  %v19357_v27 = vcombine.low %v19096_v58, %v19149_v38  ;;  %v19358_v40 = vcombine.high %v19096_v58, %v19149_v38  ;;  %v19373_v44 = vcombine.low %v19098_v30, %v19151_v55 }
 0xae3   : > { %v19556_v16 = vrot.slane %v19549_v10, %v25368_v49  ;;  %v19313_v26 = vrot.slane %v19305_v17, %v25351_v9  ;;  %v19320_v59 = vrot.slane %v19306_v61, %v25351_v9  ;;  %v19374_v41 = vcombine.high %v19098_v30, %v19151_v55 }
 0xae4   : > { %v19507_v32 = vcombine.low %v19498_v7, %v19506_v34  ;;  %v30065_v31 = vcombine.high %v19498_v7, %v19506_v34  ;;  %v19365_v3 = vrot.slane %v19357_v27, %v25351_v9  ;;  %v19372_v18 = vrot.slane %v19358_v40, %v25351_v9 }
 0xae5   : > { %v19321_v62 = vcombine.low %v19297_v48, %v19313_v26  ;;  %v19322_v50 = vcombine.high %v19297_v48, %v19313_v26  ;;  %v19337_v52 = vcombine.low %v19304_v6, %v19320_v59  ;;  %v19338_v21 = vcombine.high %v19304_v6, %v19320_v59 }
 0xae6   : > { %v19381_v57 = vrot.slane %v19373_v44, %v25351_v9  ;;  %v19557_v5 = vcombine.low %v19548_v56, %v19556_v16  ;;  %v19558_v4 = vcombine.high %v19548_v56, %v19556_v16  ;;  %v19388_v38 = vrot.slane %v19374_v41, %v25351_v9 }
 0xae7   : > { %v19329_v37 = vrot.slane %v19321_v62, %v25368_v49  ;;  %v19336_v23 = vrot.slane %v19322_v50, %v25368_v49  ;;  %v19345_v7 = vrot.slane %v19337_v52, %v25368_v49  ;;  %v19352_v58 = vrot.slane %v19338_v21, %v25368_v49 }
 0xae8   : > { %v19389_v10 = vcombine.low %v19365_v3, %v19381_v57  ;;  %v19390_v17 = vcombine.high %v19365_v3, %v19381_v57  ;;  %v19661_v48 = vpack.i.b16 %v19557_v5, %v19507_v32  ;;  %v19405_v59 = vcombine.low %v19372_v18, %v19388_v38 }
 0xae9   : > { %v19353_v6 = vcombine.high %v19329_v37, %v31348_v19  ;;  %v19354_v30 = vcombine.high %v19336_v23, %v31348_v19  ;;  %v19355_v61 = vcombine.high %v19345_v7, %v31348_v19  ;;  %v19356_v55 = vcombine.high %v19352_v58, %v31348_v19 }
 0xaea   : > { %v24621_v56 = vpack.c.bf16 %v19345_v7, %v19329_v37  ;;  %v24622_v34 = vpack.c.bf16 %v19352_v58, %v19336_v23  ;;  %v19397_v27 = vrot.slane %v19389_v10, %v25368_v49  ;;  %v19404_v40 = vrot.slane %v19390_v17, %v25368_v49 }
 0xaeb   : > { %v24625_v16 = vpack.c.bf16 %v19355_v61, %v19353_v6  ;;  %v24626_v26 = vpack.c.bf16 %v19356_v55, %v19354_v30  ;;  %v19406_v44 = vcombine.high %v19372_v18, %v19388_v38  ;;  %v19413_v57 = vrot.slane %v19405_v59, %v25368_v49 }
 0xaec   : > { %v19566_v3 = vrot.slane %v24621_v56, %v25351_v9  ;;  %v19574_v62 = vrot.slane %v24622_v34, %v25351_v9  ;;  %v19421_v50 = vcombine.high %v19397_v27, %v31348_v19  ;;  %v19422_v52 = vcombine.high %v19404_v40, %v31348_v19 }
 0xaed   : > { %v19616_v21 = vrot.slane %v24625_v16, %v25351_v9  ;;  %v19624_v41 = vrot.slane %v24626_v26, %v25351_v9  ;;  %v19420_v37 = vrot.slane %v19406_v44, %v25368_v49  ;;  %v19662_v7 = vshrl.u32 %v19507_v32, 16 }
 0xaee   : > { %v19591_v23 = vcombine.low %v19566_v3, %v19574_v62  ;;  %v19663_v58 = vshrl.u32 %v19557_v5, 16  ;;  %v19667_v18 = vpack.i.b16 %v19558_v4, %v30065_v31  ;;  %v19423_v10 = vcombine.high %v19413_v57, %v31348_v19 }
 0xaef   : > { %v19641_v38 = vcombine.low %v19616_v21, %v19624_v41  ;;  %v19424_v17 = vcombine.high %v19420_v37, %v31348_v19  ;;  %v24623_v6 = vpack.c.bf16 %v19413_v57, %v19397_v27  ;;  %v24624_v30 = vpack.c.bf16 %v19420_v37, %v19404_v40 }
 0xaf0   : > { %v19664_v61 = vpack.i.b16 %v19663_v58, %v19662_v7  ;;  %v24627_v56 = vpack.c.bf16 %v19423_v10, %v19421_v50  ;;  %v19668_v16 = vshrl.u32 %v30065_v31, 16  ;;  %v19669_v32 = vshrl.u32 %v19558_v4, 16 }
 0xaf1   : > { %v19582_v55 = vrot.slane %v24623_v6, %v25351_v9  ;;  %v24628_v34 = vpack.c.bf16 %v19424_v17, %v19422_v52  ;;  %v19590_v26 = vrot.slane %v24624_v30, %v25351_v9  ;;  %v19687_v5 = vshrl.u32 %v19661_v48, 16 }
 0xaf2   : > { %v19688_v59 = vshrl.u32 %v19664_v61, 16  ;;  %v19632_v44 = vrot.slane %v24627_v56, %v25351_v9  ;;  %v19685_v62 = vpack.i.b16 %v19664_v61, %v19661_v48  ;;  %v19598_v27 = vrot.slane %v19591_v23, %v25368_v49 }
 0xaf3   : > { %v19640_v3 = vrot.slane %v24628_v34, %v25351_v9  ;;  %v19599_v40 = vcombine.low %v19582_v55, %v19590_v26  ;;  %v19670_v21 = vpack.i.b16 %v19669_v32, %v19668_v16  ;;  %v19648_v50 = vrot.slane %v19641_v38, %v25368_v49 }
 0xaf4   : > { %v19689_v41 = vpack.i.b16 %v19688_v59, %v19687_v5  ;;  %v19695_v57 = vshrl.u32 %v19667_v18, 16  ;;  %v19715_v31 = vcombine.high %v19685_v62, %v25348_v8  ;;  %v19722_v58 = vrot.slane %v19685_v62, %v25351_v9 }
 0xaf5   : > { %v19649_v52 = vcombine.low %v19632_v44, %v19640_v3  ;;  %v19606_v4 = vrot.slane %v19599_v40, %v25368_v49  ;;  %v19696_v37 = vshrl.u32 %v19670_v21, 16  ;;  %v19693_v7 = vpack.i.b16 %v19670_v21, %v19667_v18 }
 0xaf6   : > { %v19788_v48 = vrot.slane %v19689_v41, %v25351_v9  ;;  %v19781_v23 = vcombine.high %v19689_v41, %v25348_v8  ;;  %v30106_v17 = vrot.slane %v19715_v31, %v25351_v9 }
 0xaf7   : > { %v19656_v10 = vrot.slane %v19649_v52, %v25368_v49  ;;  %v19607_v38 = vcombine.low %v19598_v27, %v19606_v4  ;;  %v19608_v6 = vcombine.high %v19598_v27, %v19606_v4  ;;  %v19697_v30 = vpack.i.b16 %v19696_v37, %v19695_v57 }
 0xaf8   : > { %v19737_v61 = vrot.slane %v19693_v7, %v25351_v9  ;;  %v30110_v55 = vrot.slane %v19781_v23, %v25351_v9  ;;  %v19730_v18 = vcombine.high %v19693_v7, %v25348_v8 }
 0xaf9   : > { %v19657_v56 = vcombine.low %v19648_v50, %v19656_v10  ;;  %v19658_v34 = vcombine.high %v19648_v50, %v19656_v10  ;;  %v19803_v16 = vrot.slane %v19697_v30, %v25351_v9  ;;  %v19796_v5 = vcombine.high %v19697_v30, %v25348_v8  ;;  %v30137_v30 = vld [vmem:[%s31218_s3 + $0x1c] sm:$0xf] }
 0xafa   : > { %v19745_v26 = vcombine.low %v19722_v58, %v19737_v61  ;;  %v19746_v32 = vcombine.high %v19722_v58, %v19737_v61  ;;  %v30116_v59 = vrot.slane %v19730_v18, %v25351_v9  ;;  %v19674_v3 = vshrl.u32 %v19607_v38, 16 }
 0xafb   : > { %v19673_v44 = vpack.i.b16 %v19657_v56, %v19607_v38  ;;  %v19675_v62 = vshrl.u32 %v19657_v56, 16  ;;  %v19811_v27 = vcombine.low %v19788_v48, %v19803_v16  ;;  %v19812_v21 = vcombine.high %v19788_v48, %v19803_v16 }
 0xafc   : > { %v19753_v40 = vrot.slane %v19745_v26, %v25368_v49  ;;  %v19760_v41 = vrot.slane %v19746_v32, %v25368_v49  ;;  %v19810_v50 = vrot.slane %v19796_v5, %v25351_v9  ;;  %v19761_v52 = vcombine.low %v30106_v17, %v30116_v59 }
 0xafd   : > { %v19762_v57 = vcombine.high %v30106_v17, %v30116_v59  ;;  %v19676_v31 = vpack.i.b16 %v19675_v62, %v19674_v3  ;;  %v19819_v4 = vrot.slane %v19811_v27, %v25368_v49  ;;  %v19826_v7 = vrot.slane %v19812_v21, %v25368_v49 }
 0xafe   : > { %v19777_v37 = vcombine.high %v19753_v40, %v31328_v33  ;;  %v19827_v58 = vcombine.low %v30110_v55, %v19810_v50  ;;  %v19983_v10 = vsel %vm3502_vm2, %v19753_v40, 0  ;;  %v19828_v23 = vcombine.high %v30110_v55, %v19810_v50 }
 0xaff   : > { %24629 = vmatprep.subr.msk.bf16.mxu0 %vm3502_vm2, %v19819_v4  ;;  %v19843_v48 = vcombine.high %v19819_v4, %v31328_v33  ;;  %v19778_v61 = vcombine.high %v19760_v41, %v31328_v33  ;;  %v19844_v18 = vcombine.high %v19826_v7, %v31328_v33  ;;  %v19679_v16 = vpack.i.b16 %v19658_v34, %v19608_v6 }
 0xb00   : > { %20079 = vmatpush1.bf16.msra.mxu0 %v19983_v10  ;;  %v19989_v38 = vsel %vm3502_vm2, %v19777_v37, 0  ;;  %v19835_v56 = vrot.slane %v19827_v58, %v25368_v49  ;;  %v19680_v55 = vshrl.u32 %v19608_v6, 16  ;;  %v19681_v26 = vshrl.u32 %v19658_v34, 16 }
 0xb01   : > { %24631 = vmatprep.subr.msk.bf16.mxu1 %vm3502_vm2, %v19843_v48  ;;  %24633 = vmatprep.subr.msk.bf16.mxu0 %vm3502_vm2, %v19826_v7  ;;  %v19703_v32 = vshrl.u32 %v19673_v44, 16  ;;  %v19995_v5 = vsel %vm3502_vm2, %v19760_v41, 0  ;;  %v19704_v3 = vshrl.u32 %v19676_v31, 16  ;;  %v19711_v27 = vshrl.u32 %v19679_v16, 16 }
 0xb02   : > { %20120 = vmatpush1.bf16.msra.mxu1 %v19989_v38  ;;  %v19682_v62 = vpack.i.b16 %v19681_v26, %v19680_v55  ;;  %v19701_v40 = vpack.i.b16 %v19676_v31, %v19673_v44  ;;  %v20001_v6 = vsel %vm3502_vm2, %v19778_v61, 0  ;;  %v19845_v34 = vcombine.high %v19835_v56, %v31328_v33 }
 0xb03   : > { %24630 = vmatmul.mubr.msk.bf16.vlgmr.msra.gmra.mrb[48].mxu0 %vm3498_vm3, %v30137_v30  ;;  %24635 = vmatprep.subr.msk.bf16.mxu1 %vm3502_vm2, %v19844_v18  ;;  %v19769_v21 = vrot.slane %v19761_v52, %v25368_v49  ;;  %v19705_v41 = vpack.i.b16 %v19704_v3, %v19703_v32  ;;  %v19842_v48 = vrot.slane %v19828_v23, %v25368_v49 }
 0xb04   : > { %20161 = vmatpush1.bf16.msra.mxu0 %v19995_v5  ;;  %20192 = vmatprep.mubr.bf16.mxu0 %v31328_v33  ;;  %v19712_v50 = vshrl.u32 %v19682_v62, 16  ;;  %v19709_v4 = vpack.i.b16 %v19682_v62, %v19679_v16  ;;  %v19854_v37 = vrot.slane %v19701_v40, %v25351_v9  ;;  %v19847_v44 = vcombine.high %v19701_v40, %v25348_v8 }
 0xb05   : > { %24632 = vmatmul.mubr.msk.bf16.vlgmr.msra.gmra.mrb[64].mxu1 %vm3498_vm3, %v30137_v30  ;;  %24637 = vmatprep.subr.msk.bf16.mxu0 %vm3502_vm2, %v19835_v56  ;;  %v19913_v31 = vcombine.high %v19705_v41, %v25348_v8  ;;  %v19920_v58 = vrot.slane %v19705_v41, %v25351_v9  ;;  %v19779_v38 = vcombine.high %v19769_v21, %v31328_v33  ;;  %v20007_v26 = vsel %vm3502_vm2, %v19769_v21, 0 }
 0xb06   : > { %20202 = vmatpush1.bf16.msra.mxu1 %v20001_v6  ;;  %20233 = vmatprep.mubr.bf16.mxu1 %v31328_v33  ;;  %v19713_v7 = vpack.i.b16 %v19712_v50, %v19711_v27  ;;  %v19869_v10 = vrot.slane %v19709_v4, %v25351_v9  ;;  %v19862_v52 = vcombine.high %v19709_v4, %v25348_v8 }
 0xb07   : > { %24639 = vmatprep.subr.msk.bf16.mxu1 %vm3502_vm2, %v19845_v34  ;;  %v30166_v61 = vrot.slane %v19847_v44, %v25351_v9  ;;  %v19927_v32 = vrot.slane %v19913_v31, %v25351_v9  ;;  %v19776_v5 = vrot.slane %v19762_v57, %v25368_v49  ;;  %v20013_v27 = vsel %vm3502_vm2, %v19779_v38, 0 }
 0xb08   : > { %v19935_v18 = vrot.slane %v19713_v7, %v25351_v9  ;;  %v19877_v56 = vcombine.low %v19854_v37, %v19869_v10  ;;  %v19878_v16 = vcombine.high %v19854_v37, %v19869_v10  ;;  %v19928_v55 = vcombine.high %v19713_v7, %v25348_v8 }
 0xb09   : > { %v30175_v23 = vrot.slane %v19862_v52, %v25351_v9  ;;  %v19846_v40 = vcombine.high %v19842_v48, %v31328_v33  ;;  %v19780_v21 = vcombine.high %v19776_v5, %v31328_v33  ;;  %v20019_v50 = vsel %vm3502_vm2, %v19776_v5, 0 }
 0xb0a   : > { %v19943_v3 = vcombine.low %v19920_v58, %v19935_v18  ;;  %v19944_v62 = vcombine.high %v19920_v58, %v19935_v18  ;;  %v19942_v6 = vrot.slane %v19928_v55, %v25351_v9  ;;  %v19885_v44 = vrot.slane %v19877_v56, %v25368_v49 }
 0xb0b   : > { %24634 = vmatmul.mubr.msk.bf16.vlgmr.msra.gmra.mrb[52].mxu0 %vm3498_vm3, %v30137_v30  ;;  %v19893_v34 = vcombine.low %v30166_v61, %v30175_v23  ;;  %v19894_v41 = vcombine.high %v30166_v61, %v30175_v23  ;;  %v20025_v37 = vsel %vm3502_vm2, %v19780_v21, 0  ;;  %v19892_v52 = vrot.slane %v19878_v16, %v25368_v49  ;;  %v31619_v21 = vld [vmem:[#allocation31_spill] sm:$0xff] }
 0xb0c   : > { %20243 = vmatpush1.bf16.msra.mxu0 %v20007_v26  ;;  %20274 = vmatprep.mubr.bf16.mxu0 %v31328_v33  ;;  %v19951_v17 = vrot.slane %v19943_v3, %v25368_v49  ;;  %v19959_v59 = vcombine.low %v19927_v32, %v19942_v6  ;;  %v19960_v57 = vcombine.high %v19927_v32, %v19942_v6  ;;  %v20031_v58 = vsel %vm3502_vm2, %v19885_v44, 0  ;;  %v31615_v6 = vld [vmem:[#allocation32_spill] sm:$0xff] }
 0xb0d   : > { %24641 = vmatprep.subr.msk.bf16.mxu0 %vm3502_vm2, %v19842_v48  ;;  %24636 = vmatmul.mubr.msk.bf16.vlgmr.msra.gmra.mrb[68].mxu1 %vm3498_vm3, %v30137_v30  ;;  %v19909_v31 = vcombine.high %v19885_v44, %v31328_v33  ;;  %v19958_v7 = vrot.slane %v19944_v62, %v25368_v49  ;;  %v19910_v38 = vcombine.high %v19892_v52, %v31328_v33  ;;  %v20043_v18 = vsel %vm3502_vm2, %v19892_v52, 0 }
 0xb0e   : > { %20284 = vmatpush1.bf16.msra.mxu1 %v20013_v27  ;;  %20315 = vmatprep.mubr.bf16.mxu1 %v31328_v33  ;;  %v19975_v4 = vcombine.high %v19951_v17, %v31328_v33  ;;  %v19967_v61 = vrot.slane %v19959_v59, %v25368_v49  ;;  %v19901_v55 = vrot.slane %v19893_v34, %v25368_v49  ;;  %v31617_v59 = vld [vmem:[#allocation28_spill] sm:$0xff] }
 0xb0f   : > { %24643 = vmatprep.subr.msk.bf16.mxu1 %vm3502_vm2, %v19846_v40  ;;  %v20037_v10 = vsel %vm3502_vm2, %v19909_v31, 0  ;;  %v19976_v48 = vcombine.high %v19958_v7, %v31328_v33  ;;  %v20049_v56 = vsel %vm3502_vm2, %v19910_v38, 0  ;;  %v19974_v26 = vrot.slane %v19960_v57, %v25368_v49  ;;  %v31618_v57 = vld [vmem:[#allocation26_spill] sm:$0xff] }
 0xb10   : > { %v19977_v16 = vcombine.high %v19967_v61, %v31328_v33  ;;  %v19911_v32 = vcombine.high %v19901_v55, %v31328_v33  ;;  %v20055_v23 = vsel %vm3502_vm2, %v19901_v55, 0  ;;  %v19908_v62 = vrot.slane %v19894_v41, %v25368_v49  ;;  %v31620_v41 = vld [vmem:[#allocation27_spill] sm:$0xff] }
 0xb11   : > { %v19978_v3 = vcombine.high %v19974_v26, %v31328_v33 }
 0xb12   : > { %v20061_v5 = vsel %vm3502_vm2, %v19911_v32, 0  ;;  %v19912_v27 = vcombine.high %v19908_v62, %v31328_v33  ;;  %v20067_v40 = vsel %vm3502_vm2, %v19908_v62, 0 }
 0xb13   : > { %24638 = vmatmul.mubr.msk.bf16.vlgmr.msra.gmra.mrb[56].mxu0 %vm3498_vm3, %v30137_v30 }
 0xb14   : > { %20325 = vmatpush1.bf16.msra.mxu0 %v20019_v50  ;;  %20356 = vmatprep.mubr.bf16.mxu0 %v31328_v33  ;;  %v20073_v34 = vsel %vm3502_vm2, %v19912_v27, 0  ;;  %v31621_v50 = vld [vmem:[#allocation33_spill] sm:$0xff] }
 0xb15   : > { %24640 = vmatmul.mubr.msk.bf16.vlgmr.msra.gmra.mrb[72].mxu1 %vm3498_vm3, %v30137_v30  ;;  %24645 = vmatprep.subr.msk.bf16.mxu0 %vm3502_vm2, %v19951_v17  ;;  %v31616_v17 = vld [vmem:[#allocation34_spill] sm:$0xff] }
 0xb16   : > { %20366 = vmatpush1.bf16.msra.mxu1 %v20025_v37  ;;  %20397 = vmatprep.mubr.bf16.mxu1 %v31328_v33  ;;  %v25014_v37 = vld [vmem:[%s25340_s12 + $0x20] sm:$0xff]  }
 0xb17   : > { %24647 = vmatprep.subr.msk.bf16.mxu1 %vm3502_vm2, %v19975_v4  ;;  %v31622_v4 = vld [vmem:[#allocation35_spill] sm:$0xff] }
 0xb1b   : > { %24642 = vmatmul.mubr.msk.bf16.vlgmr.msra.gmra.mrb[60].mxu0 %vm3498_vm3, %v30137_v30 }
 0xb1c   : > { %20407 = vmatpush1.bf16.msra.mxu0 %v20031_v58  ;;  %20438 = vmatprep.mubr.bf16.mxu0 %v31328_v33 }
 0xb1d   : > { %24644 = vmatmul.mubr.msk.bf16.vlgmr.msra.gmra.mrb[76].mxu1 %vm3498_vm3, %v30137_v30  ;;  %24649 = vmatprep.subr.msk.bf16.mxu0 %vm3502_vm2, %v19958_v7 }
 0xb1e   : > { %20448 = vmatpush1.bf16.msra.mxu1 %v20037_v10  ;;  %20479 = vmatprep.mubr.bf16.mxu1 %v31328_v33 }
 0xb1f   : > { %24651 = vmatprep.subr.msk.bf16.mxu1 %vm3502_vm2, %v19976_v48 }
 0xb23   : > { %24646 = vmatmul.mubr.msk.bf16.vlgmr.msra.gmra.mrb[64].mxu0 %vm3498_vm3, %v30137_v30 }
 0xb24   : > { %20489 = vmatpush1.bf16.msra.mxu0 %v20043_v18  ;;  %20520 = vmatprep.mubr.bf16.mxu0 %v31328_v33 }
 0xb25   : > { %24648 = vmatmul.mubr.msk.bf16.vlgmr.msra.gmra.mrb[80].mxu1 %vm3498_vm3, %v30137_v30  ;;  %24653 = vmatprep.subr.msk.bf16.mxu0 %vm3502_vm2, %v19967_v61 }
 0xb26   : > { %20530 = vmatpush1.bf16.msra.mxu1 %v20049_v56  ;;  %20561 = vmatprep.mubr.bf16.mxu1 %v31328_v33 }
 0xb27   : > { %24655 = vmatprep.subr.msk.bf16.mxu1 %vm3502_vm2, %v19977_v16 }
 0xb2b   : > { %24650 = vmatmul.mubr.msk.bf16.vlgmr.msra.gmra.mrb[68].mxu0 %vm3498_vm3, %v30137_v30 }
 0xb2c   : > { %20571 = vmatpush1.bf16.msra.mxu0 %v20055_v23  ;;  %20602 = vmatprep.mubr.bf16.mxu0 %v31328_v33 }
 0xb2d   : > { %24657 = vmatprep.subr.msk.bf16.mxu0 %vm3502_vm2, %v19974_v26  ;;  %24652 = vmatmul.mubr.msk.bf16.vlgmr.msra.gmra.mrb[84].mxu1 %vm3498_vm3, %v30137_v30 }
 0xb2e   : > { %20612 = vmatpush1.bf16.msra.mxu1 %v20061_v5  ;;  %20643 = vmatprep.mubr.bf16.mxu1 %v31328_v33 }
 0xb2f   : > { %24659 = vmatprep.subr.msk.bf16.mxu1 %vm3502_vm2, %v19978_v3 }
 0xb33   : > { %24654 = vmatmul.mubr.msk.bf16.vlgmr.msra.gmra.mrb[72].mxu0 %vm3498_vm3, %v30137_v30 }
 0xb34   : > { %20653 = vmatpush1.bf16.msra.mxu0 %v20067_v40  ;;  %20684 = vmatprep.mubr.bf16.mxu0 %v31328_v33 }
 0xb35   : > { %21310 = vmatprep.subr.bf16.mxu0 %v31615_v6  ;;  %24656 = vmatmul.mubr.msk.bf16.vlgmr.msra.gmra.mrb[88].mxu1 %vm3498_vm3, %v30137_v30 }
 0xb36   : > { %20694 = vmatpush1.bf16.msra.mxu1 %v20073_v34  ;;  %20725 = vmatprep.mubr.bf16.mxu1 %v31328_v33 }
 0xb37   : > { %21363 = vmatprep.subr.bf16.mxu1 %v31616_v17 }
 0xb3b   : > { %24658 = vmatmul.mubr.msk.bf16.vlgmr.msra.gmra.mrb[76].mxu0 %vm3498_vm3, %v30137_v30 }
 0xb3c   : > { %21311 = vmatpush1.bf16.msra.mxu0 %v31617_v59  ;;  %21342 = vmatprep.mubr.bf16.mxu0 %v31328_v33 }
 0xb3d   : > { %21312 = vmatprep.subr.bf16.mxu0 %v31618_v57  ;;  %24660 = vmatmul.mubr.msk.bf16.vlgmr.msra.gmra.mrb[92].mxu1 %vm3498_vm3, %v30137_v30  ;;  %v25015_v30 = vld [vmem:[%s25340_s12 + $0x28] sm:$0xff]  }
 0xb3e   : > { %21364 = vmatpush1.bf16.msra.mxu1 %v31619_v21  ;;  %21395 = vmatprep.mubr.bf16.mxu1 %v31328_v33 }
 0xb3f   : > { %21365 = vmatprep.subr.bf16.mxu1 %v31620_v41 }
 0xb40   : > { %21313 = vmatpush1.bf16.msra.mxu0 %v31621_v50 }
 0xb42   : > { %21366 = vmatpush1.bf16.msra.mxu1 %v31622_v4 }
 0xb43   : > { %24661 = vmatmul.mubr.msk.bf16.vlgmr.msra.gmra.mrb[80].mxu0 %vm1592_vm1, %v25014_v37 }
 0xb44   : > { %21352 = vmatprep.mubr.bf16.mxu0 %v31328_v33 }
 0xb45   : > { %24663 = vmatmul.mubr.msk.bf16.vlgmr.msra.gmra.mrb[96].mxu1 %vm1592_vm1, %v25014_v37 }
 0xb46   : > { %21405 = vmatprep.mubr.bf16.mxu1 %v31328_v33 }
 0xb4b   : > { %24662 = vmatmul.mubr.msk.bf16.gmra.mrb[84].mxu0 %vm1592_vm1, %v25015_v30 }
 0xb4c   : > { %22373 = vmatprep.mubr.bf16.mxu0 %v31328_v33 }
 0xb4d   : > { %24664 = vmatmul.mubr.msk.bf16.gmra.mrb[100].mxu1 %vm1592_vm1, %v25015_v30 }
 0xb4e   : > { %22414 = vmatprep.mubr.bf16.mxu1 %v31328_v33 }
 0xbd6   : > { %v20112_v44 = vpop.f32.mrb[48].mxu0 }
 0xbd7   : > { %v20113_v31 = vadd.f32 %v20112_v44, %v31377_v22  ;;  %v20114_v7 = vpop.f32.mrb[49].mxu0 }
 0xbd8   : > { %v20153_v58 = vpop.f32.mrb[64].mxu1  ;;  %v20115_v10 = vadd.f32 %v20114_v7, %v25920_v12  ;;  %v20116_v52 = vpop.f32.mrb[50].mxu0 }
 0xbd9   : > { %v20154_v48 = vadd.f32 %v20153_v58, %v25918_v13  ;;  %v20155_v38 = vpop.f32.mrb[65].mxu1  ;;  %v20117_v61 = vpop.f32.mrb[51].mxu0 }
 0xbda   : > { %v20156_v18 = vadd.f32 %v20155_v38, %v25922_v29  ;;  %v20157_v56 = vpop.f32.mrb[66].mxu1 }
 0xbdb   : > { %v20734_v16 = vcombine.low %v20113_v31, %v20154_v48  ;;  %v20735_v55 = vcombine.high %v20113_v31, %v20154_v48  ;;  %v20158_v26 = vpop.f32.mrb[67].mxu1 }
 0xbdc   : > { %v20750_v32 = vcombine.low %v20115_v10, %v20156_v18  ;;  %v20751_v23 = vcombine.high %v20115_v10, %v20156_v18 }
 0xbdd   : > { %v20742_v5 = vrot.slane %v20734_v16, %v25351_v9  ;;  %v20749_v3 = vrot.slane %v20735_v55, %v25351_v9 }
 0xbde   : > { %v20758_v62 = vrot.slane %v20750_v32, %v25351_v9  ;;  %v20765_v27 = vrot.slane %v20751_v23, %v25351_v9  ;;  %v20194_v40 = vpop.f32.mrb[52].mxu0 }
 0xbdf   : > { %v20195_v6 = vadd.f32 %v20194_v40, %v26930_v0  ;;  %v20196_v34 = vpop.f32.mrb[53].mxu0 }
 0xbe0   : > { %v20798_v17 = vcombine.low %v20742_v5, %v20758_v62  ;;  %v20799_v59 = vcombine.high %v20742_v5, %v20758_v62  ;;  %v20814_v57 = vcombine.low %v20749_v3, %v20765_v27  ;;  %v20815_v21 = vcombine.high %v20749_v3, %v20765_v27  ;;  %v20235_v41 = vpop.f32.mrb[68].mxu1  ;;  %v20198_v50 = vpop.f32.mrb[54].mxu0 }
 0xbe1   : > { %v20236_v4 = vadd.f32 %v20235_v41, %v26934_v1  ;;  %v20197_v37 = vadd.f32 %v20196_v34, %v26936_v2  ;;  %v20237_v30 = vpop.f32.mrb[69].mxu1  ;;  %v20199_v44 = vpop.f32.mrb[55].mxu0 }
 0xbe2   : > { %v20239_v31 = vpop.f32.mrb[70].mxu1  ;;  %v20238_v10 = vadd.f32 %v20237_v30, %v26941_v24  ;;  %v20806_v32 = vrot.slane %v20798_v17, %v25368_v49  ;;  %v20813_v23 = vrot.slane %v20799_v59, %v25368_v49  ;;  %v20829_v30 = vrot.slane %v20815_v21, %v25368_v49 }
 0xbe3   : > { %v20766_v7 = vcombine.low %v20195_v6, %v20236_v4  ;;  %v20767_v58 = vcombine.high %v20195_v6, %v20236_v4  ;;  %v20240_v52 = vpop.f32.mrb[71].mxu1 }
 0xbe4   : > { %v20782_v61 = vcombine.low %v20197_v37, %v20238_v10  ;;  %v20783_v18 = vcombine.high %v20197_v37, %v20238_v10  ;;  %v20822_v37 = vrot.slane %v20814_v57, %v25368_v49 }
 0xbe5   : > { %v20774_v48 = vrot.slane %v20766_v7, %v25351_v9  ;;  %v20781_v38 = vrot.slane %v20767_v58, %v25351_v9 }
 0xbe6   : > { %v20276_v56 = vpop.f32.mrb[56].mxu0  ;;  %v20790_v16 = vrot.slane %v20782_v61, %v25351_v9  ;;  %v20797_v55 = vrot.slane %v20783_v18, %v25351_v9 }
 0xbe7   : > { %v20278_v26 = vpop.f32.mrb[57].mxu0  ;;  %v20277_v5 = vadd.f32 %v20276_v56, %v31377_v22 }
 0xbe8   : > { %v20317_v3 = vpop.f32.mrb[72].mxu1  ;;  %v20279_v62 = vadd.f32 %v20278_v26, %v25920_v12  ;;  %v20280_v27 = vpop.f32.mrb[58].mxu0  ;;  %v20830_v40 = vcombine.low %v20774_v48, %v20790_v16  ;;  %v20831_v6 = vcombine.high %v20774_v48, %v20790_v16  ;;  %v20846_v34 = vcombine.low %v20781_v38, %v20797_v55 }
 0xbe9   : > { %v20847_v41 = vcombine.high %v20781_v38, %v20797_v55  ;;  %v20319_v50 = vpop.f32.mrb[73].mxu1  ;;  %v20281_v4 = vpop.f32.mrb[59].mxu0  ;;  %v20318_v17 = vadd.f32 %v20317_v3, %v25918_v13 }
 0xbea   : > { %v20320_v59 = vadd.f32 %v20319_v50, %v25922_v29  ;;  %v20321_v44 = vpop.f32.mrb[74].mxu1  ;;  %v20838_v31 = vrot.slane %v20830_v40, %v25368_v49  ;;  %v20845_v7 = vrot.slane %v20831_v6, %v25368_v49  ;;  %v20854_v58 = vrot.slane %v20846_v34, %v25368_v49 }
 0xbeb   : > { %v20861_v10 = vrot.slane %v20847_v41, %v25368_v49  ;;  %v20322_v52 = vpop.f32.mrb[75].mxu1  ;;  %v20870_v48 = vcombine.low %v20277_v5, %v20318_v17  ;;  %v20871_v38 = vcombine.high %v20277_v5, %v20318_v17 }
 0xbec   : > { %v20886_v61 = vcombine.low %v20279_v62, %v20320_v59  ;;  %v20887_v57 = vcombine.high %v20279_v62, %v20320_v59  ;;  %v20862_v18 = vcombine.low %v20806_v32, %v20838_v31  ;;  %v20863_v21 = vcombine.high %v20806_v32, %v20838_v31 }
 0xbed   : > { %v20864_v56 = vcombine.low %v20813_v23, %v20845_v7  ;;  %v20865_v16 = vcombine.high %v20813_v23, %v20845_v7  ;;  %v20866_v55 = vcombine.low %v20822_v37, %v20854_v58  ;;  %v20867_v26 = vcombine.high %v20822_v37, %v20854_v58 }
 0xbee   : > { %v20868_v3 = vcombine.low %v20829_v30, %v20861_v10  ;;  %v20869_v27 = vcombine.high %v20829_v30, %v20861_v10  ;;  %v20358_v40 = vpop.f32.mrb[60].mxu0  ;;  %v30312_v6 = vadd.f32 %v20863_v21, %v29840_v11  ;;  %v20878_v34 = vrot.slane %v20870_v48, %v25351_v9 }
 0xbef   : > { %v20885_v41 = vrot.slane %v20871_v38, %v25351_v9  ;;  %v20894_v5 = vrot.slane %v20886_v61, %v25351_v9  ;;  %v20360_v50 = vpop.f32.mrb[61].mxu0  ;;  %v20901_v62 = vrot.slane %v20887_v57, %v25351_v9  ;;  %v20359_v32 = vadd.f32 %v20358_v40, %v26930_v0 }
 0xbf0   : > { %v20399_v23 = vpop.f32.mrb[76].mxu1  ;;  %v20361_v4 = vadd.f32 %v20360_v50, %v26936_v2  ;;  %v20362_v37 = vpop.f32.mrb[62].mxu0  ;;  %v30321_v30 = vadd.f32 %v20862_v18, %v29837_v46  ;;  %v30325_v7 = vadd.f32 %v20865_v16, %v29846_v60  ;;  %v30329_v38 = vadd.f32 %v20864_v56, %v29843_v39 }
 0xbf1   : > { %v20934_v11 = vcombine.low %v20878_v34, %v20894_v5  ;;  %v20935_v17 = vcombine.high %v20878_v34, %v20894_v5  ;;  %v20400_v59 = vadd.f32 %v20399_v23, %v26934_v1  ;;  %v20401_v44 = vpop.f32.mrb[77].mxu1  ;;  %v20363_v31 = vpop.f32.mrb[63].mxu0  ;;  %v20950_v58 = vcombine.low %v20885_v41, %v20901_v62 }
 0xbf2   : > { %v20951_v10 = vcombine.high %v20885_v41, %v20901_v62  ;;  %v20402_v52 = vadd.f32 %v20401_v44, %v26941_v24  ;;  %v20403_v48 = vpop.f32.mrb[78].mxu1  ;;  %v30334_v60 = vadd.f32 %v20867_v26, %v29852_v47  ;;  %v30337_v16 = vadd.f32 %v20866_v55, %v29849_v42 }
 0xbf3   : > { %v20902_v61 = vcombine.low %v20359_v32, %v20400_v59  ;;  %v20903_v46 = vcombine.high %v20359_v32, %v20400_v59  ;;  %v20404_v57 = vpop.f32.mrb[79].mxu1  ;;  %v30342_v5 = vadd.f32 %v20869_v27, %v29863_v35  ;;  %v30345_v50 = vadd.f32 %v20868_v3, %v29866_v14 }
 0xbf4   : > { %v20918_v18 = vcombine.low %v20361_v4, %v20402_v52  ;;  %v20919_v21 = vcombine.high %v20361_v4, %v20402_v52  ;;  %v20942_v62 = vrot.slane %v20934_v11, %v25368_v49  ;;  %v20949_v59 = vrot.slane %v20935_v17, %v25368_v49 }
 0xbf5   : > { %v20910_v40 = vrot.slane %v20902_v61, %v25351_v9  ;;  %v20917_v34 = vrot.slane %v20903_v46, %v25351_v9  ;;  %v20958_v44 = vrot.slane %v20950_v58, %v25368_v49  ;;  %v20965_v35 = vrot.slane %v20951_v10, %v25368_v49 }
 0xbf6   : > { %v20926_v41 = vrot.slane %v20918_v18, %v25351_v9  ;;  %v20933_v39 = vrot.slane %v20919_v21, %v25351_v9  ;;  %v20440_v56 = vpop.f32.mrb[64].mxu0 }
 0xbf7   : > { %v20441_v32 = vadd.f32 %v20440_v56, %v31377_v22  ;;  %v20442_v47 = vpop.f32.mrb[65].mxu0 }
 0xbf8   : > { %v20966_v26 = vcombine.low %v20910_v40, %v20926_v41  ;;  %v20967_v23 = vcombine.high %v20910_v40, %v20926_v41  ;;  %v20982_v42 = vcombine.low %v20917_v34, %v20933_v39  ;;  %v20983_v55 = vcombine.high %v20917_v34, %v20933_v39  ;;  %v20481_v4 = vpop.f32.mrb[80].mxu1  ;;  %v20444_v37 = vpop.f32.mrb[66].mxu0 }
 0xbf9   : > { %v20482_v14 = vadd.f32 %v20481_v4, %v25918_v13  ;;  %v20483_v3 = vpop.f32.mrb[81].mxu1  ;;  %v20445_v27 = vpop.f32.mrb[67].mxu0  ;;  %v20443_v17 = vadd.f32 %v20442_v47, %v25920_v12 }
 0xbfa   : > { %v20974_v11 = vrot.slane %v20966_v26, %v25368_v49  ;;  %v20981_v31 = vrot.slane %v20967_v23, %v25368_v49  ;;  %v20990_v52 = vrot.slane %v20982_v42, %v25368_v49  ;;  %v20997_v48 = vrot.slane %v20983_v55, %v25368_v49  ;;  %v20485_v61 = vpop.f32.mrb[82].mxu1 }
 0xbfb   : > { %v21006_v46 = vcombine.low %v20441_v32, %v20482_v14  ;;  %v21007_v57 = vcombine.high %v20441_v32, %v20482_v14  ;;  %v20484_v58 = vadd.f32 %v20483_v3, %v25922_v29  ;;  %v20486_v10 = vpop.f32.mrb[83].mxu1 }
 0xbfc   : > { %v20998_v18 = vcombine.low %v20942_v62, %v20974_v11  ;;  %v20999_v21 = vcombine.high %v20942_v62, %v20974_v11  ;;  %v21000_v40 = vcombine.low %v20949_v59, %v20981_v31  ;;  %v21001_v34 = vcombine.high %v20949_v59, %v20981_v31 }
 0xbfd   : > { %v21002_v41 = vcombine.low %v20958_v44, %v20990_v52  ;;  %v21003_v39 = vcombine.high %v20958_v44, %v20990_v52  ;;  %v21004_v56 = vcombine.low %v20965_v35, %v20997_v48  ;;  %v21005_v26 = vcombine.high %v20965_v35, %v20997_v48 }
 0xbfe   : > { %v30360_v23 = vadd.f32 %v20998_v18, %v29885_v20  ;;  %v30363_v42 = vadd.f32 %v20999_v21, %v29888_v43  ;;  %v30366_v32 = vadd.f32 %v21000_v40, %v29891_v53  ;;  %v30369_v47 = vadd.f32 %v21001_v34, %v29894_v45  ;;  %v20522_v55 = vpop.f32.mrb[68].mxu0 }
 0xbff   : > { %v30372_v62 = vadd.f32 %v21002_v41, %v29897_v25  ;;  %v30375_v4 = vadd.f32 %v21003_v39, %v29900_v54  ;;  %v30378_v37 = vadd.f32 %v21004_v56, %v29903_v28  ;;  %v30381_v20 = vadd.f32 %v21005_v26, %v29906_v36  ;;  %v20524_v43 = vpop.f32.mrb[69].mxu0 }
 0xc00   : > { %v21014_v53 = vrot.slane %v21006_v46, %v25351_v9  ;;  %v21021_v59 = vrot.slane %v21007_v57, %v25351_v9  ;;  %v21022_v45 = vcombine.low %v20443_v17, %v20484_v58  ;;  %v21023_v44 = vcombine.high %v20443_v17, %v20484_v58  ;;  %v20563_v35 = vpop.f32.mrb[84].mxu1  ;;  %v20526_v14 = vpop.f32.mrb[70].mxu0 }
 0xc01   : > { %v20523_v25 = vadd.f32 %v20522_v55, %v26930_v0  ;;  %v20564_v54 = vadd.f32 %v20563_v35, %v26934_v1  ;;  %v20525_v3 = vadd.f32 %v20524_v43, %v26936_v2  ;;  %v20565_v28 = vpop.f32.mrb[85].mxu1  ;;  %v20527_v27 = vpop.f32.mrb[71].mxu0 }
 0xc02   : > { %v21030_v36 = vrot.slane %v21022_v45, %v25351_v9  ;;  %v21037_v11 = vrot.slane %v21023_v44, %v25351_v9  ;;  %v20566_v31 = vadd.f32 %v20565_v28, %v26941_v24  ;;  %v20567_v52 = vpop.f32.mrb[86].mxu1 }
 0xc03   : > { %v21038_v48 = vcombine.low %v20523_v25, %v20564_v54  ;;  %v21039_v61 = vcombine.high %v20523_v25, %v20564_v54  ;;  %v20568_v46 = vpop.f32.mrb[87].mxu1 }
 0xc04   : > { %v21070_v57 = vcombine.low %v21014_v53, %v21030_v36  ;;  %v21071_v17 = vcombine.high %v21014_v53, %v21030_v36  ;;  %v21086_v58 = vcombine.low %v21021_v59, %v21037_v11  ;;  %v21087_v10 = vcombine.high %v21021_v59, %v21037_v11 }
 0xc05   : > { %v21046_v18 = vrot.slane %v21038_v48, %v25351_v9  ;;  %v21053_v21 = vrot.slane %v21039_v61, %v25351_v9  ;;  %v21054_v40 = vcombine.low %v20525_v3, %v20566_v31  ;;  %v21055_v34 = vcombine.high %v20525_v3, %v20566_v31 }
 0xc06   : > { %v20604_v41 = vpop.f32.mrb[72].mxu0  ;;  %v21078_v55 = vrot.slane %v21070_v57, %v25368_v49  ;;  %v21085_v43 = vrot.slane %v21071_v17, %v25368_v49  ;;  %v21094_v27 = vrot.slane %v21086_v58, %v25368_v49  ;;  %v21101_v36 = vrot.slane %v21087_v10, %v25368_v49 }
 0xc07   : > { %v21062_v39 = vrot.slane %v21054_v40, %v25351_v9  ;;  %v21069_v56 = vrot.slane %v21055_v34, %v25351_v9  ;;  %v20606_v26 = vpop.f32.mrb[73].mxu0  ;;  %v20605_v53 = vadd.f32 %v20604_v41, %v31377_v22 }
 0xc08   : > { %v20645_v45 = vpop.f32.mrb[88].mxu1  ;;  %v20607_v59 = vadd.f32 %v20606_v26, %v25920_v12  ;;  %v20608_v44 = vpop.f32.mrb[74].mxu0 }
 0xc09   : > { %v21102_v35 = vcombine.low %v21046_v18, %v21062_v39  ;;  %v21103_v14 = vcombine.high %v21046_v18, %v21062_v39  ;;  %v21118_v25 = vcombine.low %v21053_v21, %v21069_v56  ;;  %v21119_v54 = vcombine.high %v21053_v21, %v21069_v56  ;;  %v20647_v3 = vpop.f32.mrb[89].mxu1  ;;  %v20609_v28 = vpop.f32.mrb[75].mxu0 }
 0xc0a   : > { %v20646_v11 = vadd.f32 %v20645_v45, %v25918_v13  ;;  %v20648_v31 = vadd.f32 %v20647_v3, %v25922_v29  ;;  %v20649_v52 = vpop.f32.mrb[90].mxu1  ;;  %v31629_v28 = vld [vmem:[#allocation25_spill] sm:$0xff] }
 0xc0b   : > { %v21110_v48 = vrot.slane %v21102_v35, %v25368_v49  ;;  %v21117_v61 = vrot.slane %v21103_v14, %v25368_v49  ;;  %v21126_v46 = vrot.slane %v21118_v25, %v25368_v49  ;;  %v21133_v57 = vrot.slane %v21119_v54, %v25368_v49  ;;  %v20650_v17 = vpop.f32.mrb[91].mxu1  ;;  %v31625_v54 = vld [vmem:[#allocation30_spill] sm:$0xff] }
 0xc0c   : > { %v21142_v18 = vcombine.low %v20605_v53, %v20646_v11  ;;  %v21143_v21 = vcombine.high %v20605_v53, %v20646_v11  ;;  %v21158_v40 = vcombine.low %v20607_v59, %v20648_v31  ;;  %v21159_v58 = vcombine.high %v20607_v59, %v20648_v31  ;;  %v31627_v53 = vld [vmem:[#allocation37_spill] sm:$0xff] }
 0xc0d   : > { %v21134_v34 = vcombine.low %v21078_v55, %v21110_v48  ;;  %v21135_v10 = vcombine.high %v21078_v55, %v21110_v48  ;;  %v21136_v41 = vcombine.low %v21085_v43, %v21117_v61  ;;  %v21137_v39 = vcombine.high %v21085_v43, %v21117_v61 }
 0xc0e   : > { %v21138_v56 = vcombine.low %v21094_v27, %v21126_v46  ;;  %v21139_v26 = vcombine.high %v21094_v27, %v21126_v46  ;;  %v21140_v45 = vcombine.low %v21101_v36, %v21133_v57  ;;  %v21141_v44 = vcombine.high %v21101_v36, %v21133_v57  ;;  %v20686_v35 = vpop.f32.mrb[76].mxu0  ;;  %v31631_v27 = vld [vmem:[#allocation38_spill] sm:$0xff]  ;;  %v31633_v36 = vld [vmem:[#allocation39_spill] sm:$0xff] }
 0xc0f   : > { %v30408_v14 = vadd.f32 %v21134_v34, %v29933_v51  ;;  %v30411_v25 = vadd.f32 %v21135_v10, %v29936_v15  ;;  %v30414_v3 = vadd.f32 %v21136_v41, %v31625_v54  ;;  %v30417_v59 = vadd.f32 %v21137_v39, %v31627_v53  ;;  %v20688_v55 = vpop.f32.mrb[77].mxu0  ;;  %v31635_v51 = vld [vmem:[#allocation43_spill] sm:$0xff] }
 0xc10   : > { %v30420_v43 = vadd.f32 %v21138_v56, %v31629_v28  ;;  %v30423_v11 = vadd.f32 %v21139_v26, %v31631_v27  ;;  %v30426_v31 = vadd.f32 %v21140_v45, %v31633_v36  ;;  %v30429_v52 = vadd.f32 %v21141_v44, %v31635_v51  ;;  %v20727_v15 = vpop.f32.mrb[92].mxu1  ;;  %v20690_v48 = vpop.f32.mrb[78].mxu0 }
 0xc11   : > { %31623 = vst [vmem:[#allocation18_spill] sm:$0xff] %v30408_v14  ;;  %31624 = vst [vmem:[#allocation24_spill] sm:$0xff] %v30411_v25  ;;  %v21150_v61 = vrot.slane %v21142_v18, %v25351_v9  ;;  %v21157_v46 = vrot.slane %v21143_v21, %v25351_v9  ;;  %v21166_v57 = vrot.slane %v21158_v40, %v25351_v9  ;;  %v20729_v34 = vpop.f32.mrb[93].mxu1  ;;  %v20691_v10 = vpop.f32.mrb[79].mxu0 }
 0xc12   : > { %31626 = vst [vmem:[#allocation21_spill] sm:$0xff] %v30414_v3  ;;  %31628 = vst [vmem:[#allocation22_spill] sm:$0xff] %v30417_v59  ;;  %v21173_v17 = vrot.slane %v21159_v58, %v25351_v9  ;;  %v20687_v41 = vadd.f32 %v20686_v35, %v26930_v0  ;;  %v20728_v39 = vadd.f32 %v20727_v15, %v26934_v1  ;;  %v20731_v45 = vpop.f32.mrb[94].mxu1 }
 0xc13   : > { %31630 = vst [vmem:[#allocation45_spill] sm:$0xff] %v30420_v43  ;;  %31632 = vst [vmem:[#allocation11_spill] sm:$0xff] %v30423_v11  ;;  %v20689_v56 = vadd.f32 %v20688_v55, %v26936_v2  ;;  %v20730_v26 = vadd.f32 %v20729_v34, %v26941_v24  ;;  %v21206_v44 = vcombine.low %v21150_v61, %v21166_v57  ;;  %v20732_v21 = vpop.f32.mrb[95].mxu1 }
 0xc14   : > { %31634 = vst [vmem:[#allocation12_spill] sm:$0xff] %v30426_v31  ;;  %31636 = vst [vmem:[#allocation9_spill] sm:$0xff] %v30429_v52  ;;  %v21207_v54 = vcombine.high %v21150_v61, %v21166_v57  ;;  %v21222_v18 = vcombine.low %v21157_v46, %v21173_v17  ;;  %v21223_v53 = vcombine.high %v21157_v46, %v21173_v17 }
 0xc15   : > { %v21174_v28 = vcombine.low %v20687_v41, %v20728_v39  ;;  %v21175_v40 = vcombine.high %v20687_v41, %v20728_v39  ;;  %v21190_v27 = vcombine.low %v20689_v56, %v20730_v26  ;;  %v21191_v58 = vcombine.high %v20689_v56, %v20730_v26 }
 0xc16   : > { %v21214_v36 = vrot.slane %v21206_v44, %v25368_v49  ;;  %v21344_v48 = vpop.f32.mrb[80].mxu0  ;;  %v21221_v61 = vrot.slane %v21207_v54, %v25368_v49  ;;  %v21230_v46 = vrot.slane %v21222_v18, %v25368_v49  ;;  %v21237_v57 = vrot.slane %v21223_v53, %v25368_v49 }
 0xc17   : > { %v21182_v35 = vrot.slane %v21174_v28, %v25351_v9  ;;  %v21189_v51 = vrot.slane %v21175_v40, %v25351_v9  ;;  %v21198_v55 = vrot.slane %v21190_v27, %v25351_v9  ;;  %v21205_v15 = vrot.slane %v21191_v58, %v25351_v9  ;;  %v21346_v34 = vpop.f32.mrb[81].mxu0 }
 0xc18   : > { %v21345_v17 = vadd.f32 %v21344_v48, %v31377_v22  ;;  %v21397_v26 = vpop.f32.mrb[96].mxu1  ;;  %v21348_v45 = vpop.f32.mrb[82].mxu0  ;;  %v21347_v21 = vadd.f32 %v21346_v34, %v25920_v12 }
 0xc19   : > { %v21238_v10 = vcombine.low %v21182_v35, %v21198_v55  ;;  %v21239_v41 = vcombine.high %v21182_v35, %v21198_v55  ;;  %v21254_v39 = vcombine.low %v21189_v51, %v21205_v15  ;;  %v21255_v56 = vcombine.high %v21189_v51, %v21205_v15  ;;  %v21399_v28 = vpop.f32.mrb[97].mxu1  ;;  %v21350_v40 = vpop.f32.mrb[83].mxu0 }
 0xc1a   : > { %v21398_v44 = vadd.f32 %v21397_v26, %v25918_v13  ;;  %v21349_v54 = vadd.f32 %v21348_v45, %v31377_v22  ;;  %v21401_v35 = vpop.f32.mrb[98].mxu1  ;;  %v21400_v15 = vadd.f32 %v21399_v28, %v25922_v29  ;;  %v31642_v28 = vld [vmem:[#allocation41_spill] sm:$0xff] }
 0xc1b   : > { %v21246_v18 = vrot.slane %v21238_v10, %v25368_v49  ;;  %v21253_v53 = vrot.slane %v21239_v41, %v25368_v49  ;;  %v21262_v27 = vrot.slane %v21254_v39, %v25368_v49  ;;  %v21269_v58 = vrot.slane %v21255_v56, %v25368_v49  ;;  %v21403_v34 = vpop.f32.mrb[99].mxu1  ;;  %v31638_v56 = vld [vmem:[#allocation40_spill] sm:$0xff] }
 0xc1c   : > { %v21416_v51 = vcombine.low %v21345_v17, %v21398_v44  ;;  %v21417_v55 = vcombine.high %v21345_v17, %v21398_v44  ;;  %v21402_v48 = vadd.f32 %v21401_v35, %v25918_v13  ;;  %v31640_v17 = vld [vmem:[#allocation44_spill] sm:$0xff] }
 0xc1d   : > { %v21270_v26 = vcombine.low %v21214_v36, %v21246_v18  ;;  %v21271_v52 = vcombine.high %v21214_v36, %v21246_v18  ;;  %v21272_v45 = vcombine.low %v21221_v61, %v21253_v53  ;;  %v21273_v31 = vcombine.high %v21221_v61, %v21253_v53  ;;  %v31644_v36 = vld [vmem:[#allocation19_spill] sm:$0xff]  ;;  %v31646_v61 = vld [vmem:[#allocation20_spill] sm:$0xff] }
 0xc1e   : > { %v21274_v11 = vcombine.low %v21230_v46, %v21262_v27  ;;  %v21275_v10 = vcombine.high %v21230_v46, %v21262_v27  ;;  %v21276_v43 = vcombine.low %v21237_v57, %v21269_v58  ;;  %v21277_v41 = vcombine.high %v21237_v57, %v21269_v58  ;;  %v21354_v3 = vpop.f32.mrb[84].mxu0  ;;  %v31648_v57 = vld [vmem:[#allocation17_spill] sm:$0xff] }
 0xc1f   : > { %v30458_v39 = vadd.f32 %v21270_v26, %v29983_v63  ;;  %v30461_v59 = vadd.f32 %v21271_v52, %v31638_v56  ;;  %v30464_v44 = vadd.f32 %v21272_v45, %v31640_v17  ;;  %v30467_v35 = vadd.f32 %v21273_v31, %v31642_v28  ;;  %v31650_v63 = vld [vmem:[#allocation23_spill] sm:$0xff]  ;;  %v30481_v52 = vpop.f32.mrb[85].mxu0 }
 0xc20   : > { %v30470_v18 = vadd.f32 %v21274_v11, %v31644_v36  ;;  %v30473_v46 = vadd.f32 %v21275_v10, %v31646_v61  ;;  %v30476_v53 = vadd.f32 %v21276_v43, %v31648_v57  ;;  %v30479_v27 = vadd.f32 %v21277_v41, %v31650_v63  ;;  %v21407_v56 = vpop.f32.mrb[100].mxu1  ;;  %v30485_v11 = vpop.f32.mrb[86].mxu0 }
 0xc21   : > { %31637 = vst [vmem:[#allocation15_spill] sm:$0xff] %v30458_v39  ;;  %31639 = vst [vmem:[#allocation10_spill] sm:$0xff] %v30461_v59  ;;  %v21424_v58 = vrot.slane %v21416_v51, %v25351_v9  ;;  %v21431_v31 = vrot.slane %v21417_v55, %v25351_v9  ;;  %v21432_v26 = vcombine.low %v21347_v21, %v21400_v15  ;;  %v30489_v36 = vpop.f32.mrb[101].mxu1  ;;  %v30491_v41 = vpop.f32.mrb[87].mxu0 }
 0xc22   : > { %31641 = vst [vmem:[#allocation16_spill] sm:$0xff] %v30464_v44  ;;  %31643 = vst [vmem:[#allocation13_spill] sm:$0xff] %v30467_v35  ;;  %v21433_v45 = vcombine.high %v21347_v21, %v21400_v15  ;;  %v21484_v17 = vcombine.low %v21349_v54, %v21402_v48  ;;  %v21485_v10 = vcombine.high %v21349_v54, %v21402_v48  ;;  %v21411_v15 = vpop.f32.mrb[102].mxu1 }
 0xc23   : > { %31645 = vst [vmem:[#allocation14_spill] sm:$0xff] %v30470_v18  ;;  %31647 = vst [vmem:[#allocation42_spill] sm:$0xff] %v30473_v46  ;;  %v21351_v28 = vadd.f32 %v21350_v40, %v25920_v12  ;;  %v21404_v43 = vadd.f32 %v21403_v34, %v25922_v29  ;;  %v21440_v61 = vrot.slane %v21432_v26, %v25351_v9  ;;  %v21413_v34 = vpop.f32.mrb[103].mxu1 }
 0xc24   : > { %31649 = vst [vmem:[#allocation46_spill] sm:$0xff] %v30476_v53  ;;  %31651 = vst [vmem:[#allocation29_spill] sm:$0xff] %v30479_v27  ;;  %v21447_v51 = vrot.slane %v21433_v45, %v25351_v9  ;;  %v21355_v55 = vadd.f32 %v21354_v3, %v31377_v22  ;;  %v21408_v21 = vadd.f32 %v21407_v56, %v25918_v13 }
 0xc25   : > { %v21492_v57 = vrot.slane %v21484_v17, %v25351_v9  ;;  %v21499_v54 = vrot.slane %v21485_v10, %v25351_v9  ;;  %v21500_v40 = vcombine.low %v21351_v28, %v21404_v43  ;;  %v21501_v48 = vcombine.high %v21351_v28, %v21404_v43 }
 0xc26   : > { %v21448_v63 = vcombine.low %v21424_v58, %v21440_v61  ;;  %v21449_v27 = vcombine.high %v21424_v58, %v21440_v61  ;;  %v21464_v53 = vcombine.low %v21431_v31, %v21447_v51  ;;  %v21465_v46 = vcombine.high %v21431_v31, %v21447_v51 }
 0xc27   : > { %v21508_v26 = vrot.slane %v21500_v40, %v25351_v9  ;;  %v21515_v45 = vrot.slane %v21501_v48, %v25351_v9  ;;  %v21552_v18 = vcombine.low %v21355_v55, %v21408_v21  ;;  %v21553_v3 = vcombine.high %v21355_v55, %v21408_v21 }
 0xc28   : > { %v21456_v56 = vrot.slane %v21448_v63, %v25368_v49  ;;  %v21463_v35 = vrot.slane %v21449_v27, %v25368_v49  ;;  %v21472_v17 = vrot.slane %v21464_v53, %v25368_v49  ;;  %v21479_v10 = vrot.slane %v21465_v46, %v25368_v49 }
 0xc29   : > { %v21516_v28 = vcombine.low %v21492_v57, %v21508_v26  ;;  %v21517_v43 = vcombine.high %v21492_v57, %v21508_v26  ;;  %v21532_v44 = vcombine.low %v21499_v54, %v21515_v45  ;;  %v21533_v58 = vcombine.high %v21499_v54, %v21515_v45 }
 0xc2a   : > { %v21480_v31 = vcombine.high %v21456_v56, %v31348_v19  ;;  %v21481_v61 = vcombine.high %v21463_v35, %v31348_v19  ;;  %v21482_v51 = vcombine.high %v21472_v17, %v31348_v19  ;;  %v21483_v55 = vcombine.high %v21479_v10, %v31348_v19 }
 0xc2b   : > { %v24666_v21 = vpack.c.bf16 %v21472_v17, %v21456_v56  ;;  %v24667_v40 = vpack.c.bf16 %v21479_v10, %v21463_v35  ;;  %v21524_v27 = vrot.slane %v21516_v28, %v25368_v49  ;;  %v21531_v53 = vrot.slane %v21517_v43, %v25368_v49 }
 0xc2c   : > { %v24670_v48 = vpack.c.bf16 %v21482_v51, %v21480_v31  ;;  %v24671_v46 = vpack.c.bf16 %v21483_v55, %v21481_v61  ;;  %v21540_v57 = vrot.slane %v21532_v44, %v25368_v49  ;;  %v21547_v54 = vrot.slane %v21533_v58, %v25368_v49 }
 0xc2d   : > { %v21729_v63 = vrot.slane %v24666_v21, %v25351_v9  ;;  %v21737_v26 = vrot.slane %v24667_v40, %v25351_v9  ;;  %v21548_v45 = vcombine.high %v21524_v27, %v31348_v19  ;;  %v21549_v59 = vcombine.high %v21531_v53, %v31348_v19 }
 0xc2e   : > { %v21779_v35 = vrot.slane %v24670_v48, %v25351_v9  ;;  %v21787_v56 = vrot.slane %v24671_v46, %v25351_v9  ;;  %v21550_v17 = vcombine.high %v21540_v57, %v31348_v19  ;;  %v21551_v10 = vcombine.high %v21547_v54, %v31348_v19 }
 0xc2f   : > { %v21754_v28 = vcombine.low %v21729_v63, %v21737_v26  ;;  %v24668_v44 = vpack.c.bf16 %v21540_v57, %v21524_v27  ;;  %v24669_v43 = vpack.c.bf16 %v21547_v54, %v21531_v53  ;;  %v25072_v58 = vmov 1966171168  }
 0xc30   : > { %v30521_v31 = vunpack.c.l.s4 %v25072_v58  ;;  %v21804_v61 = vcombine.low %v21779_v35, %v21787_v56  ;;  %v24672_v51 = vpack.c.bf16 %v21550_v17, %v21548_v45  ;;  %v24673_v55 = vpack.c.bf16 %v21551_v10, %v21549_v59 }
 0xc31   : > { %v21560_v21 = vrot.slane %v21552_v18, %v25351_v9  ;;  %v21745_v40 = vrot.slane %v24668_v44, %v25351_v9  ;;  %v21753_v48 = vrot.slane %v24669_v43, %v25351_v9  ;;  %v21567_v46 = vrot.slane %v21553_v3, %v25351_v9 }
 0xc32   : > { %v21357_v39 = vadd.f32 %v30481_v52, %v25920_v12  ;;  %v21761_v27 = vrot.slane %v21754_v28, %v25368_v49  ;;  %v21795_v53 = vrot.slane %v24672_v51, %v25351_v9  ;;  %v21803_v57 = vrot.slane %v24673_v55, %v25351_v9 }
 0xc33   : > { %v21410_v59 = vadd.f32 %v30489_v36, %v25922_v29  ;;  %v21762_v54 = vcombine.low %v21745_v40, %v21753_v48  ;;  %v21359_v18 = vadd.f32 %v30485_v11, %v31377_v22  ;;  %v21412_v63 = vadd.f32 %v21411_v15, %v25918_v13 }
 0xc34   : > { %v21361_v3 = vadd.f32 %v30491_v41, %v25920_v12  ;;  %v21812_v26 = vcombine.low %v21795_v53, %v21803_v57  ;;  %v21414_v35 = vadd.f32 %v21413_v34, %v25922_v29  ;;  %v21811_v56 = vrot.slane %v21804_v61, %v25368_v49 }
 0xc35   : > { %v21568_v52 = vcombine.low %v21357_v39, %v21410_v59  ;;  %v21569_v45 = vcombine.high %v21357_v39, %v21410_v59  ;;  %v21769_v17 = vrot.slane %v21762_v54, %v25368_v49  ;;  %v21620_v10 = vcombine.low %v21359_v18, %v21412_v63 }
 0xc36   : > { %v21621_v36 = vcombine.high %v21359_v18, %v21412_v63  ;;  %v21819_v28 = vrot.slane %v21812_v26, %v25368_v49  ;;  %v21636_v44 = vcombine.low %v21361_v3, %v21414_v35  ;;  %v21637_v40 = vcombine.high %v21361_v3, %v21414_v35 }
 0xc37   : > { %v21576_v11 = vrot.slane %v21568_v52, %v25351_v9  ;;  %v21583_v15 = vrot.slane %v21569_v45, %v25351_v9  ;;  %v21770_v43 = vcombine.low %v21761_v27, %v21769_v17  ;;  %v30545_v41 = vcombine.high %v21761_v27, %v21769_v17 }
 0xc38   : > { %v21628_v39 = vrot.slane %v21620_v10, %v25351_v9  ;;  %v21635_v34 = vrot.slane %v21621_v36, %v25351_v9  ;;  %v21644_v48 = vrot.slane %v21636_v44, %v25351_v9  ;;  %v21820_v53 = vcombine.low %v21811_v56, %v21819_v28 }
 0xc39   : > { %v21584_v58 = vcombine.low %v21560_v21, %v21576_v11  ;;  %v21585_v61 = vcombine.high %v21560_v21, %v21576_v11  ;;  %v21600_v51 = vcombine.low %v21567_v46, %v21583_v15  ;;  %v21601_v55 = vcombine.high %v21567_v46, %v21583_v15 }
 0xc3a   : > { %v21821_v57 = vcombine.high %v21811_v56, %v21819_v28  ;;  %v21651_v63 = vrot.slane %v21637_v40, %v25351_v9  ;;  %v21652_v26 = vcombine.low %v21628_v39, %v21644_v48  ;;  %v21653_v52 = vcombine.high %v21628_v39, %v21644_v48 }
 0xc3b   : > { %v21592_v59 = vrot.slane %v21584_v58, %v25368_v49  ;;  %v21599_v54 = vrot.slane %v21585_v61, %v25368_v49  ;;  %v21608_v27 = vrot.slane %v21600_v51, %v25368_v49  ;;  %v21615_v18 = vrot.slane %v21601_v55, %v25368_v49 }
 0xc3c   : > { %v21924_v21 = vpack.i.b16 %v21820_v53, %v21770_v43  ;;  %v21660_v10 = vrot.slane %v21652_v26, %v25368_v49  ;;  %v21667_v36 = vrot.slane %v21653_v52, %v25368_v49  ;;  %v21668_v15 = vcombine.low %v21635_v34, %v21651_v63 }
 0xc3d   : > { %v21616_v46 = vcombine.high %v21592_v59, %v31348_v19  ;;  %v21617_v3 = vcombine.high %v21599_v54, %v31348_v19  ;;  %v21618_v45 = vcombine.high %v21608_v27, %v31348_v19  ;;  %v21619_v35 = vcombine.high %v21615_v18, %v31348_v19 }
 0xc3e   : > { %v24674_v56 = vpack.c.bf16 %v21608_v27, %v21592_v59  ;;  %v24675_v17 = vpack.c.bf16 %v21615_v18, %v21599_v54  ;;  %v21669_v44 = vcombine.high %v21635_v34, %v21651_v63  ;;  %v21684_v61 = vcombine.high %v21660_v10, %v31348_v19 }
 0xc3f   : > { %v24678_v28 = vpack.c.bf16 %v21618_v45, %v21616_v46  ;;  %v24679_v11 = vpack.c.bf16 %v21619_v35, %v21617_v3  ;;  %v21685_v51 = vcombine.high %v21667_v36, %v31348_v19  ;;  %v21676_v48 = vrot.slane %v21668_v15, %v25368_v49 }
 0xc40   : > { %v21829_v39 = vrot.slane %v24674_v56, %v25351_v9  ;;  %v21837_v58 = vrot.slane %v24675_v17, %v25351_v9  ;;  %v21683_v59 = vrot.slane %v21669_v44, %v25368_v49  ;;  %v21925_v27 = vshrl.u32 %v21770_v43, 16 }
 0xc41   : > { %v21879_v55 = vrot.slane %v24678_v28, %v25351_v9  ;;  %v21887_v40 = vrot.slane %v24679_v11, %v25351_v9  ;;  %v21926_v18 = vshrl.u32 %v21820_v53, 16  ;;  %v21930_v34 = vpack.i.b16 %v21821_v57, %v30545_v41 }
 0xc42   : > { %v21854_v54 = vcombine.low %v21829_v39, %v21837_v58  ;;  %v21686_v26 = vcombine.high %v21676_v48, %v31348_v19  ;;  %v21687_v52 = vcombine.high %v21683_v59, %v31348_v19  ;;  %v24676_v46 = vpack.c.bf16 %v21676_v48, %v21660_v10  ;;  %v31652_v48 = vld [vmem:[#allocation8_spill] sm:$0xff] }
 0xc43   : > { %v21904_v63 = vcombine.low %v21879_v55, %v21887_v40  ;;  %v24677_v3 = vpack.c.bf16 %v21683_v59, %v21667_v36  ;;  %v21927_v45 = vpack.i.b16 %v21926_v18, %v21925_v27  ;;  %v23578_v35 = vunpack.c.0.s8 %v30521_v31 }
 0xc44   : > { %v21845_v56 = vrot.slane %v24676_v46, %v25351_v9  ;;  %v24680_v17 = vpack.c.bf16 %v21686_v26, %v21684_v61  ;;  %v24681_v28 = vpack.c.bf16 %v21687_v52, %v21685_v51  ;;  %v21931_v11 = vshrl.u32 %v30545_v41, 16 }
 0xc45   : > { %v21853_v43 = vrot.slane %v24677_v3, %v25351_v9  ;;  %v21932_v53 = vshrl.u32 %v21821_v57, 16  ;;  %v21950_v15 = vshrl.u32 %v21924_v21, 16  ;;  %v21951_v44 = vshrl.u32 %v21927_v45, 16 }
 0xc46   : > { %v21861_v39 = vrot.slane %v21854_v54, %v25368_v49  ;;  %v21895_v19 = vrot.slane %v24680_v17, %v25351_v9  ;;  %v21903_v10 = vrot.slane %v24681_v28, %v25351_v9  ;;  %v21948_v36 = vpack.i.b16 %v21927_v45, %v21924_v21 }
 0xc47   : > { %v21911_v31 = vrot.slane %v21904_v63, %v25368_v49  ;;  %v21862_v58 = vcombine.low %v21845_v56, %v21853_v43  ;;  %v21933_v55 = vpack.i.b16 %v21932_v53, %v21931_v11  ;;  %v21952_v61 = vpack.i.b16 %v21951_v44, %v21950_v15 }
 0xc48   : > { %v21912_v51 = vcombine.low %v21895_v19, %v21903_v10  ;;  %v21958_v40 = vshrl.u32 %v21930_v34, 16  ;;  %v21978_v41 = vcombine.high %v21948_v36, %v25348_v8  ;;  %v30582_v57 = vsub.s32 %v23578_v35, %v31652_v48 }
 0xc49   : > { %v21869_v59 = vrot.slane %v21862_v58, %v25368_v49  ;;  %v21959_v54 = vshrl.u32 %v21933_v55, 16  ;;  %v21956_v27 = vpack.i.b16 %v21933_v55, %v21930_v34  ;;  %v21985_v18 = vrot.slane %v21948_v36, %v25351_v9 }
 0xc4a   : > { %v21919_v21 = vrot.slane %v21912_v51, %v25368_v49  ;;  %v22051_v63 = vrot.slane %v21952_v61, %v25351_v9  ;;  %v22044_v26 = vcombine.high %v21952_v61, %v25348_v8  ;;  %v30590_v52 = vrot.slane %v21978_v41, %v25351_v9 }
 0xc4b   : > { %v21870_v46 = vcombine.low %v21861_v39, %v21869_v59  ;;  %v21871_v3 = vcombine.high %v21861_v39, %v21869_v59  ;;  %v21960_v45 = vpack.i.b16 %v21959_v54, %v21958_v40  ;;  %v22000_v35 = vrot.slane %v21956_v27, %v25351_v9 }
 0xc4c   : > { %v22058_v56 = vrot.slane %v22044_v26, %v25351_v9  ;;  %v21993_v34 = vcombine.high %v21956_v27, %v25348_v8  ;;  %v21920_v17 = vcombine.low %v21911_v31, %v21919_v21  ;;  %v21921_v28 = vcombine.high %v21911_v31, %v21919_v21 }
 0xc4d   : > { %v22066_v11 = vrot.slane %v21960_v45, %v25351_v9  ;;  %v22008_v43 = vcombine.low %v21985_v18, %v22000_v35  ;;  %v22009_v53 = vcombine.high %v21985_v18, %v22000_v35  ;;  %v22059_v15 = vcombine.high %v21960_v45, %v25348_v8  ;;  %v23573_v18 = vld [vmem:[%s31219_s4] sm:$0xff] }
 0xc4e   : > { %v30598_v44 = vrot.slane %v21993_v34, %v25351_v9  ;;  %v21936_v19 = vpack.i.b16 %v21920_v17, %v21870_v46  ;;  %v21937_v39 = vshrl.u32 %v21870_v46, 16  ;;  %v21938_v10 = vshrl.u32 %v21920_v17, 16  ;;  %v30621_v34 = vld [vmem:[%s31218_s3 + $0x20] sm:$0xf] }
 0xc4f   : > { %v22074_v36 = vcombine.low %v22051_v63, %v22066_v11  ;;  %v22016_v58 = vrot.slane %v22008_v43, %v25368_v49  ;;  %v22075_v55 = vcombine.high %v22051_v63, %v22066_v11  ;;  %v22023_v61 = vrot.slane %v22009_v53, %v25368_v49 }
 0xc50   : > { %v22073_v31 = vrot.slane %v22059_v15, %v25351_v9  ;;  %v22024_v51 = vcombine.low %v30590_v52, %v30598_v44  ;;  %v22025_v40 = vcombine.high %v30590_v52, %v30598_v44  ;;  %v21939_v41 = vpack.i.b16 %v21938_v10, %v21937_v39 }
 0xc51   : > { %v22082_v59 = vrot.slane %v22074_v36, %v25368_v49  ;;  %v22040_v54 = vcombine.high %v22016_v58, %v31328_v33  ;;  %v22089_v27 = vrot.slane %v22075_v55, %v25368_v49  ;;  %v22246_v63 = vsel %vm3502_vm2, %v22016_v58, 0 }
 0xc52   : > { %v22090_v21 = vcombine.low %v22058_v56, %v22073_v31  ;;  %v22032_v46 = vrot.slane %v22024_v51, %v25368_v49  ;;  %v22091_v45 = vcombine.high %v22058_v56, %v22073_v31  ;;  %v22041_v17 = vcombine.high %v22023_v61, %v31328_v33 }
 0xc53   : > { %24682 = vmatprep.subr.msk.bf16.mxu0 %vm3502_vm2, %v22082_v59  ;;  %v22106_v26 = vcombine.high %v22082_v59, %v31328_v33  ;;  %v22252_v35 = vsel %vm3502_vm2, %v22040_v54, 0  ;;  %v30625_v11 = vrot.slane %v23573_v18, %v30582_v57  ;;  %v22107_v43 = vcombine.high %v22089_v27, %v31328_v33 }
 0xc54   : > { %22342 = vmatpush1.bf16.msra.mxu0 %v22246_v63  ;;  %v22098_v56 = vrot.slane %v22090_v21, %v25368_v49  ;;  %v21942_v53 = vpack.i.b16 %v21921_v28, %v21871_v3  ;;  %v21943_v15 = vshrl.u32 %v21871_v3, 16  ;;  %v21944_v39 = vshrl.u32 %v21921_v28, 16 }
 0xc55   : > { %24684 = vmatprep.subr.msk.bf16.mxu1 %vm3502_vm2, %v22106_v26  ;;  %24686 = vmatprep.subr.msk.bf16.mxu0 %vm3502_vm2, %v22089_v27  ;;  %v21966_v10 = vshrl.u32 %v21936_v19, 16  ;;  %v23575_v36 = vcombine.high %v23573_v18, %v23573_v18  ;;  %v22258_v58 = vsel %vm3502_vm2, %v22023_v61, 0  ;;  %v22042_v55 = vcombine.high %v22032_v46, %v31328_v33 }
 0xc56   : > { %22383 = vmatpush1.bf16.msra.mxu1 %v22252_v35  ;;  %v21967_v31 = vshrl.u32 %v21939_v41, 16  ;;  %v30637_v51 = vsub.s32 0, %v31652_v48  ;;  %v21945_v3 = vpack.i.b16 %v21944_v39, %v21943_v15  ;;  %v21974_v28 = vshrl.u32 %v21942_v53, 16 }
 0xc57   : > { %24683 = vmatmul.mubr.msk.bf16.vlgmr.msra.gmra.mrb[88].mxu0 %vm3498_vm3, %v30621_v34  ;;  %24688 = vmatprep.subr.msk.bf16.mxu1 %vm3502_vm2, %v22107_v43  ;;  %v21964_v59 = vpack.i.b16 %v21939_v41, %v21936_v19  ;;  %v23598_v54 = vrot.slane %v30625_v11, %v30582_v57  ;;  %v22264_v61 = vsel %vm3502_vm2, %v22041_v17, 0  ;;  %v22108_v27 = vcombine.high %v22098_v56, %v31328_v33 }
 0xc58   : > { %22424 = vmatpush1.bf16.msra.mxu0 %v22258_v58  ;;  %22455 = vmatprep.mubr.bf16.mxu0 %v31328_v33  ;;  %v22105_v48 = vrot.slane %v22091_v45, %v25368_v49  ;;  %v21968_v18 = vpack.i.b16 %v21967_v31, %v21966_v10  ;;  %v21975_v21 = vshrl.u32 %v21945_v3, 16  ;;  %v21972_v19 = vpack.i.b16 %v21945_v3, %v21942_v53 }
 0xc59   : > { %24685 = vmatmul.mubr.msk.bf16.vlgmr.msra.gmra.mrb[104].mxu1 %vm3498_vm3, %v30621_v34  ;;  %24690 = vmatprep.subr.msk.bf16.mxu0 %vm3502_vm2, %v22098_v56  ;;  %v30650_v41 = vrot.slane %v21964_v59, %v25351_v9  ;;  %v22110_v63 = vcombine.high %v21964_v59, %v25348_v8  ;;  %v23620_v35 = vcombine.high %v23598_v54, %v23598_v54 }
 0xc5a   : > { %22465 = vmatpush1.bf16.msra.mxu1 %v22264_v61  ;;  %22496 = vmatprep.mubr.bf16.mxu1 %v31328_v33  ;;  %v22176_v26 = vcombine.high %v21968_v18, %v25348_v8  ;;  %v23627_v17 = vrot.slane %v23598_v54, %v30637_v51  ;;  %v23589_v45 = vrot.slane %v23575_v36, %v30582_v57  ;;  %v22270_v54 = vsel %vm3502_vm2, %v22032_v46, 0 }
 0xc5b   : > { %24692 = vmatprep.subr.msk.bf16.mxu1 %vm3502_vm2, %v22108_v27  ;;  %v21976_v43 = vpack.i.b16 %v21975_v21, %v21974_v28  ;;  %v30658_v56 = vrot.slane %v21968_v18, %v25351_v9  ;;  %v30661_v53 = vrot.slane %v21972_v19, %v25351_v9  ;;  %v22125_v15 = vcombine.high %v21972_v19, %v25348_v8  ;;  %v30691_v21 = vld [vmem:[%s31220_s5] sm:$0xff] }
 0xc5c   : > { %v30665_v39 = vrot.slane %v22176_v26, %v25351_v9  ;;  %v30668_v10 = vrot.slane %v22110_v63, %v25351_v9  ;;  %v23635_v58 = vrot.slane %v23620_v35, %v30637_v51  ;;  %23657 = vperm.xlu0 %24964, %v23627_v17   ;;  %v30672_v36 = vrot.slane %v23589_v45, %v30582_v57 }
 0xc5d   : > { %v22198_v31 = vrot.slane %v21976_v43, %v25351_v9  ;;  %v22140_v3 = vcombine.low %v30650_v41, %v30661_v53  ;;  %v22141_v28 = vcombine.high %v30650_v41, %v30661_v53  ;;  %v22191_v59 = vcombine.high %v21976_v43, %v25348_v8 }
 0xc5e   : > { %v30684_v61 = vrot.slane %v22125_v15, %v25351_v9  ;;  %23665 = vperm.xlu1 %24965, %v23635_v58   ;;  %v23591_v27 = vcombine.high %v23589_v45, %v23589_v45  ;;  %v23643_v18 = vrot.slane %v30672_v36, %v30637_v51  ;;  %v22039_v8 = vrot.slane %v22025_v40, %v25368_v49 }
 0xc5f   : > { %24687 = vmatmul.mubr.msk.bf16.vlgmr.msra.gmra.mrb[92].mxu0 %vm3498_vm3, %v30621_v34  ;;  %v22206_v46 = vcombine.low %v30658_v56, %v22198_v31  ;;  %v22207_v19 = vcombine.high %v30658_v56, %v22198_v31  ;;  %v22276_v63 = vsel %vm3502_vm2, %v22042_v55, 0  ;;  %v22109_v26 = vcombine.high %v22105_v48, %v31328_v33 }
 0xc60   : > { %22506 = vmatpush1.bf16.msra.mxu0 %v22270_v54  ;;  %22537 = vmatprep.mubr.bf16.mxu0 %v31328_v33  ;;  %v30706_v35 = vrot.slane %v22191_v59, %v25351_v9  ;;  %v22156_v52 = vcombine.low %v30668_v10, %v30684_v61  ;;  %v23729_v44 = vrot.slane %v30691_v21, %v30582_v57  ;;  %v22282_v15 = vsel %vm3502_vm2, %v22039_v8, 0 }
 0xc61   : > { %24694 = vmatprep.subr.msk.bf16.mxu0 %vm3502_vm2, %v22105_v48  ;;  %24689 = vmatmul.mubr.msk.bf16.vlgmr.msra.gmra.mrb[108].mxu1 %vm3498_vm3, %v30621_v34  ;;  %v22214_v40 = vrot.slane %v22206_v46, %v25368_v49  ;;  %v23619_v48 = vrot.slane %v23591_v27, %v30582_v57  ;;  %v22043_v45 = vcombine.high %v22039_v8, %v31328_v33 }
 0xc62   : > { %22547 = vmatpush1.bf16.msra.mxu1 %v22276_v63  ;;  %22578 = vmatprep.mubr.bf16.mxu1 %v31328_v33  ;;  %v22222_v55 = vcombine.low %v30665_v39, %v30706_v35  ;;  %v22223_v17 = vcombine.high %v30665_v39, %v30706_v35  ;;  %v22157_v43 = vcombine.high %v30668_v10, %v30684_v61 }
 0xc63   : > { %24696 = vmatprep.subr.msk.bf16.mxu1 %vm3502_vm2, %v22109_v26  ;;  %23673 = vperm.xlu0 %24964, %v23643_v18   ;;  %v23737_v56 = vcombine.high %v23729_v44, %v23729_v44  ;;  %v22238_v58 = vcombine.high %v22214_v40, %v31328_v33  ;;  %v23647_v31 = vrot.slane %v23619_v48, %v30637_v51  ;;  %v22288_v27 = vsel %vm3502_vm2, %v22043_v45, 0 }
 0xc64   : > { %v23590_v59 = vcombine.high %v30625_v11, %v30625_v11  ;;  %v22148_v18 = vrot.slane %v22140_v3, %v25368_v49  ;;  %v23621_v26 = vcombine.high %v30672_v36, %v30672_v36  ;;  %v22221_v3 = vrot.slane %v22207_v19, %v25368_v49 }
 0xc65   : > { %v23759_v54 = vrot.slane %v23737_v56, %v30582_v57  ;;  %23677 = vperm.xlu1 %24965, %v23647_v31   ;;  %v22230_v41 = vrot.slane %v22222_v55, %v25368_v49 }
 0xc66   : > { %v23612_v8 = vrot.slane %v23590_v59, %v30582_v57  ;;  %v22294_v45 = vsel %vm3502_vm2, %v22148_v18, 0  ;;  %v23651_v36 = vrot.slane %v23621_v26, %v30637_v51  ;;  %v22239_v31 = vcombine.high %v22221_v3, %v31328_v33 }
 0xc67   : > { %24691 = vmatmul.mubr.msk.bf16.vlgmr.msra.gmra.mrb[96].mxu0 %vm3498_vm3, %v30621_v34  ;;  %v23778_v11 = vrot.slane %v23759_v54, %v30637_v51  ;;  %v23745_v59 = vrot.slane %v23729_v44, %v30582_v57 }
 0xc68   : > { %22588 = vmatpush1.bf16.msra.mxu0 %v22282_v15  ;;  %22619 = vmatprep.mubr.bf16.mxu0 %v31328_v33  ;;  %v23631_v46 = vrot.slane %v23612_v8, %v30637_v51  ;;  %v23622_v63 = vcombine.high %v23612_v8, %v23612_v8  ;;  %v23623_v15 = vcombine.high %v23619_v48, %v23619_v48 }
 0xc69   : > { %24693 = vmatmul.mubr.msk.bf16.vlgmr.msra.gmra.mrb[112].mxu1 %vm3498_vm3, %v30621_v34  ;;  %24698 = vmatprep.subr.msk.bf16.mxu0 %vm3502_vm2, %v22214_v40  ;;  %v22172_v40 = vcombine.high %v22148_v18, %v31328_v33  ;;  %v22155_v48 = vrot.slane %v22141_v28, %v25368_v49  ;;  %v23769_v18 = vcombine.high %v23759_v54, %v23759_v54 }
 0xc6a   : > { %22629 = vmatpush1.bf16.msra.mxu1 %v22288_v27  ;;  %22660 = vmatprep.mubr.bf16.mxu1 %v31328_v33  ;;  %v23639_v56 = vrot.slane %v23622_v63, %v30637_v51  ;;  %v23774_v28 = vrot.slane %v23745_v59, %v30637_v51  ;;  %v22164_v54 = vrot.slane %v22156_v52, %v25368_v49 }
 0xc6b   : > { %24700 = vmatprep.subr.msk.bf16.mxu1 %vm3502_vm2, %v22238_v58  ;;  %23661 = vperm.xlu0 %24964, %v23631_v46   ;;  %v23722_v58 = vcombine.high %v30691_v21, %v30691_v21  ;;  %v22300_v19 = vsel %vm3502_vm2, %v22172_v40, 0  ;;  %v23655_v21 = vrot.slane %v23623_v15, %v30637_v51  ;;  %v22173_v8 = vcombine.high %v22155_v48, %v31328_v33 }
 0xc6c   : > { %23808 = vperm.xlu1 %24965, %v23778_v11   ;;  %v22306_v53 = vsel %vm3502_vm2, %v22155_v48, 0  ;;  %v23767_v11 = vcombine.high %v23745_v59, %v23745_v59  ;;  %v23786_v44 = vrot.slane %v23769_v18, %v30637_v51  ;;  %v22240_v63 = vcombine.high %v22230_v41, %v31328_v33 }
 0xc6d   : > { %v23736_v27 = vrot.slane %v23722_v58, %v30582_v57  ;;  %v22312_v55 = vsel %vm3502_vm2, %v22173_v8, 0  ;;  %v22237_v52 = vrot.slane %v22223_v17, %v25368_v49  ;;  %v22171_v17 = vrot.slane %v22157_v43, %v25368_v49 }
 0xc6e   : > { %v23782_v26 = vrot.slane %v23767_v11, %v30637_v51 }
 0xc6f   : > { %24695 = vmatmul.mubr.msk.bf16.vlgmr.msra.gmra.mrb[100].mxu0 %vm3498_vm3, %v30621_v34  ;;  %23681 = vperm.xlu0 %24964, %v23651_v36   ;;  %v23738_v46 = vcombine.high %v23736_v27, %v23736_v27  ;;  %v22241_v35 = vcombine.high %v22237_v52, %v31328_v33  ;;  %v22175_v48 = vcombine.high %v22171_v17, %v31328_v33  ;;  %v22330_v10 = vsel %vm3502_vm2, %v22171_v17, 0 }
 0xc70   : > { %22670 = vmatpush1.bf16.msra.mxu0 %v22294_v45  ;;  %22701 = vmatprep.mubr.bf16.mxu0 %v31328_v33  ;;  %v22174_v45 = vcombine.high %v22164_v54, %v31328_v33 }
 0xc71   : > { %24697 = vmatmul.mubr.msk.bf16.vlgmr.msra.gmra.mrb[116].mxu1 %vm3498_vm3, %v30621_v34  ;;  %24702 = vmatprep.subr.msk.bf16.mxu0 %vm3502_vm2, %v22221_v3  ;;  %v23766_v40 = vrot.slane %v23738_v46, %v30582_v57  ;;  %v23752_v3 = vrot.slane %v23736_v27, %v30582_v57  ;;  %v22336_v61 = vsel %vm3502_vm2, %v22175_v48, 0 }
 0xc72   : > { %22711 = vmatpush1.bf16.msra.mxu1 %v22300_v19  ;;  %22742 = vmatprep.mubr.bf16.mxu1 %v31328_v33  ;;  %v22324_v39 = vsel %vm3502_vm2, %v22174_v45, 0 }
 0xc73   : > { %24704 = vmatprep.subr.msk.bf16.mxu1 %vm3502_vm2, %v22239_v31  ;;  %23669 = vperm.xlu1 %24965, %v23639_v56   ;;  %v22318_v56 = vsel %vm3502_vm2, %v22164_v54, 0  ;;  %v23794_v15 = vrot.slane %v23766_v40, %v30637_v51  ;;  %v23770_v58 = vcombine.high %v23766_v40, %v23766_v40  ;;  %v23790_v57 = vrot.slane %v23752_v3, %v30637_v51 }
 0xc74   : > { %23804 = vperm.xlu0 %24964, %v23774_v28   ;;  %v23768_v36 = vcombine.high %v23752_v3, %v23752_v3 }
 0xc75   : > { %v23802_v19 = vrot.slane %v23770_v58, %v30637_v51 }
 0xc76   : > { %v23798_v31 = vrot.slane %v23768_v36, %v30637_v51 }
 0xc77   : > { %24699 = vmatmul.mubr.msk.bf16.vlgmr.msra.gmra.mrb[104].mxu0 %vm3498_vm3, %v30621_v34  ;;  %23685 = vperm.xlu1 %24965, %v23655_v21  }
 0xc78   : > { %22752 = vmatpush1.bf16.msra.mxu0 %v22306_v53  ;;  %22783 = vmatprep.mubr.bf16.mxu0 %v31328_v33 }
 0xc79   : > { %24701 = vmatmul.mubr.msk.bf16.vlgmr.msra.gmra.mrb[120].mxu1 %vm3498_vm3, %v30621_v34  ;;  %24706 = vmatprep.subr.msk.bf16.mxu0 %vm3502_vm2, %v22230_v41 }
 0xc7a   : > { %22793 = vmatpush1.bf16.msra.mxu1 %v22312_v55  ;;  %22824 = vmatprep.mubr.bf16.mxu1 %v31328_v33 }
 0xc7b   : > { %24708 = vmatprep.subr.msk.bf16.mxu1 %vm3502_vm2, %v22240_v63  ;;  %23816 = vperm.xlu1 %24965, %v23786_v44  }
 0xc7c   : > { %23812 = vperm.xlu0 %24964, %v23782_v26  }
 0xc7f   : > { %24703 = vmatmul.mubr.msk.bf16.vlgmr.msra.gmra.mrb[108].mxu0 %vm3498_vm3, %v30621_v34  ;;  %23824 = vperm.xlu1 %24965, %v23794_v15  }
 0xc80   : > { %22834 = vmatpush1.bf16.msra.mxu0 %v22318_v56  ;;  %22865 = vmatprep.mubr.bf16.mxu0 %v31328_v33 }
 0xc81   : > { %24705 = vmatmul.mubr.msk.bf16.vlgmr.msra.gmra.mrb[124].mxu1 %vm3498_vm3, %v30621_v34  ;;  %24710 = vmatprep.subr.msk.bf16.mxu0 %vm3502_vm2, %v22237_v52 }
 0xc82   : > { %22875 = vmatpush1.bf16.msra.mxu1 %v22324_v39  ;;  %22906 = vmatprep.mubr.bf16.mxu1 %v31328_v33 }
 0xc83   : > { %24712 = vmatprep.subr.msk.bf16.mxu1 %vm3502_vm2, %v22241_v35  ;;  %23820 = vperm.xlu0 %24964, %v23790_v57  }
 0xc84   : > { %23832 = vperm.xlu1 %24965, %v23802_v19  }
 0xc87   : > { %24707 = vmatmul.mubr.msk.bf16.vlgmr.msra.gmra.mrb[112].mxu0 %vm3498_vm3, %v30621_v34  ;;  %23828 = vperm.xlu0 %24964, %v23798_v31  }
 0xc88   : > { %22916 = vmatpush1.bf16.msra.mxu0 %v22330_v10  ;;  %22947 = vmatprep.mubr.bf16.mxu0 %v31328_v33 }
 0xc89   : > { %24709 = vmatmul.mubr.msk.bf16.vlgmr.msra.gmra.mrb[128].mxu1 %vm3498_vm3, %v30621_v34 }
 0xc8a   : > { %22957 = vmatpush1.bf16.msra.mxu1 %v22336_v61  ;;  %22988 = vmatprep.mubr.bf16.mxu1 %v31328_v33 }
 0xc8f   : > { %24711 = vmatmul.mubr.msk.bf16.vlgmr.msra.gmra.mrb[116].mxu0 %vm3498_vm3, %v30621_v34 }
 0xc91   : > { %24713 = vmatmul.mubr.msk.bf16.vlgmr.msra.gmra.mrb[132].mxu1 %vm3498_vm3, %v30621_v34 }
 0xcdb   : > { %v30829_v43 = vpop.permute.xlu0 %23657 }
 0xcdd   : > { %v30827_v51 = vpop.permute.xlu1 %23665 }
 0xce2   : > { %v30833_v59 = vpop.permute.xlu0 %23673 }
 0xce4   : > { %v30831_v21 = vpop.permute.xlu1 %23677 }
 0xcea   : > { %v30837_v8 = vpop.permute.xlu0 %23661 }
 0xceb   : > { %v30835_v27 = vpop.permute.xlu1 %23808 }
 0xcee   : > { %v30849_v35 = vpop.permute.xlu0 %23681 }
 0xcf2   : > { %v30840_v53 = vpop.permute.xlu1 %23669 }
 0xcf6   : > { %v30852_v19 = vpop.permute.xlu1 %23685 }
 0xd2a   : > { %v22375_v18 = vpop.f32.mrb[88].mxu0 }
 0xd2b   : > { %v22376_v33 = vadd.f32 %v22375_v18, %v31377_v22  ;;  %v22377_v41 = vpop.f32.mrb[89].mxu0 }
 0xd2c   : > { %v22416_v28 = vpop.f32.mrb[104].mxu1  ;;  %v22378_v34 = vadd.f32 %v22377_v41, %v25920_v12  ;;  %v22379_v11 = vpop.f32.mrb[90].mxu0 }
 0xd2d   : > { %v22417_v46 = vadd.f32 %v22416_v28, %v25918_v13  ;;  %v22418_v44 = vpop.f32.mrb[105].mxu1  ;;  %v22380_v55 = vpop.f32.mrb[91].mxu0 }
 0xd2e   : > { %v22419_v54 = vadd.f32 %v22418_v44, %v25922_v29  ;;  %v22420_v63 = vpop.f32.mrb[106].mxu1 }
 0xd2f   : > { %v22997_v26 = vcombine.low %v22376_v33, %v22417_v46  ;;  %v22998_v40 = vcombine.high %v22376_v33, %v22417_v46  ;;  %v22421_v3 = vpop.f32.mrb[107].mxu1 }
 0xd30   : > { %v23013_v52 = vcombine.low %v22378_v34, %v22419_v54  ;;  %v23014_v45 = vcombine.high %v22378_v34, %v22419_v54 }
 0xd31   : > { %v23005_v56 = vrot.slane %v22997_v26, %v25351_v9  ;;  %v23012_v15 = vrot.slane %v22998_v40, %v25351_v9 }
 0xd32   : > { %v23021_v58 = vrot.slane %v23013_v52, %v25351_v9  ;;  %v23028_v57 = vrot.slane %v23014_v45, %v25351_v9  ;;  %v22457_v39 = vpop.f32.mrb[92].mxu0  ;;  %v30859_v45 = vpop.permute.xlu0 %23804 }
 0xd33   : > { %v22458_v17 = vadd.f32 %v22457_v39, %v26930_v0  ;;  %v22459_v36 = vpop.f32.mrb[93].mxu0 }
 0xd34   : > { %v23061_v48 = vcombine.low %v23005_v56, %v23021_v58  ;;  %v23062_v31 = vcombine.high %v23005_v56, %v23021_v58  ;;  %v23077_v10 = vcombine.low %v23012_v15, %v23028_v57  ;;  %v23078_v61 = vcombine.high %v23012_v15, %v23028_v57  ;;  %v22498_v18 = vpop.f32.mrb[108].mxu1  ;;  %v22461_v33 = vpop.f32.mrb[94].mxu0 }
 0xd35   : > { %v22499_v41 = vadd.f32 %v22498_v18, %v26934_v1  ;;  %v22460_v28 = vadd.f32 %v22459_v36, %v26936_v2  ;;  %v22500_v34 = vpop.f32.mrb[109].mxu1  ;;  %v22462_v11 = vpop.f32.mrb[95].mxu0 }
 0xd36   : > { %v22502_v46 = vpop.f32.mrb[110].mxu1  ;;  %v22501_v54 = vadd.f32 %v22500_v34, %v26941_v24  ;;  %v30863_v57 = vpop.permute.xlu1 %23816  ;;  %v23076_v36 = vrot.slane %v23062_v31, %v25368_v49 }
 0xd37   : > { %v23029_v44 = vcombine.low %v22458_v17, %v22499_v41  ;;  %v23030_v55 = vcombine.high %v22458_v17, %v22499_v41  ;;  %v22503_v63 = vpop.f32.mrb[111].mxu1  ;;  %v23069_v17 = vrot.slane %v23061_v48, %v25368_v49 }
 0xd38   : > { %v23045_v3 = vcombine.low %v22460_v28, %v22501_v54  ;;  %v23046_v52 = vcombine.high %v22460_v28, %v22501_v54  ;;  %v23085_v63 = vrot.slane %v23077_v10, %v25368_v49 }
 0xd39   : > { %v23037_v26 = vrot.slane %v23029_v44, %v25351_v9  ;;  %v23044_v40 = vrot.slane %v23030_v55, %v25351_v9 }
 0xd3a   : > { %v22539_v56 = vpop.f32.mrb[96].mxu0  ;;  %v23053_v15 = vrot.slane %v23045_v3, %v25351_v9  ;;  %v23060_v58 = vrot.slane %v23046_v52, %v25351_v9  ;;  %v30871_v3 = vrot.slane %v23078_v61, %v25368_v49 }
 0xd3b   : > { %v22541_v39 = vpop.f32.mrb[97].mxu0  ;;  %v22540_v18 = vadd.f32 %v22539_v56, %v31377_v22 }
 0xd3c   : > { %v22580_v33 = vpop.f32.mrb[112].mxu1  ;;  %v22542_v41 = vadd.f32 %v22541_v39, %v25920_v12  ;;  %v22543_v28 = vpop.f32.mrb[98].mxu0  ;;  %v23093_v34 = vcombine.low %v23037_v26, %v23053_v15  ;;  %v23094_v11 = vcombine.high %v23037_v26, %v23053_v15  ;;  %v23109_v46 = vcombine.low %v23044_v40, %v23060_v58 }
 0xd3d   : > { %v23110_v44 = vcombine.high %v23044_v40, %v23060_v58  ;;  %v22582_v55 = vpop.f32.mrb[113].mxu1  ;;  %v22544_v54 = vpop.f32.mrb[99].mxu0  ;;  %v22581_v48 = vadd.f32 %v22580_v33, %v25918_v13 }
 0xd3e   : > { %v22583_v31 = vadd.f32 %v22582_v55, %v25922_v29  ;;  %v22584_v52 = vpop.f32.mrb[114].mxu1  ;;  %v23101_v56 = vrot.slane %v23093_v34, %v25368_v49  ;;  %v23108_v39 = vrot.slane %v23094_v11, %v25368_v49  ;;  %v23117_v26 = vrot.slane %v23109_v46, %v25368_v49  ;;  %v30881_v55 = vpop.permute.xlu0 %23812 }
 0xd3f   : > { %v30879_v40 = vrot.slane %v23110_v44, %v25368_v49  ;;  %v22585_v15 = vpop.f32.mrb[115].mxu1  ;;  %v23133_v58 = vcombine.low %v22540_v18, %v22581_v48  ;;  %v23134_v10 = vcombine.high %v22540_v18, %v22581_v48  ;;  %v30889_v48 = vpop.permute.xlu1 %23824 }
 0xd40   : > { %v23149_v28 = vcombine.low %v22542_v41, %v22583_v31  ;;  %v23150_v61 = vcombine.high %v22542_v41, %v22583_v31  ;;  %v23125_v54 = vcombine.low %v23069_v17, %v23101_v56  ;;  %v23126_v25 = vcombine.high %v23069_v17, %v23101_v56 }
 0xd41   : > { %v23127_v33 = vcombine.low %v23076_v36, %v23108_v39  ;;  %v23128_v14 = vcombine.high %v23076_v36, %v23108_v39  ;;  %v23129_v52 = vcombine.low %v23085_v63, %v23117_v26  ;;  %v23130_v34 = vcombine.high %v23085_v63, %v23117_v26 }
 0xd42   : > { %v23141_v11 = vrot.slane %v23133_v58, %v25351_v9  ;;  %v23148_v46 = vrot.slane %v23134_v10, %v25351_v9  ;;  %v22621_v44 = vpop.f32.mrb[100].mxu0  ;;  %v23545_v15 = vadd.f32 %v23126_v25, %v30312_v6  ;;  %v23541_v18 = vadd.f32 %v23125_v54, %v30321_v30 }
 0xd43   : > { %v23553_v41 = vadd.f32 %v23128_v14, %v30325_v7  ;;  %v23549_v17 = vadd.f32 %v23127_v33, %v30329_v38  ;;  %v22623_v36 = vpop.f32.mrb[101].mxu0  ;;  %v23561_v31 = vadd.f32 %v23130_v34, %v30334_v60  ;;  %v23557_v63 = vadd.f32 %v23129_v52, %v30337_v16 }
 0xd44   : > { %v23157_v56 = vrot.slane %v23149_v28, %v25351_v9  ;;  %v23164_v39 = vrot.slane %v23150_v61, %v25351_v9  ;;  %v22662_v26 = vpop.f32.mrb[116].mxu1  ;;  %v22625_v58 = vpop.f32.mrb[102].mxu0  ;;  %v23692_v6 = vmul.f32 %v30837_v8, %v23545_v15  ;;  %v23688_v30 = vmul.f32 %v30829_v43, %v23541_v18 }
 0xd45   : > { %v23700_v7 = vmul.f32 %v30840_v53, %v23553_v41  ;;  %v23696_v38 = vmul.f32 %v30827_v51, %v23549_v17  ;;  %v22664_v14 = vpop.f32.mrb[117].mxu1  ;;  %v22626_v25 = vpop.f32.mrb[103].mxu0  ;;  %v23708_v60 = vmul.f32 %v30831_v21, %v23561_v31  ;;  %v23704_v16 = vmul.f32 %v30833_v59, %v23557_v63 }
 0xd46   : > { %v23197_v10 = vcombine.low %v23141_v11, %v23157_v56  ;;  %v23198_v28 = vcombine.high %v23141_v11, %v23157_v56  ;;  %v22666_v61 = vpop.f32.mrb[118].mxu1  ;;  %v23839_v54 = vadd.f32 %v30835_v27, %v23692_v6  ;;  %v23835_v33 = vadd.f32 %v30859_v45, %v23688_v30  ;;  %v30906_v15 = vpop.permute.xlu0 %23820 }
 0xd47   : > { %v23847_v52 = vadd.f32 %v30863_v57, %v23700_v7  ;;  %v23843_v34 = vadd.f32 %v30881_v55, %v23696_v38  ;;  %v22667_v18 = vpop.f32.mrb[119].mxu1  ;;  %v23855_v41 = vadd.f32 %v30889_v48, %v23708_v60  ;;  %v23851_v17 = vadd.f32 %v30906_v15, %v23704_v16 }
 0xd48   : > { %v30911_v31 = vrot.slane %v23197_v10, %v25368_v49  ;;  %v30914_v11 = vrot.slane %v23198_v28, %v25368_v49  ;;  %v23871_v63 = vmax.f32 %v23839_v54, 0.0  ;;  %v23867_v56 = vmax.f32 %v23835_v33, 0.0  ;;  %v30926_v10 = vpop.permute.xlu1 %23832 }
 0xd49   : > { %v23879_v58 = vmax.f32 %v23847_v52, 0.0  ;;  %v23875_v6 = vmax.f32 %v23843_v34, 0.0  ;;  %v23887_v30 = vmax.f32 %v23855_v41, 0.0  ;;  %v23883_v7 = vmax.f32 %v23851_v17, 0.0 }
 0xd4a   : > { %v23213_v38 = vcombine.low %v23148_v46, %v23164_v39  ;;  %v23214_v25 = vcombine.high %v23148_v46, %v23164_v39  ;;  %v22703_v61 = vpop.f32.mrb[104].mxu0  ;;  %23903 = vst [vmem:[%s30918_s15 + $0x20] sm:$0xff] %v23871_v63  ;;  %23899 = vst [vmem:[%s30918_s15] sm:$0xff] %v23867_v56  ;;  %v22622_v60 = vadd.f32 %v22621_v44, %v26930_v0  ;;  %v30944_v56 = vpop.permute.xlu0 %23828 }
 0xd4b   : > { %23911 = vst [vmem:[%s30918_s15 + $0x60] sm:$0xff] %v23879_v58  ;;  %23907 = vst [vmem:[%s30918_s15 + $0x40] sm:$0xff] %v23875_v6  ;;  %v22663_v16 = vadd.f32 %v22662_v26, %v26934_v1  ;;  %v23132_v46 = vcombine.high %v30871_v3, %v30879_v40  ;;  %v23131_v39 = vcombine.low %v30871_v3, %v30879_v40  ;;  %v22705_v28 = vpop.f32.mrb[105].mxu0 }
 0xd4c   : > { %23919 = vst [vmem:[%s30918_s15 + $0xa0] sm:$0xff] %v23887_v30  ;;  %23915 = vst [vmem:[%s30918_s15 + $0x80] sm:$0xff] %v23883_v7  ;;  %v30935_v54 = vrot.slane %v23213_v38, %v25368_v49  ;;  %v30938_v33 = vrot.slane %v23214_v25, %v25368_v49  ;;  %v22624_v44 = vadd.f32 %v22623_v36, %v26936_v2  ;;  %v22744_v52 = vpop.f32.mrb[120].mxu1  ;;  %v22707_v34 = vpop.f32.mrb[106].mxu0 }
 0xd4d   : > { %v22665_v26 = vadd.f32 %v22664_v14, %v26941_v24  ;;  %v23165_v18 = vcombine.low %v22622_v60, %v22663_v16  ;;  %v23166_v41 = vcombine.high %v22622_v60, %v22663_v16  ;;  %v23569_v17 = vadd.f32 %v23132_v46, %v30342_v5  ;;  %v22746_v40 = vpop.f32.mrb[121].mxu1  ;;  %v22708_v63 = vpop.f32.mrb[107].mxu0 }
 0xd4e   : > { %v23565_v3 = vadd.f32 %v23131_v39, %v30345_v50  ;;  %v22704_v30 = vadd.f32 %v22703_v61, %v31377_v22  ;;  %v22745_v36 = vadd.f32 %v22744_v52, %v25918_v13  ;;  %v22748_v7 = vpop.f32.mrb[122].mxu1  ;;  %v30960_v52 = vadd.f32 %v22746_v40, %v25922_v29 }
 0xd4f   : > { %v23181_v58 = vcombine.low %v22624_v44, %v22665_v26  ;;  %v23182_v6 = vcombine.high %v22624_v44, %v22665_v26  ;;  %v23173_v14 = vrot.slane %v23165_v18, %v25351_v9  ;;  %v23180_v38 = vrot.slane %v23166_v41, %v25351_v9  ;;  %v22749_v50 = vpop.f32.mrb[123].mxu1 }
 0xd50   : > { %v23716_v25 = vmul.f32 %v30852_v19, %v23569_v17  ;;  %v23712_v5 = vmul.f32 %v30849_v35, %v23565_v3  ;;  %v23269_v46 = vcombine.low %v22704_v30, %v22745_v36  ;;  %v23270_v39 = vcombine.high %v22704_v30, %v22745_v36 }
 0xd51   : > { %v23189_v60 = vrot.slane %v23181_v58, %v25351_v9  ;;  %v23196_v16 = vrot.slane %v23182_v6, %v25351_v9  ;;  %v30957_v26 = vadd.f32 %v22705_v28, %v25920_v12 }
 0xd52   : > { %v23863_v61 = vadd.f32 %v30926_v10, %v23716_v25  ;;  %v23859_v44 = vadd.f32 %v30944_v56, %v23712_v5  ;;  %v22785_v3 = vpop.f32.mrb[108].mxu0  ;;  %v30963_v6 = vrot.slane %v23269_v46, %v25351_v9  ;;  %v30966_v30 = vrot.slane %v23270_v39, %v25351_v9 }
 0xd53   : > { %v23229_v34 = vcombine.low %v23173_v14, %v23189_v60  ;;  %v23230_v18 = vcombine.high %v23173_v14, %v23189_v60  ;;  %v23245_v41 = vcombine.low %v23180_v38, %v23196_v16  ;;  %v23246_v17 = vcombine.high %v23180_v38, %v23196_v16  ;;  %v30968_v28 = vpop.f32.mrb[109].mxu0 }
 0xd54   : > { %v23895_v63 = vmax.f32 %v23863_v61, 0.0  ;;  %v23891_v58 = vmax.f32 %v23859_v44, 0.0  ;;  %v22826_v38 = vpop.f32.mrb[124].mxu1  ;;  %v22789_v25 = vpop.f32.mrb[110].mxu0  ;;  %v23285_v5 = vcombine.low %v30957_v26, %v30960_v52  ;;  %v23286_v50 = vcombine.high %v30957_v26, %v30960_v52 }
 0xd55   : > { %v23237_v40 = vrot.slane %v23229_v34, %v25368_v49  ;;  %v23244_v36 = vrot.slane %v23230_v18, %v25368_v49  ;;  %v23253_v7 = vrot.slane %v23245_v41, %v25368_v49  ;;  %v23260_v14 = vrot.slane %v23246_v17, %v25368_v49  ;;  %v30986_v46 = vpop.f32.mrb[125].mxu1  ;;  %v22790_v39 = vpop.f32.mrb[111].mxu0 }
 0xd56   : > { %23927 = vst [vmem:[%s30918_s15 + $0xe0] sm:$0xff] %v23895_v63  ;;  %23923 = vst [vmem:[%s30918_s15 + $0xc0] sm:$0xff] %v23891_v58  ;;  %v30981_v60 = vadd.f32 %v22785_v3, %v26930_v0  ;;  %v30984_v16 = vadd.f32 %v22826_v38, %v26934_v1  ;;  %v22830_v41 = vpop.f32.mrb[126].mxu1 }
 0xd57   : > { %v23261_v61 = vcombine.low %v30911_v31, %v23237_v40  ;;  %v23262_v44 = vcombine.high %v30911_v31, %v23237_v40  ;;  %v23263_v34 = vcombine.low %v30914_v11, %v23244_v36  ;;  %v23264_v18 = vcombine.high %v30914_v11, %v23244_v36  ;;  %v22831_v63 = vpop.f32.mrb[127].mxu1 }
 0xd58   : > { %v23265_v26 = vcombine.low %v30935_v54, %v23253_v7  ;;  %v23266_v52 = vcombine.high %v30935_v54, %v23253_v7  ;;  %v23267_v17 = vcombine.low %v30938_v33, %v23260_v14  ;;  %v23268_v3 = vcombine.high %v30938_v33, %v23260_v14 }
 0xd59   : > { %v23542_v58 = vadd.f32 %v23261_v61, %v30360_v23  ;;  %v23546_v38 = vadd.f32 %v23262_v44, %v30363_v42  ;;  %v23550_v31 = vadd.f32 %v23263_v34, %v30366_v32  ;;  %v23554_v40 = vadd.f32 %v23264_v18, %v30369_v47 }
 0xd5a   : > { %v23558_v11 = vadd.f32 %v23265_v26, %v30372_v62  ;;  %v23562_v36 = vadd.f32 %v23266_v52, %v30375_v4  ;;  %v23566_v25 = vadd.f32 %v23267_v17, %v30378_v37  ;;  %v23570_v54 = vadd.f32 %v23268_v3, %v30381_v20  ;;  %v22867_v14 = vpop.f32.mrb[112].mxu0 }
 0xd5b   : > { %v23689_v7 = vmul.f32 %v30829_v43, %v23542_v58  ;;  %v23693_v33 = vmul.f32 %v30837_v8, %v23546_v38  ;;  %v23697_v23 = vmul.f32 %v30827_v51, %v23550_v31  ;;  %v23701_v42 = vmul.f32 %v30840_v53, %v23554_v40  ;;  %v22869_v37 = vpop.f32.mrb[113].mxu0 }
 0xd5c   : > { %v23705_v32 = vmul.f32 %v30833_v59, %v23558_v11  ;;  %v23709_v47 = vmul.f32 %v30831_v21, %v23562_v36  ;;  %v23713_v62 = vmul.f32 %v30849_v35, %v23566_v25  ;;  %v23717_v4 = vmul.f32 %v30852_v19, %v23570_v54  ;;  %v22908_v34 = vpop.f32.mrb[128].mxu1  ;;  %v22871_v18 = vpop.f32.mrb[114].mxu0 }
 0xd5d   : > { %v23836_v20 = vadd.f32 %v30859_v45, %v23689_v7  ;;  %v23840_v39 = vadd.f32 %v30835_v27, %v23693_v33  ;;  %v23844_v61 = vadd.f32 %v30881_v55, %v23697_v23  ;;  %v23848_v44 = vadd.f32 %v30863_v57, %v23701_v42  ;;  %v22910_v3 = vpop.f32.mrb[129].mxu1  ;;  %v22872_v63 = vpop.f32.mrb[115].mxu0 }
 0xd5e   : > { %v23852_v41 = vadd.f32 %v30906_v15, %v23705_v32  ;;  %v23856_v26 = vadd.f32 %v30889_v48, %v23709_v47  ;;  %v23860_v52 = vadd.f32 %v30944_v56, %v23713_v62  ;;  %v23864_v17 = vadd.f32 %v30926_v10, %v23717_v4  ;;  %v22912_v11 = vpop.f32.mrb[130].mxu1 }
 0xd5f   : > { %v23868_v58 = vmax.f32 %v23836_v20, 0.0  ;;  %v23872_v38 = vmax.f32 %v23840_v39, 0.0  ;;  %v23876_v31 = vmax.f32 %v23844_v61, 0.0  ;;  %v23880_v40 = vmax.f32 %v23848_v44, 0.0  ;;  %v22913_v33 = vpop.f32.mrb[131].mxu1 }
 0xd60   : > { %v23884_v36 = vmax.f32 %v23852_v41, 0.0  ;;  %v23888_v25 = vmax.f32 %v23856_v26, 0.0  ;;  %v23892_v54 = vmax.f32 %v23860_v52, 0.0  ;;  %v23896_v7 = vmax.f32 %v23864_v17, 0.0 }
 0xd61   : > { %23900 = vst [vmem:[%s30918_s15 + $0x8] sm:$0xff] %v23868_v58  ;;  %23904 = vst [vmem:[%s30918_s15 + $0x28] sm:$0xff] %v23872_v38  ;;  %v23293_v23 = vrot.slane %v23285_v5, %v25351_v9  ;;  %v23300_v42 = vrot.slane %v23286_v50, %v25351_v9  ;;  %v23301_v32 = vcombine.low %v30981_v60, %v30984_v16 }
 0xd62   : > { %23908 = vst [vmem:[%s30918_s15 + $0x48] sm:$0xff] %v23876_v31  ;;  %23912 = vst [vmem:[%s30918_s15 + $0x68] sm:$0xff] %v23880_v40  ;;  %v23302_v47 = vcombine.high %v30981_v60, %v30984_v16  ;;  %v22788_v62 = vadd.f32 %v30968_v28, %v26936_v2  ;;  %v22829_v4 = vadd.f32 %v30986_v46, %v26941_v24  ;;  %v22949_v61 = vpop.f32.mrb[116].mxu0 }
 0xd63   : > { %23916 = vst [vmem:[%s30918_s15 + $0x88] sm:$0xff] %v23884_v36  ;;  %23920 = vst [vmem:[%s30918_s15 + $0xa8] sm:$0xff] %v23888_v25  ;;  %v22868_v5 = vadd.f32 %v22867_v14, %v31377_v22  ;;  %v22909_v50 = vadd.f32 %v22908_v34, %v25918_v13  ;;  %v23333_v20 = vcombine.low %v30963_v6, %v23293_v23  ;;  %v31046_v46 = vpop.f32.mrb[117].mxu0 }
 0xd64   : > { %23924 = vst [vmem:[%s30918_s15 + $0xc8] sm:$0xff] %v23892_v54  ;;  %23928 = vst [vmem:[%s30918_s15 + $0xe8] sm:$0xff] %v23896_v7  ;;  %v23334_v39 = vcombine.high %v30963_v6, %v23293_v23  ;;  %v23349_v60 = vcombine.low %v30966_v30, %v23300_v42  ;;  %v23350_v16 = vcombine.high %v30966_v30, %v23300_v42  ;;  %v22990_v34 = vpop.f32.mrb[132].mxu1  ;;  %v22953_v26 = vpop.f32.mrb[118].mxu0 }
 0xd65   : > { %v23309_v44 = vrot.slane %v23301_v32, %v25351_v9  ;;  %v23316_v28 = vrot.slane %v23302_v47, %v25351_v9  ;;  %v23317_v18 = vcombine.low %v22788_v62, %v22829_v4  ;;  %v23318_v41 = vcombine.high %v22788_v62, %v22829_v4  ;;  %v31054_v58 = vpop.f32.mrb[133].mxu1  ;;  %v22954_v38 = vpop.f32.mrb[119].mxu0  ;;  %v31654_v26 = vld [vmem:[#allocation24_spill] sm:$0xff] }
 0xd66   : > { %v23341_v22 = vrot.slane %v23333_v20, %v25368_v49  ;;  %v23348_v13 = vrot.slane %v23334_v39, %v25368_v49  ;;  %v23357_v14 = vrot.slane %v23349_v60, %v25368_v49  ;;  %v23364_v6 = vrot.slane %v23350_v16, %v25368_v49  ;;  %v22994_v25 = vpop.f32.mrb[134].mxu1 }
 0xd67   : > { %v23325_v30 = vrot.slane %v23317_v18, %v25351_v9  ;;  %v23332_v52 = vrot.slane %v23318_v41, %v25351_v9  ;;  %v23405_v17 = vcombine.low %v22868_v5, %v22909_v50  ;;  %v23406_v63 = vcombine.high %v22868_v5, %v22909_v50  ;;  %v22995_v42 = vpop.f32.mrb[135].mxu1  ;;  %v31653_v41 = vld [vmem:[#allocation18_spill] sm:$0xff]  ;;  %v31658_v25 = vld [vmem:[#allocation11_spill] sm:$0xff] }
 0xd68   : > { %v22870_v31 = vadd.f32 %v22869_v37, %v25920_v12  ;;  %v22911_v40 = vadd.f32 %v22910_v3, %v25922_v29  ;;  %v31059_v11 = vadd.f32 %v22949_v61, %v26930_v0  ;;  %v31062_v36 = vadd.f32 %v22990_v34, %v26934_v1 }
 0xd69   : > { %v23365_v54 = vcombine.low %v23309_v44, %v23325_v30  ;;  %v23366_v7 = vcombine.high %v23309_v44, %v23325_v30  ;;  %v23381_v33 = vcombine.low %v23316_v28, %v23332_v52  ;;  %v23382_v23 = vcombine.high %v23316_v28, %v23332_v52  ;;  %v31655_v52 = vld [vmem:[#allocation21_spill] sm:$0xff] }
 0xd6a   : > { %v31065_v32 = vrot.slane %v23405_v17, %v25351_v9  ;;  %v31068_v47 = vrot.slane %v23406_v63, %v25351_v9  ;;  %v23421_v12 = vcombine.low %v22870_v31, %v22911_v40  ;;  %v23422_v29 = vcombine.high %v22870_v31, %v22911_v40  ;;  %v31656_v63 = vld [vmem:[#allocation22_spill] sm:$0xff]  ;;  %v31657_v31 = vld [vmem:[#allocation45_spill] sm:$0xff] }
 0xd6b   : > { %v23373_v0 = vrot.slane %v23365_v54, %v25368_v49  ;;  %v23380_v37 = vrot.slane %v23366_v7, %v25368_v49  ;;  %v23389_v1 = vrot.slane %v23381_v33, %v25368_v49  ;;  %v23396_v3 = vrot.slane %v23382_v23, %v25368_v49  ;;  %v31660_v54 = vld [vmem:[#allocation9_spill] sm:$0xff] }
 0xd6c   : > { %v31075_v62 = vrot.slane %v23421_v12, %v25351_v9  ;;  %v31078_v4 = vrot.slane %v23422_v29, %v25351_v9  ;;  %v23437_v5 = vcombine.low %v31059_v11, %v31062_v36  ;;  %v23438_v50 = vcombine.high %v31059_v11, %v31062_v36  ;;  %v31659_v36 = vld [vmem:[#allocation12_spill] sm:$0xff] }
 0xd6d   : > { %v23397_v20 = vcombine.low %v23341_v22, %v23373_v0  ;;  %v23398_v39 = vcombine.high %v23341_v22, %v23373_v0  ;;  %v23399_v60 = vcombine.low %v23348_v13, %v23380_v37  ;;  %v23400_v16 = vcombine.high %v23348_v13, %v23380_v37 }
 0xd6e   : > { %v23401_v61 = vcombine.low %v23357_v14, %v23389_v1  ;;  %v23402_v44 = vcombine.high %v23357_v14, %v23389_v1  ;;  %v23403_v28 = vcombine.low %v23364_v6, %v23396_v3  ;;  %v23404_v18 = vcombine.high %v23364_v6, %v23396_v3 }
 0xd6f   : > { %v23543_v34 = vadd.f32 %v23397_v20, %v31653_v41  ;;  %v23547_v30 = vadd.f32 %v23398_v39, %v31654_v26  ;;  %v23551_v17 = vadd.f32 %v23399_v60, %v31655_v52  ;;  %v23555_v38 = vadd.f32 %v23400_v16, %v31656_v63 }
 0xd70   : > { %v23559_v40 = vadd.f32 %v23401_v61, %v31657_v31  ;;  %v23563_v11 = vadd.f32 %v23402_v44, %v31658_v25  ;;  %v23567_v22 = vadd.f32 %v23403_v28, %v31659_v36  ;;  %v23571_v13 = vadd.f32 %v23404_v18, %v31660_v54 }
 0xd71   : > { %v23690_v14 = vmul.f32 %v30829_v43, %v23543_v34  ;;  %v23694_v6 = vmul.f32 %v30837_v8, %v23547_v30  ;;  %v23698_v7 = vmul.f32 %v30827_v51, %v23551_v17  ;;  %v23702_v33 = vmul.f32 %v30840_v53, %v23555_v38 }
 0xd72   : > { %v23706_v23 = vmul.f32 %v30833_v59, %v23559_v40  ;;  %v23710_v42 = vmul.f32 %v30831_v21, %v23563_v11  ;;  %v23714_v12 = vmul.f32 %v30849_v35, %v23567_v22  ;;  %v23718_v29 = vmul.f32 %v30852_v19, %v23571_v13 }
 0xd73   : > { %v23837_v0 = vadd.f32 %v30859_v45, %v23690_v14  ;;  %v23841_v37 = vadd.f32 %v30835_v27, %v23694_v6  ;;  %v23845_v1 = vadd.f32 %v30881_v55, %v23698_v7  ;;  %v23849_v3 = vadd.f32 %v30863_v57, %v23702_v33 }
 0xd74   : > { %v23853_v20 = vadd.f32 %v30906_v15, %v23706_v23  ;;  %v23857_v39 = vadd.f32 %v30889_v48, %v23710_v42  ;;  %v23861_v60 = vadd.f32 %v30944_v56, %v23714_v12  ;;  %v23865_v16 = vadd.f32 %v30926_v10, %v23718_v29 }
 0xd75   : > { %v23869_v61 = vmax.f32 %v23837_v0, 0.0  ;;  %v23873_v44 = vmax.f32 %v23841_v37, 0.0  ;;  %v23877_v28 = vmax.f32 %v23845_v1, 0.0  ;;  %v23881_v18 = vmax.f32 %v23849_v3, 0.0  ;;  %v31661_v37 = vld [vmem:[#allocation15_spill] sm:$0xff]  ;;  %v31662_v3 = vld [vmem:[#allocation10_spill] sm:$0xff] }
 0xd76   : > { %v23885_v41 = vmax.f32 %v23853_v20, 0.0  ;;  %v23889_v34 = vmax.f32 %v23857_v39, 0.0  ;;  %v23893_v26 = vmax.f32 %v23861_v60, 0.0  ;;  %v23897_v30 = vmax.f32 %v23865_v16, 0.0  ;;  %v31663_v39 = vld [vmem:[#allocation16_spill] sm:$0xff]  ;;  %v31664_v16 = vld [vmem:[#allocation13_spill] sm:$0xff] }
 0xd77   : > { %23901 = vst [vmem:[%s30918_s15 + $0x10] sm:$0xff] %v23869_v61  ;;  %23905 = vst [vmem:[%s30918_s15 + $0x30] sm:$0xff] %v23873_v44  ;;  %v23469_v52 = vcombine.low %v31065_v32, %v31075_v62  ;;  %v23470_v17 = vcombine.high %v31065_v32, %v31075_v62  ;;  %v23485_v63 = vcombine.low %v31068_v47, %v31078_v4  ;;  %v31665_v44 = vld [vmem:[#allocation14_spill] sm:$0xff] }
 0xd78   : > { %23909 = vst [vmem:[%s30918_s15 + $0x50] sm:$0xff] %v23877_v28  ;;  %23913 = vst [vmem:[%s30918_s15 + $0x70] sm:$0xff] %v23881_v18  ;;  %v23486_v38 = vcombine.high %v31068_v47, %v31078_v4  ;;  %v22952_v31 = vadd.f32 %v31046_v46, %v26936_v2  ;;  %v22993_v40 = vadd.f32 %v31054_v58, %v26941_v24  ;;  %v31666_v18 = vld [vmem:[#allocation42_spill] sm:$0xff] }
 0xd79   : > { %23917 = vst [vmem:[%s30918_s15 + $0x90] sm:$0xff] %v23885_v41  ;;  %23921 = vst [vmem:[%s30918_s15 + $0xb0] sm:$0xff] %v23889_v34  ;;  %v23445_v25 = vrot.slane %v23437_v5, %v25351_v9  ;;  %v23452_v32 = vrot.slane %v23438_v50, %v25351_v9  ;;  %v23477_v14 = vrot.slane %v23469_v52, %v25368_v49  ;;  %v31667_v41 = vld [vmem:[#allocation46_spill] sm:$0xff] }
 0xd7a   : > { %23925 = vst [vmem:[%s30918_s15 + $0xd0] sm:$0xff] %v23893_v26  ;;  %23929 = vst [vmem:[%s30918_s15 + $0xf0] sm:$0xff] %v23897_v30  ;;  %v23453_v62 = vcombine.low %v22952_v31, %v22993_v40  ;;  %v23454_v11 = vcombine.high %v22952_v31, %v22993_v40  ;;  %v23484_v2 = vrot.slane %v23470_v17, %v25368_v49  ;;  %v31668_v26 = vld [vmem:[#allocation29_spill] sm:$0xff] }
 0xd7b   : > { %v23493_v50 = vrot.slane %v23485_v63, %v25368_v49 }
 0xd7c   : > { %v23461_v36 = vrot.slane %v23453_v62, %v25351_v9  ;;  %v23468_v47 = vrot.slane %v23454_v11, %v25351_v9  ;;  %v23500_v9 = vrot.slane %v23486_v38, %v25368_v49 }
 0xd7e   : > { %v23501_v4 = vcombine.low %v23445_v25, %v23461_v36  ;;  %v23502_v22 = vcombine.high %v23445_v25, %v23461_v36  ;;  %v23517_v54 = vcombine.low %v23452_v32, %v23468_v47  ;;  %v23518_v13 = vcombine.high %v23452_v32, %v23468_v47 }
 0xd80   : > { %v23509_v24 = vrot.slane %v23501_v4, %v25368_v49  ;;  %v23516_v46 = vrot.slane %v23502_v22, %v25368_v49  ;;  %v23525_v58 = vrot.slane %v23517_v54, %v25368_v49  ;;  %v23532_v5 = vrot.slane %v23518_v13, %v25368_v49 }
 0xd82   : > { %v23533_v6 = vcombine.low %v23477_v14, %v23509_v24  ;;  %v23534_v7 = vcombine.high %v23477_v14, %v23509_v24  ;;  %v23535_v33 = vcombine.low %v23484_v2, %v23516_v46  ;;  %v23536_v23 = vcombine.high %v23484_v2, %v23516_v46 }
 0xd83   : > { %v23537_v42 = vcombine.low %v23493_v50, %v23525_v58  ;;  %v23538_v12 = vcombine.high %v23493_v50, %v23525_v58  ;;  %v23539_v29 = vcombine.low %v23500_v9, %v23532_v5  ;;  %v23540_v0 = vcombine.high %v23500_v9, %v23532_v5 }
 0xd84   : > { %v23544_v1 = vadd.f32 %v23533_v6, %v31661_v37  ;;  %v23548_v20 = vadd.f32 %v23534_v7, %v31662_v3  ;;  %v23552_v60 = vadd.f32 %v23535_v33, %v31663_v39  ;;  %v23556_v61 = vadd.f32 %v23536_v23, %v31664_v16 }
 0xd85   : > { %v23560_v28 = vadd.f32 %v23537_v42, %v31665_v44  ;;  %v23564_v49 = vadd.f32 %v23538_v12, %v31666_v18  ;;  %v23568_v34 = vadd.f32 %v23539_v29, %v31667_v41  ;;  %v23572_v30 = vadd.f32 %v23540_v0, %v31668_v26 }
 0xd86   : > { %v23691_v52 = vmul.f32 %v30829_v43, %v23544_v1  ;;  %v23695_v17 = vmul.f32 %v30837_v8, %v23548_v20  ;;  %v23699_v63 = vmul.f32 %v30827_v51, %v23552_v60  ;;  %v23703_v38 = vmul.f32 %v30840_v53, %v23556_v61 }
 0xd87   : > { %v23707_v31 = vmul.f32 %v30833_v59, %v23560_v28  ;;  %v23711_v40 = vmul.f32 %v30831_v21, %v23564_v49  ;;  %v23715_v25 = vmul.f32 %v30849_v35, %v23568_v34  ;;  %v23719_v32 = vmul.f32 %v30852_v19, %v23572_v30 }
 0xd88   : > { %v23838_v62 = vadd.f32 %v30859_v45, %v23691_v52  ;;  %v23842_v11 = vadd.f32 %v30835_v27, %v23695_v17  ;;  %v23846_v43 = vadd.f32 %v30881_v55, %v23699_v63  ;;  %v23850_v51 = vadd.f32 %v30863_v57, %v23703_v38 }
 0xd89   : > { %v23854_v59 = vadd.f32 %v30906_v15, %v23707_v31  ;;  %v23858_v21 = vadd.f32 %v30889_v48, %v23711_v40  ;;  %v23862_v8 = vadd.f32 %v30944_v56, %v23715_v25  ;;  %v23866_v53 = vadd.f32 %v30926_v10, %v23719_v32 }
 0xd8a   : > { %v23870_v27 = vmax.f32 %v23838_v62, 0.0  ;;  %v23874_v35 = vmax.f32 %v23842_v11, 0.0  ;;  %v23878_v19 = vmax.f32 %v23846_v43, 0.0  ;;  %v23882_v45 = vmax.f32 %v23850_v51, 0.0 }
 0xd8b   : > { %v23886_v55 = vmax.f32 %v23854_v59, 0.0  ;;  %v23890_v57 = vmax.f32 %v23858_v21, 0.0  ;;  %v23894_v36 = vmax.f32 %v23862_v8, 0.0  ;;  %v23898_v47 = vmax.f32 %v23866_v53, 0.0 }
 0xd8c   : > { %23902 = vst [vmem:[%s30918_s15 + $0x18] sm:$0xff] %v23870_v27  ;;  %23906 = vst [vmem:[%s30918_s15 + $0x38] sm:$0xff] %v23874_v35 }
 0xd8d   : > { %23910 = vst [vmem:[%s30918_s15 + $0x58] sm:$0xff] %v23878_v19  ;;  %23914 = vst [vmem:[%s30918_s15 + $0x78] sm:$0xff] %v23882_v45 }
 0xd8e   : > { %23918 = vst [vmem:[%s30918_s15 + $0x98] sm:$0xff] %v23886_v55  ;;  %23922 = vst [vmem:[%s30918_s15 + $0xb8] sm:$0xff] %v23890_v57 }
 0xd8f   : > { %23926 = vst [vmem:[%s30918_s15 + $0xd8] sm:$0xff] %v23894_v36  ;;  %23930 = vst [vmem:[%s30918_s15 + $0xf8] sm:$0xff] %v23898_v47 }
 0xd90   : > { %s24720_s17 = sshll.u32 %s25058_s24, 8  ;;  %s23964_s18 = sshll.u32 %s30918_s15, 4  ;;  %s23965_s18 = int_to_ptr.vmem [resolvable:$true] %s23964_s18 }
 0xd91   : > { %s23947_s12 = scalar_lea.hbm %s31221_s6, %s24720_s17  ;;  %s25073_s27 = smov 256  }
 0xd92   : > { %24891 = sst [smem:[#allocation6]] (%p25154_p5), %s25073_s27  ;;  %s25074_s8 = smov 512  }
 0xd93   : > { %24892 = sst [smem:[#allocation6 + $0x1]] (%p25154_p5), %s25074_s8  ;;  %s25075_s28 = smov 2  }
 0xd94   : > { %24893 = sst [smem:[#allocation6 + $0x2]] (%p25154_p5), %s25075_s28  ;;  %s25076_s30 = smov 128  }
 0xd95   : > { %24894 = sst [smem:[#allocation6 + $0x3]] (%p25154_p5), %s25076_s30  ;;  %s25077_s24 = smov 8  }
 0xd96   : > { %24895 = sst [smem:[#allocation6 + $0x4]] (%p25154_p5), %s25076_s30  ;;  %s25078_s11 = smov [#allocation5]  }
 0xd97   : > { %24896 = sst [smem:[#allocation6 + $0x5]] (%p25154_p5), %s25077_s24  ;;  %s25079_s13 = smov 0  }
 0xd98   : > { %24897 = dma.general (%p25154_p5), %s23965_s18, 4096, %s23947_s12, %s23932_s16, %s25078_s11, [#allocation6], %s25079_s13, 0  }
 0xd99 PF: > { %s23992_s14 = sand.u32 1, %s25046_s21   ;;  %p24900_p0 = pnand %p24075_p10, %p25165_p9 }
 0xd9a   : > { %s23993_s15 = scalar_lea.sflag [#allocation4], %s23992_s14 }
 0xd9b   : > { %25041 = dma.done.wait (!%p24900_p0), %s23993_s15, 4096  }
 0xd9c   : > { %25043 = vsyncadd (!%p24900_p0), %s23993_s15, 4294963200  ;;  %s19_s26 = sadd.s32 1, %s25066_s26   ;;  %s31669_s21 = smov %s25050_s22 }
 0xd9d   : > { %p16_p1 = scmp.ge.s32.totalorder %s19_s26, 4   ;;  %s31670_s22 = smov %s25054_s23 }
 0xd9e   : > { %s31671_s23 = smov %s25163_s9  ;;  %s31672_s24 = smov %s25062_s25 }
 0xd9f   : > { %s31673_s25 = smov %s31675_s29  ;;  %18 = sbr.rel (!%p16_p1) target bundleno = 4 (0x4), region = 145 }
 0xda6   :  { %23998 = vsyncpa [#allocation4], 1 }
 0xda7   :  { %24000 = vsyncpa [#allocation4 + $0x1], 1 }

</bundles_post_ra>
